<compile_context>
chip_gen: v7x
topology: tpu7x:2x2x1
jax: 0.10.0
libtpu: 0.0.40
codegen_flags: <defaults>
</compile_context>

<pallas_src>
import jax
import jax.numpy as jnp
from jax.experimental import pallas as pl
from jax.experimental.pallas import tpu as pltpu

# ----------------------------- config (tiny, lane-dense) ----------------------
B       = 2            # batch
N_MELS  = 8            # conv-in channels (whisper: 80)
T_IN    = 16           # mel frames (whisper: 3000)
D       = 128          # d_model (whisper-tiny: 384) — multiple of 128 lanes
H       = 4            # attention heads (whisper-tiny: 6)
DH      = D // H       # 32
FFN     = 2 * D        # 256 (whisper-tiny: 1536)
ENC_L   = 2            # encoder layers (whisper-tiny: 4)
DEC_L   = 2            # decoder layers (whisper-tiny: 4)
VOCAB   = 256          # vocab size (whisper-tiny: 51864) — multiple of 128
T_DEC   = 8            # decoder sequence length
T_ENC   = T_IN // 2    # after stride-2 conv2
TV      = 128          # lm-head vocab tile (lane-dense out_spec)
SCALE   = DH ** -0.5
NEG_INF = -1e9
MXU_DTYPE = jnp.bfloat16   # weights at rest + MXU operands; accumulation f32

VMEM_SPEC = pl.BlockSpec(memory_space=pltpu.MemorySpace.VMEM)


# ------------------------- in-kernel helper math ------------------------------
def _dot(a, b):
  """bf16 MXU matmul with f32 accumulation (weights already bf16 at rest)."""
  return jnp.dot(a.astype(MXU_DTYPE), b.astype(MXU_DTYPE),
                 preferred_element_type=jnp.float32)


def _layernorm(x, g, b):
  mu = jnp.mean(x, axis=-1, keepdims=True)
  var = jnp.mean(jnp.square(x - mu), axis=-1, keepdims=True)
  return (x - mu) * jax.lax.rsqrt(var + 1e-5) * g + b


def _gelu(x):
  # TODO(synk): HF Whisper uses exact erf-GELU; tanh approximation kept
  # (EUP-friendly, negligible drift with synthetic weights).
  return jax.nn.gelu(x, approximate=True)


def _attend(q, k, v, Tq, Tk, causal):
  """q: (B*Tq, D), k/v: (B*Tk, D) -> (B*Tq, D).

  Heads handled with a single batched (B*H) contraction for S=QK^T and one for
  P@V (no per-head loop / no lane-slice concat).
  TODO(synk): at real T_ENC=1500 this should become a flash-style
  online-softmax loop over k/v blocks instead of one resident score slab.
  """
  def split(x, T):
    return x.reshape(B, T, H, DH).transpose(0, 2, 1, 3).reshape(B * H, T, DH)

  q3, k3, v3 = split(q, Tq), split(k, Tk), split(v, Tk)
  s = jnp.einsum("zqd,zkd->zqk", q3.astype(MXU_DTYPE), k3.astype(MXU_DTYPE),
                 preferred_element_type=jnp.float32) * SCALE
  if causal:
    row = jax.lax.broadcasted_iota(jnp.int32, (Tq, Tk), 0)
    col = jax.lax.broadcasted_iota(jnp.int32, (Tq, Tk), 1)
    s = jnp.where((row >= col)[None, :, :], s, NEG_INF)
  s = s - jnp.max(s, axis=-1, keepdims=True)
  p = jnp.exp(s)
  p = p * pl.reciprocal(jnp.sum(p, axis=-1, keepdims=True), approx=True)
  o = jnp.einsum("zqk,zkd->zqd", p.astype(MXU_DTYPE), v3.astype(MXU_DTYPE),
                 preferred_element_type=jnp.float32)
  return o.reshape(B, H, Tq, DH).transpose(0, 2, 1, 3).reshape(B * Tq, D)


# ------------------------------ Pallas kernels --------------------------------
def _frontend_kernel(x_ref, w1_ref, b1_ref, w2_ref, b2_ref, pos_ref,
                     o_ref, h1_ref):
  """conv1(k=3,s=1)+GELU -> conv2(k=3,s=2)+GELU -> +sinusoidal positions.

  x: (B, T_IN+2, N_MELS) pre-padded channels-last mel features.
  The conv1 activation stays in the VMEM scratch h1_ref; stride-2 taps are
  strided reads of that scratch (no HBM round trip between the convs).
  """
  x = x_ref[...]
  acc = jnp.zeros((B * T_IN, D), jnp.float32)
  for k in range(3):                      # im2col folded: 3 shifted matmuls
    tap = x[:, k:k + T_IN, :].reshape(B * T_IN, N_MELS)
    acc = acc + jnp.dot(tap.astype(MXU_DTYPE), w1_ref[k],
                        preferred_element_type=jnp.float32)
  h1_ref[...] = _gelu(acc + b1_ref[...])  # (B*T_IN, D) resident in VMEM

  # stride-2, pad-1 taps: out[t] = h1p[2t]*w0 + h1p[2t+1]*w1 + h1p[2t+2]*w2
  h_even = h1_ref[pl.ds(0, B * T_ENC, stride=2), :].reshape(B, T_ENC, D)
  h_odd = h1_ref[pl.ds(1, B * T_ENC, stride=2), :].reshape(B, T_ENC, D)
  tap0 = jnp.concatenate(
      [jnp.zeros((B, 1, D), jnp.float32), h_odd[:, :T_ENC - 1, :]], axis=1)
  acc2 = jnp.zeros((B * T_ENC, D), jnp.float32)
  for k, tap in enumerate((tap0, h_even, h_odd)):
    acc2 = acc2 + jnp.dot(tap.reshape(B * T_ENC, D).astype(MXU_DTYPE),
                          w2_ref[k], preferred_element_type=jnp.float32)
  y = _gelu(acc2 + b2_ref[...]).reshape(B, T_ENC, D) + pos_ref[...][None, :, :]
  o_ref[...] = y.reshape(B * T_ENC, D)


# Encoder packed vector rows (per layer): 0-1 ln1(g,b), 2-3 ln2(g,b),
# 4-6 q/k/v bias (k bias = 0), 7 out-proj bias, 8 fc2 bias.
def _encoder_stack_kernel(h_ref, qkvw_ref, ow_ref, f1w_ref, f2w_ref,
                          vec_ref, f1b_ref, fln_ref, out_ref, hacc_ref):
  l = pl.program_id(0)

  @pl.when(l == 0)
  def _():
    hacc_ref[...] = h_ref[...]

  h = hacc_ref[...]                                           # (B*T_ENC, D)
  vec = vec_ref[...]
  # -- self-attention (pre-LN), fused QKV --
  x = _layernorm(h, vec[0:1, :], vec[1:2, :])
  qkv = _dot(x, qkvw_ref[...])                                # (B*T_ENC, 3D)
  attn = _attend(qkv[:, 0:D] + vec[4:5, :],
                 qkv[:, D:2 * D] + vec[5:6, :],
                 qkv[:, 2 * D:3 * D] + vec[6:7, :],
                 T_ENC, T_ENC, causal=False)
  h = h + _dot(attn, ow_ref[...]) + vec[7:8, :]
  # -- FFN (pre-LN) --
  x = _layernorm(h, vec[2:3, :], vec[3:4, :])
  x = _gelu(_dot(x, f1w_ref[...]) + f1b_ref[...])
  h = h + _dot(x, f2w_ref[...]) + vec[8:9, :]

  hacc_ref[...] = h                                           # resident residual

  @pl.when(l == pl.num_programs(0) - 1)
  def _():
    # final encoder LayerNorm fused into the last layer iteration
    out_ref[...] = _layernorm(h, fln_ref[0:1, :], fln_ref[1:2, :])


# Decoder packed vector rows (per layer): 0-1 ln1, 2-3 ln2, 4-5 ln3,
# 6-8 self q/k/v bias (k=0), 9 self out bias, 10 cross-q bias,
# 11-12 cross k/v bias (k=0), 13 cross out bias, 14 fc2 bias.
def _decoder_stack_kernel(h_ref, enc_ref, sqkvw_ref, sow_ref, cqw_ref,
                          ckvw_ref, cow_ref, f1w_ref, f2w_ref, vec_ref,
                          f1b_ref, out_ref, hacc_ref):
  l = pl.program_id(0)

  @pl.when(l == 0)
  def _():
    hacc_ref[...] = h_ref[...]

  h = hacc_ref[...]                                           # (B*T_DEC, D)
  enc = enc_ref[...]                                          # (B*T_ENC, D)
  vec = vec_ref[...]
  # -- causal self-attention, fused QKV --
  x = _layernorm(h, vec[0:1, :], vec[1:2, :])
  qkv = _dot(x, sqkvw_ref[...])
  attn = _attend(qkv[:, 0:D] + vec[6:7, :],
                 qkv[:, D:2 * D] + vec[7:8, :],
                 qkv[:, 2 * D:3 * D] + vec[8:9, :],
                 T_DEC, T_DEC, causal=True)
  h = h + _dot(attn, sow_ref[...]) + vec[9:10, :]
  # -- cross-attention over encoder output, fused KV --
  x = _layernorm(h, vec[2:3, :], vec[3:4, :])
  q = _dot(x, cqw_ref[...]) + vec[10:11, :]
  kv = _dot(enc, ckvw_ref[...])                               # (B*T_ENC, 2D)
  attn = _attend(q, kv[:, 0:D] + vec[11:12, :], kv[:, D:2 * D] + vec[12:13, :],
                 T_DEC, T_ENC, causal=False)
  h = h + _dot(attn, cow_ref[...]) + vec[13:14, :]
  # -- FFN --
  x = _layernorm(h, vec[4:5, :], vec[5:6, :])
  x = _gelu(_dot(x, f1w_ref[...]) + f1b_ref[...])
  h = h + _dot(x, f2w_ref[...]) + vec[14:15, :]

  hacc_ref[...] = h
  out_ref[...] = h


def _lmhead_kernel(h_ref, ln_ref, et_ref, o_ref):
  """Final decoder LayerNorm + tied lm-head on one lane-dense vocab tile."""
  h = _layernorm(h_ref[...], ln_ref[0:1, :], ln_ref[1:2, :])
  o_ref[...] = jnp.dot(h.astype(MXU_DTYPE), et_ref[...],
                       preferred_element_type=jnp.float32)


# ------------------------------ call wrappers ----------------------------------
def _frontend(x_pad, p):
  return pl.pallas_call(
      _frontend_kernel,
      out_shape=jax.ShapeDtypeStruct((B * T_ENC, D), jnp.float32),
      in_specs=[VMEM_SPEC] * 6,
      out_specs=VMEM_SPEC,
      scratch_shapes=[pltpu.VMEM((B * T_IN, D), jnp.float32)],
  )(x_pad, p["conv1_w"], p["conv1_b"], p["conv2_w"], p["conv2_b"], p["enc_pos"])


def _encoder_stack(h, p):
  N = B * T_ENC
  grid_spec = pltpu.PrefetchScalarGridSpec(
      num_scalar_prefetch=0,
      grid=(ENC_L,),
      in_specs=[
          pl.BlockSpec((N, D), lambda l: (0, 0)),               # residual input
          pl.BlockSpec((None, D, 3 * D), lambda l: (l, 0, 0)),  # qkv_w
          pl.BlockSpec((None, D, D), lambda l: (l, 0, 0)),      # o_w
          pl.BlockSpec((None, D, FFN), lambda l: (l, 0, 0)),    # fc1_w
          pl.BlockSpec((None, FFN, D), lambda l: (l, 0, 0)),    # fc2_w
          pl.BlockSpec((None, 9, D), lambda l: (l, 0, 0)),      # packed LN/bias
          pl.BlockSpec((None, 1, FFN), lambda l: (l, 0, 0)),    # fc1 bias
          pl.BlockSpec((2, D), lambda l: (0, 0)),               # final enc LN
      ],
      out_specs=pl.BlockSpec((N, D), lambda l: (0, 0)),
      scratch_shapes=[pltpu.VMEM((N, D), jnp.float32)],
  )
  return pl.pallas_call(
      _encoder_stack_kernel,
      out_shape=jax.ShapeDtypeStruct((N, D), jnp.float32),
      grid_spec=grid_spec,
      compiler_params=pltpu.CompilerParams(dimension_semantics=("arbitrary",)),
  )(h, p["enc_qkv_w"], p["enc_o_w"], p["enc_fc1_w"], p["enc_fc2_w"],
    p["enc_vec"], p["enc_fc1_b"], p["enc_ln"])


def _decoder_stack(h, enc, p):
  N = B * T_DEC
  NE = B * T_ENC
  grid_spec = pltpu.PrefetchScalarGridSpec(
      num_scalar_prefetch=0,
      grid=(DEC_L,),
      in_specs=[
          pl.BlockSpec((N, D), lambda l: (0, 0)),               # residual input
          pl.BlockSpec((NE, D), lambda l: (0, 0)),              # encoder output
          pl.BlockSpec((None, D, 3 * D), lambda l: (l, 0, 0)),  # self qkv_w
          pl.BlockSpec((None, D, D), lambda l: (l, 0, 0)),      # self o_w
          pl.BlockSpec((None, D, D), lambda l: (l, 0, 0)),      # cross q_w
          pl.BlockSpec((None, D, 2 * D), lambda l: (l, 0, 0)),  # cross kv_w
          pl.BlockSpec((None, D, D), lambda l: (l, 0, 0)),      # cross o_w
          pl.BlockSpec((None, D, FFN), lambda l: (l, 0, 0)),    # fc1_w
          pl.BlockSpec((None, FFN, D), lambda l: (l, 0, 0)),    # fc2_w
          pl.BlockSpec((None, 15, D), lambda l: (l, 0, 0)),     # packed LN/bias
          pl.BlockSpec((None, 1, FFN), lambda l: (l, 0, 0)),    # fc1 bias
      ],
      out_specs=pl.BlockSpec((N, D), lambda l: (0, 0)),
      scratch_shapes=[pltpu.VMEM((N, D), jnp.float32)],
  )
  return pl.pallas_call(
      _decoder_stack_kernel,
      out_shape=jax.ShapeDtypeStruct((N, D), jnp.float32),
      grid_spec=grid_spec,
      compiler_params=pltpu.CompilerParams(dimension_semantics=("arbitrary",)),
  )(h, enc, p["dec_sqkv_w"], p["dec_so_w"], p["dec_cq_w"], p["dec_ckv_w"],
    p["dec_co_w"], p["dec_fc1_w"], p["dec_fc2_w"], p["dec_vec"], p["dec_fc1_b"])


def _lm_head(h, p):
  N = B * T_DEC
  # TODO(synk): at real Whisper scale store E^T pre-transposed (bf16 / fp8 on
  # v7x) in HBM instead of transposing the tied embedding per call.
  emb_t = p["embed_tokens"].T                                  # (D, VOCAB) bf16
  grid_spec = pltpu.PrefetchScalarGridSpec(
      num_scalar_prefetch=0,
      grid=(VOCAB // TV,),
      in_specs=[
          pl.BlockSpec((N, D), lambda j: (0, 0)),
          pl.BlockSpec((2, D), lambda j: (0, 0)),
          pl.BlockSpec((D, TV), lambda j: (0, j)),
      ],
      out_specs=pl.BlockSpec((N, TV), lambda j: (0, j)),
  )
  return pl.pallas_call(
      _lmhead_kernel,
      out_shape=jax.ShapeDtypeStruct((N, VOCAB), jnp.float32),
      grid_spec=grid_spec,
      compiler_params=pltpu.CompilerParams(dimension_semantics=("parallel",)),
  )(h, p["dec_ln"], emb_t)


# ------------------------------ model forward ----------------------------------
def whisper_forward(params, input_features, decoder_input_ids):
  # ---------------- encoder ----------------
  # TODO(synk): the pad + channels-last transpose of the raw mel features is
  # host glue; at real Whisper sizes it belongs inside the frontend kernel.
  x = jnp.pad(input_features, ((0, 0), (0, 0), (1, 1))).transpose(0, 2, 1)
  h_enc = _frontend(x, params)                    # (B*T_ENC, D)
  enc = _encoder_stack(h_enc, params)             # includes final encoder LN

  # ---------------- decoder ----------------
  # TODO(synk): token-embedding gather stays in plain JAX (no clean tiny-Pallas
  # equivalent at this scale).
  tok = jnp.take(params["embed_tokens"], decoder_input_ids,
                 axis=0).astype(jnp.float32)
  h_dec = (tok + params["dec_pos"][None, :, :]).reshape(B * T_DEC, D)
  h_dec = _decoder_stack(h_dec, enc, params)

  # Final decoder LN + tied lm-head (proj_out), vocab-tiled.
  logits = _lm_head(h_dec, params)
  return logits.reshape(B, T_DEC, VOCAB)


# ------------------------------ parameters ------------------------------------
def sinusoids(length, channels, max_timescale=10000.0):
  half = channels // 2
  log_inc = jnp.log(max_timescale) / (half - 1)
  inv = jnp.exp(-log_inc * jnp.arange(half, dtype=jnp.float32))
  t = jnp.arange(length, dtype=jnp.float32)[:, None] * inv[None, :]
  return jnp.concatenate([jnp.sin(t), jnp.cos(t)], axis=1).astype(jnp.float32)


def make_params(key):
  keys = iter(jax.random.split(key, 256))

  def wb(shape, scale=0.02):     # bf16 weight at rest (MXU operand dtype)
    return (scale * jax.random.normal(next(keys), shape)).astype(MXU_DTYPE)

  def vf(shape, scale=0.02):     # f32 bias / LN vector
    return (scale * jax.random.normal(next(keys), shape)).astype(jnp.float32)

  ones = jnp.ones((D,), jnp.float32)
  zeros = jnp.zeros((D,), jnp.float32)

  def enc_vec():                 # Whisper: q/v projections have bias, k does not.
    return jnp.stack([ones, zeros, ones, zeros,
                      vf((D,)), zeros, vf((D,)),
                      vf((D,)), vf((D,))], axis=0)

  def dec_vec():
    return jnp.stack([ones, zeros, ones, zeros, ones, zeros,
                      vf((D,)), zeros, vf((D,)),       # self q/k/v bias
                      vf((D,)),                        # self out bias
                      vf((D,)),                        # cross q bias
                      zeros, vf((D,)),                 # cross k/v bias
                      vf((D,)),                        # cross out bias
                      vf((D,))], axis=0)               # fc2 bias

  return dict(
      conv1_w=wb((3, N_MELS, D)), conv1_b=vf((1, D)),
      conv2_w=wb((3, D, D)), conv2_b=vf((1, D)),
      enc_pos=sinusoids(T_ENC, D),
      enc_qkv_w=wb((ENC_L, D, 3 * D)),
      enc_o_w=wb((ENC_L, D, D)),
      enc_fc1_w=wb((ENC_L, D, FFN)),
      enc_fc2_w=wb((ENC_L, FFN, D)),
      enc_vec=jnp.stack([enc_vec() for _ in range(ENC_L)]),
      enc_fc1_b=jnp.stack([vf((1, FFN)) for _ in range(ENC_L)]),
      enc_ln=jnp.stack([ones, zeros]),
      embed_tokens=wb((VOCAB, D)),
      dec_pos=vf((T_DEC, D)),    # TODO(synk): learned positions in real Whisper
      dec_sqkv_w=wb((DEC_L, D, 3 * D)),
      dec_so_w=wb((DEC_L, D, D)),
      dec_cq_w=wb((DEC_L, D, D)),
      dec_ckv_w=wb((DEC_L, D, 2 * D)),
      dec_co_w=wb((DEC_L, D, D)),
      dec_fc1_w=wb((DEC_L, D, FFN)),
      dec_fc2_w=wb((DEC_L, FFN, D)),
      dec_vec=jnp.stack([dec_vec() for _ in range(DEC_L)]),
      dec_fc1_b=jnp.stack([vf((1, FFN)) for _ in range(DEC_L)]),
      dec_ln=jnp.stack([ones, zeros]),
  )


# --------------------------------- main ----------------------------------------
if __name__ == "__main__":
  key = jax.random.PRNGKey(0)
  k_param, k_feat, k_ids = jax.random.split(key, 3)

  params = make_params(k_param)
  input_features = jax.random.normal(
      k_feat, (B, N_MELS, T_IN), dtype=jnp.float32)           # (B, n_mels, T)
  decoder_input_ids = jax.random.randint(k_ids, (B, T_DEC), 0, VOCAB)

  logits = jax.jit(whisper_forward)(params, input_features, decoder_input_ids)
  logits = jax.block_until_ready(logits)

  assert logits.shape == (B, T_DEC, VOCAB), logits.shape
  assert bool(jnp.all(jnp.isfinite(logits)))
  print("KERNEL_OK")
</pallas_src>

<mosaic_0001>
module attributes {stable_mosaic.version = 11 : i64} {
  func.func @_encoder_stack_kernel(%arg0: i32, %arg1: memref<16x128xf32, #tpu.memory_space<vmem>>, %arg2: memref<1x128x384xbf16, #tpu.memory_space<vmem>>, %arg3: memref<1x128x128xbf16, #tpu.memory_space<vmem>>, %arg4: memref<1x128x256xbf16, #tpu.memory_space<vmem>>, %arg5: memref<1x256x128xbf16, #tpu.memory_space<vmem>>, %arg6: memref<1x9x128xf32, #tpu.memory_space<vmem>>, %arg7: memref<1x1x256xf32, #tpu.memory_space<vmem>>, %arg8: memref<2x128xf32, #tpu.memory_space<vmem>>, %arg9: memref<16x128xf32, #tpu.memory_space<vmem>>, %arg10: memref<16x128xf32, #tpu.memory_space<vmem>>) attributes {dimension_semantics = [#tpu.dimension_semantics<arbitrary>], iteration_bounds = array<i64: 2>, scalar_prefetch = 0 : i64, scratch_operands = 1 : i64, tpu.core_type = #tpu.core_type<tc>, window_params = [{pipeline_mode = #tpu.pipeline_mode<synchronous>, transform_indices = @transform_0, window_bounds = array<i64: 16, 128>}, {transform_indices = @transform_1, window_bounds = array<i64: 1, 128, 384>}, {transform_indices = @transform_2, window_bounds = array<i64: 1, 128, 128>}, {transform_indices = @transform_3, window_bounds = array<i64: 1, 128, 256>}, {transform_indices = @transform_4, window_bounds = array<i64: 1, 256, 128>}, {transform_indices = @transform_5, window_bounds = array<i64: 1, 9, 128>}, {transform_indices = @transform_6, window_bounds = array<i64: 1, 1, 256>}, {pipeline_mode = #tpu.pipeline_mode<synchronous>, transform_indices = @transform_7, window_bounds = array<i64: 2, 128>}, {pipeline_mode = #tpu.pipeline_mode<synchronous>, transform_indices = @transform_8, window_bounds = array<i64: 16, 128>}]} {
    %c0_i32 = arith.constant 0 : i32
    %0 = arith.cmpi eq, %arg0, %c0_i32 : i32
    %1 = arith.extui %0 : i1 to i32
    %c0_i32_0 = arith.constant 0 : i32
    %2 = arith.cmpi ne, %1, %c0_i32_0 : i32
    scf.if %2 {
      %c0_45 = arith.constant 0 : index
      %c0_46 = arith.constant 0 : index
      %141 = vector.load %arg1[%c0_45, %c0_46] : memref<16x128xf32, #tpu.memory_space<vmem>>, vector<16x128xf32>
      %c0_47 = arith.constant 0 : index
      %c0_48 = arith.constant 0 : index
      %142 = vector.load %arg10[%c0_47, %c0_48] : memref<16x128xf32, #tpu.memory_space<vmem>>, vector<16x128xf32>
      tpu.vector_store %arg10[%c0_47, %c0_48], %141 {strides = array<i32>} : memref<16x128xf32, #tpu.memory_space<vmem>>, vector<16x128xf32>,
    } else {
    }
    %c0 = arith.constant 0 : index
    %c0_1 = arith.constant 0 : index
    %3 = vector.load %arg10[%c0, %c0_1] : memref<16x128xf32, #tpu.memory_space<vmem>>, vector<16x128xf32>
    %c0_2 = arith.constant 0 : index
    %c0_3 = arith.constant 0 : index
    %c0_4 = arith.constant 0 : index
    %4 = vector.load %arg6[%c0_2, %c0_3, %c0_4] : memref<1x9x128xf32, #tpu.memory_space<vmem>>, vector<1x9x128xf32>
    %5 = vector.shape_cast %4 : vector<1x9x128xf32> to vector<9x128xf32>
    %6 = vector.extract_strided_slice %5 {offsets = [0, 0], sizes = [1, 128], strides = [1, 1]} : vector<9x128xf32> to vector<1x128xf32>
    %7 = vector.extract_strided_slice %5 {offsets = [1, 0], sizes = [1, 128], strides = [1, 1]} : vector<9x128xf32> to vector<1x128xf32>
    %cst = arith.constant dense<0.000000e+00> : vector<16xf32>
    %8 = vector.multi_reduction <add>, %3, %cst [1] : vector<16x128xf32> to vector<16xf32>
    %9 = vector.shape_cast %8 : vector<16xf32> to vector<16x1xf32>
    %cst_5 = arith.constant 1.280000e+02 : f32
    %10 = vector.broadcast %cst_5 : f32 to vector<16x1xf32>
    %11 = arith.divf %9, %10 : vector<16x1xf32>
    %12 = vector.broadcast %11 : vector<16x1xf32> to vector<16x128xf32>
    %13 = arith.subf %3, %12 : vector<16x128xf32>
    %14 = arith.mulf %13, %13 : vector<16x128xf32>
    %cst_6 = arith.constant dense<0.000000e+00> : vector<16xf32>
    %15 = vector.multi_reduction <add>, %14, %cst_6 [1] : vector<16x128xf32> to vector<16xf32>
    %16 = vector.shape_cast %15 : vector<16xf32> to vector<16x1xf32>
    %cst_7 = arith.constant 1.280000e+02 : f32
    %17 = vector.broadcast %cst_7 : f32 to vector<16x1xf32>
    %18 = arith.divf %16, %17 : vector<16x1xf32>
    %19 = vector.broadcast %11 : vector<16x1xf32> to vector<16x128xf32>
    %20 = arith.subf %3, %19 : vector<16x128xf32>
    %cst_8 = arith.constant 9.99999974E-6 : f32
    %21 = vector.broadcast %cst_8 : f32 to vector<16x1xf32>
    %22 = arith.addf %18, %21 : vector<16x1xf32>
    %23 = math.rsqrt %22 : vector<16x1xf32>
    %24 = vector.broadcast %23 : vector<16x1xf32> to vector<16x128xf32>
    %25 = arith.mulf %20, %24 : vector<16x128xf32>
    %26 = vector.broadcast %6 : vector<1x128xf32> to vector<16x128xf32>
    %27 = arith.mulf %25, %26 : vector<16x128xf32>
    %28 = vector.broadcast %7 : vector<1x128xf32> to vector<16x128xf32>
    %29 = arith.addf %27, %28 : vector<16x128xf32>
    %c0_9 = arith.constant 0 : index
    %c0_10 = arith.constant 0 : index
    %c0_11 = arith.constant 0 : index
    %30 = vector.load %arg2[%c0_9, %c0_10, %c0_11] : memref<1x128x384xbf16, #tpu.memory_space<vmem>>, vector<1x128x384xbf16>
    %31 = vector.shape_cast %30 : vector<1x128x384xbf16> to vector<128x384xbf16>
    %32 = arith.truncf %29 : vector<16x128xf32> to vector<16x128xbf16>
    %cst_12 = arith.constant dense<0.000000e+00> : vector<16x384xf32>
    %33 = tpu.matmul %32, %31, %cst_12 {dimension_numbers = #tpu.dot_dimension_numbers<[1], [0], [0], [1], [0, 0, 1, 1], [], []>} : vector<16x128xbf16>, vector<128x384xbf16>, vector<16x384xf32> -> vector<16x384xf32>
    %34 = vector.extract_strided_slice %33 {offsets = [0, 0], sizes = [16, 128], strides = [1, 1]} : vector<16x384xf32> to vector<16x128xf32>
    %35 = vector.extract_strided_slice %5 {offsets = [4, 0], sizes = [1, 128], strides = [1, 1]} : vector<9x128xf32> to vector<1x128xf32>
    %36 = vector.broadcast %35 : vector<1x128xf32> to vector<16x128xf32>
    %37 = arith.addf %34, %36 : vector<16x128xf32>
    %38 = vector.extract_strided_slice %33 {offsets = [0, 128], sizes = [16, 128], strides = [1, 1]} : vector<16x384xf32> to vector<16x128xf32>
    %39 = vector.extract_strided_slice %5 {offsets = [5, 0], sizes = [1, 128], strides = [1, 1]} : vector<9x128xf32> to vector<1x128xf32>
    %40 = vector.broadcast %39 : vector<1x128xf32> to vector<16x128xf32>
    %41 = arith.addf %38, %40 : vector<16x128xf32>
    %42 = vector.extract_strided_slice %33 {offsets = [0, 256], sizes = [16, 128], strides = [1, 1]} : vector<16x384xf32> to vector<16x128xf32>
    %43 = vector.extract_strided_slice %5 {offsets = [6, 0], sizes = [1, 128], strides = [1, 1]} : vector<9x128xf32> to vector<1x128xf32>
    %44 = vector.broadcast %43 : vector<1x128xf32> to vector<16x128xf32>
    %45 = arith.addf %42, %44 : vector<16x128xf32>
    %46 = vector.shape_cast %37 : vector<16x128xf32> to vector<2x8x4x32xf32>
    %47 = tpu.transpose %46, [0, 2, 1, 3] : vector<2x8x4x32xf32> -> vector<2x4x8x32xf32>
    %48 = vector.shape_cast %47 : vector<2x4x8x32xf32> to vector<8x8x32xf32>
    %49 = vector.shape_cast %41 : vector<16x128xf32> to vector<2x8x4x32xf32>
    %50 = tpu.transpose %49, [0, 2, 1, 3] : vector<2x8x4x32xf32> -> vector<2x4x8x32xf32>
    %51 = vector.shape_cast %50 : vector<2x4x8x32xf32> to vector<8x8x32xf32>
    %52 = vector.shape_cast %45 : vector<16x128xf32> to vector<2x8x4x32xf32>
    %53 = tpu.transpose %52, [0, 2, 1, 3] : vector<2x8x4x32xf32> -> vector<2x4x8x32xf32>
    %54 = vector.shape_cast %53 : vector<2x4x8x32xf32> to vector<8x8x32xf32>
    %55 = arith.truncf %48 : vector<8x8x32xf32> to vector<8x8x32xbf16>
    %56 = arith.truncf %51 : vector<8x8x32xf32> to vector<8x8x32xbf16>
    "tpu.trace_start"() <{level = 10 : i32, message = "zqd,zkd->zqk"}> : () -> ()
    %cst_13 = arith.constant dense<0.000000e+00> : vector<8x8x8xf32>
    %57 = tpu.matmul %55, %56, %cst_13 {dimension_numbers = #tpu.dot_dimension_numbers<[2], [2], [1], [1], [0, 0, 0, 1, 1, 1], [0], [0]>} : vector<8x8x32xbf16>, vector<8x8x32xbf16>, vector<8x8x8xf32> -> vector<8x8x8xf32>
    "tpu.trace_stop"() : () -> ()
    %cst_14 = arith.constant 0.176776692 : f32
    %58 = vector.broadcast %cst_14 : f32 to vector<8x8x8xf32>
    %59 = arith.mulf %57, %58 : vector<8x8x8xf32>
    %cst_15 = arith.constant dense<0xFF800000> : vector<8x8xf32>
    %60 = vector.multi_reduction <maximumf>, %59, %cst_15 [2] : vector<8x8x8xf32> to vector<8x8xf32>
    %61 = vector.shape_cast %60 : vector<8x8xf32> to vector<8x8x1xf32>
    %62 = vector.broadcast %61 : vector<8x8x1xf32> to vector<8x8x8xf32>
    %63 = arith.subf %59, %62 : vector<8x8x8xf32>
    %64 = math.exp %63 : vector<8x8x8xf32>
    %cst_16 = arith.constant dense<0.000000e+00> : vector<8x8xf32>
    %65 = vector.multi_reduction <add>, %64, %cst_16 [2] : vector<8x8x8xf32> to vector<8x8xf32>
    %66 = vector.shape_cast %65 : vector<8x8xf32> to vector<8x8x1xf32>
    %67 = tpu.reciprocal %66 {approx = true} : vector<8x8x1xf32> -> vector<8x8x1xf32>
    %68 = vector.broadcast %67 : vector<8x8x1xf32> to vector<8x8x8xf32>
    %69 = arith.mulf %64, %68 : vector<8x8x8xf32>
    %70 = arith.truncf %69 : vector<8x8x8xf32> to vector<8x8x8xbf16>
    %71 = arith.truncf %54 : vector<8x8x32xf32> to vector<8x8x32xbf16>
    "tpu.trace_start"() <{level = 10 : i32, message = "zqk,zkd->zqd"}> : () -> ()
    %cst_17 = arith.constant dense<0.000000e+00> : vector<8x8x32xf32>
    %72 = tpu.matmul %70, %71, %cst_17 {dimension_numbers = #tpu.dot_dimension_numbers<[2], [1], [1], [2], [0, 0, 0, 1, 1, 2], [0], [0]>} : vector<8x8x8xbf16>, vector<8x8x32xbf16>, vector<8x8x32xf32> -> vector<8x8x32xf32>
    "tpu.trace_stop"() : () -> ()
    %73 = vector.shape_cast %72 : vector<8x8x32xf32> to vector<2x4x8x32xf32>
    %74 = tpu.transpose %73, [0, 2, 1, 3] : vector<2x4x8x32xf32> -> vector<2x8x4x32xf32>
    %75 = vector.shape_cast %74 : vector<2x8x4x32xf32> to vector<16x128xf32>
    %c0_18 = arith.constant 0 : index
    %c0_19 = arith.constant 0 : index
    %c0_20 = arith.constant 0 : index
    %76 = vector.load %arg3[%c0_18, %c0_19, %c0_20] : memref<1x128x128xbf16, #tpu.memory_space<vmem>>, vector<1x128x128xbf16>
    %77 = vector.shape_cast %76 : vector<1x128x128xbf16> to vector<128x128xbf16>
    %78 = arith.truncf %75 : vector<16x128xf32> to vector<16x128xbf16>
    %cst_21 = arith.constant dense<0.000000e+00> : vector<16x128xf32>
    %79 = tpu.matmul %78, %77, %cst_21 {dimension_numbers = #tpu.dot_dimension_numbers<[1], [0], [0], [1], [0, 0, 1, 1], [], []>} : vector<16x128xbf16>, vector<128x128xbf16>, vector<16x128xf32> -> vector<16x128xf32>
    %80 = arith.addf %3, %79 : vector<16x128xf32>
    %81 = vector.extract_strided_slice %5 {offsets = [7, 0], sizes = [1, 128], strides = [1, 1]} : vector<9x128xf32> to vector<1x128xf32>
    %82 = vector.broadcast %81 : vector<1x128xf32> to vector<16x128xf32>
    %83 = arith.addf %80, %82 : vector<16x128xf32>
    %84 = vector.extract_strided_slice %5 {offsets = [2, 0], sizes = [1, 128], strides = [1, 1]} : vector<9x128xf32> to vector<1x128xf32>
    %85 = vector.extract_strided_slice %5 {offsets = [3, 0], sizes = [1, 128], strides = [1, 1]} : vector<9x128xf32> to vector<1x128xf32>
    %cst_22 = arith.constant dense<0.000000e+00> : vector<16xf32>
    %86 = vector.multi_reduction <add>, %83, %cst_22 [1] : vector<16x128xf32> to vector<16xf32>
    %87 = vector.shape_cast %86 : vector<16xf32> to vector<16x1xf32>
    %cst_23 = arith.constant 1.280000e+02 : f32
    %88 = vector.broadcast %cst_23 : f32 to vector<16x1xf32>
    %89 = arith.divf %87, %88 : vector<16x1xf32>
    %90 = vector.broadcast %89 : vector<16x1xf32> to vector<16x128xf32>
    %91 = arith.subf %83, %90 : vector<16x128xf32>
    %92 = arith.mulf %91, %91 : vector<16x128xf32>
    %cst_24 = arith.constant dense<0.000000e+00> : vector<16xf32>
    %93 = vector.multi_reduction <add>, %92, %cst_24 [1] : vector<16x128xf32> to vector<16xf32>
    %94 = vector.shape_cast %93 : vector<16xf32> to vector<16x1xf32>
    %cst_25 = arith.constant 1.280000e+02 : f32
    %95 = vector.broadcast %cst_25 : f32 to vector<16x1xf32>
    %96 = arith.divf %94, %95 : vector<16x1xf32>
    %97 = vector.broadcast %89 : vector<16x1xf32> to vector<16x128xf32>
    %98 = arith.subf %83, %97 : vector<16x128xf32>
    %cst_26 = arith.constant 9.99999974E-6 : f32
    %99 = vector.broadcast %cst_26 : f32 to vector<16x1xf32>
    %100 = arith.addf %96, %99 : vector<16x1xf32>
    %101 = math.rsqrt %100 : vector<16x1xf32>
    %102 = vector.broadcast %101 : vector<16x1xf32> to vector<16x128xf32>
    %103 = arith.mulf %98, %102 : vector<16x128xf32>
    %104 = vector.broadcast %84 : vector<1x128xf32> to vector<16x128xf32>
    %105 = arith.mulf %103, %104 : vector<16x128xf32>
    %106 = vector.broadcast %85 : vector<1x128xf32> to vector<16x128xf32>
    %107 = arith.addf %105, %106 : vector<16x128xf32>
    %c0_27 = arith.constant 0 : index
    %c0_28 = arith.constant 0 : index
    %c0_29 = arith.constant 0 : index
    %108 = vector.load %arg4[%c0_27, %c0_28, %c0_29] : memref<1x128x256xbf16, #tpu.memory_space<vmem>>, vector<1x128x256xbf16>
    %109 = vector.shape_cast %108 : vector<1x128x256xbf16> to vector<128x256xbf16>
    %110 = arith.truncf %107 : vector<16x128xf32> to vector<16x128xbf16>
    %cst_30 = arith.constant dense<0.000000e+00> : vector<16x256xf32>
    %111 = tpu.matmul %110, %109, %cst_30 {dimension_numbers = #tpu.dot_dimension_numbers<[1], [0], [0], [1], [0, 0, 1, 1], [], []>} : vector<16x128xbf16>, vector<128x256xbf16>, vector<16x256xf32> -> vector<16x256xf32>
    %c0_31 = arith.constant 0 : index
    %c0_32 = arith.constant 0 : index
    %c0_33 = arith.constant 0 : index
    %112 = vector.load %arg7[%c0_31, %c0_32, %c0_33] : memref<1x1x256xf32, #tpu.memory_space<vmem>>, vector<1x1x256xf32>
    %113 = vector.shape_cast %112 : vector<1x1x256xf32> to vector<1x256xf32>
    %114 = vector.broadcast %113 : vector<1x256xf32> to vector<16x256xf32>
    %115 = arith.addf %111, %114 : vector<16x256xf32>
    %116 = arith.mulf %115, %115 : vector<16x256xf32>
    %117 = arith.mulf %115, %116 : vector<16x256xf32>
    %cst_34 = arith.constant 4.471500e-02 : f32
    %118 = vector.broadcast %cst_34 : f32 to vector<16x256xf32>
    %119 = arith.mulf %118, %117 : vector<16x256xf32>
    %120 = arith.addf %115, %119 : vector<16x256xf32>
    %cst_35 = arith.constant 0.797884583 : f32
    %121 = vector.broadcast %cst_35 : f32 to vector<16x256xf32>
    %122 = arith.mulf %121, %120 : vector<16x256xf32>
    %123 = math.tanh %122 : vector<16x256xf32>
    %cst_36 = arith.constant 1.000000e+00 : f32
    %124 = vector.broadcast %cst_36 : f32 to vector<16x256xf32>
    %125 = arith.addf %124, %123 : vector<16x256xf32>
    %cst_37 = arith.constant 5.000000e-01 : f32
    %126 = vector.broadcast %cst_37 : f32 to vector<16x256xf32>
    %127 = arith.mulf %126, %125 : vector<16x256xf32>
    %128 = arith.mulf %115, %127 : vector<16x256xf32>
    %c0_38 = arith.constant 0 : index
    %c0_39 = arith.constant 0 : index
    %c0_40 = arith.constant 0 : index
    %129 = vector.load %arg5[%c0_38, %c0_39, %c0_40] : memref<1x256x128xbf16, #tpu.memory_space<vmem>>, vector<1x256x128xbf16>
    %130 = vector.shape_cast %129 : vector<1x256x128xbf16> to vector<256x128xbf16>
    %131 = arith.truncf %128 : vector<16x256xf32> to vector<16x256xbf16>
    %cst_41 = arith.constant dense<0.000000e+00> : vector<16x128xf32>
    %132 = tpu.matmul %131, %130, %cst_41 {dimension_numbers = #tpu.dot_dimension_numbers<[1], [0], [0], [1], [0, 0, 1, 1], [], []>} : vector<16x256xbf16>, vector<256x128xbf16>, vector<16x128xf32> -> vector<16x128xf32>
    %133 = arith.addf %83, %132 : vector<16x128xf32>
    %134 = vector.extract_strided_slice %5 {offsets = [8, 0], sizes = [1, 128], strides = [1, 1]} : vector<9x128xf32> to vector<1x128xf32>
    %135 = vector.broadcast %134 : vector<1x128xf32> to vector<16x128xf32>
    %136 = arith.addf %133, %135 : vector<16x128xf32>
    %c0_42 = arith.constant 0 : index
    %c0_43 = arith.constant 0 : index
    %137 = vector.load %arg10[%c0_42, %c0_43] : memref<16x128xf32, #tpu.memory_space<vmem>>, vector<16x128xf32>
    tpu.vector_store %arg10[%c0_42, %c0_43], %136 {strides = array<i32>} : memref<16x128xf32, #tpu.memory_space<vmem>>, vector<16x128xf32>,
    %c1_i32 = arith.constant 1 : i32
    %138 = arith.cmpi eq, %arg0, %c1_i32 : i32
    %139 = arith.extui %138 : i1 to i32
    %c0_i32_44 = arith.constant 0 : i32
    %140 = arith.cmpi ne, %139, %c0_i32_44 : i32
    scf.if %140 {
      %c0_45 = arith.constant 0 : index
      %c0_46 = arith.constant 0 : index
      %141 = vector.load %arg8[%c0_45, %c0_46] : memref<2x128xf32, #tpu.memory_space<vmem>>, vector<1x128xf32>
      %c1 = arith.constant 1 : index
      %c0_47 = arith.constant 0 : index
      %142 = vector.load %arg8[%c1, %c0_47] : memref<2x128xf32, #tpu.memory_space<vmem>>, vector<1x128xf32>
      %cst_48 = arith.constant dense<0.000000e+00> : vector<16xf32>
      %143 = vector.multi_reduction <add>, %136, %cst_48 [1] : vector<16x128xf32> to vector<16xf32>
      %144 = vector.shape_cast %143 : vector<16xf32> to vector<16x1xf32>
      %cst_49 = arith.constant 1.280000e+02 : f32
      %145 = vector.broadcast %cst_49 : f32 to vector<16x1xf32>
      %146 = arith.divf %144, %145 : vector<16x1xf32>
      %147 = vector.broadcast %146 : vector<16x1xf32> to vector<16x128xf32>
      %148 = arith.subf %136, %147 : vector<16x128xf32>
      %149 = arith.mulf %148, %148 : vector<16x128xf32>
      %cst_50 = arith.constant dense<0.000000e+00> : vector<16xf32>
      %150 = vector.multi_reduction <add>, %149, %cst_50 [1] : vector<16x128xf32> to vector<16xf32>
      %151 = vector.shape_cast %150 : vector<16xf32> to vector<16x1xf32>
      %cst_51 = arith.constant 1.280000e+02 : f32
      %152 = vector.broadcast %cst_51 : f32 to vector<16x1xf32>
      %153 = arith.divf %151, %152 : vector<16x1xf32>
      %154 = vector.broadcast %146 : vector<16x1xf32> to vector<16x128xf32>
      %155 = arith.subf %136, %154 : vector<16x128xf32>
      %cst_52 = arith.constant 9.99999974E-6 : f32
      %156 = vector.broadcast %cst_52 : f32 to vector<16x1xf32>
      %157 = arith.addf %153, %156 : vector<16x1xf32>
      %158 = math.rsqrt %157 : vector<16x1xf32>
      %159 = vector.broadcast %158 : vector<16x1xf32> to vector<16x128xf32>
      %160 = arith.mulf %155, %159 : vector<16x128xf32>
      %161 = vector.broadcast %141 : vector<1x128xf32> to vector<16x128xf32>
      %162 = arith.mulf %160, %161 : vector<16x128xf32>
      %163 = vector.broadcast %142 : vector<1x128xf32> to vector<16x128xf32>
      %164 = arith.addf %162, %163 : vector<16x128xf32>
      %c0_53 = arith.constant 0 : index
      %c0_54 = arith.constant 0 : index
      %165 = vector.load %arg9[%c0_53, %c0_54] : memref<16x128xf32, #tpu.memory_space<vmem>>, vector<16x128xf32>
      tpu.vector_store %arg9[%c0_53, %c0_54], %164 {strides = array<i32>} : memref<16x128xf32, #tpu.memory_space<vmem>>, vector<16x128xf32>,
    } else {
    }
    return
  }
  func.func @transform_0(%arg0: i32) -> (i32, i32) {
    %c0_i32 = arith.constant 0 : i32
    %c0_i32_0 = arith.constant 0 : i32
    %c0_i32_1 = arith.constant 0 : i32
    return %c0_i32, %c0_i32_0 : i32, i32
  }
  func.func @transform_1(%arg0: i32) -> (i32, i32, i32) {
    %c0_i32 = arith.constant 0 : i32
    %c0_i32_0 = arith.constant 0 : i32
    %c0_i32_1 = arith.constant 0 : i32
    return %arg0, %c0_i32, %c0_i32_0 : i32, i32, i32
  }
  func.func @transform_2(%arg0: i32) -> (i32, i32, i32) {
    %c0_i32 = arith.constant 0 : i32
    %c0_i32_0 = arith.constant 0 : i32
    %c0_i32_1 = arith.constant 0 : i32
    return %arg0, %c0_i32, %c0_i32_0 : i32, i32, i32
  }
  func.func @transform_3(%arg0: i32) -> (i32, i32, i32) {
    %c0_i32 = arith.constant 0 : i32
    %c0_i32_0 = arith.constant 0 : i32
    %c0_i32_1 = arith.constant 0 : i32
    return %arg0, %c0_i32, %c0_i32_0 : i32, i32, i32
  }
  func.func @transform_4(%arg0: i32) -> (i32, i32, i32) {
    %c0_i32 = arith.constant 0 : i32
    %c0_i32_0 = arith.constant 0 : i32
    %c0_i32_1 = arith.constant 0 : i32
    return %arg0, %c0_i32, %c0_i32_0 : i32, i32, i32
  }
  func.func @transform_5(%arg0: i32) -> (i32, i32, i32) {
    %c0_i32 = arith.constant 0 : i32
    %c0_i32_0 = arith.constant 0 : i32
    %c0_i32_1 = arith.constant 0 : i32
    return %arg0, %c0_i32, %c0_i32_0 : i32, i32, i32
  }
  func.func @transform_6(%arg0: i32) -> (i32, i32, i32) {
    %c0_i32 = arith.constant 0 : i32
    %c0_i32_0 = arith.constant 0 : i32
    %c0_i32_1 = arith.constant 0 : i32
    return %arg0, %c0_i32, %c0_i32_0 : i32, i32, i32
  }
  func.func @transform_7(%arg0: i32) -> (i32, i32) {
    %c0_i32 = arith.constant 0 : i32
    %c0_i32_0 = arith.constant 0 : i32
    %c0_i32_1 = arith.constant 0 : i32
    return %c0_i32, %c0_i32_0 : i32, i32
  }
  func.func @transform_8(%arg0: i32) -> (i32, i32) {
    %c0_i32 = arith.constant 0 : i32
    %c0_i32_0 = arith.constant 0 : i32
    %c0_i32_1 = arith.constant 0 : i32
    return %c0_i32, %c0_i32_0 : i32, i32
  }
}

module attributes {stable_mosaic.version = 11 : i64} {
  func.func @_decoder_stack_kernel(%arg0: i32, %arg1: memref<16x128xf32, #tpu.memory_space<vmem>>, %arg2: memref<16x128xf32, #tpu.memory_space<vmem>>, %arg3: memref<1x128x384xbf16, #tpu.memory_space<vmem>>, %arg4: memref<1x128x128xbf16, #tpu.memory_space<vmem>>, %arg5: memref<1x128x128xbf16, #tpu.memory_space<vmem>>, %arg6: memref<1x128x256xbf16, #tpu.memory_space<vmem>>, %arg7: memref<1x128x128xbf16, #tpu.memory_space<vmem>>, %arg8: memref<1x128x256xbf16, #tpu.memory_space<vmem>>, %arg9: memref<1x256x128xbf16, #tpu.memory_space<vmem>>, %arg10: memref<1x15x128xf32, #tpu.memory_space<vmem>>, %arg11: memref<1x1x256xf32, #tpu.memory_space<vmem>>, %arg12: memref<16x128xf32, #tpu.memory_space<vmem>>, %arg13: memref<16x128xf32, #tpu.memory_space<vmem>>) attributes {dimension_semantics = [#tpu.dimension_semantics<arbitrary>], iteration_bounds = array<i64: 2>, scalar_prefetch = 0 : i64, scratch_operands = 1 : i64, tpu.core_type = #tpu.core_type<tc>, window_params = [{pipeline_mode = #tpu.pipeline_mode<synchronous>, transform_indices = @transform_0, window_bounds = array<i64: 16, 128>}, {pipeline_mode = #tpu.pipeline_mode<synchronous>, transform_indices = @transform_1, window_bounds = array<i64: 16, 128>}, {transform_indices = @transform_2, window_bounds = array<i64: 1, 128, 384>}, {transform_indices = @transform_3, window_bounds = array<i64: 1, 128, 128>}, {transform_indices = @transform_4, window_bounds = array<i64: 1, 128, 128>}, {transform_indices = @transform_5, window_bounds = array<i64: 1, 128, 256>}, {transform_indices = @transform_6, window_bounds = array<i64: 1, 128, 128>}, {transform_indices = @transform_7, window_bounds = array<i64: 1, 128, 256>}, {transform_indices = @transform_8, window_bounds = array<i64: 1, 256, 128>}, {transform_indices = @transform_9, window_bounds = array<i64: 1, 15, 128>}, {transform_indices = @transform_10, window_bounds = array<i64: 1, 1, 256>}, {pipeline_mode = #tpu.pipeline_mode<synchronous>, transform_indices = @transform_11, window_bounds = array<i64: 16, 128>}]} {
    %c0_i32 = arith.constant 0 : i32
    %0 = arith.cmpi eq, %arg0, %c0_i32 : i32
    %1 = arith.extui %0 : i1 to i32
    %c0_i32_0 = arith.constant 0 : i32
    %2 = arith.cmpi ne, %1, %c0_i32_0 : i32
    scf.if %2 {
      %c0_71 = arith.constant 0 : index
      %c0_72 = arith.constant 0 : index
      %229 = vector.load %arg1[%c0_71, %c0_72] : memref<16x128xf32, #tpu.memory_space<vmem>>, vector<16x128xf32>
      %c0_73 = arith.constant 0 : index
      %c0_74 = arith.constant 0 : index
      %230 = vector.load %arg13[%c0_73, %c0_74] : memref<16x128xf32, #tpu.memory_space<vmem>>, vector<16x128xf32>
      tpu.vector_store %arg13[%c0_73, %c0_74], %229 {strides = array<i32>} : memref<16x128xf32, #tpu.memory_space<vmem>>, vector<16x128xf32>,
    } else {
    }
    %c0 = arith.constant 0 : index
    %c0_1 = arith.constant 0 : index
    %3 = vector.load %arg13[%c0, %c0_1] : memref<16x128xf32, #tpu.memory_space<vmem>>, vector<16x128xf32>
    %c0_2 = arith.constant 0 : index
    %c0_3 = arith.constant 0 : index
    %4 = vector.load %arg2[%c0_2, %c0_3] : memref<16x128xf32, #tpu.memory_space<vmem>>, vector<16x128xf32>
    %c0_4 = arith.constant 0 : index
    %c0_5 = arith.constant 0 : index
    %c0_6 = arith.constant 0 : index
    %5 = vector.load %arg10[%c0_4, %c0_5, %c0_6] : memref<1x15x128xf32, #tpu.memory_space<vmem>>, vector<1x15x128xf32>
    %6 = vector.shape_cast %5 : vector<1x15x128xf32> to vector<15x128xf32>
    %7 = vector.extract_strided_slice %6 {offsets = [0, 0], sizes = [1, 128], strides = [1, 1]} : vector<15x128xf32> to vector<1x128xf32>
    %8 = vector.extract_strided_slice %6 {offsets = [1, 0], sizes = [1, 128], strides = [1, 1]} : vector<15x128xf32> to vector<1x128xf32>
    %cst = arith.constant dense<0.000000e+00> : vector<16xf32>
    %9 = vector.multi_reduction <add>, %3, %cst [1] : vector<16x128xf32> to vector<16xf32>
    %10 = vector.shape_cast %9 : vector<16xf32> to vector<16x1xf32>
    %cst_7 = arith.constant 1.280000e+02 : f32
    %11 = vector.broadcast %cst_7 : f32 to vector<16x1xf32>
    %12 = arith.divf %10, %11 : vector<16x1xf32>
    %13 = vector.broadcast %12 : vector<16x1xf32> to vector<16x128xf32>
    %14 = arith.subf %3, %13 : vector<16x128xf32>
    %15 = arith.mulf %14, %14 : vector<16x128xf32>
    %cst_8 = arith.constant dense<0.000000e+00> : vector<16xf32>
    %16 = vector.multi_reduction <add>, %15, %cst_8 [1] : vector<16x128xf32> to vector<16xf32>
    %17 = vector.shape_cast %16 : vector<16xf32> to vector<16x1xf32>
    %cst_9 = arith.constant 1.280000e+02 : f32
    %18 = vector.broadcast %cst_9 : f32 to vector<16x1xf32>
    %19 = arith.divf %17, %18 : vector<16x1xf32>
    %20 = vector.broadcast %12 : vector<16x1xf32> to vector<16x128xf32>
    %21 = arith.subf %3, %20 : vector<16x128xf32>
    %cst_10 = arith.constant 9.99999974E-6 : f32
    %22 = vector.broadcast %cst_10 : f32 to vector<16x1xf32>
    %23 = arith.addf %19, %22 : vector<16x1xf32>
    %24 = math.rsqrt %23 : vector<16x1xf32>
    %25 = vector.broadcast %24 : vector<16x1xf32> to vector<16x128xf32>
    %26 = arith.mulf %21, %25 : vector<16x128xf32>
    %27 = vector.broadcast %7 : vector<1x128xf32> to vector<16x128xf32>
    %28 = arith.mulf %26, %27 : vector<16x128xf32>
    %29 = vector.broadcast %8 : vector<1x128xf32> to vector<16x128xf32>
    %30 = arith.addf %28, %29 : vector<16x128xf32>
    %c0_11 = arith.constant 0 : index
    %c0_12 = arith.constant 0 : index
    %c0_13 = arith.constant 0 : index
    %31 = vector.load %arg3[%c0_11, %c0_12, %c0_13] : memref<1x128x384xbf16, #tpu.memory_space<vmem>>, vector<1x128x384xbf16>
    %32 = vector.shape_cast %31 : vector<1x128x384xbf16> to vector<128x384xbf16>
    %33 = arith.truncf %30 : vector<16x128xf32> to vector<16x128xbf16>
    %cst_14 = arith.constant dense<0.000000e+00> : vector<16x384xf32>
    %34 = tpu.matmul %33, %32, %cst_14 {dimension_numbers = #tpu.dot_dimension_numbers<[1], [0], [0], [1], [0, 0, 1, 1], [], []>} : vector<16x128xbf16>, vector<128x384xbf16>, vector<16x384xf32> -> vector<16x384xf32>
    %35 = vector.extract_strided_slice %34 {offsets = [0, 0], sizes = [16, 128], strides = [1, 1]} : vector<16x384xf32> to vector<16x128xf32>
    %36 = vector.extract_strided_slice %6 {offsets = [6, 0], sizes = [1, 128], strides = [1, 1]} : vector<15x128xf32> to vector<1x128xf32>
    %37 = vector.broadcast %36 : vector<1x128xf32> to vector<16x128xf32>
    %38 = arith.addf %35, %37 : vector<16x128xf32>
    %39 = vector.extract_strided_slice %34 {offsets = [0, 128], sizes = [16, 128], strides = [1, 1]} : vector<16x384xf32> to vector<16x128xf32>
    %40 = vector.extract_strided_slice %6 {offsets = [7, 0], sizes = [1, 128], strides = [1, 1]} : vector<15x128xf32> to vector<1x128xf32>
    %41 = vector.broadcast %40 : vector<1x128xf32> to vector<16x128xf32>
    %42 = arith.addf %39, %41 : vector<16x128xf32>
    %43 = vector.extract_strided_slice %34 {offsets = [0, 256], sizes = [16, 128], strides = [1, 1]} : vector<16x384xf32> to vector<16x128xf32>
    %44 = vector.extract_strided_slice %6 {offsets = [8, 0], sizes = [1, 128], strides = [1, 1]} : vector<15x128xf32> to vector<1x128xf32>
    %45 = vector.broadcast %44 : vector<1x128xf32> to vector<16x128xf32>
    %46 = arith.addf %43, %45 : vector<16x128xf32>
    %47 = vector.shape_cast %38 : vector<16x128xf32> to vector<2x8x4x32xf32>
    %48 = tpu.transpose %47, [0, 2, 1, 3] : vector<2x8x4x32xf32> -> vector<2x4x8x32xf32>
    %49 = vector.shape_cast %48 : vector<2x4x8x32xf32> to vector<8x8x32xf32>
    %50 = vector.shape_cast %42 : vector<16x128xf32> to vector<2x8x4x32xf32>
    %51 = tpu.transpose %50, [0, 2, 1, 3] : vector<2x8x4x32xf32> -> vector<2x4x8x32xf32>
    %52 = vector.shape_cast %51 : vector<2x4x8x32xf32> to vector<8x8x32xf32>
    %53 = vector.shape_cast %46 : vector<16x128xf32> to vector<2x8x4x32xf32>
    %54 = tpu.transpose %53, [0, 2, 1, 3] : vector<2x8x4x32xf32> -> vector<2x4x8x32xf32>
    %55 = vector.shape_cast %54 : vector<2x4x8x32xf32> to vector<8x8x32xf32>
    %56 = arith.truncf %49 : vector<8x8x32xf32> to vector<8x8x32xbf16>
    %57 = arith.truncf %52 : vector<8x8x32xf32> to vector<8x8x32xbf16>
    "tpu.trace_start"() <{level = 10 : i32, message = "zqd,zkd->zqk"}> : () -> ()
    %cst_15 = arith.constant dense<0.000000e+00> : vector<8x8x8xf32>
    %58 = tpu.matmul %56, %57, %cst_15 {dimension_numbers = #tpu.dot_dimension_numbers<[2], [2], [1], [1], [0, 0, 0, 1, 1, 1], [0], [0]>} : vector<8x8x32xbf16>, vector<8x8x32xbf16>, vector<8x8x8xf32> -> vector<8x8x8xf32>
    "tpu.trace_stop"() : () -> ()
    %cst_16 = arith.constant 0.176776692 : f32
    %59 = vector.broadcast %cst_16 : f32 to vector<8x8x8xf32>
    %60 = arith.mulf %58, %59 : vector<8x8x8xf32>
    %61 = tpu.iota {dimensions = array<i32: 0>} : vector<8x8xi32>
    %62 = tpu.iota {dimensions = array<i32: 1>} : vector<8x8xi32>
    %63 = arith.cmpi sge, %61, %62 : vector<8x8xi32>
    %64 = vector.shape_cast %63 : vector<8x8xi1> to vector<1x8x8xi1>
    %cst_17 = arith.constant -1.000000e+09 : f32
    %65 = vector.shape_cast %64 : vector<1x8x8xi1> to vector<1x8x8xi1>
    %66 = vector.broadcast %65 : vector<1x8x8xi1> to vector<8x8x8xi1>
    %67 = vector.broadcast %cst_17 : f32 to vector<8x8x8xf32>
    %68 = arith.select %66, %60, %67 : vector<8x8x8xi1>, vector<8x8x8xf32>
    %cst_18 = arith.constant dense<0xFF800000> : vector<8x8xf32>
    %69 = vector.multi_reduction <maximumf>, %68, %cst_18 [2] : vector<8x8x8xf32> to vector<8x8xf32>
    %70 = vector.shape_cast %69 : vector<8x8xf32> to vector<8x8x1xf32>
    %71 = vector.broadcast %70 : vector<8x8x1xf32> to vector<8x8x8xf32>
    %72 = arith.subf %68, %71 : vector<8x8x8xf32>
    %73 = math.exp %72 : vector<8x8x8xf32>
    %cst_19 = arith.constant dense<0.000000e+00> : vector<8x8xf32>
    %74 = vector.multi_reduction <add>, %73, %cst_19 [2] : vector<8x8x8xf32> to vector<8x8xf32>
    %75 = vector.shape_cast %74 : vector<8x8xf32> to vector<8x8x1xf32>
    %76 = tpu.reciprocal %75 {approx = true} : vector<8x8x1xf32> -> vector<8x8x1xf32>
    %77 = vector.broadcast %76 : vector<8x8x1xf32> to vector<8x8x8xf32>
    %78 = arith.mulf %73, %77 : vector<8x8x8xf32>
    %79 = arith.truncf %78 : vector<8x8x8xf32> to vector<8x8x8xbf16>
    %80 = arith.truncf %55 : vector<8x8x32xf32> to vector<8x8x32xbf16>
    "tpu.trace_start"() <{level = 10 : i32, message = "zqk,zkd->zqd"}> : () -> ()
    %cst_20 = arith.constant dense<0.000000e+00> : vector<8x8x32xf32>
    %81 = tpu.matmul %79, %80, %cst_20 {dimension_numbers = #tpu.dot_dimension_numbers<[2], [1], [1], [2], [0, 0, 0, 1, 1, 2], [0], [0]>} : vector<8x8x8xbf16>, vector<8x8x32xbf16>, vector<8x8x32xf32> -> vector<8x8x32xf32>
    "tpu.trace_stop"() : () -> ()
    %82 = vector.shape_cast %81 : vector<8x8x32xf32> to vector<2x4x8x32xf32>
    %83 = tpu.transpose %82, [0, 2, 1, 3] : vector<2x4x8x32xf32> -> vector<2x8x4x32xf32>
    %84 = vector.shape_cast %83 : vector<2x8x4x32xf32> to vector<16x128xf32>
    %c0_21 = arith.constant 0 : index
    %c0_22 = arith.constant 0 : index
    %c0_23 = arith.constant 0 : index
    %85 = vector.load %arg4[%c0_21, %c0_22, %c0_23] : memref<1x128x128xbf16, #tpu.memory_space<vmem>>, vector<1x128x128xbf16>
    %86 = vector.shape_cast %85 : vector<1x128x128xbf16> to vector<128x128xbf16>
    %87 = arith.truncf %84 : vector<16x128xf32> to vector<16x128xbf16>
    %cst_24 = arith.constant dense<0.000000e+00> : vector<16x128xf32>
    %88 = tpu.matmul %87, %86, %cst_24 {dimension_numbers = #tpu.dot_dimension_numbers<[1], [0], [0], [1], [0, 0, 1, 1], [], []>} : vector<16x128xbf16>, vector<128x128xbf16>, vector<16x128xf32> -> vector<16x128xf32>
    %89 = arith.addf %3, %88 : vector<16x128xf32>
    %90 = vector.extract_strided_slice %6 {offsets = [9, 0], sizes = [1, 128], strides = [1, 1]} : vector<15x128xf32> to vector<1x128xf32>
    %91 = vector.broadcast %90 : vector<1x128xf32> to vector<16x128xf32>
    %92 = arith.addf %89, %91 : vector<16x128xf32>
    %93 = vector.extract_strided_slice %6 {offsets = [2, 0], sizes = [1, 128], strides = [1, 1]} : vector<15x128xf32> to vector<1x128xf32>
    %94 = vector.extract_strided_slice %6 {offsets = [3, 0], sizes = [1, 128], strides = [1, 1]} : vector<15x128xf32> to vector<1x128xf32>
    %cst_25 = arith.constant dense<0.000000e+00> : vector<16xf32>
    %95 = vector.multi_reduction <add>, %92, %cst_25 [1] : vector<16x128xf32> to vector<16xf32>
    %96 = vector.shape_cast %95 : vector<16xf32> to vector<16x1xf32>
    %cst_26 = arith.constant 1.280000e+02 : f32
    %97 = vector.broadcast %cst_26 : f32 to vector<16x1xf32>
    %98 = arith.divf %96, %97 : vector<16x1xf32>
    %99 = vector.broadcast %98 : vector<16x1xf32> to vector<16x128xf32>
    %100 = arith.subf %92, %99 : vector<16x128xf32>
    %101 = arith.mulf %100, %100 : vector<16x128xf32>
    %cst_27 = arith.constant dense<0.000000e+00> : vector<16xf32>
    %102 = vector.multi_reduction <add>, %101, %cst_27 [1] : vector<16x128xf32> to vector<16xf32>
    %103 = vector.shape_cast %102 : vector<16xf32> to vector<16x1xf32>
    %cst_28 = arith.constant 1.280000e+02 : f32
    %104 = vector.broadcast %cst_28 : f32 to vector<16x1xf32>
    %105 = arith.divf %103, %104 : vector<16x1xf32>
    %106 = vector.broadcast %98 : vector<16x1xf32> to vector<16x128xf32>
    %107 = arith.subf %92, %106 : vector<16x128xf32>
    %cst_29 = arith.constant 9.99999974E-6 : f32
    %108 = vector.broadcast %cst_29 : f32 to vector<16x1xf32>
    %109 = arith.addf %105, %108 : vector<16x1xf32>
    %110 = math.rsqrt %109 : vector<16x1xf32>
    %111 = vector.broadcast %110 : vector<16x1xf32> to vector<16x128xf32>
    %112 = arith.mulf %107, %111 : vector<16x128xf32>
    %113 = vector.broadcast %93 : vector<1x128xf32> to vector<16x128xf32>
    %114 = arith.mulf %112, %113 : vector<16x128xf32>
    %115 = vector.broadcast %94 : vector<1x128xf32> to vector<16x128xf32>
    %116 = arith.addf %114, %115 : vector<16x128xf32>
    %c0_30 = arith.constant 0 : index
    %c0_31 = arith.constant 0 : index
    %c0_32 = arith.constant 0 : index
    %117 = vector.load %arg5[%c0_30, %c0_31, %c0_32] : memref<1x128x128xbf16, #tpu.memory_space<vmem>>, vector<1x128x128xbf16>
    %118 = vector.shape_cast %117 : vector<1x128x128xbf16> to vector<128x128xbf16>
    %119 = arith.truncf %116 : vector<16x128xf32> to vector<16x128xbf16>
    %cst_33 = arith.constant dense<0.000000e+00> : vector<16x128xf32>
    %120 = tpu.matmul %119, %118, %cst_33 {dimension_numbers = #tpu.dot_dimension_numbers<[1], [0], [0], [1], [0, 0, 1, 1], [], []>} : vector<16x128xbf16>, vector<128x128xbf16>, vector<16x128xf32> -> vector<16x128xf32>
    %121 = vector.extract_strided_slice %6 {offsets = [10, 0], sizes = [1, 128], strides = [1, 1]} : vector<15x128xf32> to vector<1x128xf32>
    %122 = vector.broadcast %121 : vector<1x128xf32> to vector<16x128xf32>
    %123 = arith.addf %120, %122 : vector<16x128xf32>
    %c0_34 = arith.constant 0 : index
    %c0_35 = arith.constant 0 : index
    %c0_36 = arith.constant 0 : index
    %124 = vector.load %arg6[%c0_34, %c0_35, %c0_36] : memref<1x128x256xbf16, #tpu.memory_space<vmem>>, vector<1x128x256xbf16>
    %125 = vector.shape_cast %124 : vector<1x128x256xbf16> to vector<128x256xbf16>
    %126 = arith.truncf %4 : vector<16x128xf32> to vector<16x128xbf16>
    %cst_37 = arith.constant dense<0.000000e+00> : vector<16x256xf32>
    %127 = tpu.matmul %126, %125, %cst_37 {dimension_numbers = #tpu.dot_dimension_numbers<[1], [0], [0], [1], [0, 0, 1, 1], [], []>} : vector<16x128xbf16>, vector<128x256xbf16>, vector<16x256xf32> -> vector<16x256xf32>
    %128 = vector.extract_strided_slice %127 {offsets = [0, 0], sizes = [16, 128], strides = [1, 1]} : vector<16x256xf32> to vector<16x128xf32>
    %129 = vector.extract_strided_slice %6 {offsets = [11, 0], sizes = [1, 128], strides = [1, 1]} : vector<15x128xf32> to vector<1x128xf32>
    %130 = vector.broadcast %129 : vector<1x128xf32> to vector<16x128xf32>
    %131 = arith.addf %128, %130 : vector<16x128xf32>
    %132 = vector.extract_strided_slice %127 {offsets = [0, 128], sizes = [16, 128], strides = [1, 1]} : vector<16x256xf32> to vector<16x128xf32>
    %133 = vector.extract_strided_slice %6 {offsets = [12, 0], sizes = [1, 128], strides = [1, 1]} : vector<15x128xf32> to vector<1x128xf32>
    %134 = vector.broadcast %133 : vector<1x128xf32> to vector<16x128xf32>
    %135 = arith.addf %132, %134 : vector<16x128xf32>
    %136 = vector.shape_cast %123 : vector<16x128xf32> to vector<2x8x4x32xf32>
    %137 = tpu.transpose %136, [0, 2, 1, 3] : vector<2x8x4x32xf32> -> vector<2x4x8x32xf32>
    %138 = vector.shape_cast %137 : vector<2x4x8x32xf32> to vector<8x8x32xf32>
    %139 = vector.shape_cast %131 : vector<16x128xf32> to vector<2x8x4x32xf32>
    %140 = tpu.transpose %139, [0, 2, 1, 3] : vector<2x8x4x32xf32> -> vector<2x4x8x32xf32>
    %141 = vector.shape_cast %140 : vector<2x4x8x32xf32> to vector<8x8x32xf32>
    %142 = vector.shape_cast %135 : vector<16x128xf32> to vector<2x8x4x32xf32>
    %143 = tpu.transpose %142, [0, 2, 1, 3] : vector<2x8x4x32xf32> -> vector<2x4x8x32xf32>
    %144 = vector.shape_cast %143 : vector<2x4x8x32xf32> to vector<8x8x32xf32>
    %145 = arith.truncf %138 : vector<8x8x32xf32> to vector<8x8x32xbf16>
    %146 = arith.truncf %141 : vector<8x8x32xf32> to vector<8x8x32xbf16>
    "tpu.trace_start"() <{level = 10 : i32, message = "zqd,zkd->zqk"}> : () -> ()
    %cst_38 = arith.constant dense<0.000000e+00> : vector<8x8x8xf32>
    %147 = tpu.matmul %145, %146, %cst_38 {dimension_numbers = #tpu.dot_dimension_numbers<[2], [2], [1], [1], [0, 0, 0, 1, 1, 1], [0], [0]>} : vector<8x8x32xbf16>, vector<8x8x32xbf16>, vector<8x8x8xf32> -> vector<8x8x8xf32>
    "tpu.trace_stop"() : () -> ()
    %cst_39 = arith.constant 0.176776692 : f32
    %148 = vector.broadcast %cst_39 : f32 to vector<8x8x8xf32>
    %149 = arith.mulf %147, %148 : vector<8x8x8xf32>
    %cst_40 = arith.constant dense<0xFF800000> : vector<8x8xf32>
    %150 = vector.multi_reduction <maximumf>, %149, %cst_40 [2] : vector<8x8x8xf32> to vector<8x8xf32>
    %151 = vector.shape_cast %150 : vector<8x8xf32> to vector<8x8x1xf32>
    %152 = vector.broadcast %151 : vector<8x8x1xf32> to vector<8x8x8xf32>
    %153 = arith.subf %149, %152 : vector<8x8x8xf32>
    %154 = math.exp %153 : vector<8x8x8xf32>
    %cst_41 = arith.constant dense<0.000000e+00> : vector<8x8xf32>
    %155 = vector.multi_reduction <add>, %154, %cst_41 [2] : vector<8x8x8xf32> to vector<8x8xf32>
    %156 = vector.shape_cast %155 : vector<8x8xf32> to vector<8x8x1xf32>
    %157 = tpu.reciprocal %156 {approx = true} : vector<8x8x1xf32> -> vector<8x8x1xf32>
    %158 = vector.broadcast %157 : vector<8x8x1xf32> to vector<8x8x8xf32>
    %159 = arith.mulf %154, %158 : vector<8x8x8xf32>
    %160 = arith.truncf %159 : vector<8x8x8xf32> to vector<8x8x8xbf16>
    %161 = arith.truncf %144 : vector<8x8x32xf32> to vector<8x8x32xbf16>
    "tpu.trace_start"() <{level = 10 : i32, message = "zqk,zkd->zqd"}> : () -> ()
    %cst_42 = arith.constant dense<0.000000e+00> : vector<8x8x32xf32>
    %162 = tpu.matmul %160, %161, %cst_42 {dimension_numbers = #tpu.dot_dimension_numbers<[2], [1], [1], [2], [0, 0, 0, 1, 1, 2], [0], [0]>} : vector<8x8x8xbf16>, vector<8x8x32xbf16>, vector<8x8x32xf32> -> vector<8x8x32xf32>
    "tpu.trace_stop"() : () -> ()
    %163 = vector.shape_cast %162 : vector<8x8x32xf32> to vector<2x4x8x32xf32>
    %164 = tpu.transpose %163, [0, 2, 1, 3] : vector<2x4x8x32xf32> -> vector<2x8x4x32xf32>
    %165 = vector.shape_cast %164 : vector<2x8x4x32xf32> to vector<16x128xf32>
    %c0_43 = arith.constant 0 : index
    %c0_44 = arith.constant 0 : index
    %c0_45 = arith.constant 0 : index
    %166 = vector.load %arg7[%c0_43, %c0_44, %c0_45] : memref<1x128x128xbf16, #tpu.memory_space<vmem>>, vector<1x128x128xbf16>
    %167 = vector.shape_cast %166 : vector<1x128x128xbf16> to vector<128x128xbf16>
    %168 = arith.truncf %165 : vector<16x128xf32> to vector<16x128xbf16>
    %cst_46 = arith.constant dense<0.000000e+00> : vector<16x128xf32>
    %169 = tpu.matmul %168, %167, %cst_46 {dimension_numbers = #tpu.dot_dimension_numbers<[1], [0], [0], [1], [0, 0, 1, 1], [], []>} : vector<16x128xbf16>, vector<128x128xbf16>, vector<16x128xf32> -> vector<16x128xf32>
    %170 = arith.addf %92, %169 : vector<16x128xf32>
    %171 = vector.extract_strided_slice %6 {offsets = [13, 0], sizes = [1, 128], strides = [1, 1]} : vector<15x128xf32> to vector<1x128xf32>
    %172 = vector.broadcast %171 : vector<1x128xf32> to vector<16x128xf32>
    %173 = arith.addf %170, %172 : vector<16x128xf32>
    %174 = vector.extract_strided_slice %6 {offsets = [4, 0], sizes = [1, 128], strides = [1, 1]} : vector<15x128xf32> to vector<1x128xf32>
    %175 = vector.extract_strided_slice %6 {offsets = [5, 0], sizes = [1, 128], strides = [1, 1]} : vector<15x128xf32> to vector<1x128xf32>
    %cst_47 = arith.constant dense<0.000000e+00> : vector<16xf32>
    %176 = vector.multi_reduction <add>, %173, %cst_47 [1] : vector<16x128xf32> to vector<16xf32>
    %177 = vector.shape_cast %176 : vector<16xf32> to vector<16x1xf32>
    %cst_48 = arith.constant 1.280000e+02 : f32
    %178 = vector.broadcast %cst_48 : f32 to vector<16x1xf32>
    %179 = arith.divf %177, %178 : vector<16x1xf32>
    %180 = vector.broadcast %179 : vector<16x1xf32> to vector<16x128xf32>
    %181 = arith.subf %173, %180 : vector<16x128xf32>
    %182 = arith.mulf %181, %181 : vector<16x128xf32>
    %cst_49 = arith.constant dense<0.000000e+00> : vector<16xf32>
    %183 = vector.multi_reduction <add>, %182, %cst_49 [1] : vector<16x128xf32> to vector<16xf32>
    %184 = vector.shape_cast %183 : vector<16xf32> to vector<16x1xf32>
    %cst_50 = arith.constant 1.280000e+02 : f32
    %185 = vector.broadcast %cst_50 : f32 to vector<16x1xf32>
    %186 = arith.divf %184, %185 : vector<16x1xf32>
    %187 = vector.broadcast %179 : vector<16x1xf32> to vector<16x128xf32>
    %188 = arith.subf %173, %187 : vector<16x128xf32>
    %cst_51 = arith.constant 9.99999974E-6 : f32
    %189 = vector.broadcast %cst_51 : f32 to vector<16x1xf32>
    %190 = arith.addf %186, %189 : vector<16x1xf32>
    %191 = math.rsqrt %190 : vector<16x1xf32>
    %192 = vector.broadcast %191 : vector<16x1xf32> to vector<16x128xf32>
    %193 = arith.mulf %188, %192 : vector<16x128xf32>
    %194 = vector.broadcast %174 : vector<1x128xf32> to vector<16x128xf32>
    %195 = arith.mulf %193, %194 : vector<16x128xf32>
    %196 = vector.broadcast %175 : vector<1x128xf32> to vector<16x128xf32>
    %197 = arith.addf %195, %196 : vector<16x128xf32>
    %c0_52 = arith.constant 0 : index
    %c0_53 = arith.constant 0 : index
    %c0_54 = arith.constant 0 : index
    %198 = vector.load %arg8[%c0_52, %c0_53, %c0_54] : memref<1x128x256xbf16, #tpu.memory_space<vmem>>, vector<1x128x256xbf16>
    %199 = vector.shape_cast %198 : vector<1x128x256xbf16> to vector<128x256xbf16>
    %200 = arith.truncf %197 : vector<16x128xf32> to vector<16x128xbf16>
    %cst_55 = arith.constant dense<0.000000e+00> : vector<16x256xf32>
    %201 = tpu.matmul %200, %199, %cst_55 {dimension_numbers = #tpu.dot_dimension_numbers<[1], [0], [0], [1], [0, 0, 1, 1], [], []>} : vector<16x128xbf16>, vector<128x256xbf16>, vector<16x256xf32> -> vector<16x256xf32>
    %c0_56 = arith.constant 0 : index
    %c0_57 = arith.constant 0 : index
    %c0_58 = arith.constant 0 : index
    %202 = vector.load %arg11[%c0_56, %c0_57, %c0_58] : memref<1x1x256xf32, #tpu.memory_space<vmem>>, vector<1x1x256xf32>
    %203 = vector.shape_cast %202 : vector<1x1x256xf32> to vector<1x256xf32>
    %204 = vector.broadcast %203 : vector<1x256xf32> to vector<16x256xf32>
    %205 = arith.addf %201, %204 : vector<16x256xf32>
    %206 = arith.mulf %205, %205 : vector<16x256xf32>
    %207 = arith.mulf %205, %206 : vector<16x256xf32>
    %cst_59 = arith.constant 4.471500e-02 : f32
    %208 = vector.broadcast %cst_59 : f32 to vector<16x256xf32>
    %209 = arith.mulf %208, %207 : vector<16x256xf32>
    %210 = arith.addf %205, %209 : vector<16x256xf32>
    %cst_60 = arith.constant 0.797884583 : f32
    %211 = vector.broadcast %cst_60 : f32 to vector<16x256xf32>
    %212 = arith.mulf %211, %210 : vector<16x256xf32>
    %213 = math.tanh %212 : vector<16x256xf32>
    %cst_61 = arith.constant 1.000000e+00 : f32
    %214 = vector.broadcast %cst_61 : f32 to vector<16x256xf32>
    %215 = arith.addf %214, %213 : vector<16x256xf32>
    %cst_62 = arith.constant 5.000000e-01 : f32
    %216 = vector.broadcast %cst_62 : f32 to vector<16x256xf32>
    %217 = arith.mulf %216, %215 : vector<16x256xf32>
    %218 = arith.mulf %205, %217 : vector<16x256xf32>
    %c0_63 = arith.constant 0 : index
    %c0_64 = arith.constant 0 : index
    %c0_65 = arith.constant 0 : index
    %219 = vector.load %arg9[%c0_63, %c0_64, %c0_65] : memref<1x256x128xbf16, #tpu.memory_space<vmem>>, vector<1x256x128xbf16>
    %220 = vector.shape_cast %219 : vector<1x256x128xbf16> to vector<256x128xbf16>
    %221 = arith.truncf %218 : vector<16x256xf32> to vector<16x256xbf16>
    %cst_66 = arith.constant dense<0.000000e+00> : vector<16x128xf32>
    %222 = tpu.matmul %221, %220, %cst_66 {dimension_numbers = #tpu.dot_dimension_numbers<[1], [0], [0], [1], [0, 0, 1, 1], [], []>} : vector<16x256xbf16>, vector<256x128xbf16>, vector<16x128xf32> -> vector<16x128xf32>
    %223 = arith.addf %173, %222 : vector<16x128xf32>
    %224 = vector.extract_strided_slice %6 {offsets = [14, 0], sizes = [1, 128], strides = [1, 1]} : vector<15x128xf32> to vector<1x128xf32>
    %225 = vector.broadcast %224 : vector<1x128xf32> to vector<16x128xf32>
    %226 = arith.addf %223, %225 : vector<16x128xf32>
    %c0_67 = arith.constant 0 : index
    %c0_68 = arith.constant 0 : index
    %227 = vector.load %arg13[%c0_67, %c0_68] : memref<16x128xf32, #tpu.memory_space<vmem>>, vector<16x128xf32>
    tpu.vector_store %arg13[%c0_67, %c0_68], %226 {strides = array<i32>} : memref<16x128xf32, #tpu.memory_space<vmem>>, vector<16x128xf32>,
    %c0_69 = arith.constant 0 : index
    %c0_70 = arith.constant 0 : index
    %228 = vector.load %arg12[%c0_69, %c0_70] : memref<16x128xf32, #tpu.memory_space<vmem>>, vector<16x128xf32>
    tpu.vector_store %arg12[%c0_69, %c0_70], %226 {strides = array<i32>} : memref<16x128xf32, #tpu.memory_space<vmem>>, vector<16x128xf32>,
    return
  }
  func.func @transform_0(%arg0: i32) -> (i32, i32) {
    %c0_i32 = arith.constant 0 : i32
    %c0_i32_0 = arith.constant 0 : i32
    %c0_i32_1 = arith.constant 0 : i32
    return %c0_i32, %c0_i32_0 : i32, i32
  }
  func.func @transform_1(%arg0: i32) -> (i32, i32) {
    %c0_i32 = arith.constant 0 : i32
    %c0_i32_0 = arith.constant 0 : i32
    %c0_i32_1 = arith.constant 0 : i32
    return %c0_i32, %c0_i32_0 : i32, i32
  }
  func.func @transform_2(%arg0: i32) -> (i32, i32, i32) {
    %c0_i32 = arith.constant 0 : i32
    %c0_i32_0 = arith.constant 0 : i32
    %c0_i32_1 = arith.constant 0 : i32
    return %arg0, %c0_i32, %c0_i32_0 : i32, i32, i32
  }
  func.func @transform_3(%arg0: i32) -> (i32, i32, i32) {
    %c0_i32 = arith.constant 0 : i32
    %c0_i32_0 = arith.constant 0 : i32
    %c0_i32_1 = arith.constant 0 : i32
    return %arg0, %c0_i32, %c0_i32_0 : i32, i32, i32
  }
  func.func @transform_4(%arg0: i32) -> (i32, i32, i32) {
    %c0_i32 = arith.constant 0 : i32
    %c0_i32_0 = arith.constant 0 : i32
    %c0_i32_1 = arith.constant 0 : i32
    return %arg0, %c0_i32, %c0_i32_0 : i32, i32, i32
  }
  func.func @transform_5(%arg0: i32) -> (i32, i32, i32) {
    %c0_i32 = arith.constant 0 : i32
    %c0_i32_0 = arith.constant 0 : i32
    %c0_i32_1 = arith.constant 0 : i32
    return %arg0, %c0_i32, %c0_i32_0 : i32, i32, i32
  }
  func.func @transform_6(%arg0: i32) -> (i32, i32, i32) {
    %c0_i32 = arith.constant 0 : i32
    %c0_i32_0 = arith.constant 0 : i32
    %c0_i32_1 = arith.constant 0 : i32
    return %arg0, %c0_i32, %c0_i32_0 : i32, i32, i32
  }
  func.func @transform_7(%arg0: i32) -> (i32, i32, i32) {
    %c0_i32 = arith.constant 0 : i32
    %c0_i32_0 = arith.constant 0 : i32
    %c0_i32_1 = arith.constant 0 : i32
    return %arg0, %c0_i32, %c0_i32_0 : i32, i32, i32
  }
  func.func @transform_8(%arg0: i32) -> (i32, i32, i32) {
    %c0_i32 = arith.constant 0 : i32
    %c0_i32_0 = arith.constant 0 : i32
    %c0_i32_1 = arith.constant 0 : i32
    return %arg0, %c0_i32, %c0_i32_0 : i32, i32, i32
  }
  func.func @transform_9(%arg0: i32) -> (i32, i32, i32) {
    %c0_i32 = arith.constant 0 : i32
    %c0_i32_0 = arith.constant 0 : i32
    %c0_i32_1 = arith.constant 0 : i32
    return %arg0, %c0_i32, %c0_i32_0 : i32, i32, i32
  }
  func.func @transform_10(%arg0: i32) -> (i32, i32, i32) {
    %c0_i32 = arith.constant 0 : i32
    %c0_i32_0 = arith.constant 0 : i32
    %c0_i32_1 = arith.constant 0 : i32
    return %arg0, %c0_i32, %c0_i32_0 : i32, i32, i32
  }
  func.func @transform_11(%arg0: i32) -> (i32, i32) {
    %c0_i32 = arith.constant 0 : i32
    %c0_i32_0 = arith.constant 0 : i32
    %c0_i32_1 = arith.constant 0 : i32
    return %c0_i32, %c0_i32_0 : i32, i32
  }
}

module attributes {stable_mosaic.version = 11 : i64} {
  func.func @_frontend_kernel(%arg0: memref<2x18x8xf32, #tpu.memory_space<vmem>>, %arg1: memref<3x8x128xbf16, #tpu.memory_space<vmem>>, %arg2: memref<1x128xf32, #tpu.memory_space<vmem>>, %arg3: memref<3x128x128xbf16, #tpu.memory_space<vmem>>, %arg4: memref<1x128xf32, #tpu.memory_space<vmem>>, %arg5: memref<8x128xf32, #tpu.memory_space<vmem>>, %arg6: memref<16x128xf32, #tpu.memory_space<vmem>>, %arg7: memref<32x128xf32, #tpu.memory_space<vmem>>) attributes {dimension_semantics = [], scalar_prefetch = 0 : i64, scratch_operands = 1 : i64, tpu.core_type = #tpu.core_type<tc>} {
    %c0 = arith.constant 0 : index
    %c0_0 = arith.constant 0 : index
    %c0_1 = arith.constant 0 : index
    %0 = vector.load %arg0[%c0, %c0_0, %c0_1] : memref<2x18x8xf32, #tpu.memory_space<vmem>>, vector<2x18x8xf32>
    %cst = arith.constant 0.000000e+00 : f32
    %1 = vector.broadcast %cst : f32 to vector<32x128xf32>
    %2 = vector.extract_strided_slice %0 {offsets = [0, 0, 0], sizes = [2, 16, 8], strides = [1, 1, 1]} : vector<2x18x8xf32> to vector<2x16x8xf32>
    %3 = vector.shape_cast %2 : vector<2x16x8xf32> to vector<32x8xf32>
    %4 = arith.truncf %3 : vector<32x8xf32> to vector<32x8xbf16>
    %c0_2 = arith.constant 0 : index
    %c0_3 = arith.constant 0 : index
    %c0_4 = arith.constant 0 : index
    %5 = vector.load %arg1[%c0_2, %c0_3, %c0_4] : memref<3x8x128xbf16, #tpu.memory_space<vmem>>, vector<1x8x128xbf16>
    %6 = vector.shape_cast %5 : vector<1x8x128xbf16> to vector<8x128xbf16>
    %cst_5 = arith.constant dense<0.000000e+00> : vector<32x128xf32>
    %7 = tpu.matmul %4, %6, %cst_5 {dimension_numbers = #tpu.dot_dimension_numbers<[1], [0], [0], [1], [0, 0, 1, 1], [], []>} : vector<32x8xbf16>, vector<8x128xbf16>, vector<32x128xf32> -> vector<32x128xf32>
    %8 = arith.addf %1, %7 : vector<32x128xf32>
    %9 = vector.extract_strided_slice %0 {offsets = [0, 1, 0], sizes = [2, 16, 8], strides = [1, 1, 1]} : vector<2x18x8xf32> to vector<2x16x8xf32>
    %10 = vector.shape_cast %9 : vector<2x16x8xf32> to vector<32x8xf32>
    %11 = arith.truncf %10 : vector<32x8xf32> to vector<32x8xbf16>
    %c1 = arith.constant 1 : index
    %c0_6 = arith.constant 0 : index
    %c0_7 = arith.constant 0 : index
    %12 = vector.load %arg1[%c1, %c0_6, %c0_7] : memref<3x8x128xbf16, #tpu.memory_space<vmem>>, vector<1x8x128xbf16>
    %13 = vector.shape_cast %12 : vector<1x8x128xbf16> to vector<8x128xbf16>
    %cst_8 = arith.constant dense<0.000000e+00> : vector<32x128xf32>
    %14 = tpu.matmul %11, %13, %cst_8 {dimension_numbers = #tpu.dot_dimension_numbers<[1], [0], [0], [1], [0, 0, 1, 1], [], []>} : vector<32x8xbf16>, vector<8x128xbf16>, vector<32x128xf32> -> vector<32x128xf32>
    %15 = arith.addf %8, %14 : vector<32x128xf32>
    %16 = vector.extract_strided_slice %0 {offsets = [0, 2, 0], sizes = [2, 16, 8], strides = [1, 1, 1]} : vector<2x18x8xf32> to vector<2x16x8xf32>
    %17 = vector.shape_cast %16 : vector<2x16x8xf32> to vector<32x8xf32>
    %18 = arith.truncf %17 : vector<32x8xf32> to vector<32x8xbf16>
    %c2 = arith.constant 2 : index
    %c0_9 = arith.constant 0 : index
    %c0_10 = arith.constant 0 : index
    %19 = vector.load %arg1[%c2, %c0_9, %c0_10] : memref<3x8x128xbf16, #tpu.memory_space<vmem>>, vector<1x8x128xbf16>
    %20 = vector.shape_cast %19 : vector<1x8x128xbf16> to vector<8x128xbf16>
    %cst_11 = arith.constant dense<0.000000e+00> : vector<32x128xf32>
    %21 = tpu.matmul %18, %20, %cst_11 {dimension_numbers = #tpu.dot_dimension_numbers<[1], [0], [0], [1], [0, 0, 1, 1], [], []>} : vector<32x8xbf16>, vector<8x128xbf16>, vector<32x128xf32> -> vector<32x128xf32>
    %22 = arith.addf %15, %21 : vector<32x128xf32>
    %c0_12 = arith.constant 0 : index
    %c0_13 = arith.constant 0 : index
    %23 = vector.load %arg2[%c0_12, %c0_13] : memref<1x128xf32, #tpu.memory_space<vmem>>, vector<1x128xf32>
    %24 = vector.broadcast %23 : vector<1x128xf32> to vector<32x128xf32>
    %25 = arith.addf %22, %24 : vector<32x128xf32>
    %26 = arith.mulf %25, %25 : vector<32x128xf32>
    %27 = arith.mulf %25, %26 : vector<32x128xf32>
    %cst_14 = arith.constant 4.471500e-02 : f32
    %28 = vector.broadcast %cst_14 : f32 to vector<32x128xf32>
    %29 = arith.mulf %28, %27 : vector<32x128xf32>
    %30 = arith.addf %25, %29 : vector<32x128xf32>
    %cst_15 = arith.constant 0.797884583 : f32
    %31 = vector.broadcast %cst_15 : f32 to vector<32x128xf32>
    %32 = arith.mulf %31, %30 : vector<32x128xf32>
    %33 = math.tanh %32 : vector<32x128xf32>
    %cst_16 = arith.constant 1.000000e+00 : f32
    %34 = vector.broadcast %cst_16 : f32 to vector<32x128xf32>
    %35 = arith.addf %34, %33 : vector<32x128xf32>
    %cst_17 = arith.constant 5.000000e-01 : f32
    %36 = vector.broadcast %cst_17 : f32 to vector<32x128xf32>
    %37 = arith.mulf %36, %35 : vector<32x128xf32>
    %38 = arith.mulf %25, %37 : vector<32x128xf32>
    %c0_18 = arith.constant 0 : index
    %c0_19 = arith.constant 0 : index
    %39 = vector.load %arg7[%c0_18, %c0_19] : memref<32x128xf32, #tpu.memory_space<vmem>>, vector<32x128xf32>
    tpu.vector_store %arg7[%c0_18, %c0_19], %38 {strides = array<i32>} : memref<32x128xf32, #tpu.memory_space<vmem>>, vector<32x128xf32>,
    %c0_20 = arith.constant 0 : index
    %c0_21 = arith.constant 0 : index
    %40 = tpu.strided_load %arg7[%c0_20, %c0_21] {strides = array<i32: 2, 1>} : memref<32x128xf32, #tpu.memory_space<vmem>>, vector<16x128xf32>
    %41 = vector.shape_cast %40 : vector<16x128xf32> to vector<2x8x128xf32>
    %c1_22 = arith.constant 1 : index
    %c0_23 = arith.constant 0 : index
    %42 = tpu.strided_load %arg7[%c1_22, %c0_23] {strides = array<i32: 2, 1>} : memref<32x128xf32, #tpu.memory_space<vmem>>, vector<16x128xf32>
    %43 = vector.shape_cast %42 : vector<16x128xf32> to vector<2x8x128xf32>
    %cst_24 = arith.constant 0.000000e+00 : f32
    %44 = vector.broadcast %cst_24 : f32 to vector<2x1x128xf32>
    %45 = vector.extract_strided_slice %43 {offsets = [0, 0, 0], sizes = [2, 7, 128], strides = [1, 1, 1]} : vector<2x8x128xf32> to vector<2x7x128xf32>
    %46 = tpu.concatenate %44, %45 in 1 : vector<2x1x128xf32>, vector<2x7x128xf32> -> vector<2x8x128xf32>
    %cst_25 = arith.constant 0.000000e+00 : f32
    %47 = vector.broadcast %cst_25 : f32 to vector<16x128xf32>
    %48 = vector.shape_cast %46 : vector<2x8x128xf32> to vector<16x128xf32>
    %49 = arith.truncf %48 : vector<16x128xf32> to vector<16x128xbf16>
    %c0_26 = arith.constant 0 : index
    %c0_27 = arith.constant 0 : index
    %c0_28 = arith.constant 0 : index
    %50 = vector.load %arg3[%c0_26, %c0_27, %c0_28] : memref<3x128x128xbf16, #tpu.memory_space<vmem>>, vector<1x128x128xbf16>
    %51 = vector.shape_cast %50 : vector<1x128x128xbf16> to vector<128x128xbf16>
    %cst_29 = arith.constant dense<0.000000e+00> : vector<16x128xf32>
    %52 = tpu.matmul %49, %51, %cst_29 {dimension_numbers = #tpu.dot_dimension_numbers<[1], [0], [0], [1], [0, 0, 1, 1], [], []>} : vector<16x128xbf16>, vector<128x128xbf16>, vector<16x128xf32> -> vector<16x128xf32>
    %53 = arith.addf %47, %52 : vector<16x128xf32>
    %54 = vector.shape_cast %41 : vector<2x8x128xf32> to vector<16x128xf32>
    %55 = arith.truncf %54 : vector<16x128xf32> to vector<16x128xbf16>
    %c1_30 = arith.constant 1 : index
    %c0_31 = arith.constant 0 : index
    %c0_32 = arith.constant 0 : index
    %56 = vector.load %arg3[%c1_30, %c0_31, %c0_32] : memref<3x128x128xbf16, #tpu.memory_space<vmem>>, vector<1x128x128xbf16>
    %57 = vector.shape_cast %56 : vector<1x128x128xbf16> to vector<128x128xbf16>
    %cst_33 = arith.constant dense<0.000000e+00> : vector<16x128xf32>
    %58 = tpu.matmul %55, %57, %cst_33 {dimension_numbers = #tpu.dot_dimension_numbers<[1], [0], [0], [1], [0, 0, 1, 1], [], []>} : vector<16x128xbf16>, vector<128x128xbf16>, vector<16x128xf32> -> vector<16x128xf32>
    %59 = arith.addf %53, %58 : vector<16x128xf32>
    %60 = vector.shape_cast %43 : vector<2x8x128xf32> to vector<16x128xf32>
    %61 = arith.truncf %60 : vector<16x128xf32> to vector<16x128xbf16>
    %c2_34 = arith.constant 2 : index
    %c0_35 = arith.constant 0 : index
    %c0_36 = arith.constant 0 : index
    %62 = vector.load %arg3[%c2_34, %c0_35, %c0_36] : memref<3x128x128xbf16, #tpu.memory_space<vmem>>, vector<1x128x128xbf16>
    %63 = vector.shape_cast %62 : vector<1x128x128xbf16> to vector<128x128xbf16>
    %cst_37 = arith.constant dense<0.000000e+00> : vector<16x128xf32>
    %64 = tpu.matmul %61, %63, %cst_37 {dimension_numbers = #tpu.dot_dimension_numbers<[1], [0], [0], [1], [0, 0, 1, 1], [], []>} : vector<16x128xbf16>, vector<128x128xbf16>, vector<16x128xf32> -> vector<16x128xf32>
    %65 = arith.addf %59, %64 : vector<16x128xf32>
    %c0_38 = arith.constant 0 : index
    %c0_39 = arith.constant 0 : index
    %66 = vector.load %arg4[%c0_38, %c0_39] : memref<1x128xf32, #tpu.memory_space<vmem>>, vector<1x128xf32>
    %67 = vector.broadcast %66 : vector<1x128xf32> to vector<16x128xf32>
    %68 = arith.addf %65, %67 : vector<16x128xf32>
    %69 = arith.mulf %68, %68 : vector<16x128xf32>
    %70 = arith.mulf %68, %69 : vector<16x128xf32>
    %cst_40 = arith.constant 4.471500e-02 : f32
    %71 = vector.broadcast %cst_40 : f32 to vector<16x128xf32>
    %72 = arith.mulf %71, %70 : vector<16x128xf32>
    %73 = arith.addf %68, %72 : vector<16x128xf32>
    %cst_41 = arith.constant 0.797884583 : f32
    %74 = vector.broadcast %cst_41 : f32 to vector<16x128xf32>
    %75 = arith.mulf %74, %73 : vector<16x128xf32>
    %76 = math.tanh %75 : vector<16x128xf32>
    %cst_42 = arith.constant 1.000000e+00 : f32
    %77 = vector.broadcast %cst_42 : f32 to vector<16x128xf32>
    %78 = arith.addf %77, %76 : vector<16x128xf32>
    %cst_43 = arith.constant 5.000000e-01 : f32
    %79 = vector.broadcast %cst_43 : f32 to vector<16x128xf32>
    %80 = arith.mulf %79, %78 : vector<16x128xf32>
    %81 = arith.mulf %68, %80 : vector<16x128xf32>
    %82 = vector.shape_cast %81 : vector<16x128xf32> to vector<2x8x128xf32>
    %c0_44 = arith.constant 0 : index
    %c0_45 = arith.constant 0 : index
    %83 = vector.load %arg5[%c0_44, %c0_45] : memref<8x128xf32, #tpu.memory_space<vmem>>, vector<8x128xf32>
    %84 = vector.shape_cast %83 : vector<8x128xf32> to vector<1x8x128xf32>
    %85 = vector.broadcast %84 : vector<1x8x128xf32> to vector<2x8x128xf32>
    %86 = arith.addf %82, %85 : vector<2x8x128xf32>
    %87 = vector.shape_cast %86 : vector<2x8x128xf32> to vector<16x128xf32>
    %c0_46 = arith.constant 0 : index
    %c0_47 = arith.constant 0 : index
    %88 = vector.load %arg6[%c0_46, %c0_47] : memref<16x128xf32, #tpu.memory_space<vmem>>, vector<16x128xf32>
    tpu.vector_store %arg6[%c0_46, %c0_47], %87 {strides = array<i32>} : memref<16x128xf32, #tpu.memory_space<vmem>>, vector<16x128xf32>,
    return
  }
}

module attributes {stable_mosaic.version = 11 : i64} {
  func.func @_lmhead_kernel(%arg0: i32, %arg1: memref<16x128xf32, #tpu.memory_space<vmem>>, %arg2: memref<2x128xf32, #tpu.memory_space<vmem>>, %arg3: memref<128x128xbf16, #tpu.memory_space<vmem>>, %arg4: memref<16x128xf32, #tpu.memory_space<vmem>>) attributes {dimension_semantics = [#tpu.dimension_semantics<parallel>], iteration_bounds = array<i64: 2>, scalar_prefetch = 0 : i64, scratch_operands = 0 : i64, tpu.core_type = #tpu.core_type<tc>, window_params = [{pipeline_mode = #tpu.pipeline_mode<synchronous>, transform_indices = @transform_0, window_bounds = array<i64: 16, 128>}, {pipeline_mode = #tpu.pipeline_mode<synchronous>, transform_indices = @transform_1, window_bounds = array<i64: 2, 128>}, {transform_indices = @transform_2, window_bounds = array<i64: 128, 128>}, {transform_indices = @transform_3, window_bounds = array<i64: 16, 128>}]} {
    %c0 = arith.constant 0 : index
    %c0_0 = arith.constant 0 : index
    %0 = vector.load %arg1[%c0, %c0_0] : memref<16x128xf32, #tpu.memory_space<vmem>>, vector<16x128xf32>
    %c0_1 = arith.constant 0 : index
    %c0_2 = arith.constant 0 : index
    %1 = vector.load %arg2[%c0_1, %c0_2] : memref<2x128xf32, #tpu.memory_space<vmem>>, vector<1x128xf32>
    %c1 = arith.constant 1 : index
    %c0_3 = arith.constant 0 : index
    %2 = vector.load %arg2[%c1, %c0_3] : memref<2x128xf32, #tpu.memory_space<vmem>>, vector<1x128xf32>
    %cst = arith.constant dense<0.000000e+00> : vector<16xf32>
    %3 = vector.multi_reduction <add>, %0, %cst [1] : vector<16x128xf32> to vector<16xf32>
    %4 = vector.shape_cast %3 : vector<16xf32> to vector<16x1xf32>
    %cst_4 = arith.constant 1.280000e+02 : f32
    %5 = vector.broadcast %cst_4 : f32 to vector<16x1xf32>
    %6 = arith.divf %4, %5 : vector<16x1xf32>
    %7 = vector.broadcast %6 : vector<16x1xf32> to vector<16x128xf32>
    %8 = arith.subf %0, %7 : vector<16x128xf32>
    %9 = arith.mulf %8, %8 : vector<16x128xf32>
    %cst_5 = arith.constant dense<0.000000e+00> : vector<16xf32>
    %10 = vector.multi_reduction <add>, %9, %cst_5 [1] : vector<16x128xf32> to vector<16xf32>
    %11 = vector.shape_cast %10 : vector<16xf32> to vector<16x1xf32>
    %cst_6 = arith.constant 1.280000e+02 : f32
    %12 = vector.broadcast %cst_6 : f32 to vector<16x1xf32>
    %13 = arith.divf %11, %12 : vector<16x1xf32>
    %14 = vector.broadcast %6 : vector<16x1xf32> to vector<16x128xf32>
    %15 = arith.subf %0, %14 : vector<16x128xf32>
    %cst_7 = arith.constant 9.99999974E-6 : f32
    %16 = vector.broadcast %cst_7 : f32 to vector<16x1xf32>
    %17 = arith.addf %13, %16 : vector<16x1xf32>
    %18 = math.rsqrt %17 : vector<16x1xf32>
    %19 = vector.broadcast %18 : vector<16x1xf32> to vector<16x128xf32>
    %20 = arith.mulf %15, %19 : vector<16x128xf32>
    %21 = vector.broadcast %1 : vector<1x128xf32> to vector<16x128xf32>
    %22 = arith.mulf %20, %21 : vector<16x128xf32>
    %23 = vector.broadcast %2 : vector<1x128xf32> to vector<16x128xf32>
    %24 = arith.addf %22, %23 : vector<16x128xf32>
    %25 = arith.truncf %24 : vector<16x128xf32> to vector<16x128xbf16>
    %c0_8 = arith.constant 0 : index
    %c0_9 = arith.constant 0 : index
    %26 = vector.load %arg3[%c0_8, %c0_9] : memref<128x128xbf16, #tpu.memory_space<vmem>>, vector<128x128xbf16>
    %cst_10 = arith.constant dense<0.000000e+00> : vector<16x128xf32>
    %27 = tpu.matmul %25, %26, %cst_10 {dimension_numbers = #tpu.dot_dimension_numbers<[1], [0], [0], [1], [0, 0, 1, 1], [], []>} : vector<16x128xbf16>, vector<128x128xbf16>, vector<16x128xf32> -> vector<16x128xf32>
    %c0_11 = arith.constant 0 : index
    %c0_12 = arith.constant 0 : index
    %28 = vector.load %arg4[%c0_11, %c0_12] : memref<16x128xf32, #tpu.memory_space<vmem>>, vector<16x128xf32>
    tpu.vector_store %arg4[%c0_11, %c0_12], %27 {strides = array<i32>} : memref<16x128xf32, #tpu.memory_space<vmem>>, vector<16x128xf32>,
    return
  }
  func.func @transform_0(%arg0: i32) -> (i32, i32) {
    %c0_i32 = arith.constant 0 : i32
    %c0_i32_0 = arith.constant 0 : i32
    %c0_i32_1 = arith.constant 0 : i32
    return %c0_i32, %c0_i32_0 : i32, i32
  }
  func.func @transform_1(%arg0: i32) -> (i32, i32) {
    %c0_i32 = arith.constant 0 : i32
    %c0_i32_0 = arith.constant 0 : i32
    %c0_i32_1 = arith.constant 0 : i32
    return %c0_i32, %c0_i32_0 : i32, i32
  }
  func.func @transform_2(%arg0: i32) -> (i32, i32) {
    %c0_i32 = arith.constant 0 : i32
    %c0_i32_0 = arith.constant 0 : i32
    return %c0_i32, %arg0 : i32, i32
  }
  func.func @transform_3(%arg0: i32) -> (i32, i32) {
    %c0_i32 = arith.constant 0 : i32
    %c0_i32_0 = arith.constant 0 : i32
    return %c0_i32, %arg0 : i32, i32
  }
}

</mosaic_0001>

<bundles_post_ra>
// kernel: whisper_forward.7
= control target key start
LH: loop header
LB: loop body
LE: loop exit
PB: predicated region body
PF: predicated region fallthrough
CT: control target
= control target key end

     0   :  { %8 = vsyncpa [#allocation4], 0  ;;  %s848_s0 = inlined_call_operand.vmem [shape: f32[16,128], index: 0, kind: input, shape index: {}]   ;;  %s849_s1 = inlined_call_operand.vmem [shape: f32[2,128], index: 1, kind: input, shape index: {}]   ;;  %s850_s2 = inlined_call_operand.vmem [shape: bf16[128,256], index: 2, kind: input, shape index: {}]   ;;  %s851_s3 = inlined_call_operand.hbm [shape: f32[16,256], index: 3, kind: output, shape index: {}]  }
   0x1   :  { %10 = vsyncpa [#allocation4 + $0x1], 0  ;;  %s696_s12 = smov 0   ;;  %s698_s13 = smov 0  }
   0x2   :  { %s700_s14 = smov 0   ;;  %s702_s15 = smov 0  }
   0x3 LB: > { %s498_s16 = sadd.s32 4294967295, %s668_s15   ;;  %s499_s17 = sadd.s32 4294967294, %s668_s15   ;;  %s668_s15 = sphi %s702_s15, %s857_s15   ;;  %s664_s14 = sphi %s700_s14, %s856_s14   ;;  %s660_s13 = sphi %s698_s13, %s855_s13   ;;  %s656_s12 = sphi %s696_s12, %s854_s12  }
   0x4   : > { %s719_s18 = sadd.s32 1, %s668_s15   ;;  %s65_s19 = sadd.s32 1, %s664_s14 }
   0x5   : > { %s62_s20 = ssub.s32 %s668_s15, %s719_s18  ;;  %p72_p0 = scmp.ne.s32.totalorder %s664_s14, %s660_s13 }
   0x6   : > { %p63_p1 = scmp.eq.s32.totalorder %s62_s20, 0  ;;  %p73_p2 = scmp.eq.s32.totalorder %s668_s15, 0 }
   0x7   : > { %p102_p3 = scmp.eq.s32.totalorder %s498_s16, 1  ;;  %p107_p4 = scmp.ne.s32.totalorder %s660_s13, %s656_s12 }
   0x8   : > { %s732_s21 = scalar_select %p63_p1, %s664_s14, %s65_s19  }
   0x9   : > { %p74_p5 = por %p73_p2, %p72_p0  ;;  %p734_p6 = por %p102_p3, %p72_p0 }
   0xa   : > { %p108_p7 = scmp.eq.s32.totalorder %s499_s17, 1  ;;  %p501_p9 = scmp.ge.s32.totalorder %s668_s15, 2 }
   0xc   : > { %p738_p8 = por %p108_p7, %p107_p4  ;;  %130 = sbr.rel (%p501_p9) target bundleno = 33 (0x21), region = 24 }
  0x13   : > { %133 = sbr.rel (!%p74_p5) target bundleno = 33 (0x21), region = 28  ;;  %s135_s24 = sand.u32 (%p74_p5), 1, %s664_s14  }
  0x14   : > { %s503_s25 = sshll.u32 (%p74_p5), %s668_s15, 2  ;;  %s502_s26 = sshll.u32 (%p74_p5), %s135_s24, 6 }
  0x15   : > { %s750_s29 = scalar_lea.vmem (%p74_p5), %s850_s2, %s503_s25  ;;  %s137_s30 = scalar_lea.vmem (%p74_p5), [#allocation2], %s502_s26 }
  0x16   : > { %v155_v0 = vld [vmem:[%s750_s29] sm:$0xf] (%p74_p5)  ;;  %v157_v1 = vld [vmem:[%s750_s29 + $0x8] sm:$0xf] (%p74_p5)  ;;  %v159_v2 = vld [vmem:[%s750_s29 + $0x10] sm:$0xf] (%p74_p5) }
  0x17   : > { %156 = vst [vmem:[%s137_s30] sm:$0xf] (%p74_p5), %v155_v0  ;;  %158 = vst [vmem:[%s137_s30 + $0x4] sm:$0xf] (%p74_p5), %v157_v1  ;;  %v161_v3 = vld [vmem:[%s750_s29 + $0x18] sm:$0xf] (%p74_p5) }
  0x18   : > { %v163_v4 = vld [vmem:[%s750_s29 + $0x20] sm:$0xf] (%p74_p5)  ;;  %160 = vst [vmem:[%s137_s30 + $0x8] sm:$0xf] (%p74_p5), %v159_v2  ;;  %162 = vst [vmem:[%s137_s30 + $0xc] sm:$0xf] (%p74_p5), %v161_v3 }
  0x19   : > { %164 = vst [vmem:[%s137_s30 + $0x10] sm:$0xf] (%p74_p5), %v163_v4  ;;  %v165_v5 = vld [vmem:[%s750_s29 + $0x28] sm:$0xf] (%p74_p5)  ;;  %v167_v6 = vld [vmem:[%s750_s29 + $0x30] sm:$0xf] (%p74_p5) }
  0x1a   : > { %v169_v7 = vld [vmem:[%s750_s29 + $0x38] sm:$0xf]  ;;  %166 = vst [vmem:[%s137_s30 + $0x14] sm:$0xf] %v165_v5  ;;  %168 = vst [vmem:[%s137_s30 + $0x18] sm:$0xf] %v167_v6 }
  0x1b   : > { %170 = vst [vmem:[%s137_s30 + $0x1c] sm:$0xf] %v169_v7  ;;  %v171_v8 = vld [vmem:[%s750_s29 + $0x40] sm:$0xf]  ;;  %v173_v9 = vld [vmem:[%s750_s29 + $0x48] sm:$0xf] }
  0x1c   : > { %v175_v10 = vld [vmem:[%s750_s29 + $0x50] sm:$0xf]  ;;  %172 = vst [vmem:[%s137_s30 + $0x20] sm:$0xf] %v171_v8  ;;  %174 = vst [vmem:[%s137_s30 + $0x24] sm:$0xf] %v173_v9 }
  0x1d   : > { %176 = vst [vmem:[%s137_s30 + $0x28] sm:$0xf] %v175_v10  ;;  %v177_v11 = vld [vmem:[%s750_s29 + $0x58] sm:$0xf]  ;;  %v179_v12 = vld [vmem:[%s750_s29 + $0x60] sm:$0xf] }
  0x1e   : > { %v181_v13 = vld [vmem:[%s750_s29 + $0x68] sm:$0xf]  ;;  %178 = vst [vmem:[%s137_s30 + $0x2c] sm:$0xf] %v177_v11  ;;  %180 = vst [vmem:[%s137_s30 + $0x30] sm:$0xf] %v179_v12 }
  0x1f   : > { %182 = vst [vmem:[%s137_s30 + $0x34] sm:$0xf] %v181_v13  ;;  %v183_v14 = vld [vmem:[%s750_s29 + $0x70] sm:$0xf]  ;;  %v185_v15 = vld [vmem:[%s750_s29 + $0x78] sm:$0xf] }
  0x20   : > { %184 = vst [vmem:[%s137_s30 + $0x38] sm:$0xf] %v183_v14  ;;  %186 = vst [vmem:[%s137_s30 + $0x3c] sm:$0xf] %v185_v15 }
  0x21 PF: > { %p504_p10 = scmp.ge.s32.totalorder %s668_s15, 1  ;;  %p240_p11 = scmp.lt.s32.totalorder %s668_s15, 3 }
  0x23   : > { %p241_p12 = pnand %p504_p10, %p240_p11 }
  0x24   : > { %v271_v16 = vld [vmem:[%s848_s0] sm:$0xff] (!%p241_p12)  ;;  %v272_v17 = vld [vmem:[%s848_s0 + $0x8] sm:$0xff] (!%p241_p12)  ;;  %s777_s8 = sand.u32 (!%p241_p12), 1, %s660_s13   ;;  %v670_v18 = vmov (!%p241_p12), 0.0   ;;  %vm671_vm0 = vmmov (!%p241_p12), 0   ;;  %s518_s27 = sshll.u32 (!%p241_p12), %s498_s16, 7 }
  0x25   : > { %244 = sbr.rel (%p241_p12) target bundleno = 584 (0x248), region = 69  ;;  %275 = vadd.xlane.f32.xlu0 (!%p241_p12), %v271_v16  ;;  %530 = vmatprep.subr.bf16.mxu0 (!%p241_p12), %v670_v18  ;;  %s505_s9 = sshll.u32 (!%p241_p12), %s777_s8, 6  ;;  %v507_v43 = vld [vmem:[%s849_s1] ss:$0 sm:$0xff] (!%p241_p12)  ;;  %v508_v47 = vld [vmem:[%s849_s1 + $0x1] ss:$0 sm:$0xff] (!%p241_p12) }
  0x26   : > { %s780_s10 = scalar_lea.vmem (!%p241_p12), [#allocation2], %s505_s9  ;;  %546 = vmatprep.mubr.msk.bf16.mxu0 (!%p241_p12), %vm671_vm0, %v670_v18  ;;  %s506_s24 = sshll.u32 (!%p241_p12), %s777_s8, 4 }
  0x27   : > { %v594_v19 = vld [vmem:[%s780_s10] sm:$0xff] (!%p241_p12)   ;;  %v595_v28 = vld [vmem:[%s780_s10 + $0x8] sm:$0xff] (!%p241_p12)   ;;  %v596_v29 = vld [vmem:[%s780_s10 + $0x10] sm:$0xff] (!%p241_p12)   ;;  %s269_s25 = scalar_lea.vmem (!%p241_p12), [#allocation3], %s506_s24  ;;  %s804_s30 = scalar_lea.hbm (!%p241_p12), %s851_s3, %s518_s27 }
  0x28   : > { %531 = vmatpush3.bf16.msra.mxu0 (!%p241_p12), %v594_v19  ;;  %v597_v30 = vld [vmem:[%s780_s10 + $0x18] sm:$0xff] (!%p241_p12)   ;;  %v598_v31 = vld [vmem:[%s780_s10 + $0x20] sm:$0xff] (!%p241_p12)   ;;  %v599_v32 = vld [vmem:[%s780_s10 + $0x28] sm:$0xff] (!%p241_p12)   ;;  %s431_s26 = sshll.u32 (!%p241_p12), %s269_s25, 4  ;;  %s419_s4 = scalar_lea.sflag (!%p241_p12), [#allocation4], %s777_s8  ;;  %s799_s26 = int_to_ptr.vmem [resolvable:$true] %s431_s26 }
  0x29   : > { %277 = vadd.xlane.f32.xlu0 (!%p241_p12), %v272_v17  ;;  %532 = vmatprep.subr.bf16.mxu0 (!%p241_p12), %v670_v18  ;;  %v600_v33 = vld [vmem:[%s780_s10 + $0x30] sm:$0xff] (!%p241_p12)   ;;  %v601_v34 = vld [vmem:[%s780_s10 + $0x38] sm:$0xff] (!%p241_p12)   ;;  %s606_s5 = scalar_lea.vmem (!%p241_p12), %s799_s26, 256  ;;  %s672_s16 = smov (!%p241_p12), [#allocation3]  }
  0x2a   : > { %p607_p13 = scmp.ne.s32.totalorder (!%p241_p12), %s799_s26, %s606_s5  ;;  %s610_s6 = sshll.u32 (!%p241_p12), %s672_s16, 4  ;;  %s611_s6 = int_to_ptr.vmem [resolvable:$false] %s610_s6 }
  0x2b   : > { %s612_s7 = scalar_lea.vmem (!%p241_p12), %s611_s6, 512  ;;  %p613_p2 = scmp.lt.s32.totalorder (!%p241_p12), %s799_s26, %s611_s6 }
  0x2c   : > { %533 = vmatpush3.bf16.msra.mxu0 %v595_v28  ;;  %p608_p0 = pnand %p607_p13, %p734_p6  ;;  %p614_p3 = scmp.lt.s32.totalorder %s612_s7, %s606_s5 }
  0x2d   : > { %534 = vmatprep.subr.bf16.mxu0 %v670_v18 }
  0x2e   : > { %p609_p1 = pneg %p608_p0  ;;  %p615_p4 = por %p614_p3, %p613_p2 }
  0x30   : > { %535 = vmatpush3.bf16.msra.mxu0 %v596_v29  ;;  %p616_p5 = pnand %p615_p4, %p609_p1 }
  0x31   : > { %536 = vmatprep.subr.bf16.mxu0 %v670_v18 }
  0x34   : > { %537 = vmatpush3.bf16.msra.mxu0 %v597_v30 }
  0x35   : > { %538 = vmatprep.subr.bf16.mxu0 %v670_v18 }
  0x38   : > { %539 = vmatpush3.bf16.msra.mxu0 %v598_v31 }
  0x39   : > { %540 = vmatprep.subr.bf16.mxu0 %v670_v18 }
  0x3c   : > { %541 = vmatpush3.bf16.msra.mxu0 %v599_v32 }
  0x3d   : > { %542 = vmatprep.subr.bf16.mxu0 %v670_v18 }
  0x40   : > { %543 = vmatpush3.bf16.msra.mxu0 %v600_v33 }
  0x41   : > { %544 = vmatprep.subr.bf16.mxu0 %v670_v18 }
  0x44   : > { %545 = vmatpush3.bf16.msra.mxu0 %v601_v34 }
  0xb2   : > { %v276_v20 = vpop.xlane.xlu0 %275 }
  0xb3   : > { %v280_v21 = vmul.f32 0.0078125, %v276_v20 }
  0xb5   : > { %v282_v22 = vsub.f32 %v271_v16, %v280_v21 }
  0xb6   : > { %v278_v23 = vpop.xlane.xlu0 %277 }
  0xb7   : > { %v281_v24 = vmul.f32 0.0078125, %v278_v23  ;;  %v284_v25 = vmul.f32 %v282_v22, %v282_v22 }
  0xb9   : > { %v283_v26 = vsub.f32 %v272_v17, %v281_v24  ;;  %286 = vadd.xlane.f32.xlu1 %v284_v25 }
  0xbb   : > { %v285_v27 = vmul.f32 %v283_v26, %v283_v26 }
  0xbd   : > { %288 = vadd.xlane.f32.xlu1 %v285_v27 }
 0x146   : > { %v287_v35 = vpop.xlane.xlu1 %286 }
 0x147   : > { %v290_v36 = vmul.f32 0.0078125, %v287_v35 }
 0x149   : > { %v292_v37 = vadd.f32 1e-05, %v290_v36 }
 0x14a   : > { %v289_v38 = vpop.xlane.xlu1 %288 }
 0x14b   : > { %602 = vrsqrt.f32 %v292_v37  ;;  %v291_v39 = vmul.f32 0.0078125, %v289_v38 }
 0x14d   : > { %v293_v40 = vadd.f32 1e-05, %v291_v39 }
 0x14f   : > { %604 = vrsqrt.f32 %v293_v40 }
 0x155   : > { %v603_v41 = vpop.eup %602 }
 0x156   : > { %v296_v42 = vmul.f32 %v603_v41, %v282_v22 }
 0x158   : > { %v302_v46 = vmul.f32 %v507_v43, %v296_v42 }
 0x159   : > { %v605_v44 = vpop.eup %604 }
 0x15a   : > { %v297_v45 = vmul.f32 %v605_v44, %v283_v26  ;;  %v308_v49 = vadd.f32 %v508_v47, %v302_v46 }
 0x15c   : > { %v303_v48 = vmul.f32 %v507_v43, %v297_v45 }
 0x15e   : > { %v309_v50 = vadd.f32 %v508_v47, %v303_v48 }
 0x160   : > { %v310_v51 = vpack.c.bf16 %v309_v50, %v308_v49 }
 0x162   : > { %547 = vmatmul.mubr.bf16.vlgmr.msra.gmra.mrb[0].mxu0 %v310_v51 }
 0x235   : > { %v409_v52 = vpop.f32.mrb[0].mxu0 }
 0x236   : > { %416 = vst [vmem:[%s269_s25] sm:$0xff] %v409_v52  ;;  %v548_v53 = vpop.f32.mrb[1].mxu0 }
 0x237   : > { %v412_v54 = vpop.f32.mrb[2].mxu0 }
 0x238   : > { %417 = vst [vmem:[%s269_s25 + $0x8] sm:$0xff] %v412_v54  ;;  %v549_v55 = vpop.f32.mrb[3].mxu0 }
 0x239   : > { %619 = shalt.err (!%p616_p5)
}
 0x23a   : > { %s620_s9 = scalar_lea.hbm %s804_s30, 256  ;;  %s624_s17 = scalar_lea.hbm %s851_s3, 512 }
 0x23b   : > { %p621_p7 = scmp.ne.s32.totalorder %s804_s30, %s620_s9  ;;  %p625_p12 = scmp.lt.u32.totalorder %s804_s30, %s851_s3 }
 0x23c   : > { %p626_p13 = scmp.lt.u32.totalorder %s624_s17, %s620_s9  ;;  %p628_p1 = scmp.lt.u32.totalorder %s620_s9, %s804_s30 }
 0x23d   : > { %p622_p10 = pnand %p621_p7, %p734_p6 }
 0x23e   : > { %p627_p0 = por %p626_p13, %p625_p12 }
 0x23f   : > { %p623_p11 = pneg %p622_p10 }
 0x240   : > { %p629_p2 = por %p628_p1, %p627_p0 }
 0x242   : > { %p630_p3 = pnand %p629_p2, %p623_p11 }
 0x244   : > { %633 = shalt.err (!%p630_p3)
}
 0x245   : > { %s673_s24 = smov 128   ;;  %s674_s25 = smov 256  }
 0x246   : > { %s675_s27 = smov 8  }
 0x247   : > { %550 = dma.vmem_to_hbm [thread:$0]  (%p734_p6), %s799_s26, 256, %s804_s30, %s419_s4, %s673_s24, %s674_s25, %s675_s27  }
 0x248 PF: > { %s446_s28 = sand.u32 1, %s656_s12   ;;  %p553_p4 = pnand %p501_p9, %p738_p8 }
 0x249   : > { %s447_s29 = scalar_lea.sflag [#allocation4], %s446_s28 }
 0x24a   : > { %651 = dma.done.wait (!%p553_p4), %s447_s29, 256  }
 0x24b   : > { %653 = vsyncadd (!%p553_p4), %s447_s29, 4294967040  ;;  %p13_p5 = scmp.ge.s32.totalorder %s719_s18, 4   ;;  %s854_s12 = smov %s660_s13 }
 0x24c   : > { %s855_s13 = smov %s664_s14  ;;  %s856_s14 = smov %s732_s21 }
 0x24d   : > { %s857_s15 = smov %s719_s18  ;;  %15 = sbr.rel (!%p13_p5) target bundleno = 3 (0x3), region = 113 }
 0x254   :  { %452 = vsyncpa [#allocation4], 1 }
 0x255   :  { %454 = vsyncpa [#allocation4 + $0x1], 1 }

// kernel: whisper_forward.4
= control target key start
LH: loop header
LB: loop body
LE: loop exit
PB: predicated region body
PF: predicated region fallthrough
CT: control target
= control target key end

     0   :  { %11 = vsyncpa [#allocation4], 0  ;;  %s1248_s0 = inlined_call_operand.vmem [shape: f32[2,18,8], index: 0, kind: input, shape index: {}]   ;;  %s1249_s1 = inlined_call_operand.hbm [shape: bf16[3,8,128], index: 1, kind: input, shape index: {}]   ;;  %s1250_s2 = inlined_call_operand.hbm [shape: f32[1,128], index: 2, kind: input, shape index: {}]   ;;  %s1251_s3 = inlined_call_operand.hbm [shape: bf16[3,128,128], index: 3, kind: input, shape index: {}]   ;;  %s1252_s4 = inlined_call_operand.hbm [shape: f32[1,128], index: 4, kind: input, shape index: {}]   ;;  %s1253_s5 = inlined_call_operand.hbm [shape: f32[8,128], index: 5, kind: input, shape index: {}]   ;;  %s1254_s6 = inlined_call_operand.vmem [shape: f32[16,128], index: 6, kind: output, shape index: {}]  }
   0x1   :  { %12 = vsyncpa [#allocation6], 0 }
   0x2   :  { %13 = vsyncpa [#allocation9], 0  ;;  %s1070_s21 = smov [#allocation5]   ;;  %s1071_s23 = smov [#allocation8]  }
   0x3   :  { %s34_s22 = sshll.u32 %s1070_s21, 4  ;;  %s56_s24 = sshll.u32 %s1071_s23, 4  ;;  %s35_s22 = int_to_ptr.vmem [resolvable:$true] %s34_s22  ;;  %s57_s24 = int_to_ptr.vmem [resolvable:$true] %s56_s24 }
   0x4   :  { %s954_s27 = scalar_lea.hbm %s1250_s2, 16 }
   0x5   :  { %p955_p0 = scmp.ne.s32.totalorder %s1250_s2, %s954_s27  ;;  %p958_p1 = scmp.lt.u32.totalorder %s954_s27, %s1250_s2 }
   0x7   :  { %p960_p2 = pnand %p958_p1, %p955_p0 }
   0x9   :  { %963 = shalt.err (!%p960_p2)
}
   0xa   :  { %s964_s8 = scalar_lea.vmem %s35_s22, 16  ;;  %s968_s9 = scalar_lea.vmem %s35_s22, 32 }
   0xb   :  { %p965_p3 = scmp.ne.s32.totalorder %s35_s22, %s964_s8  ;;  %p969_p4 = scmp.lt.s32.totalorder %s35_s22, %s35_s22 }
   0xc   :  { %p970_p5 = scmp.lt.s32.totalorder %s968_s9, %s964_s8 }
   0xe   :  { %p971_p6 = por %p970_p5, %p969_p4 }
  0x10   :  { %p972_p7 = pnand %p971_p6, %p965_p3 }
  0x12   :  { %975 = shalt.err (!%p972_p7)
}
  0x13   :  { %37 = dma.hbm_to_vmem [thread:$0]  %s1250_s2, 16, %s35_s22, [#allocation6]  }
  0x14   :  { %s976_s14 = scalar_lea.hbm %s1252_s4, 16 }
  0x15   :  { %p977_p8 = scmp.ne.s32.totalorder %s1252_s4, %s976_s14  ;;  %p980_p9 = scmp.lt.u32.totalorder %s976_s14, %s1252_s4 }
  0x17   :  { %p982_p10 = pnand %p980_p9, %p977_p8 }
  0x19   :  { %985 = shalt.err (!%p982_p10)
}
  0x1a   :  { %s986_s19 = scalar_lea.vmem %s57_s24, 16  ;;  %s990_s20 = scalar_lea.vmem %s57_s24, 32 }
  0x1b   :  { %p987_p11 = scmp.ne.s32.totalorder %s57_s24, %s986_s19  ;;  %p991_p12 = scmp.lt.s32.totalorder %s57_s24, %s57_s24 }
  0x1c   :  { %p992_p13 = scmp.lt.s32.totalorder %s990_s20, %s986_s19 }
  0x1e   :  { %p993_p0 = por %p992_p13, %p991_p12 }
  0x20   :  { %p994_p1 = pnand %p993_p0, %p987_p11 }
  0x22   :  { %997 = shalt.err (!%p994_p1)
}
  0x23   :  { %59 = dma.hbm_to_vmem [thread:$0]  %s1252_s4, 16, %s57_s24, [#allocation9]  }
  0x24   :  { %s1072_s22 = smov [#allocation3]   ;;  %s998_s27 = scalar_lea.hbm %s1249_s1, 192 }
  0x25   :  { %s21_s23 = sshll.u32 %s1072_s22, 4  ;;  %p999_p2 = scmp.ne.s32.totalorder %s1249_s1, %s998_s27  ;;  %s22_s23 = int_to_ptr.vmem [resolvable:$true] %s21_s23 }
  0x26   :  { %p1002_p3 = scmp.lt.u32.totalorder %s998_s27, %s1249_s1 }
  0x28   :  { %p1004_p4 = pnand %p1002_p3, %p999_p2 }
  0x2a   :  { %1007 = shalt.err (!%p1004_p4)
}
  0x2b   :  { %s1008_s8 = scalar_lea.vmem %s22_s23, 192  ;;  %p1013_p6 = scmp.lt.s32.totalorder %s22_s23, %s22_s23 }
  0x2c   :  { %p1009_p5 = scmp.ne.s32.totalorder %s22_s23, %s1008_s8  ;;  %p1014_p7 = scmp.lt.s32.totalorder %s1008_s8, %s1008_s8 }
  0x2e   :  { %p1015_p8 = por %p1014_p7, %p1013_p6 }
  0x30   :  { %p1016_p9 = pnand %p1015_p8, %p1009_p5 }
  0x32   :  { %1019 = shalt.err (!%p1016_p9)
}
  0x33   :  { %s1073_s4 = smov 64   ;;  %s1074_s24 = smov 4  }
  0x34   :  { %27 = dma.hbm_to_vmem [thread:$0]  %s1249_s1, 192, %s22_s23, [#allocation4], %s1073_s4, %s1073_s4, %s1074_s24  }
  0x35   :  { %s1075_s11 = smov [#allocation7]   ;;  %s1076_s13 = smov [#allocation10]  }
  0x36   :  { %s43_s12 = sshll.u32 %s1075_s11, 4  ;;  %s66_s14 = sshll.u32 %s1076_s13, 4  ;;  %s44_s12 = int_to_ptr.vmem [resolvable:$true] %s43_s12  ;;  %s67_s14 = int_to_ptr.vmem [resolvable:$true] %s66_s14 }
  0x37   :  { %s1020_s17 = scalar_lea.hbm %s1251_s3, 3072 }
  0x38   :  { %p1021_p10 = scmp.ne.s32.totalorder %s1251_s3, %s1020_s17  ;;  %p1024_p11 = scmp.lt.u32.totalorder %s1020_s17, %s1251_s3 }
  0x3a   :  { %p1026_p12 = pnand %p1024_p11, %p1021_p10 }
  0x3c   :  { %1029 = shalt.err (!%p1026_p12)
}
  0x3d   :  { %s1030_s1 = scalar_lea.vmem %s44_s12, 3072  ;;  %p1035_p0 = scmp.lt.s32.totalorder %s44_s12, %s44_s12 }
  0x3e   :  { %p1031_p13 = scmp.ne.s32.totalorder %s44_s12, %s1030_s1  ;;  %p1036_p1 = scmp.lt.s32.totalorder %s1030_s1, %s1030_s1 }
  0x40   :  { %p1037_p2 = por %p1036_p1, %p1035_p0 }
  0x42   :  { %p1038_p3 = pnand %p1037_p2, %p1031_p13 }
  0x44   :  { %1041 = shalt.err (!%p1038_p3)
}
  0x45   :  { %49 = dma.hbm_to_vmem [thread:$0]  %s1251_s3, 3072, %s44_s12, [#allocation6], %s1073_s4, %s1073_s4, %s1074_s24  }
  0x46   :  { %s1042_s26 = scalar_lea.hbm %s1253_s5, 128 }
  0x47   :  { %p1043_p4 = scmp.ne.s32.totalorder %s1253_s5, %s1042_s26  ;;  %p1046_p5 = scmp.lt.u32.totalorder %s1042_s26, %s1253_s5 }
  0x49   :  { %p1048_p6 = pnand %p1046_p5, %p1043_p4 }
  0x4b   :  { %1051 = shalt.err (!%p1048_p6)
}
  0x4c   :  { %s1052_s7 = scalar_lea.vmem %s67_s14, 128  ;;  %p1057_p8 = scmp.lt.s32.totalorder %s67_s14, %s67_s14 }
  0x4d   :  { %p1053_p7 = scmp.ne.s32.totalorder %s67_s14, %s1052_s7  ;;  %p1058_p9 = scmp.lt.s32.totalorder %s1052_s7, %s1052_s7 }
  0x4f   :  { %p1059_p10 = por %p1058_p9, %p1057_p8 }
  0x51   :  { %p1060_p11 = pnand %p1059_p10, %p1053_p7 }
  0x53   :  { %1063 = shalt.err (!%p1060_p11)
}
  0x54   :  { %69 = dma.hbm_to_vmem [thread:$0]  %s1253_s5, 128, %s67_s14, [#allocation9]  }
  0x55   :  { %1064 = dma.done.wait [#allocation4], 192  }
  0x56   :  { %1065 = vsyncadd [#allocation4], 4294967104 }
  0x57   :  { %1066 = dma.done.wait [#allocation6], 3088  }
  0x58   :  { %1067 = vsyncadd [#allocation6], 4294964208 }
  0x59   :  { %1068 = dma.done.wait [#allocation9], 144  }
  0x5a   :  { %1069 = vsyncadd [#allocation9], 4294967152  ;;  %vm127_vm0 = vcmask 1043456   ;;  %v119_v0 = vld [vmem:[#allocation3 + $0x4] sm:$0xf]  ;;  %v87_v2 = vld [vmem:[%s1248_s0 + $0x8] sm:$0xff] }
  0x5b   :  { %v86_v1 = vld [vmem:[%s1248_s0] sm:$0xff]  ;;  %vm101_vm1 = vcmask 1046528   ;;  %906 = vmatprep.subr.msk.bf16.mxu0 %vm127_vm0, %v119_v0  ;;  %v129_v3 = vsel %vm127_vm0, %v119_v0, 0  ;;  %v88_v4 = vld [vmem:[%s1248_s0 + $0x10] sm:$0x3]  ;;  %v103_v6 = vrot.slane %v87_v2, 1 }
  0x5c   :  { %v102_v5 = vrot.slane %v86_v1, 1  ;;  %821 = vmatpush3.bf16.msra.mxu0 %v129_v3  ;;  %v105_v7 = vrot.slane %v88_v4, 1  ;;  %v94_v8 = vld [vmem:[#allocation3] sm:$0xf]  ;;  %v89_v9 = vld [vmem:[%s1248_s0 + $0x18] sm:$0xff]  ;;  %vm120_vm2 = vcmask 64512   ;;  %v92_v22 = vpack.c.bf16 %v87_v2, %v86_v1 }
  0x5d   :  { %907 = vmatprep.subr.msk.bf16.mxu0 %vm127_vm0, %v94_v8  ;;  %v90_v11 = vld [vmem:[%s1248_s0 + $0x20] sm:$0xff]  ;;  %v91_v12 = vld [vmem:[%s1248_s0 + $0x28] sm:$0x3]  ;;  %v107_v13 = vrot.slane %v89_v9, 1  ;;  %v239_v15 = vrot.slane %v86_v1, 2  ;;  %vm238_vm3 = vcmask 1045504  }
  0x5e   :  { %v104_v10 = vsel %vm101_vm1, %v102_v5, %v103_v6  ;;  %v106_v14 = vsel %vm101_vm1, %v103_v6, %v105_v7  ;;  %v108_v16 = vrot.slane %v90_v11, 1  ;;  %v110_v17 = vrot.slane %v91_v12, 1  ;;  %v256_v18 = vld [vmem:[#allocation3 + $0x8] sm:$0xf]  ;;  %v918_v38 = vld [vmem:[#allocation7 + $0x40] sm:$0xff]   ;;  %v920_v41 = vld [vmem:[#allocation7 + $0x48] sm:$0xff]  }
  0x5f   :  { %v116_v19 = vpack.c.bf16 %v106_v14, %v104_v10  ;;  %v240_v20 = vrot.slane %v87_v2, 2  ;;  %v242_v21 = vrot.slane %v88_v4, 2  ;;  %v187_v25 = vsel %vm127_vm0, %v94_v8, 0  ;;  %v919_v40 = vld [vmem:[#allocation7] sm:$0xff]   ;;  %v921_v42 = vld [vmem:[#allocation7 + $0x8] sm:$0xff]   ;;  %v922_v43 = vld [vmem:[#allocation7 + $0x50] sm:$0xff]  }
  0x60   :  { %v109_v23 = vsel %vm101_vm1, %v107_v13, %v108_v16  ;;  %v111_v24 = vsel %vm101_vm1, %v108_v16, %v110_v17  ;;  %v264_v26 = vsel %vm127_vm0, %v256_v18, 0  ;;  %v93_v30 = vpack.c.bf16 %v90_v11, %v89_v9  ;;  %v923_v44 = vld [vmem:[#allocation7 + $0x10] sm:$0xff]   ;;  %v924_v45 = vld [vmem:[#allocation7 + $0x58] sm:$0xff]   ;;  %v926_v47 = vld [vmem:[#allocation7 + $0x60] sm:$0xff]  }
  0x61   :  { %822 = vmatprep.mubr.msk.bf16.mxu0 %vm120_vm2, %v116_v19  ;;  %v117_v27 = vpack.c.bf16 %v111_v24, %v109_v23  ;;  %v241_v28 = vsel %vm238_vm3, %v239_v15, %v240_v20  ;;  %v243_v29 = vsel %vm238_vm3, %v240_v20, %v242_v21  ;;  %v247_v32 = vrot.slane %v91_v12, 2  ;;  %v925_v46 = vld [vmem:[#allocation7 + $0x18] sm:$0xff]   ;;  %v927_v48 = vld [vmem:[#allocation7 + $0x20] sm:$0xff]   ;;  %v928_v49 = vld [vmem:[#allocation7 + $0x68] sm:$0xff]  }
  0x62   :  { %v253_v31 = vpack.c.bf16 %v243_v29, %v241_v28  ;;  %v244_v33 = vrot.slane %v89_v9, 2  ;;  %v245_v34 = vrot.slane %v90_v11, 2  ;;  %v1077_v39 = vmov 0.0   ;;  %v929_v50 = vld [vmem:[#allocation7 + $0x28] sm:$0xff]   ;;  %v930_v51 = vld [vmem:[#allocation7 + $0x70] sm:$0xff]   ;;  %v932_v53 = vld [vmem:[#allocation7 + $0x78] sm:$0xff]  }
  0x63   :  { %823 = vmatmul.mubr.msk.bf16.vlgmr.msra.gmra.mrb[0].mxu0 %vm120_vm2, %v117_v27  ;;  %838 = vmatprep.subr.bf16.mxu1 %v1077_v39  ;;  %v931_v52 = vld [vmem:[#allocation7 + $0x30] sm:$0xff]   ;;  %vm1078_vm4 = vmmov 0   ;;  %v933_v54 = vld [vmem:[#allocation7 + $0x38] sm:$0xff]   ;;  %vm383_vm5 = vcmask 1040384  }
  0x64   :  { %827 = vmatpush3.bf16.msra.mxu0 %v187_v25  ;;  %828 = vmatprep.mubr.msk.bf16.mxu0 %vm120_vm2, %v92_v22  ;;  %v246_v35 = vsel %vm238_vm3, %v244_v33, %v245_v34  ;;  %v248_v36 = vsel %vm238_vm3, %v245_v34, %v247_v32  ;;  %v753_v55 = vld [vmem:[#allocation5] ss:$0 sm:$0xff]  ;;  %vm770_vm6 = vmneg %vm383_vm5 }
  0x65   :  { %908 = vmatprep.subr.msk.bf16.mxu0 %vm127_vm0, %v256_v18  ;;  %v254_v37 = vpack.c.bf16 %v248_v36, %v246_v35  ;;  %839 = vmatpush3.bf16.msra.mxu1 %v918_v38  ;;  %vm772_vm7 = vmpackc.low %vm770_vm6, %vm770_vm6 }
  0x66   :  { %840 = vmatprep.subr.bf16.mxu1 %v1077_v39  ;;  %854 = vmatprep.mubr.msk.bf16.mxu1 %vm1078_vm4, %v1077_v39 }
  0x69   :  { %841 = vmatpush3.bf16.msra.mxu1 %v920_v41 }
  0x6a   :  { %842 = vmatprep.subr.bf16.mxu1 %v1077_v39 }
  0x6d   :  { %843 = vmatpush3.bf16.msra.mxu1 %v922_v43 }
  0x6e   :  { %844 = vmatprep.subr.bf16.mxu1 %v1077_v39 }
  0x6f   :  { %829 = vmatmul.mubr.msk.bf16.vlgmr.msra.gmra.mrb[0].mxu0 %vm120_vm2, %v93_v30 }
  0x70   :  { %833 = vmatpush3.bf16.msra.mxu0 %v264_v26  ;;  %834 = vmatprep.mubr.msk.bf16.mxu0 %vm120_vm2, %v253_v31 }
  0x71   :  { %858 = vmatprep.subr.bf16.mxu0 %v1077_v39  ;;  %845 = vmatpush3.bf16.msra.mxu1 %v924_v45 }
  0x72   :  { %846 = vmatprep.subr.bf16.mxu1 %v1077_v39 }
  0x75   :  { %847 = vmatpush3.bf16.msra.mxu1 %v926_v47  ;;  %v936_v47 = vld [vmem:[#allocation7 + $0x90] sm:$0xff]  }
  0x76   :  { %848 = vmatprep.subr.bf16.mxu1 %v1077_v39 }
  0x79   :  { %849 = vmatpush3.bf16.msra.mxu1 %v928_v49  ;;  %v938_v49 = vld [vmem:[#allocation7 + $0xa0] sm:$0xff]  }
  0x7a   :  { %850 = vmatprep.subr.bf16.mxu1 %v1077_v39 }
  0x7b   :  { %835 = vmatmul.mubr.msk.bf16.vlgmr.msra.gmra.mrb[0].mxu0 %vm120_vm2, %v254_v37 }
  0x7c   :  { %859 = vmatpush3.bf16.msra.mxu0 %v919_v40  ;;  %874 = vmatprep.mubr.msk.bf16.mxu0 %vm1078_vm4, %v1077_v39  ;;  %v934_v40 = vld [vmem:[#allocation7 + $0x80] sm:$0xff]  }
  0x7d   :  { %860 = vmatprep.subr.bf16.mxu0 %v1077_v39  ;;  %851 = vmatpush3.bf16.msra.mxu1 %v930_v51  ;;  %v940_v51 = vld [vmem:[#allocation7 + $0xb0] sm:$0xff]  }
  0x7e   :  { %852 = vmatprep.subr.bf16.mxu1 %v1077_v39 }
  0x80   :  { %861 = vmatpush3.bf16.msra.mxu0 %v921_v42 }
  0x81   :  { %862 = vmatprep.subr.bf16.mxu0 %v1077_v39  ;;  %853 = vmatpush3.bf16.msra.mxu1 %v932_v53 }
  0x82   :  { %878 = vmatprep.subr.bf16.mxu1 %v1077_v39 }
  0x84   :  { %863 = vmatpush3.bf16.msra.mxu0 %v923_v44 }
  0x85   :  { %864 = vmatprep.subr.bf16.mxu0 %v1077_v39 }
  0x88   :  { %865 = vmatpush3.bf16.msra.mxu0 %v925_v46  ;;  %v935_v46 = vld [vmem:[#allocation7 + $0x88] sm:$0xff]  }
  0x89   :  { %866 = vmatprep.subr.bf16.mxu0 %v1077_v39 }
  0x8c   :  { %867 = vmatpush3.bf16.msra.mxu0 %v927_v48  ;;  %v937_v48 = vld [vmem:[#allocation7 + $0x98] sm:$0xff]  }
  0x8d   :  { %868 = vmatprep.subr.bf16.mxu0 %v1077_v39 }
  0x90   :  { %869 = vmatpush3.bf16.msra.mxu0 %v929_v50  ;;  %v939_v50 = vld [vmem:[#allocation7 + $0xa8] sm:$0xff]  }
  0x91   :  { %870 = vmatprep.subr.bf16.mxu0 %v1077_v39 }
  0x94   :  { %871 = vmatpush3.bf16.msra.mxu0 %v931_v52  ;;  %v941_v52 = vld [vmem:[#allocation7 + $0xb8] sm:$0xff]  }
  0x95   :  { %872 = vmatprep.subr.bf16.mxu0 %v1077_v39 }
  0x98   :  { %873 = vmatpush3.bf16.msra.mxu0 %v933_v54 }
 0x14e   :  { %v836_v56 = vpop.f32.mrb[0].mxu0 }
 0x14f   :  { %v328_v57 = vadd.f32 %v836_v56, %v753_v55  ;;  %v300_v58 = vpop.f32.mrb[1].mxu0 }
 0x150   :  { %v326_v59 = vadd.f32 %v753_v55, %v300_v58  ;;  %v837_v60 = vpop.f32.mrb[2].mxu0 }
 0x151   :  { %v332_v61 = vmul.f32 %v328_v57, %v328_v57  ;;  %v329_v62 = vadd.f32 %v837_v60, %v753_v55  ;;  %v303_v63 = vpop.f32.mrb[3].mxu0 }
 0x152   :  { %v330_v0 = vmul.f32 %v326_v59, %v326_v59  ;;  %v327_v1 = vadd.f32 %v753_v55, %v303_v63 }
 0x153   :  { %v336_v2 = vmul.f32 %v332_v61, %v328_v57  ;;  %v333_v3 = vmul.f32 %v329_v62, %v329_v62 }
 0x154   :  { %v334_v4 = vmul.f32 %v330_v0, %v326_v59  ;;  %v331_v5 = vmul.f32 %v327_v1, %v327_v1 }
 0x155   :  { %v340_v6 = vmul.f32 0.044715, %v336_v2  ;;  %v337_v7 = vmul.f32 %v333_v3, %v329_v62 }
 0x156   :  { %v338_v8 = vmul.f32 0.044715, %v334_v4  ;;  %v335_v9 = vmul.f32 %v331_v5, %v327_v1 }
 0x157   :  { %v344_v10 = vadd.f32 %v340_v6, %v328_v57  ;;  %v341_v11 = vmul.f32 0.044715, %v337_v7 }
 0x158   :  { %v342_v12 = vadd.f32 %v338_v8, %v326_v59  ;;  %v339_v13 = vmul.f32 0.044715, %v335_v9 }
 0x159   :  { %v348_v14 = vmul.f32 0.7978846, %v344_v10  ;;  %v345_v15 = vadd.f32 %v341_v11, %v329_v62 }
 0x15a   :  { %v346_v16 = vmul.f32 0.7978846, %v342_v12  ;;  %v343_v17 = vadd.f32 %v339_v13, %v327_v1 }
 0x15b   :  { %942 = vtanh.f32 %v348_v14  ;;  %v349_v18 = vmul.f32 0.7978846, %v345_v15 }
 0x15c   :  { %944 = vtanh.f32 %v346_v16  ;;  %v347_v19 = vmul.f32 0.7978846, %v343_v17 }
 0x15d   :  { %946 = vtanh.f32 %v349_v18 }
 0x15e   :  { %948 = vtanh.f32 %v347_v19 }
 0x165   :  { %v943_v20 = vpop.eup %942 }
 0x166   :  { %v945_v21 = vpop.eup %944  ;;  %v356_v22 = vadd.f32 1.0, %v943_v20 }
 0x167   :  { %v947_v23 = vpop.eup %946  ;;  %v354_v24 = vadd.f32 1.0, %v945_v21 }
 0x168   :  { %v949_v25 = vpop.eup %948  ;;  %v360_v26 = vmul.f32 0.5, %v356_v22  ;;  %v357_v27 = vadd.f32 1.0, %v947_v23  ;;  %v735_v23 = vld [vmem:[#allocation10] sm:$0xff] }
 0x169   :  { %v358_v28 = vmul.f32 0.5, %v354_v24  ;;  %v355_v29 = vadd.f32 1.0, %v949_v25 }
 0x16a   :  { %v364_v30 = vmul.f32 %v360_v26, %v328_v57  ;;  %v361_v31 = vmul.f32 0.5, %v357_v27 }
 0x16b   :  { %v362_v32 = vmul.f32 %v358_v28, %v326_v59  ;;  %v359_v33 = vmul.f32 0.5, %v355_v29 }
 0x16c   :  { %368 = vst [vmem:[#allocation2 + $0x10] sm:$0xff] %v364_v30  ;;  %v365_v34 = vmul.f32 %v361_v31, %v329_v62 }
 0x16d   :  { %366 = vst [vmem:[#allocation2] sm:$0xff] %v362_v32  ;;  %v363_v35 = vmul.f32 %v359_v33, %v327_v1  ;;  %v783_v1 = vld [vmem:[#allocation8] ss:$0 sm:$0xff] }
 0x16e   :  { %369 = vst [vmem:[#allocation2 + $0x18] sm:$0xff] %v365_v34 }
 0x16f   :  { %367 = vst [vmem:[#allocation2 + $0x8] sm:$0xff] %v363_v35 }
 0x175   :  { %v372_v36 = vld [vmem:[#allocation2 + $0x10] ss:$2 sm:$0xff]  ;;  %v376_v37 = vld [vmem:[#allocation2 + $0x11] ss:$2 sm:$0xff] }
 0x176   :  { %v370_v38 = vld [vmem:[#allocation2] ss:$2 sm:$0xff]  ;;  %v374_v41 = vld [vmem:[#allocation2 + $0x1] ss:$2 sm:$0xff]  ;;  %v380_v42 = vrot.slane %v376_v37, 7 }
 0x177   :  { %v403_v43 = vpack.c.bf16 %v372_v36, %v370_v38  ;;  %v379_v44 = vrot.slane %v374_v41, 7  ;;  %v599_v53 = vpack.c.bf16 %v376_v37, %v374_v41 }
 0x179   :  { %855 = vmatmul.mubr.bf16.vlgmr.msra.gmra.mrb[0].mxu1 %v403_v43  ;;  %v773_v45 = vpack.c.bf16 %v380_v42, %v379_v44 }
 0x17a   :  { %879 = vmatpush3.bf16.msra.mxu1 %v934_v40  ;;  %894 = vmatprep.mubr.msk.bf16.mxu1 %vm1078_vm4, %v1077_v39 }
 0x17b   :  { %875 = vmatmul.mubr.msk.bf16.vlgmr.msra.gmra.mrb[4].mxu0 %vm772_vm7, %v773_v45  ;;  %880 = vmatprep.subr.bf16.mxu1 %v1077_v39 }
 0x17e   :  { %881 = vmatpush3.bf16.msra.mxu1 %v935_v46 }
 0x17f   :  { %882 = vmatprep.subr.bf16.mxu1 %v1077_v39 }
 0x182   :  { %883 = vmatpush3.bf16.msra.mxu1 %v936_v47 }
 0x183   :  { %884 = vmatprep.subr.bf16.mxu1 %v1077_v39 }
 0x186   :  { %885 = vmatpush3.bf16.msra.mxu1 %v937_v48 }
 0x187   :  { %886 = vmatprep.subr.bf16.mxu1 %v1077_v39 }
 0x18a   :  { %887 = vmatpush3.bf16.msra.mxu1 %v938_v49 }
 0x18b   :  { %888 = vmatprep.subr.bf16.mxu1 %v1077_v39 }
 0x18e   :  { %889 = vmatpush3.bf16.msra.mxu1 %v939_v50 }
 0x18f   :  { %890 = vmatprep.subr.bf16.mxu1 %v1077_v39 }
 0x192   :  { %891 = vmatpush3.bf16.msra.mxu1 %v940_v51 }
 0x193   :  { %892 = vmatprep.subr.bf16.mxu1 %v1077_v39 }
 0x196   :  { %893 = vmatpush3.bf16.msra.mxu1 %v941_v52 }
 0x199   :  { %895 = vmatmul.mubr.bf16.vlgmr.msra.gmra.mrb[4].mxu1 %v599_v53 }
 0x24c   :  { %v503_v54 = vpop.f32.mrb[0].mxu1 }
 0x24d   :  { %v856_v55 = vpop.f32.mrb[1].mxu1 }
 0x24e   :  { %v506_v56 = vpop.f32.mrb[2].mxu1  ;;  %v592_v57 = vpop.f32.mrb[4].mxu0 }
 0x24f   :  { %v593_v58 = vadd.f32 %v592_v57, %v503_v54  ;;  %v857_v59 = vpop.f32.mrb[3].mxu1  ;;  %v876_v60 = vpop.f32.mrb[5].mxu0 }
 0x250   :  { %v595_v61 = vpop.f32.mrb[6].mxu0 }
 0x251   :  { %v596_v62 = vadd.f32 %v595_v61, %v506_v56  ;;  %v877_v63 = vpop.f32.mrb[7].mxu0 }
 0x26c   :  { %v699_v0 = vpop.f32.mrb[4].mxu1 }
 0x26d   :  { %v706_v2 = vadd.f32 %v699_v0, %v593_v58  ;;  %v896_v3 = vpop.f32.mrb[5].mxu1 }
 0x26e   :  { %v702_v4 = vpop.f32.mrb[6].mxu1 }
 0x26f   :  { %v715_v5 = vadd.f32 %v783_v1, %v706_v2  ;;  %v707_v39 = vadd.f32 %v702_v4, %v596_v62  ;;  %v897_v6 = vpop.f32.mrb[7].mxu1 }
 0x271   :  { %v717_v7 = vmul.f32 %v715_v5, %v715_v5  ;;  %v716_v8 = vadd.f32 %v783_v1, %v707_v39 }
 0x273   :  { %v719_v9 = vmul.f32 %v717_v7, %v715_v5  ;;  %v718_v10 = vmul.f32 %v716_v8, %v716_v8 }
 0x275   :  { %v721_v11 = vmul.f32 0.044715, %v719_v9  ;;  %v720_v12 = vmul.f32 %v718_v10, %v716_v8 }
 0x277   :  { %v723_v13 = vadd.f32 %v721_v11, %v715_v5  ;;  %v722_v14 = vmul.f32 0.044715, %v720_v12 }
 0x279   :  { %v725_v15 = vmul.f32 0.7978846, %v723_v13  ;;  %v724_v16 = vadd.f32 %v722_v14, %v716_v8 }
 0x27b   :  { %950 = vtanh.f32 %v725_v15  ;;  %v726_v17 = vmul.f32 0.7978846, %v724_v16 }
 0x27d   :  { %952 = vtanh.f32 %v726_v17 }
 0x285   :  { %v951_v18 = vpop.eup %950 }
 0x286   :  { %v729_v19 = vadd.f32 1.0, %v951_v18 }
 0x287   :  { %v953_v20 = vpop.eup %952 }
 0x288   :  { %v731_v21 = vmul.f32 0.5, %v729_v19  ;;  %v730_v22 = vadd.f32 1.0, %v953_v20 }
 0x28a   :  { %v733_v24 = vmul.f32 %v731_v21, %v715_v5  ;;  %v732_v25 = vmul.f32 0.5, %v730_v22 }
 0x28c   :  { %v736_v26 = vadd.f32 %v735_v23, %v733_v24  ;;  %v734_v27 = vmul.f32 %v732_v25, %v716_v8 }
 0x28e   :  { %738 = vst [vmem:[%s1254_s6] sm:$0xff] %v736_v26  ;;  %v737_v28 = vadd.f32 %v735_v23, %v734_v27 }
 0x290   :  { %739 = vst [vmem:[%s1254_s6 + $0x8] sm:$0xff] %v737_v28 }
 0x291   :  { %744 = vsyncpa [#allocation4], 1 }
 0x292   :  { %745 = vsyncpa [#allocation6], 1 }
 0x293   :  { %746 = vsyncpa [#allocation9], 1 }

// kernel: whisper_forward.5
= control target key start
LH: loop header
LB: loop body
LE: loop exit
PB: predicated region body
PF: predicated region fallthrough
CT: control target
= control target key end

     0   :  { %s5082_s0 = inlined_call_operand.vmem [shape: f32[16,128], index: 0, kind: input, shape index: {}]   ;;  %s5083_s1 = inlined_call_operand.vmem [shape: bf16[2,128,384], index: 1, kind: input, shape index: {}]   ;;  %s5084_s2 = inlined_call_operand.hbm [shape: bf16[2,128,128], index: 2, kind: input, shape index: {}]   ;;  %s5085_s3 = inlined_call_operand.vmem [shape: bf16[2,128,256], index: 3, kind: input, shape index: {}]   ;;  %s5086_s4 = inlined_call_operand.hbm [shape: bf16[2,256,128], index: 4, kind: input, shape index: {}]   ;;  %s5087_s5 = inlined_call_operand.vmem [shape: f32[2,9,128], index: 5, kind: input, shape index: {}]   ;;  %s5088_s6 = inlined_call_operand.hbm [shape: f32[2,1,256], index: 6, kind: input, shape index: {}]   ;;  %s5089_s7 = inlined_call_operand.hbm [shape: f32[2,128], index: 7, kind: input, shape index: {}]   ;;  %s5090_s8 = inlined_call_operand.vmem [shape: f32[16,128], index: 8, kind: output, shape index: {}]  }
   0x1   :  { %5104 = sst [smem:[#allocation16_spill]] %s5086_s4 }
   0x2   :  { %5105 = sst [smem:[#allocation17_spill]] %s5090_s8 }
   0x3   :  { %13 = vsyncpa [#allocation4], 0 }
   0x4   :  { %15 = vsyncpa [#allocation4 + $0x1], 0 }
   0x5   :  { %16 = vsyncpa [#allocation6], 0 }
   0x6   :  { %18 = vsyncpa [#allocation6 + $0x1], 0 }
   0x7   :  { %19 = vsyncpa [#allocation9], 0  ;;  %s4285_s27 = smov 0   ;;  %s4287_s28 = smov 0  }
   0x8   :  { %s4289_s29 = smov 0   ;;  %s4291_s30 = smov 0  }
   0x9 LB: > { %5106 = sst [smem:[#allocation13_spill]] %s4220_s29  ;;  %s4306_s9 = sadd.s32 1, %s4224_s30   ;;  %s4224_s30 = sphi %s4291_s30, %s5126_s30   ;;  %s4220_s29 = sphi %s4289_s29, %s5128_s29   ;;  %s4216_s28 = sphi %s4287_s28, %s5130_s28   ;;  %s4212_s27 = sphi %s4285_s27, %s5129_s27  }
   0xa   : > { %5107 = sst [smem:[#allocation14_spill]] %s4306_s9  ;;  %s79_s10 = sadd.s32 1, %s4220_s29 }
   0xb   : > { %s76_s11 = ssub.s32 %s4224_s30, %s4306_s9  ;;  %p86_p0 = scmp.ne.s32.totalorder %s4220_s29, %s4216_s28 }
   0xc   : > { %p77_p1 = scmp.eq.s32.totalorder %s76_s11, 0  ;;  %p87_p2 = scmp.eq.s32.totalorder %s4224_s30, 0 }
   0xd   : > { %p3869_p3 = scmp.lt.s32.totalorder %s4224_s30, 2  ;;  %s4319_s13 = sand.u32 1, %s4220_s29  }
   0xe   : > { %s4316_s12 = scalar_select %p77_p1, %s4220_s29, %s79_s10  }
   0xf   : > { %p88_p4 = por %p87_p2, %p86_p0  ;;  %s313_s15 = sand.u32 1, %s4224_s30  }
  0x10   : > { %5108 = sst [smem:[#allocation15_spill]] %s4316_s12  ;;  %s3511_s16 = sshll.u32 %s4319_s13, 7 }
  0x11   : > { %p4321_p5 = pnand %p3869_p3, %p88_p4  ;;  %s3631_s17 = sshll.u32 %s4224_s30, 11 }
  0x12   : > { %s317_s18 = scalar_lea.vmem [#allocation5], %s3511_s16  ;;  %s5110_s4 = sld [smem:[#allocation16_spill]] }
  0x13   : > { %s5109_s14 = scalar_select %p4321_p5, 1, 0 }
  0x14   : > { %s324_s19 = sshll.u32 %s317_s18, 4  ;;  %s4335_s23 = scalar_lea.sflag [#allocation6], %s313_s15  ;;  %s4333_s19 = int_to_ptr.vmem [resolvable:$true] %s324_s19 }
  0x15   : > { %p4341_p7 = pneg %p4321_p5 }
  0x17   : > { %s5111_s25 = scalar_select %p4341_p7, 1, 0 }
  0x18   : > { %s4331_s22 = scalar_lea.hbm %s5110_s4, %s3631_s17  ;;  %s4069_s11 = scalar_lea.hbm %s5110_s4, 4096 }
  0x19   : > { %s4064_s24 = scalar_lea.hbm %s4331_s22, 2048  ;;  %p4070_p10 = scmp.lt.u32.totalorder %s4331_s22, %s5110_s4 }
  0x1a   : > { %p4065_p6 = scmp.ne.s32.totalorder %s4331_s22, %s4064_s24  ;;  %p4071_p11 = scmp.lt.u32.totalorder %s4069_s11, %s4064_s24 }
  0x1b   : > { %p4073_p13 = scmp.lt.u32.totalorder %s4064_s24, %s4331_s22 }
  0x1c   : > { %p4067_p8 = pnand %p4341_p7, %p4065_p6  ;;  %p4072_p12 = por %p4071_p11, %p4070_p10 }
  0x1e   : > { %p4068_p9 = pneg %p4067_p8  ;;  %p4074_p0 = por %p4073_p13, %p4072_p12 }
  0x20   : > { %p4075_p1 = pnand %p4074_p0, %p4068_p9 }
  0x22   : > { %4078 = shalt.err (!%p4075_p1)
}
  0x23   : > { %s4079_s15 = scalar_lea.vmem %s4333_s19, 2048  ;;  %s4226_s18 = smov [#allocation5]  }
  0x24   : > { %p4080_p2 = scmp.ne.s32.totalorder %s4333_s19, %s4079_s15  ;;  %s4084_s20 = sshll.u32 %s4226_s18, 4  ;;  %s4085_s20 = int_to_ptr.vmem [resolvable:$false] %s4084_s20 }
  0x25   : > { %s4086_s21 = scalar_lea.vmem %s4085_s20, 4096  ;;  %p4087_p6 = scmp.lt.s32.totalorder %s4333_s19, %s4085_s20 }
  0x26   : > { %p4082_p3 = pnand %p4080_p2, %p4341_p7  ;;  %p4088_p8 = scmp.lt.s32.totalorder %s4086_s21, %s4079_s15 }
  0x28   : > { %p4083_p4 = pneg %p4082_p3  ;;  %p4089_p10 = por %p4088_p8, %p4087_p6 }
  0x2a   : > { %p4090_p11 = pnand %p4089_p10, %p4083_p4 }
  0x2c   : > { %4093 = shalt.err (!%p4090_p11)
}
  0x2d   : > { %s5091_s24 = smov 64   ;;  %s5092_s26 = smov 4  }
  0x2e   : > { %3864 = dma.hbm_to_vmem [thread:$0]  (!%p4321_p5), %s4331_s22, 2048, %s4333_s19, %s4335_s23, %s5091_s24, %s5091_s24, %s5092_s26  }
  0x2f   : > { %s4369_s10 = sadd.s32 4294967295, %s4224_s30   ;;  %p92_p12 = scmp.ne.s32.totalorder %s4216_s28, %s4212_s27 }
  0x30   : > { %p5097_p9 = scmp.eq.s32.totalorder %s4369_s10, 0  ;;  %p3505_p13 = scmp.ge.s32.totalorder %s4224_s30, 1 }
  0x31   : > { %p249_p0 = scmp.lt.s32.totalorder %s4224_s30, 3  ;;  %s4229_s19 = smov [#allocation8]  }
  0x32   : > { %p4379_p2 = por %p5097_p9, %p92_p12  ;;  %s265_s22 = sshll.u32 %s4229_s19, 4  ;;  %s266_s22 = int_to_ptr.vmem [resolvable:$true] %s265_s22 }
  0x33   : > { %p4383_p3 = pnand %p3505_p13, %p249_p0  ;;  %s3508_s27 = sshll.u32 %s4319_s13, 6 }
  0x34   : > { %s5112_s11 = scalar_select %p4379_p2, 1, 0 }
  0x35   : > { %s5113_s16 = scalar_select %p4383_p3, 1, 0 }
  0x36   : > { %p3854_p4 = pneg %p4383_p3  ;;  %s3630_s17 = sshll.u32 %s4224_s30, 10 }
  0x37   : > { %s4400_s21 = scalar_lea.hbm %s5084_s2, %s3630_s17  ;;  %s288_s24 = scalar_lea.vmem [#allocation3], %s3508_s27 }
  0x38   : > { %p4393_p6 = pnand %p3854_p4, %p5097_p9  ;;  %s295_s26 = sshll.u32 %s288_s24, 4  ;;  %s4403_s26 = int_to_ptr.vmem [resolvable:$true] %s295_s26 }
  0x39   : > { %s3514_s4 = sshll.u32 %s4319_s13, 1  ;;  %s4094_s29 = scalar_lea.hbm %s5089_s7, 32 }
  0x3a   : > { %p4095_p8 = scmp.ne.s32.totalorder %s5089_s7, %s4094_s29  ;;  %p4096_p10 = pneg %p4393_p6 }
  0x3b   : > { %p4101_p13 = scmp.lt.u32.totalorder %s4094_s29, %s5089_s7 }
  0x3c   : > { %p4097_p11 = pnand %p4096_p10, %p4095_p8 }
  0x3e   : > { %p4098_p12 = pneg %p4097_p11 }
  0x40   : > { %p4103_p0 = pnand %p4101_p13, %p4098_p12 }
  0x42   : > { %4106 = shalt.err (!%p4103_p0)
}
  0x43   : > { %s4107_s24 = scalar_lea.vmem %s266_s22, 32  ;;  %p4115_p2 = scmp.lt.s32.totalorder %s266_s22, %s266_s22 }
  0x44   : > { %p4108_p4 = scmp.ne.s32.totalorder %s266_s22, %s4107_s24  ;;  %p4116_p3 = scmp.lt.s32.totalorder %s4107_s24, %s4107_s24 }
  0x46   : > { %p4110_p1 = pnand %p4108_p4, %p4096_p10  ;;  %p4117_p5 = por %p4116_p3, %p4115_p2 }
  0x48   : > { %p4111_p9 = pneg %p4110_p1 }
  0x4a   : > { %p4118_p7 = pnand %p4117_p5, %p4111_p9 }
  0x4c   : > { %4121 = shalt.err (!%p4118_p7)
}
  0x4d   : > { %3857 = dma.hbm_to_vmem [thread:$0]  (!%p4393_p6), %s5089_s7, 32, %s266_s22, [#allocation9]  }
  0x4e   : > { %s285_s29 = scalar_lea.sflag [#allocation4], %s4319_s13  ;;  %s4122_s12 = scalar_lea.hbm %s4400_s21, 1024 }
  0x4f   : > { %p4123_p1 = scmp.ne.s32.totalorder %s4400_s21, %s4122_s12  ;;  %p5115_p8 = scmp.ne.s32.totalorder %s5111_s25, 0 }
  0x50   : > { %s4127_s15 = scalar_lea.hbm %s5084_s2, 2048  ;;  %p4128_p5 = scmp.lt.u32.totalorder %s4400_s21, %s5084_s2 }
  0x51   : > { %p4125_p10 = pnand %p4123_p1, %p5115_p8  ;;  %p4129_p7 = scmp.lt.u32.totalorder %s4127_s15, %s4122_s12 }
  0x52   : > { %p4131_p3 = scmp.lt.u32.totalorder %s4122_s12, %s4400_s21 }
  0x53   : > { %p4126_p2 = pneg %p4125_p10  ;;  %p4130_p9 = por %p4129_p7, %p4128_p5 }
  0x55   : > { %p4132_p11 = por %p4131_p3, %p4130_p9 }
  0x57   : > { %p4133_p12 = pnand %p4132_p11, %p4126_p2 }
  0x59   : > { %4136 = shalt.err (!%p4133_p12)
}
  0x5a   : > { %s4137_s22 = scalar_lea.vmem %s4403_s26, 1024  ;;  %s4230_s17 = smov [#allocation3]  }
  0x5b   : > { %p4138_p6 = scmp.ne.s32.totalorder %s4403_s26, %s4137_s22  ;;  %s4142_s24 = sshll.u32 %s4230_s17, 4  ;;  %s4143_s24 = int_to_ptr.vmem [resolvable:$false] %s4142_s24 }
  0x5c   : > { %s4144_s8 = scalar_lea.vmem %s4143_s24, 2048  ;;  %p4145_p4 = scmp.lt.s32.totalorder %s4403_s26, %s4143_s24 }
  0x5d   : > { %p4140_p13 = pnand %p4138_p6, %p5115_p8  ;;  %p4146_p1 = scmp.lt.s32.totalorder %s4144_s8, %s4137_s22 }
  0x5f   : > { %p4141_p0 = pneg %p4140_p13  ;;  %p4147_p10 = por %p4146_p1, %p4145_p4 }
  0x61   : > { %p4148_p5 = pnand %p4147_p10, %p4141_p0 }
  0x63   : > { %4151 = shalt.err (!%p4148_p5)
}
  0x64   : > { %p5116_p2 = scmp.ne.s32.totalorder %s5109_s14, 0  ;;  %s5117_s9 = smov 4  }
  0x65   : > { %s5118_s12 = smov 64   ;;  %s3632_s27 = sshll.u32 %s4224_s30, 5 }
  0x66   : > { %3861 = dma.hbm_to_vmem [thread:$0]  (!%p5116_p2), %s4400_s21, 1024, %s4403_s26, %s285_s29, %s5118_s12, %s5118_s12, %s5117_s9  }
  0x67   : > { %s4452_s19 = scalar_lea.hbm %s5088_s6, %s3632_s27  ;;  %s346_s18 = scalar_lea.vmem [#allocation7], %s3514_s4 }
  0x68   : > { %s354_s22 = sshll.u32 %s346_s18, 4  ;;  %s4152_s17 = scalar_lea.hbm %s4452_s19, 32  ;;  %s355_s22 = int_to_ptr.vmem [resolvable:$true] %s354_s22 }
  0x69   : > { %p4153_p7 = scmp.ne.s32.totalorder %s4452_s19, %s4152_s17  ;;  %s4157_s21 = scalar_lea.hbm %s5088_s6, 64 }
  0x6a   : > { %p4158_p11 = scmp.lt.u32.totalorder %s4452_s19, %s5088_s6  ;;  %p4159_p12 = scmp.lt.u32.totalorder %s4157_s21, %s4152_s17 }
  0x6b   : > { %p4155_p9 = pnand %p4153_p7, %p5115_p8  ;;  %p4161_p13 = scmp.lt.u32.totalorder %s4152_s17, %s4452_s19 }
  0x6c   : > { %p4160_p6 = por %p4159_p12, %p4158_p11 }
  0x6d   : > { %p4156_p3 = pneg %p4155_p9 }
  0x6e   : > { %p4162_p0 = por %p4161_p13, %p4160_p6 }
  0x70   : > { %p4163_p4 = pnand %p4162_p0, %p4156_p3 }
  0x72   : > { %4166 = shalt.err (!%p4163_p4)
}
  0x73   : > { %s4167_s4 = scalar_lea.vmem %s355_s22, 32  ;;  %s4231_s13 = smov [#allocation7]  }
  0x74   : > { %p4168_p1 = scmp.ne.s32.totalorder %s355_s22, %s4167_s4  ;;  %s4172_s8 = sshll.u32 %s4231_s13, 4  ;;  %s4173_s8 = int_to_ptr.vmem [resolvable:$false] %s4172_s8 }
  0x75   : > { %s4174_s9 = scalar_lea.vmem %s4173_s8, 64  ;;  %p4175_p7 = scmp.lt.s32.totalorder %s355_s22, %s4173_s8 }
  0x76   : > { %p4170_p10 = pnand %p4168_p1, %p5115_p8  ;;  %p4176_p9 = scmp.lt.s32.totalorder %s4174_s9, %s4167_s4 }
  0x78   : > { %p4171_p5 = pneg %p4170_p10  ;;  %p4177_p2 = por %p4176_p9, %p4175_p7 }
  0x7a   : > { %p4178_p11 = pnand %p4177_p2, %p4171_p5 }
  0x7c   : > { %4181 = shalt.err (!%p4178_p11)
}
  0x7d   : > { %p5119_p12 = scmp.ne.s32.totalorder %s5109_s14, 0  ;;  %p5120_p3 = scmp.ne.s32.totalorder %s5113_s16, 0 }
  0x7e   : > { %s365_s25 = sand.u32 (!%p5120_p3), 1, %s4216_s28   ;;  %p5121_p8 = scmp.ne.s32.totalorder (!%p5120_p3), %s5112_s11, 0 }
  0x7f   : > { %3867 = dma.hbm_to_vmem [thread:$0]  (!%p5119_p12), %s4452_s19, 32, %s355_s22, %s4335_s23  }
  0x80   : > { %363 = sbr.rel (%p5120_p3) target bundleno = 3162 (0xc5a), region = 52  ;;  %s3518_s12 = sshll.u32 (!%p5120_p3), %s365_s25, 6 }
  0x81   : > { %s366_s27 = scalar_lea.sflag (!%p5120_p3), [#allocation4], %s365_s25  ;;  %s4477_s20 = scalar_lea.vmem (!%p5120_p3), [#allocation3], %s3518_s12 }
  0x87   : > { %4199 = dma.done.wait (%p5121_p8), %s366_s27, 1024  }
  0x88   : > { %4201 = vsyncadd (%p5121_p8), %s366_s27, 4294966272  ;;  %s374_s14 = sand.u32 1, %s4369_s10   ;;  %s3519_s15 = sshll.u32 %s365_s25, 7 }
  0x89   : > { %s375_s23 = scalar_lea.sflag [#allocation6], %s374_s14  ;;  %s4484_s19 = scalar_lea.vmem [#allocation5], %s3519_s15 }
  0x8a   : > { %4203 = dma.done.wait (%p5121_p8), %s375_s23, 2080  }
  0x8b   : > { %4205 = vsyncadd (%p5121_p8), %s375_s23, 4294965216  ;;  %s3520_s16 = sshll.u32 %s365_s25, 1  ;;  %p5122_p2 = scmp.eq.s32.totalorder %s4369_s10, 0 }
  0x8c   : > { %s4490_s18 = scalar_lea.vmem [#allocation7], %s3520_s16 }
  0x8d   : > { %4207 = dma.done.wait (%p5122_p2), [#allocation9], 32   ;;  %p5123_p6 = pmov %p5122_p2 }
  0x8e   : > { %p444_p13 = scmp.lt.s32.totalorder %s4369_s10, 1  ;;  %p5124_p0 = scmp.ne.s32.totalorder %s4369_s10, 0 }
  0x8f   : > { %4209 = vsyncadd (%p5123_p6), [#allocation9], 4294967264  ;;  %v464_v0 = vld [vmem:[%s5082_s0] sm:$0xff] (!%p5124_p0)  ;;  %v465_v1 = vld [vmem:[%s5082_s0 + $0x8] sm:$0xff] (!%p5124_p0) }
  0x90   : > { %s445_s22 = scalar_select %p444_p13, %s4369_s10, 1 }
  0x91   : > { %463 = sbr.rel (%p5124_p0) target bundleno = 152 (0x98), region = 72  ;;  %466 = vst [vmem:[#allocation2] sm:$0xff] (!%p5124_p0), %v464_v0  ;;  %467 = vst [vmem:[#allocation2 + $0x8] sm:$0xff] (!%p5124_p0), %v465_v1 }
  0x92   : > { %s3843_s17 = smul.u32 192, %s445_s22  ;;  %s3633_s26 = sshll.u32 %s445_s22, 7 }
  0x93   : > { %s4501_s11 = scalar_lea.vmem %s5085_s3, %s3633_s26  ;;  %s3634_s29 = sshll.u32 %s445_s22, 4 }
  0x94   : > { %s4506_s13 = scalar_lea.vmem %s5083_s1, %s3843_s17  ;;  %s4511_s25 = scalar_lea.vmem %s5087_s5, %s3634_s29 }
  0x98 PF: > { %v468_v2 = vld [vmem:[#allocation2] sm:$0xff]  ;;  %v469_v3 = vld [vmem:[#allocation2 + $0x8] sm:$0xff]  ;;  %v4232_v6 = vmov 0.0   ;;  %v3939_v20 = vld [vmem:[%s4506_s13 + $0x30] ss:$12 sps:$4 sm:$0xff]   ;;  %v4233_v32 = vmov 0   ;;  %v495_v42 = vlaneseq }
  0x99   : > { %472 = vadd.xlane.f32.xlu0 %v468_v2  ;;  %v3929_v4 = vld [vmem:[%s4506_s13 + $0x4] ss:$12 sps:$4 sm:$0xff]   ;;  %v3931_v5 = vld [vmem:[%s4506_s13] ss:$12 sps:$4 sm:$0xff]   ;;  %3707 = vmatprep.subr.bf16.mxu1 %v4232_v6  ;;  %v3932_v7 = vld [vmem:[%s4506_s13 + $0x8] ss:$12 sps:$4 sm:$0xff]  }
  0x9a   : > { %v3933_v8 = vld [vmem:[%s4506_s13 + $0x1c] ss:$12 sps:$4 sm:$0xff]   ;;  %668 = vmatprep.subr.bf16.mxu0 %v3929_v4  ;;  %3708 = vmatpush3.bf16.msra.mxu1 %v3932_v7  ;;  %v3935_v17 = vld [vmem:[%s4506_s13 + $0x18] ss:$12 sps:$4 sm:$0xff]   ;;  %v3936_v18 = vld [vmem:[%s4506_s13 + $0x20] ss:$12 sps:$4 sm:$0xff]  }
  0x9b   : > { %669 = vmatpush1.bf16.msra.mxu0 %v3931_v5  ;;  %3709 = vmatprep.subr.bf16.mxu1 %v4232_v6  ;;  %v3937_v19 = vld [vmem:[%s4506_s13 + $0x34] ss:$12 sps:$4 sm:$0xff]   ;;  %v3940_v21 = vld [vmem:[%s4506_s13 + $0x38] ss:$12 sps:$4 sm:$0xff]   ;;  %v3944_v24 = vld [vmem:[%s4506_s13 + $0x50] ss:$12 sps:$4 sm:$0xff]  }
  0x9c   : > { %670 = vmatprep.subr.bf16.mxu0 %v3933_v8  ;;  %v3941_v22 = vld [vmem:[%s4506_s13 + $0x4c] ss:$12 sps:$4 sm:$0xff]   ;;  %v3943_v23 = vld [vmem:[%s4506_s13 + $0x48] ss:$12 sps:$4 sm:$0xff]   ;;  %v3945_v25 = vld [vmem:[%s4506_s13 + $0x64] ss:$12 sps:$4 sm:$0xff]   ;;  %700 = vmatprep.mubr.bf16.mxu0 %v4233_v32 }
  0x9d   : > { %474 = vadd.xlane.f32.xlu0 %v469_v3  ;;  %v3947_v26 = vld [vmem:[%s4506_s13 + $0x60] ss:$12 sps:$4 sm:$0xff]   ;;  %v3948_v27 = vld [vmem:[%s4506_s13 + $0x68] ss:$12 sps:$4 sm:$0xff]   ;;  %v3951_v29 = vld [vmem:[%s4506_s13 + $0x78] ss:$12 sps:$4 sm:$0xff]  }
  0x9e   : > { %3710 = vmatpush3.bf16.msra.mxu1 %v3936_v18  ;;  %v3949_v28 = vld [vmem:[%s4506_s13 + $0x7c] ss:$12 sps:$4 sm:$0xff]   ;;  %v3952_v30 = vld [vmem:[%s4506_s13 + $0x80] ss:$12 sps:$4 sm:$0xff]   ;;  %vm4234_vm0 = vmmov 0   ;;  %v4566_v45 = vshrl.u32 %v495_v42, 7 }
  0x9f   : > { %671 = vmatpush1.bf16.msra.mxu0 %v3935_v17  ;;  %3711 = vmatprep.subr.bf16.mxu1 %v4232_v6  ;;  %v3953_v31 = vld [vmem:[%s4506_s13 + $0x94] ss:$12 sps:$4 sm:$0xff]   ;;  %v3955_v33 = vld [vmem:[%s4506_s13 + $0x90] ss:$12 sps:$4 sm:$0xff]   ;;  %v3956_v34 = vld [vmem:[%s4506_s13 + $0x98] ss:$12 sps:$4 sm:$0xff]  }
  0xa0   : > { %672 = vmatprep.subr.bf16.mxu0 %v3937_v19  ;;  %3723 = vmatprep.mubr.msk.bf16.mxu1 %vm4234_vm0, %v4232_v6  ;;  %v3957_v35 = vld [vmem:[%s4506_s13 + $0xac] ss:$12 sps:$4 sm:$0xff]   ;;  %v3959_v36 = vld [vmem:[%s4506_s13 + $0xa8] ss:$12 sps:$4 sm:$0xff]   ;;  %v3960_v37 = vld [vmem:[%s4506_s13 + $0xb0] ss:$12 sps:$4 sm:$0xff]  }
  0xa1   : > { %v497_v46 = vsub.s32 0, %v4566_v45  ;;  %v4570_v47 = vld [vmem:[%s4511_s25] sm:$0xff]  ;;  %v503_v51 = vsub.s32 1, %v4566_v45  ;;  %v760_v60 = vsub.s32 5, %v4566_v45  ;;  %v754_v61 = vsub.s32 4, %v4566_v45  ;;  %s4235_s23 = smov 64  }
  0xa2   : > { %3712 = vmatpush3.bf16.msra.mxu1 %v3940_v21  ;;  %s4236_s16 = smov 96   ;;  %s4237_s22 = smov 32   ;;  %vm1662_vm1 = vcmask 261120   ;;  %vm2039_vm2 = vcmask 64512   ;;  %vm2147_vm3 = vcmask 1043456   ;;  %vm2811_vm4 = vcmask 523264  }
  0xa3   : > { %673 = vmatpush1.bf16.msra.mxu0 %v3939_v20  ;;  %3713 = vmatprep.subr.bf16.mxu1 %v4232_v6  ;;  %v498_v50 = vrot.slane %v4570_v47, %v497_v46  ;;  %v504_v55 = vrot.slane %v4570_v47, %v503_v51  ;;  %v761_v62 = vrot.slane %v4570_v47, %v760_v60  ;;  %vm2814_vm5 = vcmask 785408   ;;  %p3625_p4 = scmp.ne.s32.totalorder %s4369_s10, 1 }
  0xa4   : > { %674 = vmatprep.subr.bf16.mxu0 %v3941_v22 }
  0xa6   : > { %3714 = vmatpush3.bf16.msra.mxu1 %v3944_v24 }
  0xa7   : > { %675 = vmatpush1.bf16.msra.mxu0 %v3943_v23  ;;  %3715 = vmatprep.subr.bf16.mxu1 %v4232_v6 }
  0xa8   : > { %676 = vmatprep.subr.bf16.mxu0 %v3945_v25 }
  0xaa   : > { %3716 = vmatpush3.bf16.msra.mxu1 %v3948_v27 }
  0xab   : > { %677 = vmatpush1.bf16.msra.mxu0 %v3947_v26  ;;  %3717 = vmatprep.subr.bf16.mxu1 %v4232_v6 }
  0xac   : > { %678 = vmatprep.subr.bf16.mxu0 %v3949_v28 }
  0xae   : > { %3718 = vmatpush3.bf16.msra.mxu1 %v3952_v30 }
  0xaf   : > { %679 = vmatpush1.bf16.msra.mxu0 %v3951_v29  ;;  %3719 = vmatprep.subr.bf16.mxu1 %v4232_v6 }
  0xb0   : > { %680 = vmatprep.subr.bf16.mxu0 %v3953_v31 }
  0xb2   : > { %3720 = vmatpush3.bf16.msra.mxu1 %v3956_v34 }
  0xb3   : > { %681 = vmatpush1.bf16.msra.mxu0 %v3955_v33  ;;  %3721 = vmatprep.subr.bf16.mxu1 %v4232_v6 }
  0xb4   : > { %682 = vmatprep.subr.bf16.mxu0 %v3957_v35 }
  0xb6   : > { %3722 = vmatpush3.bf16.msra.mxu1 %v3960_v37 }
  0xb7   : > { %683 = vmatpush1.bf16.msra.mxu0 %v3959_v36  ;;  %3727 = vmatprep.subr.bf16.mxu1 %v4232_v6 }
  0xb8   : > { %3751 = vmatprep.subr.bf16.mxu0 %v4232_v6 }
 0x126   : > { %v473_v9 = vpop.xlane.xlu0 %472 }
 0x127   : > { %v477_v10 = vmul.f32 0.0078125, %v473_v9 }
 0x129   : > { %v4527_v11 = vsub.f32 %v468_v2, %v477_v10 }
 0x12a   : > { %v475_v12 = vpop.xlane.xlu0 %474 }
 0x12b   : > { %v478_v13 = vmul.f32 0.0078125, %v475_v12  ;;  %v481_v14 = vmul.f32 %v4527_v11, %v4527_v11 }
 0x12d   : > { %v4531_v15 = vsub.f32 %v469_v3, %v478_v13  ;;  %483 = vadd.xlane.f32.xlu1 %v481_v14  ;;  %v755_v3 = vrot.slane %v4570_v47, %v754_v61  ;;  %v4238_v13 = vmov 1983009808  }
 0x12e   : > { %v793_v14 = vunpack.c.l.s4 %v4238_v13 }
 0x12f   : > { %v482_v16 = vmul.f32 %v4531_v15, %v4531_v15 }
 0x130   : > { %v794_v17 = vunpack.c.0.s8 %v793_v14 }
 0x131   : > { %485 = vadd.xlane.f32.xlu1 %v482_v16 }
 0x132   : > { %v4616_v21 = vsub.s32 %v794_v17, %v4566_v45 }
 0x1ba   : > { %v484_v38 = vpop.xlane.xlu1 %483 }
 0x1bb   : > { %v487_v39 = vmul.f32 0.0078125, %v484_v38 }
 0x1bd   : > { %v489_v40 = vadd.f32 1e-05, %v487_v39 }
 0x1be   : > { %v486_v41 = vpop.xlane.xlu1 %485 }
 0x1bf   : > { %4009 = vrsqrt.f32 %v489_v40  ;;  %v488_v43 = vmul.f32 0.0078125, %v486_v41 }
 0x1c1   : > { %v490_v44 = vadd.f32 1e-05, %v488_v43 }
 0x1c3   : > { %4011 = vrsqrt.f32 %v490_v44 }
 0x1c9   : > { %v4010_v48 = vpop.eup %4009 }
 0x1ca   : > { %v493_v49 = vmul.f32 %v4010_v48, %v4527_v11 }
 0x1cc   : > { %v499_v54 = vmul.f32 %v498_v50, %v493_v49 }
 0x1cd   : > { %v4012_v52 = vpop.eup %4011 }
 0x1ce   : > { %v494_v53 = vmul.f32 %v4012_v52, %v4531_v15  ;;  %v505_v57 = vadd.f32 %v504_v55, %v499_v54  ;;  %v4239_v15 = vmov 1934713408  }
 0x1cf   : > { %v825_v16 = vunpack.c.l.s4 %v4239_v15 }
 0x1d0   : > { %v500_v56 = vmul.f32 %v498_v50, %v494_v53 }
 0x1d1   : > { %v826_v20 = vunpack.c.0.s8 %v825_v16 }
 0x1d2   : > { %v506_v58 = vadd.f32 %v504_v55, %v500_v56 }
 0x1d3   : > { %v4619_v28 = vsub.s32 %v826_v20, %v4566_v45 }
 0x1d4   : > { %v539_v59 = vpack.c.bf16 %v506_v58, %v505_v57 }
 0x1d6   : > { %701 = vmatmul.mubr.bf16.vlgmr.msra.gmra.mrb[0].mxu0 %v539_v59  ;;  %3724 = vmatmul.mubr.bf16.vlgmr.msra.gmra.mrb[0].mxu1 %v539_v59 }
 0x1d7   : > { %3729 = vmatprep.mubr.msk.bf16.mxu1 %vm4234_vm0, %v4232_v6  ;;  %3753 = vmatprep.mubr.msk.bf16.mxu0 %vm4234_vm0, %v4232_v6 }
 0x2a9   : > { %v702_v63 = vpop.f32.mrb[0].mxu0  ;;  %v4588_v0 = vpop.f32.mrb[0].mxu1 }
 0x2aa   : > { %v704_v1 = vpop.f32.mrb[1].mxu0  ;;  %v3725_v2 = vpop.f32.mrb[1].mxu1  ;;  %v756_v10 = vadd.f32 %v755_v3, %v702_v63 }
 0x2ab   : > { %v762_v4 = vadd.f32 %v761_v62, %v704_v1  ;;  %v706_v5 = vpop.f32.mrb[2].mxu0  ;;  %v4591_v7 = vpop.f32.mrb[2].mxu1 }
 0x2ac   : > { %v708_v8 = vpop.f32.mrb[3].mxu0  ;;  %v3726_v9 = vpop.f32.mrb[3].mxu1  ;;  %v4605_v12 = vadd.f32 %v755_v3, %v706_v5 }
 0x2ad   : > { %1070 = vrot.lane.b32.xlu1 %v762_v4, %s4235_s23  ;;  %1064 = vrot.lane.b32.xlu0 %v762_v4, %s4236_s16  ;;  %v4597_v11 = vadd.f32 %v761_v62, %v708_v8 }
 0x2b1   : > { %1076 = vrot.lane.b32.xlu1 %v762_v4, %s4237_s22  ;;  %778 = vrot.lane.b32.xlu0 %v756_v10, %s4235_s23 }
 0x2b5   : > { %772 = vrot.lane.b32.xlu1 %v756_v10, %s4236_s16  ;;  %1066 = vrot.lane.b32.xlu0 %v4597_v11, %s4236_s16 }
 0x2b9   : > { %784 = vrot.lane.b32.xlu1 %v756_v10, %s4237_s22  ;;  %1078 = vrot.lane.b32.xlu0 %v4597_v11, %s4237_s22 }
 0x2bd   : > { %1072 = vrot.lane.b32.xlu1 %v4597_v11, %s4235_s23  ;;  %780 = vrot.lane.b32.xlu0 %v4605_v12, %s4235_s23 }
 0x2c1   : > { %774 = vrot.lane.b32.xlu1 %v4605_v12, %s4236_s16 }
 0x2c5   : > { %786 = vrot.lane.b32.xlu1 %v4605_v12, %s4237_s22 }
 0x31f   : > { %v1071_v18 = vpop.permute.xlu1 %1070  ;;  %v1065_v19 = vpop.permute.xlu0 %1064 }
 0x320   : > { %v1082_v22 = vcombine.low %v762_v4, %v1071_v18  ;;  %v1083_v23 = vcombine.high %v762_v4, %v1071_v18 }
 0x322   : > { %v1090_v29 = vrot.slane %v1082_v22, %v4616_v21  ;;  %v1097_v30 = vrot.slane %v1083_v23, %v4616_v21 }
 0x323   : > { %v1077_v24 = vpop.permute.xlu1 %1076  ;;  %v779_v25 = vpop.permute.xlu0 %778 }
 0x324   : > { %v1098_v26 = vcombine.low %v1065_v19, %v1077_v24  ;;  %v1099_v27 = vcombine.high %v1065_v19, %v1077_v24  ;;  %v790_v40 = vcombine.low %v756_v10, %v779_v25  ;;  %v791_v41 = vcombine.high %v756_v10, %v779_v25 }
 0x326   : > { %v1106_v31 = vrot.slane %v1098_v26, %v4616_v21  ;;  %v1113_v33 = vrot.slane %v1099_v27, %v4616_v21  ;;  %v798_v62 = vrot.slane %v790_v40, %v4616_v21  ;;  %v805_v63 = vrot.slane %v791_v41, %v4616_v21 }
 0x327   : > { %v773_v34 = vpop.permute.xlu1 %772  ;;  %v1067_v35 = vpop.permute.xlu0 %1066 }
 0x328   : > { %v1114_v36 = vcombine.low %v1090_v29, %v1106_v31  ;;  %v1115_v37 = vcombine.high %v1090_v29, %v1106_v31  ;;  %v1130_v38 = vcombine.low %v1097_v30, %v1113_v33  ;;  %v1131_v39 = vcombine.high %v1097_v30, %v1113_v33 }
 0x32a   : > { %v1122_v42 = vrot.slane %v1114_v36, %v4619_v28  ;;  %v1129_v43 = vrot.slane %v1115_v37, %v4619_v28  ;;  %v1138_v44 = vrot.slane %v1130_v38, %v4619_v28  ;;  %v1145_v48 = vrot.slane %v1131_v39, %v4619_v28 }
 0x32b   : > { %v785_v49 = vpop.permute.xlu1 %784  ;;  %v1079_v50 = vpop.permute.xlu0 %1078 }
 0x32c   : > { %v1218_v52 = vcombine.low %v1122_v42, %v1129_v43  ;;  %v3556_v53 = vcombine.high %v1122_v42, %v1129_v43  ;;  %v1234_v54 = vcombine.low %v1138_v44, %v1145_v48  ;;  %v3557_v55 = vcombine.high %v1138_v44, %v1145_v48 }
 0x32d   : > { %v806_v56 = vcombine.low %v773_v34, %v785_v49  ;;  %v807_v57 = vcombine.high %v773_v34, %v785_v49  ;;  %v1166_v58 = vcombine.low %v1067_v35, %v1079_v50  ;;  %v1167_v59 = vcombine.high %v1067_v35, %v1079_v50 }
 0x32e   : > { %v4630_v60 = vrot.slane %v1218_v52, %v4616_v21  ;;  %v4633_v61 = vrot.slane %v3556_v53, %v4616_v21  ;;  %v4638_v1 = vrot.slane %v1234_v54, %v4616_v21  ;;  %v4641_v2 = vrot.slane %v3557_v55, %v4616_v21 }
 0x32f   : > { %v814_v3 = vrot.slane %v806_v56, %v4616_v21  ;;  %v821_v4 = vrot.slane %v807_v57, %v4616_v21  ;;  %v1073_v5 = vpop.permute.xlu1 %1072  ;;  %v781_v8 = vpop.permute.xlu0 %780  ;;  %v1174_v9 = vrot.slane %v1166_v58, %v4616_v21  ;;  %v1181_v10 = vrot.slane %v1167_v59, %v4616_v21 }
 0x330   : > { %v1150_v13 = vcombine.low %v4597_v11, %v1073_v5  ;;  %v1151_v14 = vcombine.high %v4597_v11, %v1073_v5  ;;  %v858_v22 = vcombine.low %v4605_v12, %v781_v8  ;;  %v859_v23 = vcombine.high %v4605_v12, %v781_v8 }
 0x331   : > { %v822_v15 = vcombine.low %v798_v62, %v814_v3  ;;  %v823_v16 = vcombine.high %v798_v62, %v814_v3  ;;  %v838_v17 = vcombine.low %v805_v63, %v821_v4  ;;  %v839_v18 = vcombine.high %v805_v63, %v821_v4 }
 0x332   : > { %v1158_v19 = vrot.slane %v1150_v13, %v4616_v21  ;;  %v1165_v20 = vrot.slane %v1151_v14, %v4616_v21  ;;  %v1250_v3 = vcombine.low %v4630_v60, %v4633_v61  ;;  %v1266_v4 = vcombine.low %v4638_v1, %v4641_v2 }
 0x333   : > { %v830_v24 = vrot.slane %v822_v15, %v4619_v28  ;;  %v837_v25 = vrot.slane %v823_v16, %v4619_v28  ;;  %v846_v26 = vrot.slane %v838_v17, %v4619_v28  ;;  %v853_v11 = vrot.slane %v839_v18, %v4619_v28  ;;  %v775_v27 = vpop.permute.xlu1 %774 }
 0x334   : > { %v1182_v29 = vcombine.low %v1158_v19, %v1174_v9  ;;  %v1183_v30 = vcombine.high %v1158_v19, %v1174_v9  ;;  %v1198_v31 = vcombine.low %v1165_v20, %v1181_v10  ;;  %v1199_v33 = vcombine.high %v1165_v20, %v1181_v10 }
 0x335   : > { %v926_v34 = vcombine.low %v830_v24, %v837_v25  ;;  %v3552_v35 = vcombine.high %v830_v24, %v837_v25  ;;  %v942_v36 = vcombine.low %v846_v26, %v853_v11  ;;  %v3553_v37 = vcombine.high %v846_v26, %v853_v11 }
 0x336   : > { %v1190_v38 = vrot.slane %v1182_v29, %v4619_v28  ;;  %v1197_v12 = vrot.slane %v1183_v30, %v4619_v28  ;;  %v1206_v39 = vrot.slane %v1198_v31, %v4619_v28  ;;  %v1213_v40 = vrot.slane %v1199_v33, %v4619_v28 }
 0x337   : > { %v4662_v41 = vrot.slane %v926_v34, %v4616_v21  ;;  %v4665_v42 = vrot.slane %v3552_v35, %v4616_v21  ;;  %v4668_v43 = vrot.slane %v942_v36, %v4616_v21  ;;  %v4671_v44 = vrot.slane %v3553_v37, %v4616_v21  ;;  %v787_v53 = vpop.permute.xlu1 %786 }
 0x338   : > { %v1286_v48 = vcombine.low %v1190_v38, %v1197_v12  ;;  %v3558_v49 = vcombine.high %v1190_v38, %v1197_v12  ;;  %v1302_v50 = vcombine.low %v1206_v39, %v1213_v40  ;;  %v3559_v52 = vcombine.high %v1206_v39, %v1213_v40 }
 0x339   : > { %v958_v54 = vcombine.low %v4662_v41, %v4665_v42  ;;  %v974_v55 = vcombine.low %v4668_v43, %v4671_v44  ;;  %v874_v62 = vcombine.low %v775_v27, %v787_v53  ;;  %v875_v63 = vcombine.high %v775_v27, %v787_v53 }
 0x33a   : > { %v1293_v56 = vrot.slane %v1286_v48, %v4616_v21  ;;  %v1301_v57 = vrot.slane %v3558_v49, %v4616_v21  ;;  %v4680_v58 = vrot.slane %v1302_v50, %v4616_v21  ;;  %v1317_v59 = vrot.slane %v3559_v52, %v4616_v21 }
 0x33b   : > { %v866_v5 = vrot.slane %v858_v22, %v4616_v21  ;;  %v873_v8 = vrot.slane %v859_v23, %v4616_v21  ;;  %v882_v13 = vrot.slane %v874_v62, %v4616_v21  ;;  %v889_v14 = vrot.slane %v875_v63, %v4616_v21 }
 0x33c   : > { %v1318_v9 = vcombine.low %v1293_v56, %v1301_v57  ;;  %v1334_v10 = vcombine.low %v4680_v58, %v1317_v59  ;;  %v1258_v15 = vrot.slane %v1250_v3, %v4619_v28  ;;  %v1274_v16 = vrot.slane %v1266_v4, %v4619_v28 }
 0x33d   : > { %v966_v17 = vrot.slane %v958_v54, %v4619_v28  ;;  %v982_v18 = vrot.slane %v974_v55, %v4619_v28  ;;  %v890_v22 = vcombine.low %v866_v5, %v882_v13  ;;  %v891_v23 = vcombine.high %v866_v5, %v882_v13 }
 0x33e   : > { %v4697_v19 = vrot.slane %v1318_v9, %v4619_v28  ;;  %v4700_v20 = vrot.slane %v1334_v10, %v4619_v28  ;;  %v906_v24 = vcombine.low %v873_v8, %v889_v14  ;;  %v907_v25 = vcombine.high %v873_v8, %v889_v14 }
 0x33f   : > { %v1282_v26 = vcombine.low %v1258_v15, %v1274_v16  ;;  %v898_v27 = vrot.slane %v890_v22, %v4619_v28  ;;  %v905_v29 = vrot.slane %v891_v23, %v4619_v28  ;;  %v990_v34 = vcombine.low %v966_v17, %v982_v18 }
 0x340   : > { %v1350_v11 = vcombine.low %v4697_v19, %v4700_v20  ;;  %v914_v30 = vrot.slane %v906_v24, %v4619_v28  ;;  %v921_v31 = vrot.slane %v907_v25, %v4619_v28  ;;  %v1283_v35 = vcombine.high %v1258_v15, %v1274_v16 }
 0x341   : > { %v1654_v33 = vpack.c.bf16 %v1282_v26, %v1282_v26  ;;  %v994_v37 = vcombine.low %v898_v27, %v905_v29  ;;  %v3554_v38 = vcombine.high %v898_v27, %v905_v29  ;;  %v1251_v49 = vcombine.high %v4630_v60, %v4633_v61 }
 0x342   : > { %v1658_v36 = vpack.c.bf16 %v1350_v11, %v1350_v11  ;;  %v1010_v12 = vcombine.low %v914_v30, %v921_v31  ;;  %v3555_v39 = vcombine.high %v914_v30, %v921_v31  ;;  %v1267_v55 = vcombine.high %v4638_v1, %v4641_v2 }
 0x343   : > { %v1667_v40 = vsel %vm1662_vm1, %v1654_v33, 0  ;;  %v1001_v50 = vrot.slane %v994_v37, %v4616_v21  ;;  %v1009_v52 = vrot.slane %v3554_v38, %v4616_v21  ;;  %v1319_v62 = vcombine.high %v1293_v56, %v1301_v57 }
 0x344   : > { %v1851_v48 = vsel %vm1662_vm1, %v1658_v36, 0  ;;  %v1017_v53 = vrot.slane %v1010_v12, %v4616_v21  ;;  %v1025_v54 = vrot.slane %v3555_v39, %v4616_v21  ;;  %3728 = vmatpush3.bf16.xpose.msra.mxu1 %v1667_v40  ;;  %v1646_v4 = vpack.c.bf16 %v990_v34, %v990_v34 }
 0x345   : > { %3733 = vmatprep.subr.bf16.mxu1 %v4232_v6  ;;  %3752 = vmatpush3.bf16.xpose.msra.mxu0 %v1851_v48  ;;  %v1026_v63 = vcombine.low %v1001_v50, %v1009_v52  ;;  %v1655_v60 = vpack.c.bf16 %v1283_v35, %v1283_v35  ;;  %v1265_v61 = vrot.slane %v1251_v49, %v4619_v28 }
 0x346   : > { %v1042_v3 = vcombine.low %v1017_v53, %v1025_v54  ;;  %3763 = vmatprep.subr.bf16.mxu0 %v4232_v6  ;;  %v1281_v5 = vrot.slane %v1267_v55, %v4619_v28  ;;  %v1333_v8 = vrot.slane %v1319_v62, %v4619_v28  ;;  %v1335_v9 = vcombine.high %v4680_v58, %v1317_v59 }
 0x347   : > { %v1034_v10 = vrot.slane %v1026_v63, %v4619_v28  ;;  %v1027_v1 = vcombine.high %v1001_v50, %v1009_v52  ;;  %v1043_v2 = vcombine.high %v1017_v53, %v1025_v54  ;;  %v1713_v14 = vsel %vm1662_vm1, %v1655_v60, 0 }
 0x348   : > { %v1050_v13 = vrot.slane %v1042_v3, %v4619_v28  ;;  %v1349_v56 = vrot.slane %v1335_v9, %v4619_v28  ;;  %v1284_v15 = vcombine.low %v1265_v61, %v1281_v5  ;;  %v959_v22 = vcombine.high %v4662_v41, %v4665_v42 }
 0x349   : > { %v975_v58 = vcombine.high %v4668_v43, %v4671_v44  ;;  %v991_v23 = vcombine.high %v966_v17, %v982_v18  ;;  %v1041_v25 = vrot.slane %v1027_v1, %v4619_v28  ;;  %v1057_v26 = vrot.slane %v1043_v2, %v4619_v28 }
 0x34a   : > { %v1058_v57 = vcombine.low %v1034_v10, %v1050_v13  ;;  %v1352_v16 = vcombine.low %v1333_v8, %v1349_v56  ;;  %v1656_v11 = vpack.c.bf16 %v1284_v15, %v1284_v15  ;;  %v973_v43 = vrot.slane %v959_v22, %v4619_v28 }
 0x34b   : > { %3730 = vmatmul.mubr.msk.bf16.vlgmr.msra.gmra.mrb[4].mxu1 %vm1662_vm1, %v1646_v4  ;;  %v1647_v42 = vpack.c.bf16 %v991_v23, %v991_v23  ;;  %v989_v44 = vrot.slane %v975_v58, %v4619_v28  ;;  %v1060_v17 = vcombine.low %v1041_v25, %v1057_v26  ;;  %v1285_v27 = vcombine.high %v1265_v61, %v1281_v5 }
 0x34c   : > { %3734 = vmatpush3.bf16.xpose.msra.mxu1 %v1713_v14  ;;  %3735 = vmatprep.mubr.msk.bf16.mxu1 %vm4234_vm0, %v4232_v6  ;;  %v1650_v59 = vpack.c.bf16 %v1058_v57, %v1058_v57  ;;  %v1660_v24 = vpack.c.bf16 %v1352_v16, %v1352_v16  ;;  %v1759_v18 = vsel %vm1662_vm1, %v1656_v11, 0  ;;  %v1351_v35 = vcombine.high %v4697_v19, %v4700_v20 }
 0x34d   : > { %3739 = vmatprep.subr.bf16.mxu1 %v4232_v6  ;;  %v992_v29 = vcombine.low %v973_v43, %v989_v44  ;;  %v1652_v30 = vpack.c.bf16 %v1060_v17, %v1060_v17  ;;  %v1657_v31 = vpack.c.bf16 %v1285_v27, %v1285_v27  ;;  %v993_v36 = vcombine.high %v973_v43, %v989_v44 }
 0x34e   : > { %3754 = vmatmul.mubr.msk.bf16.vlgmr.msra.gmra.mrb[4].mxu0 %vm1662_vm1, %v1650_v59  ;;  %v1943_v41 = vsel %vm1662_vm1, %v1660_v24, 0  ;;  %v1659_v37 = vpack.c.bf16 %v1351_v35, %v1351_v35  ;;  %v1353_v39 = vcombine.high %v1333_v8, %v1349_v56  ;;  %v1059_v40 = vcombine.high %v1034_v10, %v1050_v13 }
 0x34f   : > { %3765 = vmatprep.mubr.msk.bf16.mxu0 %vm4234_vm0, %v4232_v6  ;;  %3764 = vmatpush3.bf16.xpose.msra.mxu0 %v1943_v41  ;;  %v1648_v33 = vpack.c.bf16 %v992_v29, %v992_v29  ;;  %v1805_v34 = vsel %vm1662_vm1, %v1657_v31, 0  ;;  %v1649_v38 = vpack.c.bf16 %v993_v36, %v993_v36  ;;  %v1061_v49 = vcombine.high %v1041_v25, %v1057_v26 }
 0x350   : > { %3775 = vmatprep.subr.bf16.mxu0 %v4232_v6  ;;  %v1897_v12 = vsel %vm1662_vm1, %v1659_v37, 0  ;;  %v1661_v19 = vpack.c.bf16 %v1353_v39, %v1353_v39  ;;  %v1651_v20 = vpack.c.bf16 %v1059_v40, %v1059_v40  ;;  %v766_v26 = vsub.s32 6, %v4566_v45 }
 0x351   : > { %v1653_v50 = vpack.c.bf16 %v1061_v49, %v1061_v49 }
 0x352   : > { %v1989_v48 = vsel %vm1662_vm1, %v1661_v19, 0 }
 0x353   : > { %3736 = vmatmul.mubr.msk.bf16.vlgmr.msra.gmra.mrb[8].mxu1 %vm1662_vm1, %v1647_v42  ;;  %v767_v42 = vrot.slane %v4570_v47, %v766_v26 }
 0x354   : > { %3740 = vmatpush3.bf16.xpose.msra.mxu1 %v1759_v18  ;;  %3741 = vmatprep.mubr.msk.bf16.mxu1 %vm4234_vm0, %v4232_v6 }
 0x355   : > { %3745 = vmatprep.subr.bf16.mxu1 %v4232_v6  ;;  %v4787_v27 = vadd.f32 %v767_v42, %v4588_v0  ;;  %v4805_v19 = vadd.f32 %v767_v42, %v4591_v7 }
 0x356   : > { %3766 = vmatmul.mubr.msk.bf16.vlgmr.msra.gmra.mrb[8].mxu0 %vm1662_vm1, %v1652_v30 }
 0x357   : > { %3777 = vmatprep.mubr.msk.bf16.mxu0 %vm4234_vm0, %v4232_v6 }
 0x35b   : > { %3742 = vmatmul.mubr.msk.bf16.vlgmr.msra.gmra.mrb[12].mxu1 %vm1662_vm1, %v1648_v33 }
 0x35c   : > { %3746 = vmatpush3.bf16.xpose.msra.mxu1 %v1805_v34  ;;  %3747 = vmatprep.mubr.msk.bf16.mxu1 %vm4234_vm0, %v4232_v6 }
 0x35d   : > { %3757 = vmatprep.subr.bf16.mxu1 %v4232_v6 }
 0x363   : > { %3748 = vmatmul.mubr.msk.bf16.vlgmr.msra.gmra.mrb[16].mxu1 %vm1662_vm1, %v1649_v38 }
 0x364   : > { %3758 = vmatpush3.bf16.xpose.msra.mxu1 %v1897_v12  ;;  %3759 = vmatprep.mubr.msk.bf16.mxu1 %vm4234_vm0, %v4232_v6 }
 0x365   : > { %3769 = vmatprep.subr.bf16.mxu1 %v4232_v6 }
 0x36b   : > { %3760 = vmatmul.mubr.msk.bf16.vlgmr.msra.gmra.mrb[20].mxu1 %vm1662_vm1, %v1651_v20 }
 0x36c   : > { %3770 = vmatpush3.bf16.xpose.msra.mxu1 %v1989_v48  ;;  %3771 = vmatprep.mubr.msk.bf16.mxu1 %vm4234_vm0, %v4232_v6 }
 0x36d   : > { %3781 = vmatprep.subr.bf16.mxu1 %v4232_v6 }
 0x373   : > { %3772 = vmatmul.mubr.msk.bf16.vlgmr.msra.gmra.mrb[24].mxu1 %vm1662_vm1, %v1653_v50 }
 0x374   : > { %3783 = vmatprep.mubr.msk.bf16.mxu1 %vm4234_vm0, %v4232_v6 }
 0x41e   : > { %v1703_v52 = vpop.f32.mrb[4].mxu1 }
 0x41f   : > { %v4773_v53 = vmul.f32 0.17677669, %v1703_v52  ;;  %v3731_v54 = vpop.f32.mrb[5].mxu1 }
 0x420   : > { %v1706_v55 = vpop.f32.mrb[6].mxu1 }
 0x421   : > { %v3732_v62 = vpop.f32.mrb[7].mxu1  ;;  %v2040_v63 = vsel %vm2039_vm2, %v4773_v53, -inf  ;;  %v1887_v3 = vpop.f32.mrb[4].mxu0 }
 0x422   : > { %2041 = vmax.xlane.f32.xlu0 %v2040_v63  ;;  %v2035_v4 = vmul.f32 0.17677669, %v1887_v3  ;;  %v3755_v60 = vpop.f32.mrb[5].mxu0 }
 0x423   : > { %v1890_v61 = vpop.f32.mrb[6].mxu0 }
 0x424   : > { %v3756_v5 = vpop.f32.mrb[7].mxu0  ;;  %v2052_v8 = vsel %vm2039_vm2, %v2035_v4, -inf }
 0x426   : > { %v1749_v9 = vpop.f32.mrb[8].mxu1  ;;  %2053 = vmax.xlane.f32.xlu0 %v2052_v8 }
 0x427   : > { %v2032_v10 = vmul.f32 0.17677669, %v1749_v9  ;;  %v3737_v13 = vpop.f32.mrb[9].mxu1 }
 0x428   : > { %v1752_v1 = vpop.f32.mrb[10].mxu1 }
 0x429   : > { %v3738_v2 = vpop.f32.mrb[11].mxu1  ;;  %v2043_v56 = vsel %vm2039_vm2, %v2032_v10, -inf  ;;  %v1979_v57 = vpop.f32.mrb[8].mxu0 }
 0x42a   : > { %2044 = vmax.xlane.f32.xlu1 %v2043_v56  ;;  %v4779_v14 = vmul.f32 0.17677669, %v1979_v57  ;;  %v3767_v15 = vpop.f32.mrb[9].mxu0 }
 0x42b   : > { %v1982_v16 = vpop.f32.mrb[10].mxu0 }
 0x42c   : > { %v3768_v22 = vpop.f32.mrb[11].mxu0  ;;  %v2058_v58 = vsel %vm2039_vm2, %v4779_v14, -inf }
 0x42d   : > { %2059 = vmax.xlane.f32.xlu0 %v2058_v58 }
 0x42e   : > { %v1795_v59 = vpop.f32.mrb[12].mxu1 }
 0x42f   : > { %v2033_v23 = vmul.f32 0.17677669, %v1795_v59  ;;  %v3743_v24 = vpop.f32.mrb[13].mxu1 }
 0x430   : > { %v1798_v25 = vpop.f32.mrb[14].mxu1 }
 0x431   : > { %v3744_v11 = vpop.f32.mrb[15].mxu1  ;;  %v2046_v41 = vsel %vm2039_vm2, %v2033_v23, -inf }
 0x432   : > { %2047 = vmax.xlane.f32.xlu0 %v2046_v41 }
 0x436   : > { %v1841_v43 = vpop.f32.mrb[16].mxu1 }
 0x437   : > { %v2034_v44 = vmul.f32 0.17677669, %v1841_v43  ;;  %v3749_v17 = vpop.f32.mrb[17].mxu1 }
 0x438   : > { %v1844_v18 = vpop.f32.mrb[18].mxu1 }
 0x439   : > { %v3750_v29 = vpop.f32.mrb[19].mxu1  ;;  %v2049_v30 = vsel %vm2039_vm2, %v2034_v44, -inf }
 0x43a   : > { %2050 = vmax.xlane.f32.xlu0 %v2049_v30 }
 0x43b   : > { %1362 = vrot.lane.b32.xlu1 %v4787_v27, %s4235_s23 }
 0x43e   : > { %v1933_v31 = vpop.f32.mrb[20].mxu1 }
 0x43f   : > { %1368 = vrot.lane.b32.xlu1 %v4787_v27, %s4237_s22  ;;  %v3761_v33 = vpop.f32.mrb[21].mxu1  ;;  %v4796_v0 = vmul.f32 0.17677669, %v1933_v31 }
 0x440   : > { %v1936_v47 = vpop.f32.mrb[22].mxu1 }
 0x441   : > { %v3762_v34 = vpop.f32.mrb[23].mxu1  ;;  %v2055_v39 = vsel %vm2039_vm2, %v4796_v0, -inf }
 0x446   : > { %v2025_v35 = vpop.f32.mrb[24].mxu1 }
 0x447   : > { %v3773_v36 = vpop.f32.mrb[25].mxu1  ;;  %v4798_v12 = vmul.f32 0.17677669, %v2025_v35 }
 0x448   : > { %v2028_v37 = vpop.f32.mrb[26].mxu1 }
 0x449   : > { %v3774_v38 = vpop.f32.mrb[27].mxu1  ;;  %v2061_v40 = vsel %vm2039_vm2, %v4798_v12, -inf }
 0x450   : > { %1356 = vrot.lane.b32.xlu0 %v4787_v27, %s4236_s16 }
 0x463   : > { %2056 = vmax.xlane.f32.xlu1 %v2055_v39 }
 0x467   : > { %2062 = vmax.xlane.f32.xlu1 %v2061_v40 }
 0x478   : > { %1358 = vrot.lane.b32.xlu1 %v4805_v19, %s4236_s16 }
 0x4af   : > { %v2042_v20 = vpop.xlane.xlu0 %2041 }
 0x4b0   : > { %v2064_v48 = vsub.f32 %v4773_v53, %v2042_v20 }
 0x4b2   : > { %v2072_v49 = vmul.f32 1.442695, %v2064_v48 }
 0x4b3   : > { %v2054_v50 = vpop.xlane.xlu0 %2053 }
 0x4b4   : > { %4013 = vpow2.f32 %v2072_v49  ;;  %v2068_v52 = vsub.f32 %v2035_v4, %v2054_v50 }
 0x4b6   : > { %v2080_v54 = vmul.f32 1.442695, %v2068_v52 }
 0x4b7   : > { %v2045_v55 = vpop.xlane.xlu1 %2044 }
 0x4b8   : > { %v2065_v62 = vsub.f32 %v2032_v10, %v2045_v55  ;;  %4015 = vpow2.f32 %v2080_v54 }
 0x4ba   : > { %v2074_v63 = vmul.f32 1.442695, %v2065_v62  ;;  %v4810_v3 = vpop.xlane.xlu0 %2059 }
 0x4bb   : > { %v1363_v9 = vpop.permute.xlu1 %1362 }
 0x4bc   : > { %4017 = vpow2.f32 %v2074_v63  ;;  %v1374_v56 = vcombine.low %v4787_v27, %v1363_v9  ;;  %v1375_v57 = vcombine.high %v4787_v27, %v1363_v9 }
 0x4be   : > { %v4812_v7 = vpop.eup %4013  ;;  %v1382_v24 = vrot.slane %v1374_v56, %v4616_v21  ;;  %v1389_v25 = vrot.slane %v1375_v57, %v4616_v21 }
 0x4bf   : > { %v2088_v60 = vsel %vm2039_vm2, %v4812_v7, 0.0  ;;  %v2048_v61 = vpop.xlane.xlu0 %2047  ;;  %v1369_v16 = vpop.permute.xlu1 %1368 }
 0x4c0   : > { %2089 = vadd.xlane.f32.xlu0 %v2088_v60  ;;  %v2066_v53 = vsub.f32 %v2033_v23, %v2048_v61 }
 0x4c2   : > { %v4816_v5 = vpop.eup %4015  ;;  %v2076_v8 = vmul.f32 1.442695, %v2066_v53 }
 0x4c3   : > { %v2100_v4 = vsel %vm2039_vm2, %v4816_v5, 0.0 }
 0x4c4   : > { %4019 = vpow2.f32 %v2076_v8  ;;  %2101 = vadd.xlane.f32.xlu0 %v2100_v4 }
 0x4c6   : > { %v4820_v10 = vpop.eup %4017 }
 0x4c7   : > { %v2091_v13 = vsel %vm2039_vm2, %v4820_v10, 0.0  ;;  %v2051_v1 = vpop.xlane.xlu0 %2050 }
 0x4c8   : > { %2092 = vadd.xlane.f32.xlu1 %v2091_v13  ;;  %v2067_v2 = vsub.f32 %v2034_v44, %v2051_v1  ;;  %v2070_v1 = vsub.f32 %v4779_v14, %v4810_v3 }
 0x4ca   : > { %v2078_v15 = vmul.f32 1.442695, %v2067_v2 }
 0x4cb   : > { %v1357_v22 = vpop.permute.xlu0 %1356 }
 0x4cc   : > { %4021 = vpow2.f32 %v2078_v15  ;;  %v1390_v58 = vcombine.low %v1357_v22, %v1369_v16  ;;  %v1391_v59 = vcombine.high %v1357_v22, %v1369_v16  ;;  %v2084_v15 = vmul.f32 1.442695, %v2070_v1 }
 0x4ce   : > { %v4826_v23 = vpop.eup %4019  ;;  %v1398_v26 = vrot.slane %v1390_v58, %v4616_v21  ;;  %v1405_v11 = vrot.slane %v1391_v59, %v4616_v21 }
 0x4cf   : > { %v2094_v41 = vsel %vm2039_vm2, %v4826_v23, 0.0 }
 0x4d0   : > { %v1406_v42 = vcombine.low %v1382_v24, %v1398_v26  ;;  %v1407_v43 = vcombine.high %v1382_v24, %v1398_v26  ;;  %v1422_v44 = vcombine.low %v1389_v25, %v1405_v11  ;;  %v1423_v17 = vcombine.high %v1389_v25, %v1405_v11  ;;  %2095 = vadd.xlane.f32.xlu1 %v2094_v41 }
 0x4d2   : > { %v1414_v18 = vrot.slane %v1406_v42, %v4619_v28  ;;  %v1421_v27 = vrot.slane %v1407_v43, %v4619_v28  ;;  %v1430_v29 = vrot.slane %v1422_v44, %v4619_v28  ;;  %v1437_v30 = vrot.slane %v1423_v17, %v4619_v28 }
 0x4d4   : > { %v1510_v31 = vcombine.low %v1414_v18, %v1421_v27  ;;  %v3560_v33 = vcombine.high %v1414_v18, %v1421_v27  ;;  %v1526_v47 = vcombine.low %v1430_v29, %v1437_v30  ;;  %v3561_v34 = vcombine.high %v1430_v29, %v1437_v30 }
 0x4d6   : > { %v4838_v35 = vpop.eup %4021  ;;  %v1517_v36 = vrot.slane %v1510_v31, %v4616_v21  ;;  %v1525_v37 = vrot.slane %v3560_v33, %v4616_v21  ;;  %v1533_v38 = vrot.slane %v1526_v47, %v4616_v21  ;;  %v1541_v39 = vrot.slane %v3561_v34, %v4616_v21 }
 0x4d7   : > { %v2097_v40 = vsel %vm2039_vm2, %v4838_v35, 0.0 }
 0x4d8   : > { %2098 = vadd.xlane.f32.xlu0 %v2097_v40  ;;  %v1542_v20 = vcombine.low %v1517_v36, %v1525_v37  ;;  %v1558_v48 = vcombine.low %v1533_v38, %v1541_v39  ;;  %v1543_v49 = vcombine.high %v1517_v36, %v1525_v37  ;;  %v1559_v50 = vcombine.high %v1533_v38, %v1541_v39 }
 0x4da   : > { %v1550_v52 = vrot.slane %v1542_v20, %v4619_v28  ;;  %v1566_v54 = vrot.slane %v1558_v48, %v4619_v28  ;;  %v1557_v55 = vrot.slane %v1543_v49, %v4619_v28  ;;  %v1573_v62 = vrot.slane %v1559_v50, %v4619_v28 }
 0x4dc   : > { %v1574_v63 = vcombine.low %v1550_v52, %v1566_v54  ;;  %v1575_v60 = vcombine.high %v1550_v52, %v1566_v54  ;;  %v1576_v61 = vcombine.low %v1557_v55, %v1573_v62  ;;  %v1577_v53 = vcombine.high %v1557_v55, %v1573_v62 }
 0x4de   : > { %v2136_v8 = vpack.c.bf16 %v1574_v63, %v1574_v63  ;;  %v2137_v4 = vpack.c.bf16 %v1575_v60, %v1575_v60  ;;  %v2138_v44 = vpack.c.bf16 %v1576_v61, %v1576_v61  ;;  %v2139_v31 = vpack.c.bf16 %v1577_v53, %v1577_v53 }
 0x4e0   : > { %v2149_v9 = vsel %vm2147_vm3, %v2136_v8, 0  ;;  %v2195_v13 = vsel %vm2147_vm3, %v2137_v4, 0  ;;  %v2287_v33 = vsel %vm2147_vm3, %v2139_v31, 0 }
 0x4e1   : > { %3776 = vmatpush3.bf16.msra.mxu0 %v2149_v9  ;;  %3782 = vmatpush3.bf16.msra.mxu1 %v2195_v13 }
 0x4e2   : > { %1370 = vrot.lane.b32.xlu1 %v4805_v19, %s4237_s22  ;;  %3787 = vmatprep.subr.bf16.mxu0 %v4232_v6 }
 0x4e3   : > { %3793 = vmatprep.subr.bf16.mxu1 %v4232_v6 }
 0x4f0   : > { %v2057_v2 = vpop.xlane.xlu1 %2056 }
 0x4f1   : > { %v2069_v56 = vsub.f32 %v4796_v0, %v2057_v2 }
 0x4f3   : > { %v2082_v57 = vmul.f32 1.442695, %v2069_v56 }
 0x4f4   : > { %v2063_v14 = vpop.xlane.xlu1 %2062 }
 0x4f5   : > { %4023 = vpow2.f32 %v2082_v57  ;;  %v2071_v0 = vsub.f32 %v4798_v12, %v2063_v14  ;;  %v2241_v12 = vsel %vm2147_vm3, %v2138_v44, 0 }
 0x4f6   : > { %4025 = vpow2.f32 %v2084_v15 }
 0x4f7   : > { %v2086_v3 = vmul.f32 1.442695, %v2071_v0 }
 0x4f8   : > { %v1359_v11 = vpop.permute.xlu1 %1358 }
 0x4f9   : > { %4027 = vpow2.f32 %v2086_v3 }
 0x4ff   : > { %v4859_v16 = vpop.eup %4023 }
 0x500   : > { %v2103_v22 = vsel %vm2039_vm2, %v4859_v16, 0.0  ;;  %v4863_v58 = vpop.eup %4025 }
 0x501   : > { %2104 = vadd.xlane.f32.xlu0 %v2103_v22  ;;  %v2106_v59 = vsel %vm2039_vm2, %v4863_v58, 0.0 }
 0x503   : > { %v4870_v24 = vpop.eup %4027 }
 0x504   : > { %v2109_v25 = vsel %vm2039_vm2, %v4870_v24, 0.0 }
 0x506   : > { %2107 = vadd.xlane.f32.xlu1 %v2106_v59 }
 0x517   : > { %1364 = vrot.lane.b32.xlu0 %v4805_v19, %s4235_s23 }
 0x536   : > { %2110 = vadd.xlane.f32.xlu0 %v2109_v25 }
 0x54d   : > { %v2090_v26 = vpop.xlane.xlu0 %2089 }
 0x54e   : > { %4029 = vrcp.f32 %v2090_v26 }
 0x551   : > { %v2102_v30 = vpop.xlane.xlu0 %2101 }
 0x555   : > { %v2093_v41 = vpop.xlane.xlu1 %2092 }
 0x556   : > { %4031 = vrcp.f32 %v2093_v41 }
 0x558   : > { %v4030_v42 = vpop.eup %4029 }
 0x559   : > { %v2120_v43 = vmul.f32 %v4030_v42, %v4812_v7 }
 0x55b   : > { %v2128_v17 = vpack.c.bf16 %v2120_v43, %v2120_v43 }
 0x55d   : > { %3778 = vmatmul.mubr.msk.bf16.vlgmr.msra.gmra.mrb[12].mxu0 %vm2039_vm2, %v2128_v17  ;;  %v2096_v18 = vpop.xlane.xlu1 %2095 }
 0x55e   : > { %3788 = vmatpush3.bf16.msra.mxu0 %v2241_v12  ;;  %4033 = vrcp.f32 %v2096_v18  ;;  %3789 = vmatprep.mubr.msk.bf16.mxu0 %vm4234_vm0, %v4232_v6 }
 0x55f   : > { %3799 = vmatprep.subr.bf16.mxu0 %v4232_v6 }
 0x560   : > { %v4032_v27 = vpop.eup %4031 }
 0x561   : > { %v2121_v29 = vmul.f32 %v4032_v27, %v4820_v10  ;;  %v1371_v40 = vpop.permute.xlu1 %1370 }
 0x562   : > { %v1458_v48 = vcombine.low %v1359_v11, %v1371_v40  ;;  %v1459_v49 = vcombine.high %v1359_v11, %v1371_v40 }
 0x563   : > { %v2129_v7 = vpack.c.bf16 %v2121_v29, %v2121_v29 }
 0x564   : > { %v1466_v54 = vrot.slane %v1458_v48, %v4616_v21  ;;  %v1473_v55 = vrot.slane %v1459_v49, %v4616_v21 }
 0x565   : > { %3784 = vmatmul.mubr.msk.bf16.vlgmr.msra.gmra.mrb[28].mxu1 %vm2039_vm2, %v2129_v7  ;;  %v2099_v47 = vpop.xlane.xlu0 %2098 }
 0x566   : > { %3794 = vmatpush3.bf16.msra.mxu1 %v2287_v33  ;;  %4035 = vrcp.f32 %v2099_v47  ;;  %3795 = vmatprep.mubr.msk.bf16.mxu1 %vm4234_vm0, %v4232_v6 }
 0x567   : > { %3805 = vmatprep.subr.bf16.mxu1 %v4232_v6  ;;  %4037 = vrcp.f32 %v2102_v30 }
 0x568   : > { %v4034_v34 = vpop.eup %4033 }
 0x569   : > { %v2122_v36 = vmul.f32 %v4034_v34, %v4826_v23 }
 0x56b   : > { %v2130_v37 = vpack.c.bf16 %v2122_v36, %v2122_v36 }
 0x56d   : > { %3790 = vmatmul.mubr.msk.bf16.vlgmr.msra.gmra.mrb[16].mxu0 %vm2039_vm2, %v2130_v37 }
 0x56e   : > { %3801 = vmatprep.mubr.msk.bf16.mxu0 %vm4234_vm0, %v4232_v6 }
 0x570   : > { %v4036_v10 = vpop.eup %4035 }
 0x571   : > { %v2123_v38 = vmul.f32 %v4036_v10, %v4838_v35  ;;  %v4038_v26 = vpop.eup %4037 }
 0x572   : > { %v2124_v30 = vmul.f32 %v4038_v26, %v4816_v5 }
 0x573   : > { %v2131_v39 = vpack.c.bf16 %v2123_v38, %v2123_v38 }
 0x574   : > { %v2132_v10 = vpack.c.bf16 %v2124_v30, %v2124_v30 }
 0x575   : > { %3796 = vmatmul.mubr.msk.bf16.vlgmr.msra.gmra.mrb[32].mxu1 %vm2039_vm2, %v2131_v39 }
 0x576   : > { %3807 = vmatprep.mubr.msk.bf16.mxu1 %vm4234_vm0, %v4232_v6 }
 0x58e   : > { %v2105_v20 = vpop.xlane.xlu0 %2104 }
 0x58f   : > { %4039 = vrcp.f32 %v2105_v20 }
 0x592   : > { %v1365_v23 = vpop.permute.xlu0 %1364 }
 0x593   : > { %v1442_v50 = vcombine.low %v4805_v19, %v1365_v23  ;;  %v1443_v52 = vcombine.high %v4805_v19, %v1365_v23  ;;  %v2108_v14 = vpop.xlane.xlu1 %2107 }
 0x594   : > { %4041 = vrcp.f32 %v2108_v14 }
 0x595   : > { %v1450_v35 = vrot.slane %v1442_v50, %v4616_v21  ;;  %v1457_v62 = vrot.slane %v1443_v52, %v4616_v21 }
 0x597   : > { %v1474_v63 = vcombine.low %v1450_v35, %v1466_v54  ;;  %v1475_v60 = vcombine.high %v1450_v35, %v1466_v54  ;;  %v1490_v61 = vcombine.low %v1457_v62, %v1473_v55  ;;  %v1491_v53 = vcombine.high %v1457_v62, %v1473_v55 }
 0x599   : > { %v1482_v8 = vrot.slane %v1474_v63, %v4619_v28  ;;  %v1489_v4 = vrot.slane %v1475_v60, %v4619_v28  ;;  %v1498_v19 = vrot.slane %v1490_v61, %v4619_v28  ;;  %v1505_v9 = vrot.slane %v1491_v53, %v4619_v28  ;;  %v4040_v44 = vpop.eup %4039  ;;  %v3961_v61 = vld [vmem:[%s4477_s20] sm:$0xff]  }
 0x59a   : > { %v2125_v31 = vmul.f32 %v4040_v44, %v4859_v16 }
 0x59b   : > { %v1578_v13 = vcombine.low %v1482_v8, %v1489_v4  ;;  %v3562_v1 = vcombine.high %v1482_v8, %v1489_v4  ;;  %v1594_v2 = vcombine.low %v1498_v19, %v1505_v9  ;;  %v3563_v56 = vcombine.high %v1498_v19, %v1505_v9  ;;  %v3962_v19 = vld [vmem:[%s4477_s20 + $0x8] sm:$0xff]  }
 0x59c   : > { %v2133_v38 = vpack.c.bf16 %v2125_v31, %v2125_v31 }
 0x59d   : > { %v1585_v57 = vrot.slane %v1578_v13, %v4616_v21  ;;  %v1593_v15 = vrot.slane %v3562_v1, %v4616_v21  ;;  %v1601_v22 = vrot.slane %v1594_v2, %v4616_v21  ;;  %v1609_v59 = vrot.slane %v3563_v56, %v4616_v21  ;;  %v3963_v13 = vld [vmem:[%s4477_s20 + $0x10] sm:$0xff]  }
 0x59e   : > { %v4042_v39 = vpop.eup %4041 }
 0x59f   : > { %v1610_v0 = vcombine.low %v1585_v57, %v1593_v15  ;;  %v1626_v3 = vcombine.low %v1601_v22, %v1609_v59  ;;  %v1611_v25 = vcombine.high %v1585_v57, %v1593_v15  ;;  %v1627_v11 = vcombine.high %v1601_v22, %v1609_v59  ;;  %v3964_v15 = vld [vmem:[%s4477_s20 + $0x18] sm:$0xff]  }
 0x5a0   : > { %v2126_v40 = vmul.f32 %v4042_v39, %v4863_v58 }
 0x5a1   : > { %v1618_v41 = vrot.slane %v1610_v0, %v4619_v28  ;;  %v1634_v42 = vrot.slane %v1626_v3, %v4619_v28  ;;  %v1625_v43 = vrot.slane %v1611_v25, %v4619_v28  ;;  %v1641_v17 = vrot.slane %v1627_v11, %v4619_v28 }
 0x5a2   : > { %v2134_v20 = vpack.c.bf16 %v2126_v40, %v2126_v40 }
 0x5a3   : > { %v1642_v12 = vcombine.low %v1618_v41, %v1634_v42  ;;  %v1643_v18 = vcombine.high %v1618_v41, %v1634_v42  ;;  %v1644_v27 = vcombine.low %v1625_v43, %v1641_v17  ;;  %v1645_v29 = vcombine.high %v1625_v43, %v1641_v17  ;;  %v3965_v43 = vld [vmem:[%s4477_s20 + $0x20] sm:$0xff]  }
 0x5a5   : > { %v2140_v7 = vpack.c.bf16 %v1642_v12, %v1642_v12  ;;  %v2141_v33 = vpack.c.bf16 %v1643_v18, %v1643_v18  ;;  %v2142_v36 = vpack.c.bf16 %v1644_v27, %v1644_v27  ;;  %v2143_v37 = vpack.c.bf16 %v1645_v29, %v1645_v29 }
 0x5a7   : > { %v2333_v47 = vsel %vm2147_vm3, %v2140_v7, 0  ;;  %v2379_v34 = vsel %vm2147_vm3, %v2141_v33, 0  ;;  %v2425_v5 = vsel %vm2147_vm3, %v2142_v36, 0  ;;  %v2471_v16 = vsel %vm2147_vm3, %v2143_v37, 0  ;;  %v3966_v7 = vld [vmem:[%s4477_s20 + $0x28] sm:$0xff]  }
 0x5a8   : > { %3800 = vmatpush3.bf16.msra.mxu0 %v2333_v47  ;;  %3806 = vmatpush3.bf16.msra.mxu1 %v2379_v34 }
 0x5a9   : > { %3811 = vmatprep.subr.bf16.mxu0 %v4232_v6  ;;  %3817 = vmatprep.subr.bf16.mxu1 %v4232_v6 }
 0x5ab   : > { %3802 = vmatmul.mubr.msk.bf16.vlgmr.msra.gmra.mrb[20].mxu0 %vm2039_vm2, %v2132_v10  ;;  %3808 = vmatmul.mubr.msk.bf16.vlgmr.msra.gmra.mrb[36].mxu1 %vm2039_vm2, %v2133_v38 }
 0x5ac   : > { %3812 = vmatpush3.bf16.msra.mxu0 %v2425_v5  ;;  %3818 = vmatpush3.bf16.msra.mxu1 %v2471_v16 }
 0x5ad   : > { %3813 = vmatprep.mubr.msk.bf16.mxu0 %vm4234_vm0, %v4232_v6  ;;  %3819 = vmatprep.mubr.msk.bf16.mxu1 %vm4234_vm0, %v4232_v6 }
 0x5ae   : > { %3823 = vmatprep.subr.bf16.mxu0 %v4232_v6 }
 0x5b3   : > { %3814 = vmatmul.mubr.msk.bf16.vlgmr.msra.gmra.mrb[24].mxu0 %vm2039_vm2, %v2134_v20 }
 0x5b4   : > { %3839 = vmatprep.mubr.msk.bf16.mxu0 %vm4234_vm0, %v4232_v6  ;;  %3824 = vmatpush3.bf16.msra.mxu0 %v3961_v61 }
 0x5b5   : > { %3825 = vmatprep.subr.bf16.mxu0 %v4232_v6 }
 0x5b8   : > { %3826 = vmatpush3.bf16.msra.mxu0 %v3962_v19 }
 0x5b9   : > { %3827 = vmatprep.subr.bf16.mxu0 %v4232_v6 }
 0x5bc   : > { %3828 = vmatpush3.bf16.msra.mxu0 %v3963_v13 }
 0x5bd   : > { %3829 = vmatprep.subr.bf16.mxu0 %v4232_v6 }
 0x5c0   : > { %3830 = vmatpush3.bf16.msra.mxu0 %v3964_v15 }
 0x5c1   : > { %3831 = vmatprep.subr.bf16.mxu0 %v4232_v6 }
 0x5c3   : > { %v2111_v48 = vpop.xlane.xlu0 %2110 }
 0x5c4   : > { %4043 = vrcp.f32 %v2111_v48  ;;  %3832 = vmatpush3.bf16.msra.mxu0 %v3965_v43 }
 0x5c5   : > { %3833 = vmatprep.subr.bf16.mxu0 %v4232_v6 }
 0x5c8   : > { %3834 = vmatpush3.bf16.msra.mxu0 %v3966_v7 }
 0x5c9   : > { %3835 = vmatprep.subr.bf16.mxu0 %v4232_v6 }
 0x5ce   : > { %v4044_v49 = vpop.eup %4043 }
 0x5cf   : > { %v2127_v58 = vmul.f32 %v4044_v49, %v4870_v24 }
 0x5d1   : > { %v2135_v23 = vpack.c.bf16 %v2127_v58, %v2127_v58 }
 0x5d3   : > { %3820 = vmatmul.mubr.msk.bf16.vlgmr.msra.gmra.mrb[40].mxu1 %vm2039_vm2, %v2135_v23 }
 0x5d4   : > { %3106 = vmatprep.mubr.bf16.mxu1 %v4233_v32 }
 0x630   : > { %v2185_v50 = vpop.f32.mrb[12].mxu0 }
 0x631   : > { %v3779_v52 = vpop.f32.mrb[13].mxu0 }
 0x632   : > { %v2188_v54 = vpop.f32.mrb[14].mxu0 }
 0x633   : > { %v3780_v55 = vpop.f32.mrb[15].mxu0 }
 0x638   : > { %v2231_v35 = vpop.f32.mrb[28].mxu1 }
 0x639   : > { %v3785_v62 = vpop.f32.mrb[29].mxu1 }
 0x63a   : > { %v2234_v63 = vpop.f32.mrb[30].mxu1 }
 0x63b   : > { %v3786_v60 = vpop.f32.mrb[31].mxu1 }
 0x640   : > { %v2277_v53 = vpop.f32.mrb[16].mxu0 }
 0x641   : > { %v2513_v8 = vcombine.low %v2185_v50, %v2277_v53  ;;  %v2514_v24 = vcombine.high %v2185_v50, %v2277_v53  ;;  %v3791_v4 = vpop.f32.mrb[17].mxu0 }
 0x642   : > { %v2280_v9 = vpop.f32.mrb[18].mxu0 }
 0x643   : > { %v3792_v32 = vpop.f32.mrb[19].mxu0  ;;  %v2521_v59 = vrot.slane %v2513_v8, %v4616_v21  ;;  %v2528_v14 = vrot.slane %v2514_v24, %v4616_v21 }
 0x648   : > { %v2323_v1 = vpop.f32.mrb[32].mxu1 }
 0x649   : > { %v2529_v2 = vcombine.low %v2231_v35, %v2323_v1  ;;  %v2530_v56 = vcombine.high %v2231_v35, %v2323_v1  ;;  %v3797_v57 = vpop.f32.mrb[33].mxu1 }
 0x64a   : > { %v2326_v22 = vpop.f32.mrb[34].mxu1 }
 0x64b   : > { %v2537_v0 = vrot.slane %v2529_v2, %v4616_v21  ;;  %v2544_v3 = vrot.slane %v2530_v56, %v4616_v21  ;;  %v3798_v25 = vpop.f32.mrb[35].mxu1 }
 0x64d   : > { %v2545_v26 = vcombine.low %v2521_v59, %v2537_v0  ;;  %v2546_v11 = vcombine.high %v2521_v59, %v2537_v0  ;;  %v2561_v41 = vcombine.low %v2528_v14, %v2544_v3  ;;  %v2562_v42 = vcombine.high %v2528_v14, %v2544_v3 }
 0x64f   : > { %v2553_v44 = vrot.slane %v2545_v26, %v4619_v28  ;;  %v2560_v17 = vrot.slane %v2546_v11, %v4619_v28  ;;  %v2569_v12 = vrot.slane %v2561_v41, %v4619_v28  ;;  %v2576_v18 = vrot.slane %v2562_v42, %v4619_v28 }
 0x651   : > { %v2649_v27 = vcombine.low %v2553_v44, %v2560_v17  ;;  %v3580_v29 = vcombine.high %v2553_v44, %v2560_v17  ;;  %v2665_v30 = vcombine.low %v2569_v12, %v2576_v18  ;;  %v3581_v31 = vcombine.high %v2569_v12, %v2576_v18  ;;  %v3967_v18 = vld [vmem:[%s4477_s20 + $0x30] sm:$0xff]  }
 0x652   : > { %3836 = vmatpush3.bf16.msra.mxu0 %v3967_v18 }
 0x653   : > { %v2656_v33 = vrot.slane %v2649_v27, %v4616_v21  ;;  %v2664_v47 = vrot.slane %v3580_v29, %v4616_v21  ;;  %v2672_v34 = vrot.slane %v2665_v30, %v4616_v21  ;;  %v2680_v36 = vrot.slane %v3581_v31, %v4616_v21  ;;  %3837 = vmatprep.subr.bf16.mxu0 %v4232_v6 }
 0x655   : > { %v2682_v37 = vcombine.high %v2656_v33, %v2664_v47  ;;  %v2698_v10 = vcombine.high %v2672_v34, %v2680_v36  ;;  %v2681_v38 = vcombine.low %v2656_v33, %v2664_v47  ;;  %v2697_v39 = vcombine.low %v2672_v34, %v2680_v36 }
 0x657   : > { %v4959_v5 = vrot.slane %v2682_v37, %v4619_v28  ;;  %v4962_v16 = vrot.slane %v2698_v10, %v4619_v28  ;;  %v4965_v40 = vrot.slane %v2681_v38, %v4619_v28  ;;  %v4968_v20 = vrot.slane %v2697_v39, %v4619_v28  ;;  %v3968_v39 = vld [vmem:[%s4477_s20 + $0x38] sm:$0xff]  }
 0x658   : > { %3838 = vmatpush3.bf16.msra.mxu0 %v3968_v39 }
 0x659   : > { %v2715_v48 = vcombine.low %v4959_v5, %v4962_v16  ;;  %v2713_v49 = vcombine.low %v4965_v40, %v4968_v20  ;;  %v2714_v58 = vcombine.high %v4965_v40, %v4968_v20  ;;  %v2716_v23 = vcombine.high %v4959_v5, %v4962_v16  ;;  %v5007_v40 = vld [vmem:[%s4511_s25] sm:$0xff] }
 0x67e   : > { %v2369_v50 = vpop.f32.mrb[20].mxu0  ;;  %v2415_v52 = vpop.f32.mrb[36].mxu1 }
 0x67f   : > { %v3803_v54 = vpop.f32.mrb[21].mxu0  ;;  %v3809_v55 = vpop.f32.mrb[37].mxu1 }
 0x680   : > { %v2372_v35 = vpop.f32.mrb[22].mxu0  ;;  %v2418_v62 = vpop.f32.mrb[38].mxu1 }
 0x681   : > { %v3804_v63 = vpop.f32.mrb[23].mxu0  ;;  %v3810_v60 = vpop.f32.mrb[39].mxu1 }
 0x686   : > { %v2461_v61 = vpop.f32.mrb[24].mxu0 }
 0x687   : > { %v2581_v53 = vcombine.low %v2369_v50, %v2461_v61  ;;  %v2582_v8 = vcombine.high %v2369_v50, %v2461_v61  ;;  %v3815_v24 = vpop.f32.mrb[25].mxu0 }
 0x688   : > { %v2464_v4 = vpop.f32.mrb[26].mxu0 }
 0x689   : > { %v3816_v19 = vpop.f32.mrb[27].mxu0  ;;  %v2589_v56 = vrot.slane %v2581_v53, %v4616_v21  ;;  %v2596_v57 = vrot.slane %v2582_v8, %v4616_v21 }
 0x6a6   : > { %v2507_v9 = vpop.f32.mrb[40].mxu1 }
 0x6a7   : > { %v2597_v32 = vcombine.low %v2415_v52, %v2507_v9  ;;  %v2598_v13 = vcombine.high %v2415_v52, %v2507_v9  ;;  %v3821_v1 = vpop.f32.mrb[41].mxu1 }
 0x6a8   : > { %v2510_v2 = vpop.f32.mrb[42].mxu1 }
 0x6a9   : > { %v2605_v15 = vrot.slane %v2597_v32, %v4616_v21  ;;  %v2612_v22 = vrot.slane %v2598_v13, %v4616_v21  ;;  %v3822_v59 = vpop.f32.mrb[43].mxu1  ;;  %v2927_v32 = vsub.s32 7, %v4566_v45  ;;  %v4058_v13 = vld [vmem:[#allocation2] sm:$0xff] }
 0x6ab   : > { %v2613_v14 = vcombine.low %v2589_v56, %v2605_v15  ;;  %v2614_v0 = vcombine.high %v2589_v56, %v2605_v15  ;;  %v2629_v3 = vcombine.low %v2596_v57, %v2612_v22  ;;  %v2630_v25 = vcombine.high %v2596_v57, %v2612_v22  ;;  %v4059_v15 = vld [vmem:[#allocation2 + $0x8] sm:$0xff] }
 0x6ac   : > { %v2928_v20 = vrot.slane %v5007_v40, %v2927_v32  ;;  %v3998_v32 = vld [vmem:[%s4484_s19 + $0x10] sm:$0xff]  }
 0x6ad   : > { %v2621_v26 = vrot.slane %v2613_v14, %v4619_v28  ;;  %v2628_v11 = vrot.slane %v2614_v0, %v4619_v28  ;;  %v2637_v41 = vrot.slane %v2629_v3, %v4619_v28  ;;  %v2644_v42 = vrot.slane %v2630_v25, %v4619_v28  ;;  %v3969_v0 = vld [vmem:[%s4501_s11] ss:$8 sps:$4 sm:$0xff]   ;;  %v3971_v3 = vld [vmem:[%s4501_s11 + $0x4] ss:$8 sps:$4 sm:$0xff]   ;;  %v3974_v25 = vld [vmem:[%s4501_s11 + $0x14] ss:$8 sps:$4 sm:$0xff]  }
 0x6ae   : > { %3074 = vmatprep.subr.bf16.mxu1 %v3971_v3 }
 0x6af   : > { %v2717_v43 = vcombine.low %v2621_v26, %v2628_v11  ;;  %v3582_v44 = vcombine.high %v2621_v26, %v2628_v11  ;;  %v2733_v17 = vcombine.low %v2637_v41, %v2644_v42  ;;  %v3583_v12 = vcombine.high %v2637_v41, %v2644_v42  ;;  %3075 = vmatpush1.bf16.msra.mxu1 %v3969_v0  ;;  %v3972_v26 = vld [vmem:[%s4501_s11 + $0x10] ss:$8 sps:$4 sm:$0xff]  }
 0x6b0   : > { %3076 = vmatprep.subr.bf16.mxu1 %v3974_v25  ;;  %v2982_v0 = vld [vmem:[%s4490_s18] sm:$0x3] }
 0x6b1   : > { %v2724_v27 = vrot.slane %v2717_v43, %v4616_v21  ;;  %v2732_v29 = vrot.slane %v3582_v44, %v4616_v21  ;;  %v2740_v30 = vrot.slane %v2733_v17, %v4616_v21  ;;  %v2748_v31 = vrot.slane %v3583_v12, %v4616_v21 }
 0x6b2   : > { %v2987_v3 = vrot.slane %v2982_v0, %v497_v46  ;;  %v2991_v25 = vrot.slane %v2982_v0, %v503_v51 }
 0x6b3   : > { %v2750_v7 = vcombine.high %v2724_v27, %v2732_v29  ;;  %v2766_v33 = vcombine.high %v2740_v30, %v2748_v31  ;;  %v2749_v47 = vcombine.low %v2724_v27, %v2732_v29  ;;  %v2765_v34 = vcombine.low %v2740_v30, %v2748_v31  ;;  %3077 = vmatpush1.bf16.msra.mxu1 %v3972_v26  ;;  %v3977_v27 = vld [vmem:[%s4501_s11 + $0x24] ss:$8 sps:$4 sm:$0xff]   ;;  %v3975_v29 = vld [vmem:[%s4501_s11 + $0x20] ss:$8 sps:$4 sm:$0xff]   ;;  %v3980_v30 = vld [vmem:[%s4501_s11 + $0x34] ss:$8 sps:$4 sm:$0xff]  }
 0x6b4   : > { %3078 = vmatprep.subr.bf16.mxu1 %v3977_v27  ;;  %v3978_v31 = vld [vmem:[%s4501_s11 + $0x30] ss:$8 sps:$4 sm:$0xff]  }
 0x6b5   : > { %v2764_v36 = vrot.slane %v2750_v7, %v4619_v28  ;;  %v2780_v37 = vrot.slane %v2766_v33, %v4619_v28  ;;  %v2757_v10 = vrot.slane %v2749_v47, %v4619_v28  ;;  %v2773_v38 = vrot.slane %v2765_v34, %v4619_v28  ;;  %v3981_v7 = vld [vmem:[%s4501_s11 + $0x40] ss:$8 sps:$4 sm:$0xff]   ;;  %v3983_v33 = vld [vmem:[%s4501_s11 + $0x44] ss:$8 sps:$4 sm:$0xff]   ;;  %v3986_v47 = vld [vmem:[%s4501_s11 + $0x54] ss:$8 sps:$4 sm:$0xff]  }
 0x6b6   : > { %v3984_v34 = vld [vmem:[%s4501_s11 + $0x50] ss:$8 sps:$4 sm:$0xff]  }
 0x6b7   : > { %v2783_v5 = vcombine.low %v2764_v36, %v2780_v37  ;;  %v2782_v16 = vcombine.high %v2757_v10, %v2773_v38  ;;  %v2781_v50 = vcombine.low %v2757_v10, %v2773_v38  ;;  %v2784_v21 = vcombine.high %v2764_v36, %v2780_v37  ;;  %3079 = vmatpush1.bf16.msra.mxu1 %v3975_v29  ;;  %v3989_v36 = vld [vmem:[%s4501_s11 + $0x64] ss:$8 sps:$4 sm:$0xff]   ;;  %v3987_v37 = vld [vmem:[%s4501_s11 + $0x60] ss:$8 sps:$4 sm:$0xff]   ;;  %v3992_v10 = vld [vmem:[%s4501_s11 + $0x74] ss:$8 sps:$4 sm:$0xff]  }
 0x6b8   : > { %3080 = vmatprep.subr.bf16.mxu1 %v3980_v30  ;;  %v3990_v38 = vld [vmem:[%s4501_s11 + $0x70] ss:$8 sps:$4 sm:$0xff]  }
 0x6b9   : > { %v3919_v52 = vpack.i.bf16 %v2783_v5, %v2715_v48  ;;  %v3914_v54 = vpack.i.bf16 %v2782_v16, %v2714_v58  ;;  %v3924_v55 = vpack.i.bf16 %v2784_v21, %v2716_v23 }
 0x6bb   : > { %3920 = vrot.lane.b32.xlu1 %v3919_v52, %s4235_s23  ;;  %3915 = vrot.lane.b32.xlu0 %v3914_v54, %s4237_s22  ;;  %v2955_v54 = vsub.s32 2, %v4566_v45 }
 0x6bc   : > { %3081 = vmatpush1.bf16.msra.mxu1 %v3978_v31 }
 0x6bd   : > { %3082 = vmatprep.subr.bf16.mxu1 %v3983_v33 }
 0x6bf   : > { %3925 = vrot.lane.b32.xlu1 %v3924_v55, %s4236_s16 }
 0x6c0   : > { %3083 = vmatpush1.bf16.msra.mxu1 %v3981_v7 }
 0x6c1   : > { %3084 = vmatprep.subr.bf16.mxu1 %v3986_v47 }
 0x6c4   : > { %3085 = vmatpush1.bf16.msra.mxu1 %v3984_v34 }
 0x6c5   : > { %3086 = vmatprep.subr.bf16.mxu1 %v3989_v36 }
 0x6c8   : > { %3087 = vmatpush1.bf16.msra.mxu1 %v3987_v37 }
 0x6c9   : > { %3088 = vmatprep.subr.bf16.mxu1 %v3992_v10 }
 0x6cc   : > { %3089 = vmatpush1.bf16.msra.mxu1 %v3990_v38 }
 0x72d   : > { %v3921_v6 = vpop.permute.xlu1 %3920  ;;  %v3916_v35 = vpop.permute.xlu0 %3915 }
 0x72e   : > { %v3918_v62 = vunpack.i.h.bf16 %v3916_v35  ;;  %v3917_v63 = vunpack.i.l.bf16 %v3916_v35  ;;  %v3923_v28 = vunpack.i.h.bf16 %v3921_v6  ;;  %v3922_v60 = vunpack.i.l.bf16 %v3921_v6 }
 0x72f   : > { %v2956_v35 = vrot.slane %v5007_v40, %v2955_v54 }
 0x730   : > { %v2809_v48 = vsel %vm1662_vm1, %v2713_v49, %v3917_v63  ;;  %v2810_v58 = vsel %vm1662_vm1, %v2781_v50, %v3918_v62  ;;  %v2961_v62 = vsub.s32 3, %v4566_v45 }
 0x731   : > { %v3926_v23 = vpop.permute.xlu1 %3925  ;;  %v2812_v8 = vsel %vm2811_vm4, %v2809_v48, %v3922_v60  ;;  %v2813_v24 = vsel %vm2811_vm4, %v2810_v58, %v3923_v28 }
 0x732   : > { %v3928_v61 = vunpack.i.h.bf16 %v3926_v23  ;;  %v3927_v53 = vunpack.i.l.bf16 %v3926_v23  ;;  %v2962_v48 = vrot.slane %v5007_v40, %v2961_v62  ;;  %v3999_v40 = vld [vmem:[%s4484_s19 + $0x58] sm:$0xff]  }
 0x734   : > { %v2815_v4 = vsel %vm2814_vm5, %v2812_v8, %v3927_v53  ;;  %v2816_v19 = vsel %vm2814_vm5, %v2813_v24, %v3928_v61  ;;  %v3993_v8 = vld [vmem:[%s4484_s19 + $0x40] sm:$0xff]  }
 0x735   : > { %v2833_v9 = vpack.c.bf16 %v2816_v19, %v2815_v4  ;;  %v3994_v24 = vld [vmem:[%s4484_s19] sm:$0xff]   ;;  %3685 = vmatprep.subr.bf16.mxu0 %v3993_v8  ;;  %v3995_v4 = vld [vmem:[%s4484_s19 + $0x48] sm:$0xff]  }
 0x736   : > { %v3996_v19 = vld [vmem:[%s4484_s19 + $0x8] sm:$0xff]  }
 0x737   : > { %3840 = vmatmul.mubr.bf16.vlgmr.msra.gmra.mrb[28].mxu0 %v2833_v9  ;;  %v3997_v9 = vld [vmem:[%s4484_s19 + $0x50] sm:$0xff]  }
 0x738   : > { %3686 = vmatpush3.bf16.msra.mxu0 %v3994_v24 }
 0x739   : > { %3687 = vmatprep.subr.bf16.mxu0 %v3995_v4 }
 0x73c   : > { %3688 = vmatpush3.bf16.msra.mxu0 %v3996_v19 }
 0x73d   : > { %3689 = vmatprep.subr.bf16.mxu0 %v3997_v9 }
 0x740   : > { %3690 = vmatpush3.bf16.msra.mxu0 %v3998_v32 }
 0x741   : > { %3691 = vmatprep.subr.bf16.mxu0 %v3999_v40 }
 0x80a   : > { %v2916_v49 = vpop.f32.mrb[28].mxu0 }
 0x80b   : > { %v2923_v1 = vadd.f32 %v4058_v13, %v2916_v49  ;;  %v3841_v2 = vpop.f32.mrb[29].mxu0  ;;  %v4001_v49 = vld [vmem:[%s4484_s19 + $0x60] sm:$0xff]  }
 0x80c   : > { %v2919_v56 = vpop.f32.mrb[30].mxu0  ;;  %v4002_v13 = vld [vmem:[%s4484_s19 + $0x20] sm:$0xff]   ;;  %v4004_v2 = vld [vmem:[%s4484_s19 + $0x28] sm:$0xff]  }
 0x80d   : > { %v5010_v57 = vadd.f32 %v2928_v20, %v2923_v1  ;;  %v2924_v22 = vadd.f32 %v4059_v15, %v2919_v56  ;;  %v3842_v59 = vpop.f32.mrb[31].mxu0  ;;  %v4003_v1 = vld [vmem:[%s4484_s19 + $0x68] sm:$0xff]   ;;  %v4005_v56 = vld [vmem:[%s4484_s19 + $0x70] sm:$0xff]  }
 0x80e   : > { %v4006_v15 = vld [vmem:[%s4484_s19 + $0x30] sm:$0xff]   ;;  %v4008_v59 = vld [vmem:[%s4484_s19 + $0x38] sm:$0xff]  }
 0x80f   : > { %v5012_v14 = vadd.f32 %v2928_v20, %v2924_v22  ;;  %2931 = vadd.xlane.f32.xlu1 %v5010_v57  ;;  %v4000_v20 = vld [vmem:[%s4484_s19 + $0x18] sm:$0xff]  }
 0x810   : > { %3692 = vmatpush3.bf16.msra.mxu0 %v4000_v20  ;;  %v4007_v22 = vld [vmem:[%s4484_s19 + $0x78] sm:$0xff]   ;;  %s5125_s19 = sld [smem:[#allocation17_spill]] (!%p3625_p4) }
 0x811   : > { %2933 = vadd.xlane.f32.xlu0 %v5012_v14  ;;  %3693 = vmatprep.subr.bf16.mxu0 %v4001_v49  ;;  %v3624_v20 = vld [vmem:[%s4511_s25 + $0x8] ss:$0 sm:$0xff] }
 0x814   : > { %3694 = vmatpush3.bf16.msra.mxu0 %v4002_v13 }
 0x815   : > { %3695 = vmatprep.subr.bf16.mxu0 %v4003_v1 }
 0x818   : > { %3696 = vmatpush3.bf16.msra.mxu0 %v4004_v2 }
 0x819   : > { %3697 = vmatprep.subr.bf16.mxu0 %v4005_v56 }
 0x81c   : > { %3698 = vmatpush3.bf16.msra.mxu0 %v4006_v15 }
 0x81d   : > { %3699 = vmatprep.subr.bf16.mxu0 %v4007_v22 }
 0x820   : > { %3700 = vmatpush3.bf16.msra.mxu0 %v4008_v59 }
 0x89c   : > { %v2932_v11 = vpop.xlane.xlu1 %2931 }
 0x89d   : > { %v2935_v41 = vmul.f32 0.0078125, %v2932_v11 }
 0x89e   : > { %v2934_v42 = vpop.xlane.xlu0 %2933 }
 0x89f   : > { %v2937_v43 = vsub.f32 %v5010_v57, %v2935_v41  ;;  %v2936_v44 = vmul.f32 0.0078125, %v2934_v42 }
 0x8a1   : > { %v2938_v17 = vsub.f32 %v5012_v14, %v2936_v44  ;;  %v2939_v12 = vmul.f32 %v2937_v43, %v2937_v43 }
 0x8a3   : > { %2941 = vadd.xlane.f32.xlu0 %v2939_v12  ;;  %v2940_v18 = vmul.f32 %v2938_v17, %v2938_v17 }
 0x8a7   : > { %2943 = vadd.xlane.f32.xlu0 %v2940_v18 }
 0x930   : > { %v2942_v39 = vpop.xlane.xlu0 %2941 }
 0x931   : > { %v2945_v5 = vmul.f32 0.0078125, %v2942_v39 }
 0x933   : > { %v2947_v16 = vadd.f32 1e-05, %v2945_v5 }
 0x934   : > { %v2944_v50 = vpop.xlane.xlu0 %2943 }
 0x935   : > { %4045 = vrsqrt.f32 %v2947_v16  ;;  %v2946_v21 = vmul.f32 0.0078125, %v2944_v50 }
 0x937   : > { %v2948_v52 = vadd.f32 1e-05, %v2946_v21 }
 0x939   : > { %4047 = vrsqrt.f32 %v2948_v52 }
 0x93f   : > { %v4046_v55 = vpop.eup %4045 }
 0x940   : > { %v2951_v6 = vmul.f32 %v4046_v55, %v2937_v43 }
 0x942   : > { %v2957_v60 = vmul.f32 %v2956_v35, %v2951_v6 }
 0x943   : > { %v4048_v63 = vpop.eup %4047 }
 0x944   : > { %v2952_v28 = vmul.f32 %v4048_v63, %v2938_v17  ;;  %v2963_v23 = vadd.f32 %v2962_v48, %v2957_v60 }
 0x946   : > { %v2958_v58 = vmul.f32 %v2956_v35, %v2952_v28 }
 0x948   : > { %v2964_v61 = vadd.f32 %v2962_v48, %v2958_v58 }
 0x94a   : > { %v2981_v53 = vpack.c.bf16 %v2964_v61, %v2963_v23 }
 0x94c   : > { %3107 = vmatmul.mubr.bf16.vlgmr.msra.gmra.mrb[44].mxu1 %v2981_v53 }
 0xa1f   : > { %v3108_v26 = vpop.f32.mrb[44].mxu1 }
 0xa20   : > { %v3109_v11 = vadd.f32 %v3108_v26, %v2987_v3  ;;  %v3110_v41 = vpop.f32.mrb[45].mxu1 }
 0xa21   : > { %v3111_v42 = vadd.f32 %v3110_v41, %v2991_v25  ;;  %v3112_v43 = vpop.f32.mrb[46].mxu1 }
 0xa22   : > { %v3117_v44 = vmul.f32 %v3109_v11, %v3109_v11  ;;  %v3113_v17 = vadd.f32 %v3112_v43, %v2987_v3  ;;  %v3114_v12 = vpop.f32.mrb[47].mxu1 }
 0xa23   : > { %v3118_v18 = vmul.f32 %v3111_v42, %v3111_v42  ;;  %v3115_v27 = vadd.f32 %v3114_v12, %v2991_v25 }
 0xa24   : > { %v3121_v29 = vmul.f32 %v3117_v44, %v3109_v11  ;;  %v3119_v30 = vmul.f32 %v3113_v17, %v3113_v17 }
 0xa25   : > { %v3122_v31 = vmul.f32 %v3118_v18, %v3111_v42  ;;  %v3120_v7 = vmul.f32 %v3115_v27, %v3115_v27  ;;  %v3626_v18 = vld [vmem:[#allocation8] ss:$0 sm:$0xff] (!%p3625_p4) }
 0xa26   : > { %v3125_v33 = vmul.f32 0.044715, %v3121_v29  ;;  %v3123_v47 = vmul.f32 %v3119_v30, %v3113_v17  ;;  %v3627_v29 = vld [vmem:[#allocation8 + $0x1] ss:$0 sm:$0xff] (!%p3625_p4) }
 0xa27   : > { %v3126_v46 = vmul.f32 0.044715, %v3122_v31  ;;  %v3124_v34 = vmul.f32 %v3120_v7, %v3115_v27 }
 0xa28   : > { %v3129_v45 = vadd.f32 %v3125_v33, %v3109_v11  ;;  %v3127_v51 = vmul.f32 0.044715, %v3123_v47 }
 0xa29   : > { %v3130_v36 = vadd.f32 %v3126_v46, %v3111_v42  ;;  %v3128_v37 = vmul.f32 0.044715, %v3124_v34 }
 0xa2a   : > { %v3133_v10 = vmul.f32 0.7978846, %v3129_v45  ;;  %v3131_v38 = vadd.f32 %v3127_v51, %v3113_v17 }
 0xa2b   : > { %v3134_v39 = vmul.f32 0.7978846, %v3130_v36  ;;  %v3132_v5 = vadd.f32 %v3128_v37, %v3115_v27 }
 0xa2c   : > { %4049 = vtanh.f32 %v3133_v10  ;;  %v3135_v16 = vmul.f32 0.7978846, %v3131_v38 }
 0xa2d   : > { %4051 = vtanh.f32 %v3134_v39  ;;  %v3136_v50 = vmul.f32 0.7978846, %v3132_v5 }
 0xa2e   : > { %4053 = vtanh.f32 %v3135_v16 }
 0xa2f   : > { %4055 = vtanh.f32 %v3136_v50 }
 0xa36   : > { %v4050_v21 = vpop.eup %4049 }
 0xa37   : > { %v4052_v52 = vpop.eup %4051  ;;  %v3141_v54 = vadd.f32 1.0, %v4050_v21 }
 0xa38   : > { %v4054_v55 = vpop.eup %4053  ;;  %v3142_v6 = vadd.f32 1.0, %v4052_v52 }
 0xa39   : > { %v4056_v35 = vpop.eup %4055  ;;  %v3145_v62 = vmul.f32 0.5, %v3141_v54  ;;  %v3143_v63 = vadd.f32 1.0, %v4054_v55 }
 0xa3a   : > { %v3144_v28 = vadd.f32 1.0, %v4056_v35  ;;  %v3146_v60 = vmul.f32 0.5, %v3142_v6 }
 0xa3b   : > { %v3147_v48 = vmul.f32 0.5, %v3143_v63  ;;  %v3149_v23 = vmul.f32 %v3145_v62, %v3109_v11 }
 0xa3c   : > { %v3148_v58 = vmul.f32 0.5, %v3144_v28  ;;  %v3150_v53 = vmul.f32 %v3146_v60, %v3111_v42 }
 0xa3d   : > { %v3151_v61 = vmul.f32 %v3147_v48, %v3113_v17 }
 0xa3e   : > { %v3152_v8 = vmul.f32 %v3148_v58, %v3115_v27 }
 0xa3f   : > { %v3185_v24 = vpack.c.bf16 %v3151_v61, %v3149_v23 }
 0xa40   : > { %v3186_v4 = vpack.c.bf16 %v3152_v8, %v3150_v53 }
 0xa42   : > { %3315 = vmatprep.mubr.bf16.mxu0 %v3186_v4 }
 0xa43   : > { %3316 = vmatmul.mubr.bf16.vlgmr.msra.gmra.mrb[32].mxu0 %v3185_v24 }
 0xb16   : > { %v3701_v19 = vpop.f32.mrb[32].mxu0 }
 0xb17   : > { %v3702_v9 = vpop.f32.mrb[33].mxu0 }
 0xb18   : > { %v3703_v32 = vadd.f32 %v3702_v9, %v3701_v19  ;;  %v3704_v40 = vpop.f32.mrb[34].mxu0 }
 0xb19   : > { %v3705_v49 = vpop.f32.mrb[35].mxu0 }
 0xb1a   : > { %v3324_v13 = vadd.f32 %v3703_v32, %v5010_v57  ;;  %v3706_v1 = vadd.f32 %v3705_v49, %v3704_v40  ;;  %3337 = sbr.rel (%p3625_p4) target bundleno = 3162 (0xc5a), region = 76 }
 0xb1c   : > { %v3330_v2 = vadd.f32 %v3624_v20, %v3324_v13  ;;  %v3325_v56 = vadd.f32 %v3706_v1, %v5012_v14 }
 0xb1e   : > { %3332 = vst [vmem:[#allocation2] sm:$0xff] %v3330_v2  ;;  %v3331_v15 = vadd.f32 %v3624_v20, %v3325_v56  ;;  %3340 = vadd.xlane.f32.xlu0 (!%p3625_p4), %v3330_v2 }
 0xb20   : > { %3333 = vst [vmem:[#allocation2 + $0x8] sm:$0xff] %v3331_v15 }
 0xb22   : > { %3342 = vadd.xlane.f32.xlu0 %v3331_v15 }
 0xbab   : > { %v3341_v22 = vpop.xlane.xlu0 %3340 }
 0xbac   : > { %v3344_v59 = vmul.f32 0.0078125, %v3341_v22 }
 0xbae   : > { %v3346_v0 = vsub.f32 %v3330_v2, %v3344_v59 }
 0xbaf   : > { %v3343_v3 = vpop.xlane.xlu0 %3342 }
 0xbb0   : > { %v3345_v25 = vmul.f32 0.0078125, %v3343_v3  ;;  %v3348_v26 = vmul.f32 %v3346_v0, %v3346_v0 }
 0xbb2   : > { %v3347_v11 = vsub.f32 %v3331_v15, %v3345_v25  ;;  %3350 = vadd.xlane.f32.xlu1 %v3348_v26 }
 0xbb4   : > { %v3349_v57 = vmul.f32 %v3347_v11, %v3347_v11 }
 0xbb6   : > { %3352 = vadd.xlane.f32.xlu1 %v3349_v57 }
 0xc3f   : > { %v3351_v41 = vpop.xlane.xlu1 %3350 }
 0xc40   : > { %v3354_v14 = vmul.f32 0.0078125, %v3351_v41 }
 0xc42   : > { %v3356_v42 = vadd.f32 1e-05, %v3354_v14 }
 0xc43   : > { %v3353_v43 = vpop.xlane.xlu1 %3352 }
 0xc44   : > { %4060 = vrsqrt.f32 %v3356_v42  ;;  %v3355_v44 = vmul.f32 0.0078125, %v3353_v43 }
 0xc46   : > { %v3357_v17 = vadd.f32 1e-05, %v3355_v44 }
 0xc48   : > { %4062 = vrsqrt.f32 %v3357_v17 }
 0xc4e   : > { %v4061_v12 = vpop.eup %4060 }
 0xc4f   : > { %v3360_v27 = vmul.f32 %v4061_v12, %v3346_v0 }
 0xc51   : > { %v3366_v30 = vmul.f32 %v3626_v18, %v3360_v27 }
 0xc52   : > { %v4063_v31 = vpop.eup %4062 }
 0xc53   : > { %v3372_v7 = vadd.f32 %v3627_v29, %v3366_v30  ;;  %v3361_v33 = vmul.f32 %v4063_v31, %v3347_v11 }
 0xc55   : > { %3374 = vst [vmem:[%s5125_s19] sm:$0xff] %v3372_v7  ;;  %v3367_v47 = vmul.f32 %v3626_v18, %v3361_v33 }
 0xc57   : > { %v3373_v46 = vadd.f32 %v3627_v29, %v3367_v47 }
 0xc59   : > { %3375 = vst [vmem:[%s5125_s19 + $0x8] sm:$0xff] %v3373_v46 }
 0xc5a PF: > { %s5126_s30 = sld [smem:[#allocation14_spill]]  ;;  %s5127_s26 = sld [smem:[#allocation13_spill]] }
 0xc5b   : > { %s5128_s29 = sld [smem:[#allocation15_spill]]  ;;  %s5129_s27 = smov %s4216_s28 }
 0xc60   : > { %p22_p1 = scmp.ge.s32.totalorder %s5126_s30, 4   ;;  %s5130_s28 = smov %s5127_s26 }
 0xc62   :  { %24 = sbr.rel (!%p22_p1) target bundleno = 9 (0x9), region = 133 }
 0xc69   :  { %3387 = vsyncpa [#allocation4], 1 }
 0xc6a   :  { %3389 = vsyncpa [#allocation4 + $0x1], 1 }
 0xc6b   :  { %3390 = vsyncpa [#allocation6], 1 }
 0xc6c   :  { %3392 = vsyncpa [#allocation6 + $0x1], 1 }
 0xc6d   :  { %3393 = vsyncpa [#allocation9], 1 }

// kernel: whisper_forward.6
= control target key start
LH: loop header
LB: loop body
LE: loop exit
PB: predicated region body
PF: predicated region fallthrough
CT: control target
= control target key end

     0   :  { %s8571_s0 = inlined_call_operand.vmem [shape: f32[16,128], index: 0, kind: input, shape index: {}]   ;;  %s8572_s1 = inlined_call_operand.vmem [shape: f32[16,128], index: 1, kind: input, shape index: {}]   ;;  %s8573_s2 = inlined_call_operand.vmem [shape: bf16[2,128,384], index: 2, kind: input, shape index: {}]   ;;  %s8574_s3 = inlined_call_operand.hbm [shape: bf16[2,128,128], index: 3, kind: input, shape index: {}]   ;;  %s8575_s4 = inlined_call_operand.hbm [shape: bf16[2,128,128], index: 4, kind: input, shape index: {}]   ;;  %s8576_s5 = inlined_call_operand.vmem [shape: bf16[2,128,256], index: 5, kind: input, shape index: {}]   ;;  %s8577_s6 = inlined_call_operand.hbm [shape: bf16[2,128,128], index: 6, kind: input, shape index: {}]   ;;  %s8578_s7 = inlined_call_operand.vmem [shape: bf16[2,128,256], index: 7, kind: input, shape index: {}]   ;;  %s8579_s8 = inlined_call_operand.vmem [shape: bf16[2,256,128], index: 8, kind: input, shape index: {}]   ;;  %s8580_s9 = inlined_call_operand.vmem [shape: f32[2,15,128], index: 9, kind: input, shape index: {}]   ;;  %s8581_s10 = inlined_call_operand.hbm [shape: f32[2,1,256], index: 10, kind: input, shape index: {}]   ;;  %s8582_s11 = inlined_call_operand.vmem [shape: f32[16,128], index: 11, kind: output, shape index: {}]  }
   0x1   :  { %8595 = sst [smem:[#allocation16_spill]] %s8571_s0 }
   0x2   :  { %8596 = sst [smem:[#allocation17_spill]] %s8572_s1 }
   0x3   :  { %8597 = sst [smem:[#allocation18_spill]] %s8574_s3 }
   0x4   :  { %8598 = sst [smem:[#allocation19_spill]] %s8575_s4 }
   0x5   :  { %8599 = sst [smem:[#allocation20_spill]] %s8580_s9 }
   0x6   :  { %8600 = sst [smem:[#allocation21_spill]] %s8582_s11 }
   0x7   :  { %16 = vsyncpa [#allocation4], 0 }
   0x8   :  { %18 = vsyncpa [#allocation4 + $0x1], 0 }
   0x9   :  { %19 = vsyncpa [#allocation6], 0 }
   0xa   :  { %21 = vsyncpa [#allocation6 + $0x1], 0 }
   0xb   :  { %22 = vsyncpa [#allocation9], 0 }
   0xc   :  { %24 = vsyncpa [#allocation9 + $0x1], 0  ;;  %s7255_s17 = smov 0   ;;  %s7257_s18 = smov 0  }
   0xd   :  { %s7259_s19 = smov 0   ;;  %s7261_s20 = smov 0  }
   0xe LB: > { %8601 = sst [smem:[#allocation13_spill]] %s7175_s19  ;;  %s7274_s21 = sadd.s32 4294967295, %s7179_s20   ;;  %s7179_s20 = sphi %s7261_s20, %s8623_s20   ;;  %s7175_s19 = sphi %s7259_s19, %s8625_s19   ;;  %s7171_s18 = sphi %s7257_s18, %s8627_s18   ;;  %s7167_s17 = sphi %s7255_s17, %s8626_s17  }
   0xf   : > { %s7277_s22 = sadd.s32 1, %s7179_s20   ;;  %s105_s24 = sadd.s32 1, %s7175_s19 }
  0x10   : > { %8602 = sst [smem:[#allocation14_spill]] %s7277_s22  ;;  %s102_s23 = ssub.s32 %s7179_s20, %s7277_s22 }
  0x11   : > { %p103_p0 = scmp.eq.s32.totalorder %s102_s23, 0  ;;  %p112_p1 = scmp.ne.s32.totalorder %s7175_s19, %s7171_s18 }
  0x12   : > { %p113_p2 = scmp.eq.s32.totalorder %s7179_s20, 0  ;;  %p118_p3 = scmp.ne.s32.totalorder %s7171_s18, %s7167_s17 }
  0x13   : > { %s7287_s25 = scalar_select %p103_p0, %s7175_s19, %s105_s24  }
  0x14   : > { %p114_p4 = por %p113_p2, %p112_p1  ;;  %p119_p5 = scmp.eq.s32.totalorder %s7274_s21, 0 }
  0x15   : > { %8603 = sst [smem:[#allocation15_spill]] %s7287_s25  ;;  %p6734_p6 = scmp.lt.s32.totalorder %s7179_s20, 2 }
  0x16   : > { %p7291_p7 = por %p119_p5, %p118_p3  ;;  %s7296_s27 = sand.u32 1, %s7175_s19  }
  0x17   : > { %s7299_s28 = sshll.u32 %s7296_s27, 6  ;;  %s7302_s29 = sshll.u32 %s7179_s20, 10 }
  0x18   : > { %s8604_s26 = scalar_select %p7291_p7, 1, 0 }
  0x19   : > { %p7304_p8 = pnand %p6734_p6, %p114_p4  ;;  %s380_s12 = sand.u32 1, %s7179_s20  }
  0x1a   : > { %s8606_s4 = sld [smem:[#allocation19_spill]]  ;;  %s384_s16 = scalar_lea.vmem [#allocation5], %s7299_s28 }
  0x1b   : > { %s8605_s30 = scalar_select %p7304_p8, 1, 0 }
  0x1c   : > { %s391_s17 = sshll.u32 %s384_s16, 4  ;;  %s7320_s23 = scalar_lea.sflag [#allocation6], %s380_s12  ;;  %s7317_s17 = int_to_ptr.vmem [resolvable:$true] %s391_s17 }
  0x1d   : > { %p7326_p12 = pneg %p7304_p8 }
  0x20   : > { %s7313_s15 = scalar_lea.hbm %s8606_s4, %s7302_s29  ;;  %s7022_s16 = scalar_lea.hbm %s8606_s4, 2048 }
  0x21   : > { %s7017_s24 = scalar_lea.hbm %s7313_s15, 1024  ;;  %p7023_p1 = scmp.lt.u32.totalorder %s7313_s15, %s8606_s4 }
  0x22   : > { %p7018_p11 = scmp.ne.s32.totalorder %s7313_s15, %s7017_s24  ;;  %p7024_p2 = scmp.lt.u32.totalorder %s7022_s16, %s7017_s24 }
  0x23   : > { %p7026_p4 = scmp.lt.u32.totalorder %s7017_s24, %s7313_s15 }
  0x24   : > { %p7020_p13 = pnand %p7326_p12, %p7018_p11  ;;  %p7025_p3 = por %p7024_p2, %p7023_p1 }
  0x26   : > { %p7021_p0 = pneg %p7020_p13  ;;  %p7027_p5 = por %p7026_p4, %p7025_p3 }
  0x28   : > { %p7028_p6 = pnand %p7027_p5, %p7021_p0 }
  0x2a   : > { %7031 = shalt.err (!%p7028_p6)
}
  0x2b   : > { %s7032_s12 = scalar_lea.vmem %s7317_s17, 1024  ;;  %s7181_s13 = smov [#allocation5]  }
  0x2c   : > { %p7033_p11 = scmp.ne.s32.totalorder %s7317_s17, %s7032_s12  ;;  %s7037_s14 = sshll.u32 %s7181_s13, 4  ;;  %s7038_s14 = int_to_ptr.vmem [resolvable:$false] %s7037_s14 }
  0x2d   : > { %s7039_s19 = scalar_lea.vmem %s7038_s14, 2048  ;;  %p7040_p10 = scmp.lt.s32.totalorder %s7317_s17, %s7038_s14 }
  0x2e   : > { %p7035_p13 = pnand %p7033_p11, %p7326_p12  ;;  %p7041_p7 = scmp.lt.s32.totalorder %s7039_s19, %s7032_s12 }
  0x30   : > { %p7036_p9 = pneg %p7035_p13  ;;  %p7042_p1 = por %p7041_p7, %p7040_p10 }
  0x32   : > { %p7043_p2 = pnand %p7042_p1, %p7036_p9 }
  0x34   : > { %7046 = shalt.err (!%p7043_p2)
}
  0x35   : > { %s8587_s22 = smov 64   ;;  %s8589_s24 = smov 4  }
  0x36   : > { %6727 = dma.hbm_to_vmem [thread:$0]  (!%p7304_p8), %s7313_s15, 1024, %s7317_s17, %s7320_s23, %s8587_s22, %s8587_s22, %s8589_s24  }
  0x37   : > { %p8608_p7 = scmp.lt.s32.totalorder %s7179_s20, 3  ;;  %p8609_p9 = scmp.ge.s32.totalorder %s7179_s20, 1 }
  0x38   : > { %s8611_s3 = sld [smem:[#allocation18_spill]]  ;;  %s363_s19 = scalar_lea.vmem [#allocation3], %s7299_s28 }
  0x39   : > { %p7357_p10 = pnand %p8609_p9, %p8608_p7  ;;  %s370_s4 = sshll.u32 %s363_s19, 4  ;;  %s7368_s4 = int_to_ptr.vmem [resolvable:$true] %s370_s4 }
  0x3a   : > { %s7374_s22 = scalar_lea.hbm %s8577_s6, %s7302_s29  ;;  %s360_s24 = scalar_lea.sflag [#allocation4], %s7296_s27 }
  0x3b   : > { %s8610_s16 = scalar_select %p7357_p10, 1, 0 }
  0x3e   : > { %s7365_s14 = scalar_lea.hbm %s8611_s3, %s7302_s29  ;;  %s7052_s1 = scalar_lea.hbm %s8611_s3, 2048 }
  0x3f   : > { %s7047_s11 = scalar_lea.hbm %s7365_s14, 1024  ;;  %p7053_p5 = scmp.lt.u32.totalorder %s7365_s14, %s8611_s3 }
  0x40   : > { %p7048_p0 = scmp.ne.s32.totalorder %s7365_s14, %s7047_s11  ;;  %p7054_p6 = scmp.lt.u32.totalorder %s7052_s1, %s7047_s11 }
  0x41   : > { %p7056_p13 = scmp.lt.u32.totalorder %s7047_s11, %s7365_s14 }
  0x42   : > { %p7050_p3 = pnand %p7048_p0, %p7326_p12  ;;  %p7055_p11 = por %p7054_p6, %p7053_p5 }
  0x44   : > { %p7051_p4 = pneg %p7050_p3  ;;  %p7057_p1 = por %p7056_p13, %p7055_p11 }
  0x46   : > { %p7058_p2 = pnand %p7057_p1, %p7051_p4 }
  0x48   : > { %7061 = shalt.err (!%p7058_p2)
}
  0x49   : > { %s7062_s29 = scalar_lea.vmem %s7368_s4, 1024  ;;  %s7184_s19 = smov [#allocation3]  }
  0x4a   : > { %p7063_p7 = scmp.ne.s32.totalorder %s7368_s4, %s7062_s29  ;;  %s7067_s15 = sshll.u32 %s7184_s19, 4  ;;  %s7068_s15 = int_to_ptr.vmem [resolvable:$false] %s7067_s15 }
  0x4b   : > { %s7069_s0 = scalar_lea.vmem %s7068_s15, 2048  ;;  %p7070_p3 = scmp.lt.s32.totalorder %s7368_s4, %s7068_s15 }
  0x4c   : > { %p7065_p9 = pnand %p7063_p7, %p7326_p12  ;;  %p7071_p10 = scmp.lt.s32.totalorder %s7069_s0, %s7062_s29 }
  0x4e   : > { %p7066_p0 = pneg %p7065_p9  ;;  %p7072_p5 = por %p7071_p10, %p7070_p3 }
  0x50   : > { %p7073_p6 = pnand %p7072_p5, %p7066_p0 }
  0x52   : > { %7076 = shalt.err (!%p7073_p6)
}
  0x53   : > { %s8612_s1 = smov 4   ;;  %s8613_s9 = smov 64  }
  0x54   : > { %6724 = dma.hbm_to_vmem [thread:$0]  (!%p7304_p8), %s7365_s14, 1024, %s7368_s4, %s360_s24, %s8613_s9, %s8613_s9, %s8612_s1  }
  0x55   : > { %s413_s11 = scalar_lea.vmem [#allocation7], %s7299_s28  ;;  %s6130_s12 = sshll.u32 %s7296_s27, 1 }
  0x56   : > { %s420_s17 = sshll.u32 %s413_s11, 4  ;;  %s7077_s13 = scalar_lea.hbm %s7374_s22, 1024  ;;  %s7404_s17 = int_to_ptr.vmem [resolvable:$true] %s420_s17 }
  0x57   : > { %p7078_p10 = scmp.ne.s32.totalorder %s7374_s22, %s7077_s13  ;;  %s7082_s15 = scalar_lea.hbm %s8577_s6, 2048 }
  0x58   : > { %p7083_p13 = scmp.lt.u32.totalorder %s7374_s22, %s8577_s6  ;;  %p7084_p1 = scmp.lt.u32.totalorder %s7082_s15, %s7077_s13 }
  0x59   : > { %p7080_p4 = pnand %p7078_p10, %p7326_p12  ;;  %p7086_p7 = scmp.lt.u32.totalorder %s7077_s13, %s7374_s22 }
  0x5a   : > { %p7085_p2 = por %p7084_p1, %p7083_p13 }
  0x5b   : > { %p7081_p11 = pneg %p7080_p4 }
  0x5c   : > { %p7087_p9 = por %p7086_p7, %p7085_p2 }
  0x5e   : > { %p7088_p0 = pnand %p7087_p9, %p7081_p11 }
  0x60   : > { %7091 = shalt.err (!%p7088_p0)
}
  0x61   : > { %s7092_s4 = scalar_lea.vmem %s7404_s17, 1024  ;;  %s7185_s28 = smov [#allocation7]  }
  0x62   : > { %p7093_p3 = scmp.ne.s32.totalorder %s7404_s17, %s7092_s4  ;;  %s7097_s24 = sshll.u32 %s7185_s28, 4  ;;  %s7098_s24 = int_to_ptr.vmem [resolvable:$false] %s7097_s24 }
  0x63   : > { %s7099_s3 = scalar_lea.vmem %s7098_s24, 2048  ;;  %p7100_p10 = scmp.lt.s32.totalorder %s7404_s17, %s7098_s24 }
  0x64   : > { %p7095_p5 = pnand %p7093_p3, %p7326_p12  ;;  %p7101_p4 = scmp.lt.s32.totalorder %s7099_s3, %s7092_s4 }
  0x66   : > { %p7096_p6 = pneg %p7095_p5  ;;  %p7102_p13 = por %p7101_p4, %p7100_p10 }
  0x68   : > { %p7103_p1 = pnand %p7102_p13, %p7096_p6 }
  0x6a   : > { %7106 = shalt.err (!%p7103_p1)
}
  0x6b   : > { %6730 = dma.hbm_to_vmem [thread:$0]  (!%p7304_p8), %s7374_s22, 1024, %s7404_s17, %s7320_s23, %s8613_s9, %s8613_s9, %s8612_s1  }
  0x6c   : > { %s6313_s14 = sshll.u32 %s7179_s20, 5  ;;  %s458_s19 = scalar_lea.vmem [#allocation8], %s6130_s12 }
  0x6d   : > { %s7436_s29 = scalar_lea.hbm %s8581_s10, %s6313_s14  ;;  %s466_s15 = sshll.u32 %s458_s19, 4  ;;  %s467_s15 = int_to_ptr.vmem [resolvable:$true] %s466_s15 }
  0x6e   : > { %s455_s0 = scalar_lea.sflag [#allocation9], %s7296_s27  ;;  %s7107_s4 = scalar_lea.hbm %s7436_s29, 32 }
  0x6f   : > { %p7108_p11 = scmp.ne.s32.totalorder %s7436_s29, %s7107_s4  ;;  %s7112_s22 = scalar_lea.hbm %s8581_s10, 64 }
  0x70   : > { %p7113_p9 = scmp.lt.u32.totalorder %s7436_s29, %s8581_s10  ;;  %p7114_p0 = scmp.lt.u32.totalorder %s7112_s22, %s7107_s4 }
  0x71   : > { %p7110_p2 = pnand %p7108_p11, %p7326_p12  ;;  %p7116_p5 = scmp.lt.u32.totalorder %s7107_s4, %s7436_s29 }
  0x72   : > { %p7115_p3 = por %p7114_p0, %p7113_p9 }
  0x73   : > { %p7111_p7 = pneg %p7110_p2 }
  0x74   : > { %p7117_p6 = por %p7116_p5, %p7115_p3 }
  0x76   : > { %p7118_p10 = pnand %p7117_p6, %p7111_p7 }
  0x78   : > { %7121 = shalt.err (!%p7118_p10)
}
  0x79   : > { %s7122_s27 = scalar_lea.vmem %s467_s15, 32  ;;  %s7186_s17 = smov [#allocation8]  }
  0x7a   : > { %p7123_p4 = scmp.ne.s32.totalorder %s467_s15, %s7122_s27  ;;  %s7127_s12 = sshll.u32 %s7186_s17, 4  ;;  %s7128_s12 = int_to_ptr.vmem [resolvable:$false] %s7127_s12 }
  0x7b   : > { %s7129_s28 = scalar_lea.vmem %s7128_s12, 64  ;;  %p7130_p11 = scmp.lt.s32.totalorder %s467_s15, %s7128_s12 }
  0x7c   : > { %p7125_p13 = pnand %p7123_p4, %p7326_p12  ;;  %p7131_p2 = scmp.lt.s32.totalorder %s7129_s28, %s7122_s27 }
  0x7e   : > { %p7126_p1 = pneg %p7125_p13  ;;  %p7132_p8 = por %p7131_p2, %p7130_p11 }
  0x80   : > { %p7133_p0 = pnand %p7132_p8, %p7126_p1 }
  0x82   : > { %7136 = shalt.err (!%p7133_p0)
}
  0x83   : > { %p8614_p9 = scmp.ne.s32.totalorder %s8605_s30, 0  ;;  %p8615_p7 = scmp.ne.s32.totalorder %s8610_s16, 0 }
  0x84   : > { %s477_s25 = sand.u32 (!%p8615_p7), 1, %s7171_s18   ;;  %p8616_p12 = scmp.ne.s32.totalorder (!%p8615_p7), %s8604_s26, 0 }
  0x85   : > { %6733 = dma.hbm_to_vmem [thread:$0]  (!%p8614_p9), %s7436_s29, 32, %s467_s15, %s455_s0  }
  0x86   : > { %475 = sbr.rel (%p8615_p7) target bundleno = 4760 (0x1298), region = 64  ;;  %s6134_s24 = sshll.u32 (!%p8615_p7), %s477_s25, 6 }
  0x87   : > { %s478_s3 = scalar_lea.sflag (!%p8615_p7), [#allocation4], %s477_s25  ;;  %s7461_s14 = scalar_lea.vmem (!%p8615_p7), [#allocation3], %s6134_s24 }
  0x8d   : > { %7154 = dma.done.wait (%p8616_p12), %s478_s3, 1024  }
  0x8e   : > { %7156 = vsyncadd (%p8616_p12), %s478_s3, 4294966272  ;;  %s486_s30 = sand.u32 1, %s7274_s21   ;;  %s7468_s13 = scalar_lea.vmem [#allocation5], %s6134_s24 }
  0x8f   : > { %s487_s11 = scalar_lea.sflag [#allocation6], %s486_s30 }
  0x90   : > { %7158 = dma.done.wait (%p8616_p12), %s487_s11, 2048  }
  0x91   : > { %7160 = vsyncadd (%p8616_p12), %s487_s11, 4294965248  ;;  %s6137_s16 = sshll.u32 %s477_s25, 1  ;;  %s7474_s29 = scalar_lea.vmem [#allocation7], %s6134_s24 }
  0x92   : > { %s505_s19 = scalar_lea.sflag [#allocation9], %s477_s25  ;;  %s7476_s15 = scalar_lea.vmem [#allocation8], %s6137_s16 }
  0x93   : > { %7162 = dma.done.wait (%p8616_p12), %s505_s19, 32  }
  0x94   : > { %7164 = vsyncadd (%p8616_p12), %s505_s19, 4294967264  ;;  %p582_p8 = scmp.lt.s32.totalorder %s7274_s21, 1  ;;  %s8617_s19 = sld [smem:[#allocation20_spill]] }
  0x95   : > { %p6147_p3 = scmp.ne.s32.totalorder %s7274_s21, 0 }
  0x96   : > { %s583_s0 = scalar_select %p582_p8, %s7274_s21, 1 }
  0x97   : > { %611 = sbr.rel (%p6147_p3) target bundleno = 159 (0x9f), region = 84  ;;  %s8618_s27 = sld [smem:[#allocation16_spill]] (!%p6147_p3) }
  0x98   : > { %s6712_s4 = smul.u32 192, %s583_s0  ;;  %s6314_s20 = sshll.u32 %s583_s0, 7 }
  0x99   : > { %s7487_s1 = scalar_lea.vmem %s8576_s5, %s6314_s20  ;;  %s7492_s17 = scalar_lea.vmem %s8578_s7, %s6314_s20 }
  0x9a   : > { %s7497_s26 = scalar_lea.vmem %s8573_s2, %s6712_s4  ;;  %s7502_s3 = scalar_lea.vmem %s8579_s8, %s6314_s20 }
  0x9b   : > { %s6317_s30 = sshll.u32 %s583_s0, 4 }
  0x9c   : > { %s7507_s23 = scalar_lea.vmem %s8617_s19, %s6317_s30 }
  0x9d   : > { %v612_v0 = vld [vmem:[%s8618_s27] sm:$0xff] (!%p6147_p3)  ;;  %v613_v1 = vld [vmem:[%s8618_s27 + $0x8] sm:$0xff] (!%p6147_p3) }
  0x9e   : > { %614 = vst [vmem:[#allocation2] sm:$0xff] %v612_v0  ;;  %615 = vst [vmem:[#allocation2 + $0x8] sm:$0xff] %v613_v1 }
  0x9f PF: > { %v6807_v4 = vld [vmem:[%s7497_s26 + $0x4] ss:$12 sps:$4 sm:$0xff]   ;;  %v6809_v5 = vld [vmem:[%s7497_s26] ss:$12 sps:$4 sm:$0xff]   ;;  %v7187_v6 = vmov 0.0   ;;  %v7188_v32 = vmov 0   ;;  %v645_v42 = vlaneseq }
  0xa0   : > { %6440 = vmatprep.subr.bf16.mxu1 %v7187_v6  ;;  %v6810_v7 = vld [vmem:[%s7497_s26 + $0x8] ss:$12 sps:$4 sm:$0xff]   ;;  %818 = vmatprep.subr.bf16.mxu0 %v6807_v4  ;;  %v6813_v17 = vld [vmem:[%s7497_s26 + $0x18] ss:$12 sps:$4 sm:$0xff]   ;;  %v6814_v18 = vld [vmem:[%s7497_s26 + $0x20] ss:$12 sps:$4 sm:$0xff]  }
  0xa1   : > { %v6811_v8 = vld [vmem:[%s7497_s26 + $0x1c] ss:$12 sps:$4 sm:$0xff]   ;;  %819 = vmatpush1.bf16.msra.mxu0 %v6809_v5  ;;  %6441 = vmatpush3.bf16.msra.mxu1 %v6810_v7  ;;  %v6815_v19 = vld [vmem:[%s7497_s26 + $0x34] ss:$12 sps:$4 sm:$0xff]   ;;  %v6818_v21 = vld [vmem:[%s7497_s26 + $0x38] ss:$12 sps:$4 sm:$0xff]  }
  0xa2   : > { %820 = vmatprep.subr.bf16.mxu0 %v6811_v8  ;;  %6442 = vmatprep.subr.bf16.mxu1 %v7187_v6  ;;  %v6817_v20 = vld [vmem:[%s7497_s26 + $0x30] ss:$12 sps:$4 sm:$0xff]   ;;  %v6819_v22 = vld [vmem:[%s7497_s26 + $0x4c] ss:$12 sps:$4 sm:$0xff]   ;;  %v6821_v23 = vld [vmem:[%s7497_s26 + $0x48] ss:$12 sps:$4 sm:$0xff]  }
  0xa3   : > { %v6822_v24 = vld [vmem:[%s7497_s26 + $0x50] ss:$12 sps:$4 sm:$0xff]   ;;  %v6825_v26 = vld [vmem:[%s7497_s26 + $0x60] ss:$12 sps:$4 sm:$0xff]   ;;  %v6826_v27 = vld [vmem:[%s7497_s26 + $0x68] ss:$12 sps:$4 sm:$0xff]   ;;  %850 = vmatprep.mubr.bf16.mxu0 %v7188_v32 }
  0xa4   : > { %v6823_v25 = vld [vmem:[%s7497_s26 + $0x64] ss:$12 sps:$4 sm:$0xff]   ;;  %v6827_v28 = vld [vmem:[%s7497_s26 + $0x7c] ss:$12 sps:$4 sm:$0xff]   ;;  %v6830_v30 = vld [vmem:[%s7497_s26 + $0x80] ss:$12 sps:$4 sm:$0xff]  }
  0xa5   : > { %v616_v2 = vld [vmem:[#allocation2] sm:$0xff]  ;;  %v617_v3 = vld [vmem:[#allocation2 + $0x8] sm:$0xff]  ;;  %821 = vmatpush1.bf16.msra.mxu0 %v6813_v17  ;;  %6443 = vmatpush3.bf16.msra.mxu1 %v6814_v18  ;;  %vm7189_vm0 = vmmov 0   ;;  %v6833_v33 = vld [vmem:[%s7497_s26 + $0x90] ss:$12 sps:$4 sm:$0xff]   ;;  %v7562_v45 = vshrl.u32 %v645_v42, 7 }
  0xa6   : > { %622 = vadd.xlane.f32.xlu0 %v616_v2  ;;  %6444 = vmatprep.subr.bf16.mxu1 %v7187_v6  ;;  %v6829_v29 = vld [vmem:[%s7497_s26 + $0x78] ss:$12 sps:$4 sm:$0xff]   ;;  %v6831_v31 = vld [vmem:[%s7497_s26 + $0x94] ss:$12 sps:$4 sm:$0xff]   ;;  %v6838_v37 = vld [vmem:[%s7497_s26 + $0xb0] ss:$12 sps:$4 sm:$0xff]  }
  0xa7   : > { %822 = vmatprep.subr.bf16.mxu0 %v6815_v19  ;;  %6456 = vmatprep.mubr.msk.bf16.mxu1 %vm7189_vm0, %v7187_v6  ;;  %v6834_v34 = vld [vmem:[%s7497_s26 + $0x98] ss:$12 sps:$4 sm:$0xff]   ;;  %v6837_v36 = vld [vmem:[%s7497_s26 + $0xa8] ss:$12 sps:$4 sm:$0xff]   ;;  %v7565_v46 = vsub.s32 0, %v7562_v45  ;;  %v7571_v51 = vsub.s32 1, %v7562_v45 }
  0xa8   : > { %v6835_v35 = vld [vmem:[%s7497_s26 + $0xac] ss:$12 sps:$4 sm:$0xff]   ;;  %v620_v47 = vld [vmem:[%s7507_s23] sm:$0xff]  ;;  %v910_v60 = vsub.s32 7, %v7562_v45  ;;  %v904_v61 = vsub.s32 6, %v7562_v45  ;;  %s7190_s21 = smov 64  }
  0xa9   : > { %823 = vmatpush1.bf16.msra.mxu0 %v6817_v20  ;;  %6445 = vmatpush3.bf16.msra.mxu1 %v6818_v21  ;;  %v648_v50 = vrot.slane %v620_v47, %v7565_v46  ;;  %v654_v55 = vrot.slane %v620_v47, %v7571_v51  ;;  %s7191_s0 = smov 96   ;;  %s7192_s20 = smov 32   ;;  %vm1812_vm1 = vcmask 261120   ;;  %vm2204_vm3 = vcmask 64512  }
  0xaa   : > { %624 = vadd.xlane.f32.xlu0 %v617_v3  ;;  %6446 = vmatprep.subr.bf16.mxu1 %v7187_v6  ;;  %v911_v62 = vrot.slane %v620_v47, %v910_v60  ;;  %vm2312_vm4 = vcmask 1043456   ;;  %vm2976_vm5 = vcmask 523264   ;;  %vm2979_vm6 = vcmask 785408   ;;  %s8621_s26 = sld [smem:[#allocation17_spill]] }
  0xab   : > { %824 = vmatprep.subr.bf16.mxu0 %v6819_v22 }
  0xad   : > { %825 = vmatpush1.bf16.msra.mxu0 %v6821_v23  ;;  %6447 = vmatpush3.bf16.msra.mxu1 %v6822_v24 }
  0xae   : > { %6448 = vmatprep.subr.bf16.mxu1 %v7187_v6  ;;  %826 = vmatprep.subr.bf16.mxu0 %v6823_v25 }
  0xb1   : > { %827 = vmatpush1.bf16.msra.mxu0 %v6825_v26  ;;  %6449 = vmatpush3.bf16.msra.mxu1 %v6826_v27 }
  0xb2   : > { %828 = vmatprep.subr.bf16.mxu0 %v6827_v28  ;;  %6450 = vmatprep.subr.bf16.mxu1 %v7187_v6 }
  0xb5   : > { %829 = vmatpush1.bf16.msra.mxu0 %v6829_v29  ;;  %6451 = vmatpush3.bf16.msra.mxu1 %v6830_v30 }
  0xb6   : > { %830 = vmatprep.subr.bf16.mxu0 %v6831_v31  ;;  %6452 = vmatprep.subr.bf16.mxu1 %v7187_v6 }
  0xb9   : > { %831 = vmatpush1.bf16.msra.mxu0 %v6833_v33  ;;  %6453 = vmatpush3.bf16.msra.mxu1 %v6834_v34 }
  0xba   : > { %832 = vmatprep.subr.bf16.mxu0 %v6835_v35  ;;  %6454 = vmatprep.subr.bf16.mxu1 %v7187_v6 }
  0xbd   : > { %833 = vmatpush1.bf16.msra.mxu0 %v6837_v36  ;;  %6455 = vmatpush3.bf16.msra.mxu1 %v6838_v37 }
  0xbe   : > { %6460 = vmatprep.subr.bf16.mxu1 %v7187_v6  ;;  %6484 = vmatprep.subr.bf16.mxu0 %v7187_v6 }
 0x133   : > { %v623_v9 = vpop.xlane.xlu0 %622 }
 0x134   : > { %v627_v10 = vmul.f32 0.0078125, %v623_v9 }
 0x136   : > { %v7522_v11 = vsub.f32 %v616_v2, %v627_v10 }
 0x137   : > { %v625_v12 = vpop.xlane.xlu0 %624 }
 0x138   : > { %v628_v13 = vmul.f32 0.0078125, %v625_v12  ;;  %v631_v14 = vmul.f32 %v7522_v11, %v7522_v11 }
 0x13a   : > { %v7526_v15 = vsub.f32 %v617_v3, %v628_v13  ;;  %633 = vadd.xlane.f32.xlu1 %v631_v14  ;;  %v905_v3 = vrot.slane %v620_v47, %v904_v61  ;;  %v7193_v13 = vmov 1983009808  }
 0x13b   : > { %v943_v14 = vunpack.c.l.s4 %v7193_v13 }
 0x13c   : > { %v632_v16 = vmul.f32 %v7526_v15, %v7526_v15 }
 0x13d   : > { %v944_v17 = vunpack.c.0.s8 %v943_v14 }
 0x13e   : > { %635 = vadd.xlane.f32.xlu1 %v632_v16 }
 0x13f   : > { %v7610_v21 = vsub.s32 %v944_v17, %v7562_v45 }
 0x1c7   : > { %v634_v38 = vpop.xlane.xlu1 %633 }
 0x1c8   : > { %v637_v39 = vmul.f32 0.0078125, %v634_v38 }
 0x1ca   : > { %v639_v40 = vadd.f32 1e-05, %v637_v39 }
 0x1cb   : > { %v636_v41 = vpop.xlane.xlu1 %635 }
 0x1cc   : > { %6927 = vrsqrt.f32 %v639_v40  ;;  %v638_v43 = vmul.f32 0.0078125, %v636_v41 }
 0x1ce   : > { %v640_v44 = vadd.f32 1e-05, %v638_v43 }
 0x1d0   : > { %6929 = vrsqrt.f32 %v640_v44 }
 0x1d6   : > { %v6928_v48 = vpop.eup %6927 }
 0x1d7   : > { %v643_v49 = vmul.f32 %v6928_v48, %v7522_v11 }
 0x1d9   : > { %v649_v54 = vmul.f32 %v648_v50, %v643_v49 }
 0x1da   : > { %v6930_v52 = vpop.eup %6929 }
 0x1db   : > { %v644_v53 = vmul.f32 %v6930_v52, %v7526_v15  ;;  %v655_v57 = vadd.f32 %v654_v55, %v649_v54  ;;  %v7194_v15 = vmov 1934713408  }
 0x1dc   : > { %v975_v16 = vunpack.c.l.s4 %v7194_v15 }
 0x1dd   : > { %v650_v56 = vmul.f32 %v648_v50, %v644_v53 }
 0x1de   : > { %v976_v20 = vunpack.c.0.s8 %v975_v16 }
 0x1df   : > { %v656_v58 = vadd.f32 %v654_v55, %v650_v56 }
 0x1e0   : > { %v7613_v28 = vsub.s32 %v976_v20, %v7562_v45 }
 0x1e1   : > { %v689_v59 = vpack.c.bf16 %v656_v58, %v655_v57 }
 0x1e3   : > { %851 = vmatmul.mubr.bf16.vlgmr.msra.gmra.mrb[0].mxu0 %v689_v59  ;;  %6457 = vmatmul.mubr.bf16.vlgmr.msra.gmra.mrb[0].mxu1 %v689_v59 }
 0x1e4   : > { %6462 = vmatprep.mubr.msk.bf16.mxu1 %vm7189_vm0, %v7187_v6  ;;  %6486 = vmatprep.mubr.msk.bf16.mxu0 %vm7189_vm0, %v7187_v6 }
 0x2b6   : > { %v852_v63 = vpop.f32.mrb[0].mxu0  ;;  %v7581_v0 = vpop.f32.mrb[0].mxu1 }
 0x2b7   : > { %v854_v1 = vpop.f32.mrb[1].mxu0  ;;  %v6458_v2 = vpop.f32.mrb[1].mxu1  ;;  %v906_v10 = vadd.f32 %v905_v3, %v852_v63 }
 0x2b8   : > { %v912_v4 = vadd.f32 %v911_v62, %v854_v1  ;;  %v856_v5 = vpop.f32.mrb[2].mxu0  ;;  %v7585_v7 = vpop.f32.mrb[2].mxu1 }
 0x2b9   : > { %v858_v8 = vpop.f32.mrb[3].mxu0  ;;  %v6459_v9 = vpop.f32.mrb[3].mxu1  ;;  %v7599_v12 = vadd.f32 %v905_v3, %v856_v5 }
 0x2ba   : > { %1220 = vrot.lane.b32.xlu1 %v912_v4, %s7190_s21  ;;  %1214 = vrot.lane.b32.xlu0 %v912_v4, %s7191_s0  ;;  %v7591_v11 = vadd.f32 %v911_v62, %v858_v8 }
 0x2be   : > { %1226 = vrot.lane.b32.xlu1 %v912_v4, %s7192_s20  ;;  %928 = vrot.lane.b32.xlu0 %v906_v10, %s7190_s21 }
 0x2c2   : > { %922 = vrot.lane.b32.xlu1 %v906_v10, %s7191_s0  ;;  %1216 = vrot.lane.b32.xlu0 %v7591_v11, %s7191_s0 }
 0x2c6   : > { %934 = vrot.lane.b32.xlu1 %v906_v10, %s7192_s20  ;;  %1228 = vrot.lane.b32.xlu0 %v7591_v11, %s7192_s20 }
 0x2ca   : > { %1222 = vrot.lane.b32.xlu1 %v7591_v11, %s7190_s21  ;;  %930 = vrot.lane.b32.xlu0 %v7599_v12, %s7190_s21 }
 0x2ce   : > { %924 = vrot.lane.b32.xlu1 %v7599_v12, %s7191_s0 }
 0x2d2   : > { %936 = vrot.lane.b32.xlu1 %v7599_v12, %s7192_s20 }
 0x32c   : > { %v1221_v18 = vpop.permute.xlu1 %1220  ;;  %v1215_v19 = vpop.permute.xlu0 %1214 }
 0x32d   : > { %v1232_v22 = vcombine.low %v912_v4, %v1221_v18  ;;  %v1233_v23 = vcombine.high %v912_v4, %v1221_v18 }
 0x32f   : > { %v1240_v29 = vrot.slane %v1232_v22, %v7610_v21  ;;  %v1247_v30 = vrot.slane %v1233_v23, %v7610_v21 }
 0x330   : > { %v1227_v24 = vpop.permute.xlu1 %1226  ;;  %v929_v25 = vpop.permute.xlu0 %928 }
 0x331   : > { %v1248_v26 = vcombine.low %v1215_v19, %v1227_v24  ;;  %v1249_v27 = vcombine.high %v1215_v19, %v1227_v24  ;;  %v940_v40 = vcombine.low %v906_v10, %v929_v25  ;;  %v941_v41 = vcombine.high %v906_v10, %v929_v25 }
 0x333   : > { %v1256_v31 = vrot.slane %v1248_v26, %v7610_v21  ;;  %v1263_v33 = vrot.slane %v1249_v27, %v7610_v21  ;;  %v948_v63 = vrot.slane %v940_v40, %v7610_v21  ;;  %v955_v1 = vrot.slane %v941_v41, %v7610_v21 }
 0x334   : > { %v923_v34 = vpop.permute.xlu1 %922  ;;  %v1217_v35 = vpop.permute.xlu0 %1216 }
 0x335   : > { %v1264_v36 = vcombine.low %v1240_v29, %v1256_v31  ;;  %v1265_v37 = vcombine.high %v1240_v29, %v1256_v31  ;;  %v1280_v38 = vcombine.low %v1247_v30, %v1263_v33  ;;  %v1281_v39 = vcombine.high %v1247_v30, %v1263_v33 }
 0x337   : > { %v1272_v43 = vrot.slane %v1264_v36, %v7613_v28  ;;  %v1279_v44 = vrot.slane %v1265_v37, %v7613_v28  ;;  %v1288_v47 = vrot.slane %v1280_v38, %v7613_v28  ;;  %v1295_v48 = vrot.slane %v1281_v39, %v7613_v28 }
 0x338   : > { %v935_v49 = vpop.permute.xlu1 %934  ;;  %v1229_v50 = vpop.permute.xlu0 %1228 }
 0x339   : > { %v1368_v52 = vcombine.low %v1272_v43, %v1279_v44  ;;  %v6176_v53 = vcombine.high %v1272_v43, %v1279_v44  ;;  %v1384_v54 = vcombine.low %v1288_v47, %v1295_v48  ;;  %v6177_v55 = vcombine.high %v1288_v47, %v1295_v48 }
 0x33a   : > { %v956_v56 = vcombine.low %v923_v34, %v935_v49  ;;  %v957_v57 = vcombine.high %v923_v34, %v935_v49  ;;  %v1316_v58 = vcombine.low %v1217_v35, %v1229_v50  ;;  %v1317_v59 = vcombine.high %v1217_v35, %v1229_v50 }
 0x33b   : > { %v7624_v60 = vrot.slane %v1368_v52, %v7610_v21  ;;  %v7627_v62 = vrot.slane %v6176_v53, %v7610_v21  ;;  %v7632_v2 = vrot.slane %v1384_v54, %v7610_v21  ;;  %v7635_v3 = vrot.slane %v6177_v55, %v7610_v21 }
 0x33c   : > { %v964_v4 = vrot.slane %v956_v56, %v7610_v21  ;;  %v971_v5 = vrot.slane %v957_v57, %v7610_v21  ;;  %v1223_v8 = vpop.permute.xlu1 %1222  ;;  %v931_v9 = vpop.permute.xlu0 %930  ;;  %v1324_v10 = vrot.slane %v1316_v58, %v7610_v21  ;;  %v1331_v13 = vrot.slane %v1317_v59, %v7610_v21 }
 0x33d   : > { %v1300_v14 = vcombine.low %v7591_v11, %v1223_v8  ;;  %v1301_v15 = vcombine.high %v7591_v11, %v1223_v8  ;;  %v1008_v23 = vcombine.low %v7599_v12, %v931_v9  ;;  %v1009_v24 = vcombine.high %v7599_v12, %v931_v9 }
 0x33e   : > { %v972_v16 = vcombine.low %v948_v63, %v964_v4  ;;  %v973_v17 = vcombine.high %v948_v63, %v964_v4  ;;  %v988_v18 = vcombine.low %v955_v1, %v971_v5  ;;  %v989_v19 = vcombine.high %v955_v1, %v971_v5 }
 0x33f   : > { %v1308_v20 = vrot.slane %v1300_v14, %v7610_v21  ;;  %v1315_v22 = vrot.slane %v1301_v15, %v7610_v21  ;;  %v1400_v5 = vcombine.low %v7624_v60, %v7627_v62  ;;  %v1416_v8 = vcombine.low %v7632_v2, %v7635_v3 }
 0x340   : > { %v980_v25 = vrot.slane %v972_v16, %v7613_v28  ;;  %v987_v26 = vrot.slane %v973_v17, %v7613_v28  ;;  %v996_v27 = vrot.slane %v988_v18, %v7613_v28  ;;  %v1003_v11 = vrot.slane %v989_v19, %v7613_v28  ;;  %v925_v29 = vpop.permute.xlu1 %924 }
 0x341   : > { %v1332_v30 = vcombine.low %v1308_v20, %v1324_v10  ;;  %v1333_v31 = vcombine.high %v1308_v20, %v1324_v10  ;;  %v1348_v33 = vcombine.low %v1315_v22, %v1331_v13  ;;  %v1349_v34 = vcombine.high %v1315_v22, %v1331_v13 }
 0x342   : > { %v1076_v35 = vcombine.low %v980_v25, %v987_v26  ;;  %v6172_v36 = vcombine.high %v980_v25, %v987_v26  ;;  %v1092_v37 = vcombine.low %v996_v27, %v1003_v11  ;;  %v6173_v38 = vcombine.high %v996_v27, %v1003_v11 }
 0x343   : > { %v1340_v39 = vrot.slane %v1332_v30, %v7613_v28  ;;  %v1347_v12 = vrot.slane %v1333_v31, %v7613_v28  ;;  %v1356_v40 = vrot.slane %v1348_v33, %v7613_v28  ;;  %v1363_v41 = vrot.slane %v1349_v34, %v7613_v28 }
 0x344   : > { %v7656_v43 = vrot.slane %v1076_v35, %v7610_v21  ;;  %v7659_v44 = vrot.slane %v6172_v36, %v7610_v21  ;;  %v7662_v47 = vrot.slane %v1092_v37, %v7610_v21  ;;  %v7665_v48 = vrot.slane %v6173_v38, %v7610_v21  ;;  %v937_v54 = vpop.permute.xlu1 %936 }
 0x345   : > { %v1436_v49 = vcombine.low %v1340_v39, %v1347_v12  ;;  %v6178_v50 = vcombine.high %v1340_v39, %v1347_v12  ;;  %v1452_v52 = vcombine.low %v1356_v40, %v1363_v41  ;;  %v6179_v53 = vcombine.high %v1356_v40, %v1363_v41 }
 0x346   : > { %v1108_v55 = vcombine.low %v7656_v43, %v7659_v44  ;;  %v1124_v56 = vcombine.low %v7662_v47, %v7665_v48  ;;  %v1024_v1 = vcombine.low %v925_v29, %v937_v54  ;;  %v1025_v4 = vcombine.high %v925_v29, %v937_v54 }
 0x347   : > { %v1443_v57 = vrot.slane %v1436_v49, %v7610_v21  ;;  %v1451_v58 = vrot.slane %v6178_v50, %v7610_v21  ;;  %v7674_v59 = vrot.slane %v1452_v52, %v7610_v21  ;;  %v1467_v63 = vrot.slane %v6179_v53, %v7610_v21 }
 0x348   : > { %v1016_v9 = vrot.slane %v1008_v23, %v7610_v21  ;;  %v1023_v10 = vrot.slane %v1009_v24, %v7610_v21  ;;  %v1032_v15 = vrot.slane %v1024_v1, %v7610_v21  ;;  %v1039_v16 = vrot.slane %v1025_v4, %v7610_v21 }
 0x349   : > { %v1468_v13 = vcombine.low %v1443_v57, %v1451_v58  ;;  %v1484_v14 = vcombine.low %v7674_v59, %v1467_v63  ;;  %v1408_v17 = vrot.slane %v1400_v5, %v7613_v28  ;;  %v1424_v18 = vrot.slane %v1416_v8, %v7613_v28 }
 0x34a   : > { %v1116_v19 = vrot.slane %v1108_v55, %v7613_v28  ;;  %v1132_v20 = vrot.slane %v1124_v56, %v7613_v28  ;;  %v1040_v24 = vcombine.low %v1016_v9, %v1032_v15  ;;  %v1041_v25 = vcombine.high %v1016_v9, %v1032_v15 }
 0x34b   : > { %v7691_v22 = vrot.slane %v1468_v13, %v7613_v28  ;;  %v7694_v23 = vrot.slane %v1484_v14, %v7613_v28  ;;  %v1056_v26 = vcombine.low %v1023_v10, %v1039_v16  ;;  %v1057_v27 = vcombine.high %v1023_v10, %v1039_v16 }
 0x34c   : > { %v1432_v11 = vcombine.low %v1408_v17, %v1424_v18  ;;  %v1048_v30 = vrot.slane %v1040_v24, %v7613_v28  ;;  %v1055_v31 = vrot.slane %v1041_v25, %v7613_v28  ;;  %v1140_v36 = vcombine.low %v1116_v19, %v1132_v20 }
 0x34d   : > { %v1500_v29 = vcombine.low %v7691_v22, %v7694_v23  ;;  %v1064_v33 = vrot.slane %v1056_v26, %v7613_v28  ;;  %v1071_v34 = vrot.slane %v1057_v27, %v7613_v28  ;;  %v1433_v37 = vcombine.high %v1408_v17, %v1424_v18 }
 0x34e   : > { %v1804_v35 = vpack.c.bf16 %v1432_v11, %v1432_v11  ;;  %v1144_v39 = vcombine.low %v1048_v30, %v1055_v31  ;;  %v6174_v12 = vcombine.high %v1048_v30, %v1055_v31  ;;  %v1401_v52 = vcombine.high %v7624_v60, %v7627_v62 }
 0x34f   : > { %v1808_v38 = vpack.c.bf16 %v1500_v29, %v1500_v29  ;;  %v1160_v40 = vcombine.low %v1064_v33, %v1071_v34  ;;  %v6175_v41 = vcombine.high %v1064_v33, %v1071_v34  ;;  %v1417_v1 = vcombine.high %v7632_v2, %v7635_v3 }
 0x350   : > { %v1817_v49 = vsel %vm1812_vm1, %v1804_v35, 0  ;;  %v1151_v53 = vrot.slane %v1144_v39, %v7610_v21  ;;  %v1159_v54 = vrot.slane %v6174_v12, %v7610_v21  ;;  %v1469_v4 = vcombine.high %v1443_v57, %v1451_v58 }
 0x351   : > { %v2001_v50 = vsel %vm1812_vm1, %v1808_v38, 0  ;;  %v1167_v55 = vrot.slane %v1160_v40, %v7610_v21  ;;  %v1175_v56 = vrot.slane %v6175_v41, %v7610_v21  ;;  %6461 = vmatpush3.bf16.xpose.msra.mxu1 %v1817_v49  ;;  %v1796_v9 = vpack.c.bf16 %v1140_v36, %v1140_v36 }
 0x352   : > { %6466 = vmatprep.subr.bf16.mxu1 %v7187_v6  ;;  %6485 = vmatpush3.bf16.xpose.msra.mxu0 %v2001_v50  ;;  %v1176_v5 = vcombine.low %v1151_v53, %v1159_v54  ;;  %v1805_v60 = vpack.c.bf16 %v1433_v37, %v1433_v37  ;;  %v1415_v62 = vrot.slane %v1401_v52, %v7613_v28 }
 0x353   : > { %v1192_v8 = vcombine.low %v1167_v55, %v1175_v56  ;;  %6496 = vmatprep.subr.bf16.mxu0 %v7187_v6  ;;  %v1431_v10 = vrot.slane %v1417_v1, %v7613_v28  ;;  %v1483_v13 = vrot.slane %v1469_v4, %v7613_v28  ;;  %v1485_v14 = vcombine.high %v7674_v59, %v1467_v63 }
 0x354   : > { %v1184_v15 = vrot.slane %v1176_v5, %v7613_v28  ;;  %v1177_v2 = vcombine.high %v1151_v53, %v1159_v54  ;;  %v1193_v3 = vcombine.high %v1167_v55, %v1175_v56  ;;  %v1863_v17 = vsel %vm1812_vm1, %v1805_v60, 0 }
 0x355   : > { %v1200_v16 = vrot.slane %v1192_v8, %v7613_v28  ;;  %v1499_v57 = vrot.slane %v1485_v14, %v7613_v28  ;;  %v1434_v18 = vcombine.low %v1415_v62, %v1431_v10  ;;  %v1109_v25 = vcombine.high %v7656_v43, %v7659_v44 }
 0x356   : > { %v1125_v59 = vcombine.high %v7662_v47, %v7665_v48  ;;  %v1141_v26 = vcombine.high %v1116_v19, %v1132_v20  ;;  %v1191_v11 = vrot.slane %v1177_v2, %v7613_v28  ;;  %v1207_v29 = vrot.slane %v1193_v3, %v7613_v28 }
 0x357   : > { %v1208_v58 = vcombine.low %v1184_v15, %v1200_v16  ;;  %v1502_v24 = vcombine.low %v1483_v13, %v1499_v57  ;;  %v1806_v30 = vpack.c.bf16 %v1434_v18, %v1434_v18  ;;  %v1123_v47 = vrot.slane %v1109_v25, %v7613_v28 }
 0x358   : > { %6463 = vmatmul.mubr.msk.bf16.vlgmr.msra.gmra.mrb[4].mxu1 %vm1812_vm1, %v1796_v9  ;;  %v1797_v44 = vpack.c.bf16 %v1141_v26, %v1141_v26  ;;  %v1139_v48 = vrot.slane %v1125_v59, %v7613_v28  ;;  %v1210_v19 = vcombine.low %v1191_v11, %v1207_v29  ;;  %v1435_v31 = vcombine.high %v1415_v62, %v1431_v10 }
 0x359   : > { %6467 = vmatpush3.bf16.xpose.msra.mxu1 %v1863_v17  ;;  %6468 = vmatprep.mubr.msk.bf16.mxu1 %vm7189_vm0, %v7187_v6  ;;  %v1800_v63 = vpack.c.bf16 %v1208_v58, %v1208_v58  ;;  %v1810_v27 = vpack.c.bf16 %v1502_v24, %v1502_v24  ;;  %v1909_v20 = vsel %vm1812_vm1, %v1806_v30, 0  ;;  %v1501_v38 = vcombine.high %v7691_v22, %v7694_v23 }
 0x35a   : > { %6472 = vmatprep.subr.bf16.mxu1 %v7187_v6  ;;  %v1142_v33 = vcombine.low %v1123_v47, %v1139_v48  ;;  %v1802_v34 = vpack.c.bf16 %v1210_v19, %v1210_v19  ;;  %v1807_v35 = vpack.c.bf16 %v1435_v31, %v1435_v31  ;;  %v1143_v39 = vcombine.high %v1123_v47, %v1139_v48 }
 0x35b   : > { %6487 = vmatmul.mubr.msk.bf16.vlgmr.msra.gmra.mrb[4].mxu0 %vm1812_vm1, %v1800_v63  ;;  %v2093_v43 = vsel %vm1812_vm1, %v1810_v27, 0  ;;  %v1809_v12 = vpack.c.bf16 %v1501_v38, %v1501_v38  ;;  %v1503_v49 = vcombine.high %v1483_v13, %v1499_v57  ;;  %v1209_v50 = vcombine.high %v1184_v15, %v1200_v16 }
 0x35c   : > { %6498 = vmatprep.mubr.msk.bf16.mxu0 %vm7189_vm0, %v7187_v6  ;;  %6497 = vmatpush3.bf16.xpose.msra.mxu0 %v2093_v43  ;;  %v1798_v36 = vpack.c.bf16 %v1142_v33, %v1142_v33  ;;  %v1955_v37 = vsel %vm1812_vm1, %v1807_v35, 0  ;;  %v1799_v40 = vpack.c.bf16 %v1143_v39, %v1143_v39  ;;  %v1211_v53 = vcombine.high %v1191_v11, %v1207_v29  ;;  %v7798_v33 = vld [vmem:[%s7507_s23 + $0x8] sm:$0x7f] }
 0x35d   : > { %6508 = vmatprep.subr.bf16.mxu0 %v7187_v6  ;;  %v2047_v41 = vsel %vm1812_vm1, %v1809_v12, 0  ;;  %v1811_v22 = vpack.c.bf16 %v1503_v49, %v1503_v49  ;;  %v1801_v23 = vpack.c.bf16 %v1209_v50, %v1209_v50  ;;  %v2192_v55 = vand.u32 127, %v645_v42 }
 0x35e   : > { %v1803_v54 = vpack.c.bf16 %v1211_v53, %v1211_v53 }
 0x35f   : > { %v2139_v52 = vsel %vm1812_vm1, %v1811_v22, 0  ;;  %vm7769_vm2 = vcmp.ge.s32.totalorder %v7562_v45, %v2192_v55 }
 0x360   : > { %6469 = vmatmul.mubr.msk.bf16.vlgmr.msra.gmra.mrb[8].mxu1 %vm1812_vm1, %v1797_v44 }
 0x361   : > { %6473 = vmatpush3.bf16.xpose.msra.mxu1 %v1909_v20  ;;  %6474 = vmatprep.mubr.msk.bf16.mxu1 %vm7189_vm0, %v7187_v6 }
 0x362   : > { %6478 = vmatprep.subr.bf16.mxu1 %v7187_v6 }
 0x363   : > { %6499 = vmatmul.mubr.msk.bf16.vlgmr.msra.gmra.mrb[8].mxu0 %vm1812_vm1, %v1802_v34  ;;  %v917_v34 = vrot.slane %v7798_v33, %v7565_v46 }
 0x364   : > { %6510 = vmatprep.mubr.msk.bf16.mxu0 %vm7189_vm0, %v7187_v6 }
 0x368   : > { %6475 = vmatmul.mubr.msk.bf16.vlgmr.msra.gmra.mrb[12].mxu1 %vm1812_vm1, %v1798_v36 }
 0x369   : > { %6479 = vmatpush3.bf16.xpose.msra.mxu1 %v1955_v37  ;;  %6480 = vmatprep.mubr.msk.bf16.mxu1 %vm7189_vm0, %v7187_v6 }
 0x36a   : > { %6490 = vmatprep.subr.bf16.mxu1 %v7187_v6 }
 0x370   : > { %6481 = vmatmul.mubr.msk.bf16.vlgmr.msra.gmra.mrb[16].mxu1 %vm1812_vm1, %v1799_v40  ;;  %v7805_v40 = vadd.f32 %v917_v34, %v7581_v0 }
 0x371   : > { %6491 = vmatpush3.bf16.xpose.msra.mxu1 %v2047_v41  ;;  %6492 = vmatprep.mubr.msk.bf16.mxu1 %vm7189_vm0, %v7187_v6 }
 0x372   : > { %6502 = vmatprep.subr.bf16.mxu1 %v7187_v6 }
 0x378   : > { %6493 = vmatmul.mubr.msk.bf16.vlgmr.msra.gmra.mrb[20].mxu1 %vm1812_vm1, %v1801_v23 }
 0x379   : > { %6503 = vmatpush3.bf16.xpose.msra.mxu1 %v2139_v52  ;;  %6504 = vmatprep.mubr.msk.bf16.mxu1 %vm7189_vm0, %v7187_v6 }
 0x37a   : > { %6514 = vmatprep.subr.bf16.mxu1 %v7187_v6 }
 0x380   : > { %6505 = vmatmul.mubr.msk.bf16.vlgmr.msra.gmra.mrb[24].mxu1 %vm1812_vm1, %v1803_v54 }
 0x381   : > { %6516 = vmatprep.mubr.msk.bf16.mxu1 %vm7189_vm0, %v7187_v6 }
 0x42b   : > { %v1853_v56 = vpop.f32.mrb[4].mxu1 }
 0x42c   : > { %v2181_v4 = vmul.f32 0.17677669, %v1853_v56  ;;  %v6464_v5 = vpop.f32.mrb[5].mxu1 }
 0x42d   : > { %v1856_v8 = vpop.f32.mrb[6].mxu1 }
 0x42e   : > { %v6465_v9 = vpop.f32.mrb[7].mxu1  ;;  %v7775_v60 = vsel %vm7769_vm2, %v2181_v4, -1e+09  ;;  %v2037_v62 = vpop.f32.mrb[4].mxu0 }
 0x42f   : > { %v2205_v10 = vsel %vm2204_vm3, %v7775_v60, -inf  ;;  %v2185_v42 = vmul.f32 0.17677669, %v2037_v62  ;;  %v6488_v13 = vpop.f32.mrb[5].mxu0  ;;  %v7827_v62 = vadd.f32 %v917_v34, %v7585_v7 }
 0x430   : > { %2206 = vmax.xlane.f32.xlu0 %v2205_v10  ;;  %v2040_v14 = vpop.f32.mrb[6].mxu0 }
 0x431   : > { %v6489_v15 = vpop.f32.mrb[7].mxu0  ;;  %v7781_v16 = vsel %vm7769_vm2, %v2185_v42, -1e+09 }
 0x432   : > { %v2217_v2 = vsel %vm2204_vm3, %v7781_v16, -inf }
 0x433   : > { %v1899_v3 = vpop.f32.mrb[8].mxu1 }
 0x434   : > { %v2182_v57 = vmul.f32 0.17677669, %v1899_v3  ;;  %v6470_v58 = vpop.f32.mrb[9].mxu1  ;;  %2218 = vmax.xlane.f32.xlu0 %v2217_v2 }
 0x435   : > { %v1902_v17 = vpop.f32.mrb[10].mxu1 }
 0x436   : > { %v6471_v18 = vpop.f32.mrb[11].mxu1  ;;  %v2197_v24 = vsel %vm7769_vm2, %v2182_v57, -1e+09  ;;  %v2129_v59 = vpop.f32.mrb[8].mxu0 }
 0x437   : > { %v2208_v25 = vsel %vm2204_vm3, %v2197_v24, -inf  ;;  %v2187_v63 = vmul.f32 0.17677669, %v2129_v59  ;;  %v6500_v26 = vpop.f32.mrb[9].mxu0 }
 0x438   : > { %2209 = vmax.xlane.f32.xlu1 %v2208_v25  ;;  %v2132_v27 = vpop.f32.mrb[10].mxu0 }
 0x439   : > { %v6501_v11 = vpop.f32.mrb[11].mxu0  ;;  %v7790_v29 = vsel %vm7769_vm2, %v2187_v63, -1e+09 }
 0x43a   : > { %v2223_v43 = vsel %vm2204_vm3, %v7790_v29, -inf }
 0x43b   : > { %v1945_v30 = vpop.f32.mrb[12].mxu1  ;;  %2224 = vmax.xlane.f32.xlu0 %v2223_v43 }
 0x43c   : > { %v2183_v44 = vmul.f32 0.17677669, %v1945_v30  ;;  %v6476_v47 = vpop.f32.mrb[13].mxu1 }
 0x43d   : > { %v1948_v48 = vpop.f32.mrb[14].mxu1 }
 0x43e   : > { %v6477_v19 = vpop.f32.mrb[15].mxu1  ;;  %v2198_v20 = vsel %vm7769_vm2, %v2183_v44, -1e+09 }
 0x43f   : > { %v2211_v31 = vsel %vm2204_vm3, %v2198_v20, -inf }
 0x440   : > { %2212 = vmax.xlane.f32.xlu0 %v2211_v31 }
 0x443   : > { %v1991_v35 = vpop.f32.mrb[16].mxu1 }
 0x444   : > { %v2184_v36 = vmul.f32 0.17677669, %v1991_v35  ;;  %v6482_v37 = vpop.f32.mrb[17].mxu1 }
 0x445   : > { %v1994_v38 = vpop.f32.mrb[18].mxu1 }
 0x446   : > { %v6483_v39 = vpop.f32.mrb[19].mxu1  ;;  %v2199_v12 = vsel %vm7769_vm2, %v2184_v36, -1e+09 }
 0x447   : > { %v2214_v41 = vsel %vm2204_vm3, %v2199_v12, -inf }
 0x448   : > { %2215 = vmax.xlane.f32.xlu0 %v2214_v41 }
 0x449   : > { %1512 = vrot.lane.b32.xlu1 %v7805_v40, %s7190_s21 }
 0x44b   : > { %v2083_v49 = vpop.f32.mrb[20].mxu1 }
 0x44c   : > { %v2186_v50 = vmul.f32 0.17677669, %v2083_v49  ;;  %v6494_v22 = vpop.f32.mrb[21].mxu1 }
 0x44d   : > { %1518 = vrot.lane.b32.xlu1 %v7805_v40, %s7192_s20  ;;  %v2086_v23 = vpop.f32.mrb[22].mxu1 }
 0x44e   : > { %v6495_v52 = vpop.f32.mrb[23].mxu1  ;;  %v7814_v53 = vsel %vm7769_vm2, %v2186_v50, -1e+09 }
 0x44f   : > { %v2220_v8 = vsel %vm2204_vm3, %v7814_v53, -inf }
 0x453   : > { %v2175_v0 = vpop.f32.mrb[24].mxu1 }
 0x454   : > { %v2188_v54 = vmul.f32 0.17677669, %v2175_v0  ;;  %v6506_v55 = vpop.f32.mrb[25].mxu1 }
 0x455   : > { %v2178_v56 = vpop.f32.mrb[26].mxu1 }
 0x456   : > { %v6507_v4 = vpop.f32.mrb[27].mxu1  ;;  %v7818_v5 = vsel %vm7769_vm2, %v2188_v54, -1e+09 }
 0x457   : > { %v2226_v9 = vsel %vm2204_vm3, %v7818_v5, -inf }
 0x45e   : > { %1506 = vrot.lane.b32.xlu0 %v7805_v40, %s7191_s0 }
 0x471   : > { %2221 = vmax.xlane.f32.xlu1 %v2220_v8 }
 0x475   : > { %2227 = vmax.xlane.f32.xlu1 %v2226_v9 }
 0x486   : > { %1508 = vrot.lane.b32.xlu1 %v7827_v62, %s7191_s0 }
 0x4bd   : > { %v2207_v1 = vpop.xlane.xlu0 %2206 }
 0x4be   : > { %v2229_v10 = vsub.f32 %v7775_v60, %v2207_v1 }
 0x4c0   : > { %v2237_v42 = vmul.f32 1.442695, %v2229_v10 }
 0x4c1   : > { %v2219_v13 = vpop.xlane.xlu0 %2218 }
 0x4c2   : > { %6931 = vpow2.f32 %v2237_v42  ;;  %v2233_v14 = vsub.f32 %v7781_v16, %v2219_v13 }
 0x4c4   : > { %v2245_v15 = vmul.f32 1.442695, %v2233_v14 }
 0x4c5   : > { %v2210_v2 = vpop.xlane.xlu1 %2209 }
 0x4c6   : > { %v2230_v3 = vsub.f32 %v2197_v24, %v2210_v2  ;;  %6933 = vpow2.f32 %v2245_v15 }
 0x4c8   : > { %v2239_v57 = vmul.f32 1.442695, %v2230_v3  ;;  %v7833_v58 = vpop.xlane.xlu0 %2224 }
 0x4c9   : > { %v1513_v24 = vpop.permute.xlu1 %1512 }
 0x4ca   : > { %6935 = vpow2.f32 %v2239_v57  ;;  %v1524_v30 = vcombine.low %v7805_v40, %v1513_v24  ;;  %v1525_v43 = vcombine.high %v7805_v40, %v1513_v24 }
 0x4cc   : > { %v7835_v7 = vpop.eup %6931  ;;  %v1532_v34 = vrot.slane %v1524_v30, %v7610_v21  ;;  %v1539_v35 = vrot.slane %v1525_v43, %v7610_v21  ;;  %v2235_v30 = vsub.f32 %v7790_v29, %v7833_v58 }
 0x4cd   : > { %v2253_v17 = vsel %vm2204_vm3, %v7835_v7, 0.0  ;;  %v2213_v18 = vpop.xlane.xlu0 %2212  ;;  %v1519_v47 = vpop.permute.xlu1 %1518 }
 0x4ce   : > { %2254 = vadd.xlane.f32.xlu0 %v2253_v17  ;;  %v2231_v60 = vsub.f32 %v2198_v20, %v2213_v18 }
 0x4d0   : > { %v7839_v25 = vpop.eup %6933  ;;  %v2241_v59 = vmul.f32 1.442695, %v2231_v60 }
 0x4d1   : > { %v2265_v16 = vsel %vm2204_vm3, %v7839_v25, 0.0 }
 0x4d2   : > { %6937 = vpow2.f32 %v2241_v59  ;;  %2266 = vadd.xlane.f32.xlu0 %v2265_v16 }
 0x4d4   : > { %v7843_v63 = vpop.eup %6935 }
 0x4d5   : > { %v2256_v26 = vsel %vm2204_vm3, %v7843_v63, 0.0  ;;  %v2216_v27 = vpop.xlane.xlu0 %2215 }
 0x4d6   : > { %2257 = vadd.xlane.f32.xlu1 %v2256_v26  ;;  %v2232_v11 = vsub.f32 %v2199_v12, %v2216_v27 }
 0x4d8   : > { %v2243_v44 = vmul.f32 1.442695, %v2232_v11 }
 0x4d9   : > { %v1507_v48 = vpop.permute.xlu0 %1506 }
 0x4da   : > { %6939 = vpow2.f32 %v2243_v44  ;;  %v1540_v19 = vcombine.low %v1507_v48, %v1519_v47  ;;  %v1541_v20 = vcombine.high %v1507_v48, %v1519_v47  ;;  %v2249_v48 = vmul.f32 1.442695, %v2235_v30 }
 0x4dc   : > { %v7849_v31 = vpop.eup %6937  ;;  %v1548_v36 = vrot.slane %v1540_v19, %v7610_v21  ;;  %v1555_v37 = vrot.slane %v1541_v20, %v7610_v21 }
 0x4dd   : > { %v2259_v38 = vsel %vm2204_vm3, %v7849_v31, 0.0 }
 0x4de   : > { %v1556_v39 = vcombine.low %v1532_v34, %v1548_v36  ;;  %v1557_v12 = vcombine.high %v1532_v34, %v1548_v36  ;;  %v1572_v40 = vcombine.low %v1539_v35, %v1555_v37  ;;  %v1573_v41 = vcombine.high %v1539_v35, %v1555_v37  ;;  %2260 = vadd.xlane.f32.xlu1 %v2259_v38 }
 0x4e0   : > { %v1564_v49 = vrot.slane %v1556_v39, %v7613_v28  ;;  %v1571_v50 = vrot.slane %v1557_v12, %v7613_v28  ;;  %v1580_v22 = vrot.slane %v1572_v40, %v7613_v28  ;;  %v1587_v23 = vrot.slane %v1573_v41, %v7613_v28 }
 0x4e2   : > { %v1660_v52 = vcombine.low %v1564_v49, %v1571_v50  ;;  %v6180_v0 = vcombine.high %v1564_v49, %v1571_v50  ;;  %v1676_v54 = vcombine.low %v1580_v22, %v1587_v23  ;;  %v6181_v55 = vcombine.high %v1580_v22, %v1587_v23 }
 0x4e4   : > { %v7861_v56 = vpop.eup %6939  ;;  %v1667_v4 = vrot.slane %v1660_v52, %v7610_v21  ;;  %v1675_v8 = vrot.slane %v6180_v0, %v7610_v21  ;;  %v1683_v9 = vrot.slane %v1676_v54, %v7610_v21  ;;  %v1691_v1 = vrot.slane %v6181_v55, %v7610_v21 }
 0x4e5   : > { %v2262_v10 = vsel %vm2204_vm3, %v7861_v56, 0.0 }
 0x4e6   : > { %2263 = vadd.xlane.f32.xlu0 %v2262_v10  ;;  %v1692_v42 = vcombine.low %v1667_v4, %v1675_v8  ;;  %v1708_v13 = vcombine.low %v1683_v9, %v1691_v1  ;;  %v1693_v14 = vcombine.high %v1667_v4, %v1675_v8  ;;  %v1709_v15 = vcombine.high %v1683_v9, %v1691_v1 }
 0x4e8   : > { %v1700_v2 = vrot.slane %v1692_v42, %v7613_v28  ;;  %v1716_v3 = vrot.slane %v1708_v13, %v7613_v28  ;;  %v1707_v57 = vrot.slane %v1693_v14, %v7613_v28  ;;  %v1723_v17 = vrot.slane %v1709_v15, %v7613_v28 }
 0x4ea   : > { %v1724_v18 = vcombine.low %v1700_v2, %v1716_v3  ;;  %v1725_v60 = vcombine.high %v1700_v2, %v1716_v3  ;;  %v1726_v59 = vcombine.low %v1707_v57, %v1723_v17  ;;  %v1727_v16 = vcombine.high %v1707_v57, %v1723_v17 }
 0x4ec   : > { %v2301_v24 = vpack.c.bf16 %v1724_v18, %v1724_v18  ;;  %v2302_v26 = vpack.c.bf16 %v1725_v60, %v1725_v60  ;;  %v2303_v49 = vpack.c.bf16 %v1726_v59, %v1726_v59  ;;  %v2304_v54 = vpack.c.bf16 %v1727_v16, %v1727_v16 }
 0x4ee   : > { %v2314_v27 = vsel %vm2312_vm4, %v2301_v24, 0  ;;  %v2360_v11 = vsel %vm2312_vm4, %v2302_v26, 0  ;;  %v2452_v55 = vsel %vm2312_vm4, %v2304_v54, 0 }
 0x4ef   : > { %6509 = vmatpush3.bf16.msra.mxu0 %v2314_v27  ;;  %6515 = vmatpush3.bf16.msra.mxu1 %v2360_v11 }
 0x4f0   : > { %1520 = vrot.lane.b32.xlu1 %v7827_v62, %s7192_s20  ;;  %6520 = vmatprep.subr.bf16.mxu0 %v7187_v6 }
 0x4f1   : > { %6526 = vmatprep.subr.bf16.mxu1 %v7187_v6 }
 0x4fe   : > { %v2222_v43 = vpop.xlane.xlu1 %2221 }
 0x4ff   : > { %v2234_v44 = vsub.f32 %v7814_v53, %v2222_v43 }
 0x501   : > { %v2247_v47 = vmul.f32 1.442695, %v2234_v44 }
 0x502   : > { %v2228_v29 = vpop.xlane.xlu1 %2227 }
 0x503   : > { %6941 = vpow2.f32 %v2247_v47  ;;  %v2236_v53 = vsub.f32 %v7818_v5, %v2228_v29  ;;  %v2406_v5 = vsel %vm2312_vm4, %v2303_v49, 0 }
 0x504   : > { %6943 = vpow2.f32 %v2249_v48 }
 0x505   : > { %v2251_v58 = vmul.f32 1.442695, %v2236_v53 }
 0x506   : > { %v1509_v39 = vpop.permute.xlu1 %1508 }
 0x507   : > { %6945 = vpow2.f32 %v2251_v58 }
 0x50d   : > { %v7882_v19 = vpop.eup %6941 }
 0x50e   : > { %v2268_v20 = vsel %vm2204_vm3, %v7882_v19, 0.0  ;;  %v7886_v34 = vpop.eup %6943 }
 0x50f   : > { %2269 = vadd.xlane.f32.xlu0 %v2268_v20  ;;  %v2271_v35 = vsel %vm2204_vm3, %v7886_v34, 0.0 }
 0x511   : > { %v7893_v36 = vpop.eup %6945 }
 0x512   : > { %v2274_v37 = vsel %vm2204_vm3, %v7893_v36, 0.0 }
 0x514   : > { %2272 = vadd.xlane.f32.xlu1 %v2271_v35 }
 0x525   : > { %1514 = vrot.lane.b32.xlu0 %v7827_v62, %s7190_s21 }
 0x544   : > { %2275 = vadd.xlane.f32.xlu0 %v2274_v37 }
 0x55b   : > { %v2255_v38 = vpop.xlane.xlu0 %2254 }
 0x55c   : > { %6947 = vrcp.f32 %v2255_v38 }
 0x55f   : > { %v2267_v0 = vpop.xlane.xlu0 %2266 }
 0x563   : > { %v2258_v12 = vpop.xlane.xlu1 %2257 }
 0x564   : > { %6949 = vrcp.f32 %v2258_v12 }
 0x566   : > { %v6948_v40 = vpop.eup %6947 }
 0x567   : > { %v2285_v41 = vmul.f32 %v6948_v40, %v7835_v7 }
 0x569   : > { %v2293_v50 = vpack.c.bf16 %v2285_v41, %v2285_v41 }
 0x56b   : > { %6511 = vmatmul.mubr.msk.bf16.vlgmr.msra.gmra.mrb[12].mxu0 %vm2204_vm3, %v2293_v50  ;;  %v2261_v22 = vpop.xlane.xlu1 %2260 }
 0x56c   : > { %6521 = vmatpush3.bf16.msra.mxu0 %v2406_v5  ;;  %6951 = vrcp.f32 %v2261_v22  ;;  %6522 = vmatprep.mubr.msk.bf16.mxu0 %vm7189_vm0, %v7187_v6 }
 0x56d   : > { %6532 = vmatprep.subr.bf16.mxu0 %v7187_v6 }
 0x56e   : > { %v6950_v23 = vpop.eup %6949 }
 0x56f   : > { %v2286_v52 = vmul.f32 %v6950_v23, %v7843_v63  ;;  %v1521_v13 = vpop.permute.xlu1 %1520 }
 0x570   : > { %v1608_v15 = vcombine.low %v1509_v39, %v1521_v13  ;;  %v1609_v2 = vcombine.high %v1509_v39, %v1521_v13 }
 0x571   : > { %v2294_v7 = vpack.c.bf16 %v2286_v52, %v2286_v52 }
 0x572   : > { %v1616_v17 = vrot.slane %v1608_v15, %v7610_v21  ;;  %v1623_v18 = vrot.slane %v1609_v2, %v7610_v21 }
 0x573   : > { %6517 = vmatmul.mubr.msk.bf16.vlgmr.msra.gmra.mrb[28].mxu1 %vm2204_vm3, %v2294_v7  ;;  %v2264_v4 = vpop.xlane.xlu0 %2263 }
 0x574   : > { %6527 = vmatpush3.bf16.msra.mxu1 %v2452_v55  ;;  %6953 = vrcp.f32 %v2264_v4  ;;  %6528 = vmatprep.mubr.msk.bf16.mxu1 %vm7189_vm0, %v7187_v6 }
 0x575   : > { %6538 = vmatprep.subr.bf16.mxu1 %v7187_v6  ;;  %6955 = vrcp.f32 %v2267_v0 }
 0x576   : > { %v6952_v8 = vpop.eup %6951 }
 0x577   : > { %v2287_v9 = vmul.f32 %v6952_v8, %v7849_v31 }
 0x579   : > { %v2295_v1 = vpack.c.bf16 %v2287_v9, %v2287_v9 }
 0x57b   : > { %6523 = vmatmul.mubr.msk.bf16.vlgmr.msra.gmra.mrb[16].mxu0 %vm2204_vm3, %v2295_v1 }
 0x57c   : > { %6534 = vmatprep.mubr.msk.bf16.mxu0 %vm7189_vm0, %v7187_v6 }
 0x57e   : > { %v6954_v63 = vpop.eup %6953 }
 0x57f   : > { %v2288_v10 = vmul.f32 %v6954_v63, %v7861_v56  ;;  %v6956_v12 = vpop.eup %6955 }
 0x580   : > { %v2289_v7 = vmul.f32 %v6956_v12, %v7839_v25 }
 0x581   : > { %v2296_v42 = vpack.c.bf16 %v2288_v10, %v2288_v10 }
 0x583   : > { %6529 = vmatmul.mubr.msk.bf16.vlgmr.msra.gmra.mrb[32].mxu1 %vm2204_vm3, %v2296_v42  ;;  %v2297_v42 = vpack.c.bf16 %v2289_v7, %v2289_v7 }
 0x584   : > { %6540 = vmatprep.mubr.msk.bf16.mxu1 %vm7189_vm0, %v7187_v6 }
 0x59c   : > { %v2270_v14 = vpop.xlane.xlu0 %2269 }
 0x59d   : > { %6957 = vrcp.f32 %v2270_v14 }
 0x5a0   : > { %v1515_v31 = vpop.permute.xlu0 %1514 }
 0x5a1   : > { %v1592_v3 = vcombine.low %v7827_v62, %v1515_v31  ;;  %v1593_v57 = vcombine.high %v7827_v62, %v1515_v31  ;;  %v2273_v58 = vpop.xlane.xlu1 %2272 }
 0x5a2   : > { %6959 = vrcp.f32 %v2273_v58  ;;  %v6842_v58 = vld [vmem:[%s7461_s14 + $0x18] sm:$0xff]  }
 0x5a3   : > { %v1600_v56 = vrot.slane %v1592_v3, %v7610_v21  ;;  %v1607_v60 = vrot.slane %v1593_v57, %v7610_v21 }
 0x5a5   : > { %v1624_v59 = vcombine.low %v1600_v56, %v1616_v17  ;;  %v1625_v16 = vcombine.high %v1600_v56, %v1616_v17  ;;  %v1640_v24 = vcombine.low %v1607_v60, %v1623_v18  ;;  %v1641_v26 = vcombine.high %v1607_v60, %v1623_v18 }
 0x5a7   : > { %v1632_v27 = vrot.slane %v1624_v59, %v7613_v28  ;;  %v1639_v11 = vrot.slane %v1625_v16, %v7613_v28  ;;  %v1648_v62 = vrot.slane %v1640_v24, %v7613_v28  ;;  %v1655_v30 = vrot.slane %v1641_v26, %v7613_v28  ;;  %v6958_v5 = vpop.eup %6957 }
 0x5a8   : > { %v2290_v55 = vmul.f32 %v6958_v5, %v7882_v19 }
 0x5a9   : > { %v1728_v43 = vcombine.low %v1632_v27, %v1639_v11  ;;  %v6182_v44 = vcombine.high %v1632_v27, %v1639_v11  ;;  %v1744_v47 = vcombine.low %v1648_v62, %v1655_v30  ;;  %v6183_v48 = vcombine.high %v1648_v62, %v1655_v30  ;;  %v6839_v27 = vld [vmem:[%s7461_s14] sm:$0xff]  }
 0x5aa   : > { %v2298_v13 = vpack.c.bf16 %v2290_v55, %v2290_v55 }
 0x5ab   : > { %v1735_v20 = vrot.slane %v1728_v43, %v7610_v21  ;;  %v1743_v35 = vrot.slane %v6182_v44, %v7610_v21  ;;  %v1751_v29 = vrot.slane %v1744_v47, %v7610_v21  ;;  %v1759_v53 = vrot.slane %v6183_v48, %v7610_v21  ;;  %v6840_v43 = vld [vmem:[%s7461_s14 + $0x8] sm:$0xff]   ;;  %v6841_v48 = vld [vmem:[%s7461_s14 + $0x10] sm:$0xff]  }
 0x5ac   : > { %v6960_v14 = vpop.eup %6959 }
 0x5ad   : > { %v1760_v37 = vcombine.low %v1735_v20, %v1743_v35  ;;  %v1776_v38 = vcombine.low %v1751_v29, %v1759_v53  ;;  %v1761_v39 = vcombine.high %v1735_v20, %v1743_v35  ;;  %v1777_v40 = vcombine.high %v1751_v29, %v1759_v53 }
 0x5ae   : > { %v2291_v15 = vmul.f32 %v6960_v14, %v7886_v34 }
 0x5af   : > { %v1768_v41 = vrot.slane %v1760_v37, %v7613_v28  ;;  %v1784_v49 = vrot.slane %v1776_v38, %v7613_v28  ;;  %v1775_v50 = vrot.slane %v1761_v39, %v7613_v28  ;;  %v1791_v22 = vrot.slane %v1777_v40, %v7613_v28 }
 0x5b0   : > { %v2299_v2 = vpack.c.bf16 %v2291_v15, %v2291_v15 }
 0x5b1   : > { %v1792_v23 = vcombine.low %v1768_v41, %v1784_v49  ;;  %v1793_v52 = vcombine.high %v1768_v41, %v1784_v49  ;;  %v1794_v0 = vcombine.low %v1775_v50, %v1791_v22  ;;  %v1795_v54 = vcombine.high %v1775_v50, %v1791_v22 }
 0x5b3   : > { %v2305_v4 = vpack.c.bf16 %v1792_v23, %v1792_v23  ;;  %v2306_v8 = vpack.c.bf16 %v1793_v52, %v1793_v52  ;;  %v2307_v63 = vpack.c.bf16 %v1794_v0, %v1794_v0  ;;  %v2308_v10 = vpack.c.bf16 %v1795_v54, %v1795_v54  ;;  %v6843_v23 = vld [vmem:[%s7461_s14 + $0x20] sm:$0xff]  }
 0x5b5   : > { %v2498_v9 = vsel %vm2312_vm4, %v2305_v4, 0  ;;  %v2544_v1 = vsel %vm2312_vm4, %v2306_v8, 0  ;;  %v2590_v25 = vsel %vm2312_vm4, %v2307_v63, 0  ;;  %v2636_v19 = vsel %vm2312_vm4, %v2308_v10, 0 }
 0x5b6   : > { %6533 = vmatpush3.bf16.msra.mxu0 %v2498_v9  ;;  %6539 = vmatpush3.bf16.msra.mxu1 %v2544_v1  ;;  %v6844_v1 = vld [vmem:[%s7461_s14 + $0x28] sm:$0xff]  }
 0x5b7   : > { %6544 = vmatprep.subr.bf16.mxu0 %v7187_v6  ;;  %6550 = vmatprep.subr.bf16.mxu1 %v7187_v6 }
 0x5b9   : > { %6535 = vmatmul.mubr.msk.bf16.vlgmr.msra.gmra.mrb[20].mxu0 %vm2204_vm3, %v2297_v42  ;;  %6541 = vmatmul.mubr.msk.bf16.vlgmr.msra.gmra.mrb[36].mxu1 %vm2204_vm3, %v2298_v13 }
 0x5ba   : > { %6545 = vmatpush3.bf16.msra.mxu0 %v2590_v25  ;;  %6551 = vmatpush3.bf16.msra.mxu1 %v2636_v19 }
 0x5bb   : > { %6546 = vmatprep.mubr.msk.bf16.mxu0 %vm7189_vm0, %v7187_v6  ;;  %6552 = vmatprep.mubr.msk.bf16.mxu1 %vm7189_vm0, %v7187_v6 }
 0x5bc   : > { %6556 = vmatprep.subr.bf16.mxu0 %v7187_v6  ;;  %6576 = vmatprep.subr.bf16.mxu1 %v7187_v6 }
 0x5c1   : > { %6547 = vmatmul.mubr.msk.bf16.vlgmr.msra.gmra.mrb[24].mxu0 %vm2204_vm3, %v2299_v2 }
 0x5c2   : > { %6572 = vmatprep.mubr.msk.bf16.mxu0 %vm7189_vm0, %v7187_v6  ;;  %6557 = vmatpush3.bf16.msra.mxu0 %v6839_v27 }
 0x5c3   : > { %6558 = vmatprep.subr.bf16.mxu0 %v7187_v6 }
 0x5c6   : > { %6559 = vmatpush3.bf16.msra.mxu0 %v6840_v43 }
 0x5c7   : > { %6560 = vmatprep.subr.bf16.mxu0 %v7187_v6 }
 0x5ca   : > { %6561 = vmatpush3.bf16.msra.mxu0 %v6841_v48 }
 0x5cb   : > { %6562 = vmatprep.subr.bf16.mxu0 %v7187_v6 }
 0x5ce   : > { %6563 = vmatpush3.bf16.msra.mxu0 %v6842_v58 }
 0x5cf   : > { %6564 = vmatprep.subr.bf16.mxu0 %v7187_v6 }
 0x5d1   : > { %v2276_v31 = vpop.xlane.xlu0 %2275 }
 0x5d2   : > { %6961 = vrcp.f32 %v2276_v31  ;;  %6565 = vmatpush3.bf16.msra.mxu0 %v6843_v23 }
 0x5d3   : > { %6566 = vmatprep.subr.bf16.mxu0 %v7187_v6 }
 0x5d6   : > { %6567 = vmatpush3.bf16.msra.mxu0 %v6844_v1 }
 0x5d7   : > { %6568 = vmatprep.subr.bf16.mxu0 %v7187_v6 }
 0x5dc   : > { %v6962_v34 = vpop.eup %6961 }
 0x5dd   : > { %v2292_v3 = vmul.f32 %v6962_v34, %v7893_v36 }
 0x5df   : > { %v2300_v57 = vpack.c.bf16 %v2292_v3, %v2292_v3 }
 0x5e1   : > { %6553 = vmatmul.mubr.msk.bf16.vlgmr.msra.gmra.mrb[40].mxu1 %vm2204_vm3, %v2300_v57 }
 0x5e2   : > { %6592 = vmatprep.mubr.msk.bf16.mxu1 %vm7189_vm0, %v7187_v6 }
 0x63e   : > { %v2350_v17 = vpop.f32.mrb[12].mxu0 }
 0x63f   : > { %v6512_v18 = vpop.f32.mrb[13].mxu0 }
 0x640   : > { %v2353_v56 = vpop.f32.mrb[14].mxu0 }
 0x641   : > { %v6513_v60 = vpop.f32.mrb[15].mxu0 }
 0x646   : > { %v2396_v59 = vpop.f32.mrb[28].mxu1 }
 0x647   : > { %v6518_v16 = vpop.f32.mrb[29].mxu1 }
 0x648   : > { %v2399_v24 = vpop.f32.mrb[30].mxu1 }
 0x649   : > { %v6519_v26 = vpop.f32.mrb[31].mxu1 }
 0x64e   : > { %v2442_v11 = vpop.f32.mrb[16].mxu0 }
 0x64f   : > { %v2678_v62 = vcombine.low %v2350_v17, %v2442_v11  ;;  %v2679_v36 = vcombine.high %v2350_v17, %v2442_v11  ;;  %v6524_v30 = vpop.f32.mrb[17].mxu0 }
 0x650   : > { %v2445_v44 = vpop.f32.mrb[18].mxu0 }
 0x651   : > { %v6525_v47 = vpop.f32.mrb[19].mxu0  ;;  %v2686_v38 = vrot.slane %v2678_v62, %v7610_v21  ;;  %v2693_v39 = vrot.slane %v2679_v36, %v7610_v21 }
 0x656   : > { %v2488_v20 = vpop.f32.mrb[32].mxu1 }
 0x657   : > { %v2694_v35 = vcombine.low %v2396_v59, %v2488_v20  ;;  %v2695_v29 = vcombine.high %v2396_v59, %v2488_v20  ;;  %v6530_v53 = vpop.f32.mrb[33].mxu1 }
 0x658   : > { %v2491_v37 = vpop.f32.mrb[34].mxu1 }
 0x659   : > { %v2702_v12 = vrot.slane %v2694_v35, %v7610_v21  ;;  %v2709_v40 = vrot.slane %v2695_v29, %v7610_v21  ;;  %v6531_v41 = vpop.f32.mrb[35].mxu1 }
 0x65b   : > { %v2710_v49 = vcombine.low %v2686_v38, %v2702_v12  ;;  %v2711_v50 = vcombine.high %v2686_v38, %v2702_v12  ;;  %v2726_v5 = vcombine.low %v2693_v39, %v2709_v40  ;;  %v2727_v22 = vcombine.high %v2693_v39, %v2709_v40 }
 0x65d   : > { %v2718_v52 = vrot.slane %v2710_v49, %v7613_v28  ;;  %v2725_v0 = vrot.slane %v2711_v50, %v7613_v28  ;;  %v2734_v54 = vrot.slane %v2726_v5, %v7613_v28  ;;  %v2741_v7 = vrot.slane %v2727_v22, %v7613_v28 }
 0x65f   : > { %v2814_v55 = vcombine.low %v2718_v52, %v2725_v0  ;;  %v6200_v4 = vcombine.high %v2718_v52, %v2725_v0  ;;  %v2830_v8 = vcombine.low %v2734_v54, %v2741_v7  ;;  %v6201_v9 = vcombine.high %v2734_v54, %v2741_v7 }
 0x661   : > { %v2821_v63 = vrot.slane %v2814_v55, %v7610_v21  ;;  %v2829_v10 = vrot.slane %v6200_v4, %v7610_v21  ;;  %v2837_v42 = vrot.slane %v2830_v8, %v7610_v21  ;;  %v2845_v13 = vrot.slane %v6201_v9, %v7610_v21  ;;  %v6845_v8 = vld [vmem:[%s7461_s14 + $0x30] sm:$0xff]  }
 0x662   : > { %6569 = vmatpush3.bf16.msra.mxu0 %v6845_v8  ;;  %v6858_v8 = vld [vmem:[%s7487_s1 + $0x34] ss:$8 sps:$4 sm:$0xff]  }
 0x663   : > { %v2847_v14 = vcombine.high %v2821_v63, %v2829_v10  ;;  %v2863_v25 = vcombine.high %v2837_v42, %v2845_v13  ;;  %v2846_v19 = vcombine.low %v2821_v63, %v2829_v10  ;;  %v2862_v15 = vcombine.low %v2837_v42, %v2845_v13  ;;  %6570 = vmatprep.subr.bf16.mxu0 %v7187_v6 }
 0x665   : > { %v7984_v2 = vrot.slane %v2847_v14, %v7613_v28  ;;  %v7987_v31 = vrot.slane %v2863_v25, %v7613_v28  ;;  %v7990_v34 = vrot.slane %v2846_v19, %v7613_v28  ;;  %v7993_v3 = vrot.slane %v2862_v15, %v7613_v28 }
 0x667   : > { %v2880_v57 = vcombine.low %v7984_v2, %v7987_v31  ;;  %v2878_v17 = vcombine.low %v7990_v34, %v7993_v3  ;;  %v2879_v18 = vcombine.high %v7990_v34, %v7993_v3  ;;  %v2881_v56 = vcombine.high %v7984_v2, %v7987_v31 }
 0x668   : > { %v3093_v34 = vrot.slane %v7798_v33, %v7571_v51 }
 0x68c   : > { %v2534_v60 = vpop.f32.mrb[20].mxu0  ;;  %v2580_v59 = vpop.f32.mrb[36].mxu1 }
 0x68d   : > { %v6536_v16 = vpop.f32.mrb[21].mxu0  ;;  %v6542_v24 = vpop.f32.mrb[37].mxu1 }
 0x68e   : > { %v2537_v26 = vpop.f32.mrb[22].mxu0  ;;  %v2583_v27 = vpop.f32.mrb[38].mxu1 }
 0x68f   : > { %v6537_v11 = vpop.f32.mrb[23].mxu0  ;;  %v6543_v62 = vpop.f32.mrb[39].mxu1 }
 0x694   : > { %v2626_v36 = vpop.f32.mrb[24].mxu0 }
 0x695   : > { %v2746_v30 = vcombine.low %v2534_v60, %v2626_v36  ;;  %v2747_v43 = vcombine.high %v2534_v60, %v2626_v36  ;;  %v6548_v44 = vpop.f32.mrb[25].mxu0  ;;  %v6846_v60 = vld [vmem:[%s7461_s14 + $0x38] sm:$0xff]  }
 0x696   : > { %v2629_v47 = vpop.f32.mrb[26].mxu0  ;;  %6571 = vmatpush3.bf16.msra.mxu0 %v6846_v60 }
 0x697   : > { %v6549_v48 = vpop.f32.mrb[27].mxu0  ;;  %v2754_v37 = vrot.slane %v2746_v30, %v7610_v21  ;;  %v2761_v38 = vrot.slane %v2747_v43, %v7610_v21 }
 0x6b4   : > { %v2672_v20 = vpop.f32.mrb[40].mxu1 }
 0x6b5   : > { %v2762_v35 = vcombine.low %v2580_v59, %v2672_v20  ;;  %v2763_v29 = vcombine.high %v2580_v59, %v2672_v20  ;;  %v6554_v53 = vpop.f32.mrb[41].mxu1 }
 0x6b6   : > { %v2675_v58 = vpop.f32.mrb[42].mxu1 }
 0x6b7   : > { %v2770_v39 = vrot.slane %v2762_v35, %v7610_v21  ;;  %v2777_v12 = vrot.slane %v2763_v29, %v7610_v21  ;;  %v6555_v40 = vpop.f32.mrb[43].mxu1 }
 0x6b9   : > { %v2778_v41 = vcombine.low %v2754_v37, %v2770_v39  ;;  %v2779_v49 = vcombine.high %v2754_v37, %v2770_v39  ;;  %v2794_v50 = vcombine.low %v2761_v38, %v2777_v12  ;;  %v2795_v5 = vcombine.high %v2761_v38, %v2777_v12 }
 0x6bb   : > { %v2786_v22 = vrot.slane %v2778_v41, %v7613_v28  ;;  %v2793_v23 = vrot.slane %v2779_v49, %v7613_v28  ;;  %v2802_v52 = vrot.slane %v2794_v50, %v7613_v28  ;;  %v2809_v0 = vrot.slane %v2795_v5, %v7613_v28  ;;  %v7012_v49 = vld [vmem:[#allocation2 + $0x8] sm:$0xff] }
 0x6bd   : > { %v2882_v54 = vcombine.low %v2786_v22, %v2793_v23  ;;  %v6202_v7 = vcombine.high %v2786_v22, %v2793_v23  ;;  %v2898_v55 = vcombine.low %v2802_v52, %v2809_v0  ;;  %v6203_v4 = vcombine.high %v2802_v52, %v2809_v0  ;;  %v6847_v23 = vld [vmem:[%s7487_s1] ss:$8 sps:$4 sm:$0xff]   ;;  %v6849_v52 = vld [vmem:[%s7487_s1 + $0x4] ss:$8 sps:$4 sm:$0xff]   ;;  %v6852_v0 = vld [vmem:[%s7487_s1 + $0x14] ss:$8 sps:$4 sm:$0xff]  }
 0x6be   : > { %3337 = vmatprep.subr.bf16.mxu0 %v6849_v52  ;;  %v7013_v52 = vld [vmem:[%s7507_s23] sm:$0xff] }
 0x6bf   : > { %v2889_v9 = vrot.slane %v2882_v54, %v7610_v21  ;;  %v2897_v1 = vrot.slane %v6202_v7, %v7610_v21  ;;  %v2905_v63 = vrot.slane %v2898_v55, %v7610_v21  ;;  %v2913_v10 = vrot.slane %v6203_v4, %v7610_v21  ;;  %v6850_v54 = vld [vmem:[%s7487_s1 + $0x10] ss:$8 sps:$4 sm:$0xff]   ;;  %v6855_v7 = vld [vmem:[%s7487_s1 + $0x24] ss:$8 sps:$4 sm:$0xff]   ;;  %v6853_v4 = vld [vmem:[%s7487_s1 + $0x20] ss:$8 sps:$4 sm:$0xff]  }
 0x6c0   : > { %v6871_v55 = vld [vmem:[%s7468_s13] sm:$0xff]  }
 0x6c1   : > { %v2915_v42 = vcombine.high %v2889_v9, %v2897_v1  ;;  %v2931_v13 = vcombine.high %v2905_v63, %v2913_v10  ;;  %v2914_v14 = vcombine.low %v2889_v9, %v2897_v1  ;;  %v2930_v25 = vcombine.low %v2905_v63, %v2913_v10  ;;  %6577 = vmatpush3.bf16.msra.mxu1 %v6871_v55  ;;  %v6856_v9 = vld [vmem:[%s7487_s1 + $0x30] ss:$8 sps:$4 sm:$0xff]   ;;  %v6861_v1 = vld [vmem:[%s7487_s1 + $0x44] ss:$8 sps:$4 sm:$0xff]   ;;  %v6859_v63 = vld [vmem:[%s7487_s1 + $0x40] ss:$8 sps:$4 sm:$0xff]  }
 0x6c2   : > { %6578 = vmatprep.subr.bf16.mxu1 %v7187_v6  ;;  %v6864_v10 = vld [vmem:[%s7487_s1 + $0x54] ss:$8 sps:$4 sm:$0xff]  }
 0x6c3   : > { %v2929_v19 = vrot.slane %v2915_v42, %v7613_v28  ;;  %v2945_v15 = vrot.slane %v2931_v13, %v7613_v28  ;;  %v2922_v2 = vrot.slane %v2914_v14, %v7613_v28  ;;  %v2938_v31 = vrot.slane %v2930_v25, %v7613_v28  ;;  %v6862_v42 = vld [vmem:[%s7487_s1 + $0x50] ss:$8 sps:$4 sm:$0xff]   ;;  %v6867_v13 = vld [vmem:[%s7487_s1 + $0x64] ss:$8 sps:$4 sm:$0xff]   ;;  %v6865_v14 = vld [vmem:[%s7487_s1 + $0x60] ss:$8 sps:$4 sm:$0xff]  }
 0x6c4   : > { %v6870_v25 = vld [vmem:[%s7487_s1 + $0x74] ss:$8 sps:$4 sm:$0xff]  }
 0x6c5   : > { %v2948_v59 = vcombine.low %v2929_v19, %v2945_v15  ;;  %v2947_v16 = vcombine.high %v2922_v2, %v2938_v31  ;;  %v2946_v24 = vcombine.low %v2922_v2, %v2938_v31  ;;  %v2949_v26 = vcombine.high %v2929_v19, %v2945_v15  ;;  %v6868_v19 = vld [vmem:[%s7487_s1 + $0x70] ss:$8 sps:$4 sm:$0xff]   ;;  %v618_v15 = vld [vmem:[%s8621_s26] sm:$0xff]  ;;  %v619_v2 = vld [vmem:[%s8621_s26 + $0x8] sm:$0xff] }
 0x6c6   : > { %v3256_v31 = vpack.c.bf16 %v619_v2, %v618_v15 }
 0x6c7   : > { %v6782_v27 = vpack.i.bf16 %v2948_v59, %v2880_v57  ;;  %v6777_v11 = vpack.i.bf16 %v2947_v16, %v2879_v18  ;;  %v6787_v62 = vpack.i.bf16 %v2949_v26, %v2881_v56 }
 0x6c9   : > { %6783 = vrot.lane.b32.xlu1 %v6782_v27, %s7190_s21  ;;  %6778 = vrot.lane.b32.xlu0 %v6777_v11, %s7192_s20 }
 0x6cd   : > { %6788 = vrot.lane.b32.xlu1 %v6787_v62, %s7191_s0 }
 0x73b   : > { %v6784_v36 = vpop.permute.xlu1 %6783  ;;  %v6779_v30 = vpop.permute.xlu0 %6778 }
 0x73c   : > { %v6781_v43 = vunpack.i.h.bf16 %v6779_v30  ;;  %v6780_v44 = vunpack.i.l.bf16 %v6779_v30  ;;  %v6786_v47 = vunpack.i.h.bf16 %v6784_v36  ;;  %v6785_v48 = vunpack.i.l.bf16 %v6784_v36  ;;  %v6872_v36 = vld [vmem:[%s7468_s13 + $0x8] sm:$0xff]   ;;  %v6873_v30 = vld [vmem:[%s7468_s13 + $0x10] sm:$0xff]  }
 0x73d   : > { %6579 = vmatpush3.bf16.msra.mxu1 %v6872_v36 }
 0x73e   : > { %v2974_v20 = vsel %vm1812_vm1, %v2878_v17, %v6780_v44  ;;  %v2975_v57 = vsel %vm1812_vm1, %v2946_v24, %v6781_v43  ;;  %v7011_v17 = vld [vmem:[#allocation2] sm:$0xff]  ;;  %6580 = vmatprep.subr.bf16.mxu1 %v7187_v6  ;;  %v6874_v43 = vld [vmem:[%s7468_s13 + $0x18] sm:$0xff]   ;;  %v6875_v44 = vld [vmem:[%s7468_s13 + $0x20] sm:$0xff]  }
 0x73f   : > { %v6789_v18 = vpop.permute.xlu1 %6788  ;;  %v2977_v29 = vsel %vm2976_vm5, %v2974_v20, %v6785_v48  ;;  %v2978_v53 = vsel %vm2976_vm5, %v2975_v57, %v6786_v47  ;;  %v6876_v47 = vld [vmem:[%s7468_s13 + $0x28] sm:$0xff]   ;;  %v6877_v48 = vld [vmem:[%s7468_s13 + $0x30] sm:$0xff]   ;;  %v6878_v20 = vld [vmem:[%s7468_s13 + $0x38] sm:$0xff]   ;;  %v3126_v57 = vsub.s32 3, %v7562_v45 }
 0x740   : > { %v6791_v56 = vunpack.i.h.bf16 %v6789_v18  ;;  %v6790_v35 = vunpack.i.l.bf16 %v6789_v18  ;;  %v3388_v18 = vsub.s32 4, %v7562_v45 }
 0x741   : > { %6581 = vmatpush3.bf16.msra.mxu1 %v6873_v30 }
 0x742   : > { %v2980_v58 = vsel %vm2979_vm6, %v2977_v29, %v6790_v35  ;;  %v2981_v37 = vsel %vm2979_vm6, %v2978_v53, %v6791_v56  ;;  %6582 = vmatprep.subr.bf16.mxu1 %v7187_v6  ;;  %v3383_v56 = vrot.slane %v7798_v33, %v3126_v57  ;;  %v8092_v29 = vrot.slane %v7798_v33, %v3388_v18 }
 0x743   : > { %v2998_v38 = vpack.c.bf16 %v2981_v37, %v2980_v58 }
 0x745   : > { %6573 = vmatmul.mubr.bf16.vlgmr.msra.gmra.mrb[28].mxu0 %v2998_v38  ;;  %6583 = vmatpush3.bf16.msra.mxu1 %v6874_v43 }
 0x746   : > { %3369 = vmatprep.mubr.bf16.mxu0 %v7188_v32  ;;  %3338 = vmatpush1.bf16.msra.mxu0 %v6847_v23 }
 0x747   : > { %3339 = vmatprep.subr.bf16.mxu0 %v6852_v0  ;;  %6584 = vmatprep.subr.bf16.mxu1 %v7187_v6 }
 0x749   : > { %6585 = vmatpush3.bf16.msra.mxu1 %v6875_v44 }
 0x74a   : > { %3340 = vmatpush1.bf16.msra.mxu0 %v6850_v54  ;;  %6586 = vmatprep.subr.bf16.mxu1 %v7187_v6 }
 0x74b   : > { %3341 = vmatprep.subr.bf16.mxu0 %v6855_v7 }
 0x74d   : > { %6587 = vmatpush3.bf16.msra.mxu1 %v6876_v47 }
 0x74e   : > { %3342 = vmatpush1.bf16.msra.mxu0 %v6853_v4  ;;  %6588 = vmatprep.subr.bf16.mxu1 %v7187_v6  ;;  %v3127_v4 = vrot.slane %v7013_v52, %v3126_v57 }
 0x74f   : > { %3343 = vmatprep.subr.bf16.mxu0 %v6858_v8 }
 0x751   : > { %6589 = vmatpush3.bf16.msra.mxu1 %v6877_v48 }
 0x752   : > { %3344 = vmatpush1.bf16.msra.mxu0 %v6856_v9  ;;  %6590 = vmatprep.subr.bf16.mxu1 %v7187_v6 }
 0x753   : > { %3345 = vmatprep.subr.bf16.mxu0 %v6861_v1 }
 0x755   : > { %6591 = vmatpush3.bf16.msra.mxu1 %v6878_v20 }
 0x756   : > { %3346 = vmatpush1.bf16.msra.mxu0 %v6859_v63  ;;  %6596 = vmatprep.subr.bf16.mxu1 %v7187_v6 }
 0x757   : > { %3347 = vmatprep.subr.bf16.mxu0 %v6864_v10 }
 0x75a   : > { %3348 = vmatpush1.bf16.msra.mxu0 %v6862_v42 }
 0x75b   : > { %3349 = vmatprep.subr.bf16.mxu0 %v6867_v13 }
 0x75e   : > { %3350 = vmatpush1.bf16.msra.mxu0 %v6865_v14 }
 0x75f   : > { %3351 = vmatprep.subr.bf16.mxu0 %v6870_v25 }
 0x762   : > { %3352 = vmatpush1.bf16.msra.mxu0 %v6868_v19 }
 0x763   : > { %6620 = vmatprep.subr.bf16.mxu0 %v7187_v6 }
 0x765   : > { %3370 = vmatmul.mubr.bf16.vlgmr.msra.gmra.mrb[32].mxu0 %v3256_v31 }
 0x766   : > { %6622 = vmatprep.mubr.msk.bf16.mxu0 %vm7189_vm0, %v7187_v6 }
 0x818   : > { %v3081_v3 = vpop.f32.mrb[28].mxu0 }
 0x819   : > { %v3088_v39 = vadd.f32 %v7011_v17, %v3081_v3  ;;  %v6574_v12 = vpop.f32.mrb[29].mxu0 }
 0x81a   : > { %v3084_v40 = vpop.f32.mrb[30].mxu0 }
 0x81b   : > { %v8037_v41 = vadd.f32 %v3093_v34, %v3088_v39  ;;  %v3089_v50 = vadd.f32 %v7012_v49, %v3084_v40  ;;  %v6575_v5 = vpop.f32.mrb[31].mxu0 }
 0x81d   : > { %v8039_v22 = vadd.f32 %v3093_v34, %v3089_v50  ;;  %3096 = vadd.xlane.f32.xlu1 %v8037_v41  ;;  %v3120_v50 = vsub.s32 2, %v7562_v45 }
 0x81f   : > { %3098 = vadd.xlane.f32.xlu0 %v8039_v22  ;;  %v3121_v0 = vrot.slane %v7013_v52, %v3120_v50 }
 0x838   : > { %v3371_v35 = vpop.f32.mrb[32].mxu0 }
 0x839   : > { %v3384_v53 = vadd.f32 %v3383_v56, %v3371_v35  ;;  %v8094_v58 = vpop.f32.mrb[33].mxu0 }
 0x83a   : > { %v3375_v37 = vpop.f32.mrb[34].mxu0 }
 0x83b   : > { %3686 = vrot.lane.b32.xlu1 %v3384_v53, %s7191_s0  ;;  %v8098_v38 = vadd.f32 %v3383_v56, %v3375_v37  ;;  %v3377_v34 = vpop.f32.mrb[35].mxu0 }
 0x83c   : > { %v8101_v3 = vadd.f32 %v8092_v29, %v3377_v34 }
 0x83f   : > { %3698 = vrot.lane.b32.xlu1 %v3384_v53, %s7192_s20 }
 0x8aa   : > { %v3097_v60 = vpop.xlane.xlu1 %3096 }
 0x8ab   : > { %v3100_v59 = vmul.f32 0.0078125, %v3097_v60 }
 0x8ac   : > { %v3099_v16 = vpop.xlane.xlu0 %3098 }
 0x8ad   : > { %v3102_v24 = vsub.f32 %v8037_v41, %v3100_v59  ;;  %v3101_v26 = vmul.f32 0.0078125, %v3099_v16 }
 0x8ae   : > { %v3687_v10 = vpop.permute.xlu1 %3686 }
 0x8af   : > { %v3103_v27 = vsub.f32 %v8039_v22, %v3101_v26  ;;  %v3104_v11 = vmul.f32 %v3102_v24, %v3102_v24 }
 0x8b1   : > { %3106 = vadd.xlane.f32.xlu0 %v3104_v11  ;;  %v3105_v62 = vmul.f32 %v3103_v27, %v3103_v27 }
 0x8b2   : > { %v3699_v13 = vpop.permute.xlu1 %3698 }
 0x8b3   : > { %v3720_v19 = vcombine.low %v3687_v10, %v3699_v13  ;;  %v3721_v15 = vcombine.high %v3687_v10, %v3699_v13 }
 0x8b5   : > { %3108 = vadd.xlane.f32.xlu0 %v3105_v62  ;;  %v3728_v60 = vrot.slane %v3720_v19, %v7610_v21  ;;  %v3735_v59 = vrot.slane %v3721_v15, %v7610_v21 }
 0x8cb   : > { %3692 = vrot.lane.b32.xlu0 %v3384_v53, %s7190_s21 }
 0x93e   : > { %v3107_v17 = vpop.xlane.xlu0 %3106 }
 0x93f   : > { %v3110_v33 = vmul.f32 0.0078125, %v3107_v17 }
 0x941   : > { %v3112_v39 = vadd.f32 1e-05, %v3110_v33 }
 0x942   : > { %v3109_v12 = vpop.xlane.xlu0 %3108 }
 0x943   : > { %6963 = vrsqrt.f32 %v3112_v39  ;;  %v3111_v40 = vmul.f32 0.0078125, %v3109_v12 }
 0x945   : > { %v3113_v49 = vadd.f32 1e-05, %v3111_v40 }
 0x946   : > { %v3693_v42 = vpop.permute.xlu0 %3692 }
 0x947   : > { %6965 = vrsqrt.f32 %v3113_v49  ;;  %v3704_v14 = vcombine.low %v3384_v53, %v3693_v42  ;;  %v3705_v25 = vcombine.high %v3384_v53, %v3693_v42 }
 0x949   : > { %v3712_v2 = vrot.slane %v3704_v14, %v7610_v21  ;;  %v3719_v31 = vrot.slane %v3705_v25, %v7610_v21 }
 0x94b   : > { %v3736_v16 = vcombine.low %v3712_v2, %v3728_v60  ;;  %v3752_v26 = vcombine.low %v3719_v31, %v3735_v59 }
 0x94d   : > { %v6964_v5 = vpop.eup %6963  ;;  %v3744_v11 = vrot.slane %v3736_v16, %v7613_v28  ;;  %v3760_v36 = vrot.slane %v3752_v26, %v7613_v28 }
 0x94e   : > { %v3116_v23 = vmul.f32 %v6964_v5, %v3102_v24  ;;  %v3737_v24 = vcombine.high %v3712_v2, %v3728_v60 }
 0x950   : > { %v3122_v55 = vmul.f32 %v3121_v0, %v3116_v23  ;;  %v3751_v62 = vrot.slane %v3737_v24, %v7613_v28 }
 0x951   : > { %v6966_v54 = vpop.eup %6965 }
 0x952   : > { %v3117_v7 = vmul.f32 %v6966_v54, %v3103_v27  ;;  %v3128_v9 = vadd.f32 %v3127_v4, %v3122_v55  ;;  %v3753_v27 = vcombine.high %v3719_v31, %v3735_v59  ;;  %v3840_v43 = vcombine.low %v3744_v11, %v3751_v62 }
 0x953   : > { %v6240_v44 = vcombine.high %v3744_v11, %v3751_v62 }
 0x954   : > { %v3123_v8 = vmul.f32 %v3121_v0, %v3117_v7  ;;  %v3767_v30 = vrot.slane %v3753_v27, %v7613_v28  ;;  %v3847_v20 = vrot.slane %v3840_v43, %v7610_v21  ;;  %v7014_v7 = vld [vmem:[%s7507_s23 + $0x8] sm:$0x7f] }
 0x955   : > { %v3855_v57 = vrot.slane %v6240_v44, %v7610_v21  ;;  %v3150_v55 = vrot.slane %v7014_v7, %v3120_v50  ;;  %v8152_v50 = vadd.f32 %v8092_v29, %v8094_v58 }
 0x956   : > { %v3129_v1 = vadd.f32 %v3127_v4, %v3123_v8  ;;  %v3856_v47 = vcombine.low %v3760_v36, %v3767_v30  ;;  %v6241_v48 = vcombine.high %v3760_v36, %v3767_v30 }
 0x957   : > { %v3872_v53 = vcombine.low %v3847_v20, %v3855_v57  ;;  %v3873_v33 = vcombine.high %v3847_v20, %v3855_v57 }
 0x958   : > { %v3146_v63 = vpack.c.bf16 %v3129_v1, %v3128_v9  ;;  %v3863_v56 = vrot.slane %v3856_v47, %v7610_v21  ;;  %v3871_v35 = vrot.slane %v6241_v48, %v7610_v21 }
 0x959   : > { %v3880_v34 = vrot.slane %v3872_v53, %v7613_v28  ;;  %v3887_v40 = vrot.slane %v3873_v33, %v7613_v28 }
 0x95a   : > { %6593 = vmatmul.mubr.bf16.vlgmr.msra.gmra.mrb[44].mxu1 %v3146_v63  ;;  %v3888_v37 = vcombine.low %v3863_v56, %v3871_v35  ;;  %v3889_v39 = vcombine.high %v3863_v56, %v3871_v35 }
 0x95b   : > { %6598 = vmatprep.mubr.msk.bf16.mxu1 %vm7189_vm0, %v7187_v6 }
 0x95c   : > { %v3896_v17 = vrot.slane %v3888_v37, %v7613_v28  ;;  %v3903_v49 = vrot.slane %v3889_v39, %v7613_v28 }
 0x95e   : > { %v3904_v12 = vcombine.low %v3880_v34, %v3896_v17  ;;  %v8124_v23 = vcombine.high %v3880_v34, %v3896_v17  ;;  %v8126_v52 = vcombine.low %v3887_v40, %v3903_v49  ;;  %v8128_v0 = vcombine.high %v3887_v40, %v3903_v49 }
 0x960   : > { %v4276_v5 = vpack.c.bf16 %v3904_v12, %v3904_v12  ;;  %v4277_v39 = vpack.c.bf16 %v8124_v23, %v8124_v23 }
 0x962   : > { %v4288_v54 = vsel %vm1812_vm1, %v4276_v5, 0 }
 0x963   : > { %6597 = vmatpush3.bf16.xpose.msra.mxu1 %v4288_v54 }
 0x964   : > { %6602 = vmatprep.subr.bf16.mxu1 %v7187_v6 }
 0xa2d   : > { %v3233_v4 = vpop.f32.mrb[44].mxu1 }
 0xa2e   : > { %v3234_v8 = vadd.f32 %v3233_v4, %v3150_v55  ;;  %v6594_v9 = vpop.f32.mrb[45].mxu1 }
 0xa2f   : > { %v3236_v1 = vpop.f32.mrb[46].mxu1 }
 0xa30   : > { %3406 = vrot.lane.b32.xlu0 %v3234_v8, %s7192_s20  ;;  %3394 = vrot.lane.b32.xlu1 %v3234_v8, %s7191_s0  ;;  %v6595_v63 = vpop.f32.mrb[47].mxu1  ;;  %v8138_v10 = vadd.f32 %v3236_v1, %v3150_v55 }
 0xa34   : > { %3694 = vrot.lane.b32.xlu0 %v8098_v38, %s7190_s21  ;;  %3400 = vrot.lane.b32.xlu1 %v3234_v8, %s7190_s21 }
 0xa38   : > { %3688 = vrot.lane.b32.xlu1 %v8098_v38, %s7191_s0  ;;  %3396 = vrot.lane.b32.xlu0 %v8138_v10, %s7191_s0 }
 0xa3c   : > { %3700 = vrot.lane.b32.xlu1 %v8098_v38, %s7192_s20  ;;  %3408 = vrot.lane.b32.xlu0 %v8138_v10, %s7192_s20 }
 0xa40   : > { %3402 = vrot.lane.b32.xlu1 %v8138_v10, %s7190_s21 }
 0xa44   : > { %3978 = vrot.lane.b32.xlu1 %v8152_v50, %s7191_s0 }
 0xaa2   : > { %v3407_v42 = vpop.permute.xlu0 %3406  ;;  %v3395_v13 = vpop.permute.xlu1 %3394 }
 0xaa3   : > { %v3428_v14 = vcombine.low %v3395_v13, %v3407_v42  ;;  %v3429_v25 = vcombine.high %v3395_v13, %v3407_v42 }
 0xaa5   : > { %v3436_v60 = vrot.slane %v3428_v14, %v7610_v21  ;;  %v3443_v59 = vrot.slane %v3429_v25, %v7610_v21 }
 0xaa6   : > { %v3695_v19 = vpop.permute.xlu0 %3694  ;;  %v3401_v15 = vpop.permute.xlu1 %3400 }
 0xaa7   : > { %v3412_v2 = vcombine.low %v3234_v8, %v3401_v15  ;;  %v3413_v31 = vcombine.high %v3234_v8, %v3401_v15  ;;  %v3772_v47 = vcombine.low %v8098_v38, %v3695_v19  ;;  %v3773_v48 = vcombine.high %v8098_v38, %v3695_v19 }
 0xaa9   : > { %v3420_v16 = vrot.slane %v3412_v2, %v7610_v21  ;;  %v3427_v29 = vrot.slane %v3413_v31, %v7610_v21  ;;  %v3780_v5 = vrot.slane %v3772_v47, %v7610_v21  ;;  %v3787_v54 = vrot.slane %v3773_v48, %v7610_v21 }
 0xaaa   : > { %v3689_v58 = vpop.permute.xlu1 %3688  ;;  %v3397_v24 = vpop.permute.xlu0 %3396 }
 0xaab   : > { %v3444_v26 = vcombine.low %v3420_v16, %v3436_v60  ;;  %v3445_v27 = vcombine.high %v3420_v16, %v3436_v60  ;;  %v3460_v11 = vcombine.low %v3427_v29, %v3443_v59  ;;  %v3461_v62 = vcombine.high %v3427_v29, %v3443_v59 }
 0xaad   : > { %v3452_v36 = vrot.slane %v3444_v26, %v7613_v28  ;;  %v3459_v30 = vrot.slane %v3445_v27, %v7613_v28  ;;  %v3468_v43 = vrot.slane %v3460_v11, %v7613_v28  ;;  %v3475_v44 = vrot.slane %v3461_v62, %v7613_v28 }
 0xaae   : > { %v3701_v20 = vpop.permute.xlu1 %3700  ;;  %v3409_v57 = vpop.permute.xlu0 %3408 }
 0xaaf   : > { %v3548_v56 = vcombine.low %v3452_v36, %v3459_v30  ;;  %v6236_v35 = vcombine.high %v3452_v36, %v3459_v30  ;;  %v3564_v53 = vcombine.low %v3468_v43, %v3475_v44  ;;  %v6237_v37 = vcombine.high %v3468_v43, %v3475_v44 }
 0xab0   : > { %v3788_v34 = vcombine.low %v3689_v58, %v3701_v20  ;;  %v3789_v17 = vcombine.high %v3689_v58, %v3701_v20  ;;  %v3496_v33 = vcombine.low %v3397_v24, %v3409_v57  ;;  %v3497_v9 = vcombine.high %v3397_v24, %v3409_v57 }
 0xab1   : > { %v8169_v12 = vrot.slane %v3548_v56, %v7610_v21  ;;  %v8172_v40 = vrot.slane %v6236_v35, %v7610_v21  ;;  %v8175_v38 = vrot.slane %v3564_v53, %v7610_v21  ;;  %v8178_v49 = vrot.slane %v6237_v37, %v7610_v21 }
 0xab2   : > { %v3796_v7 = vrot.slane %v3788_v34, %v7610_v21  ;;  %v3803_v23 = vrot.slane %v3789_v17, %v7610_v21  ;;  %v3403_v55 = vpop.permute.xlu1 %3402  ;;  %v3504_v1 = vrot.slane %v3496_v33, %v7610_v21  ;;  %v3511_v29 = vrot.slane %v3497_v9, %v7610_v21 }
 0xab3   : > { %v3580_v4 = vcombine.low %v8169_v12, %v8172_v40  ;;  %v3596_v8 = vcombine.low %v8175_v38, %v8178_v49  ;;  %v3480_v25 = vcombine.low %v8138_v10, %v3403_v55  ;;  %v3481_v19 = vcombine.high %v8138_v10, %v3403_v55 }
 0xab4   : > { %v3804_v63 = vcombine.low %v3780_v5, %v3796_v7  ;;  %v3805_v42 = vcombine.high %v3780_v5, %v3796_v7  ;;  %v3820_v13 = vcombine.low %v3787_v54, %v3803_v23  ;;  %v3821_v14 = vcombine.high %v3787_v54, %v3803_v23 }
 0xab5   : > { %v3588_v15 = vrot.slane %v3580_v4, %v7613_v28  ;;  %v3604_v2 = vrot.slane %v3596_v8, %v7613_v28  ;;  %v3488_v58 = vrot.slane %v3480_v25, %v7610_v21  ;;  %v3495_v24 = vrot.slane %v3481_v19, %v7610_v21 }
 0xab6   : > { %v3812_v31 = vrot.slane %v3804_v63, %v7613_v28  ;;  %v3819_v60 = vrot.slane %v3805_v42, %v7613_v28  ;;  %v3828_v59 = vrot.slane %v3820_v13, %v7613_v28  ;;  %v3835_v16 = vrot.slane %v3821_v14, %v7613_v28 }
 0xab7   : > { %v3612_v26 = vcombine.low %v3588_v15, %v3604_v2  ;;  %v3512_v36 = vcombine.low %v3488_v58, %v3504_v1  ;;  %v3513_v30 = vcombine.high %v3488_v58, %v3504_v1  ;;  %v3528_v43 = vcombine.low %v3495_v24, %v3511_v29 }
 0xab8   : > { %v3908_v10 = vcombine.low %v3812_v31, %v3819_v60  ;;  %v6242_v27 = vcombine.high %v3812_v31, %v3819_v60  ;;  %v3924_v11 = vcombine.low %v3828_v59, %v3835_v16  ;;  %v6243_v62 = vcombine.high %v3828_v59, %v3835_v16 }
 0xab9   : > { %v3529_v44 = vcombine.high %v3495_v24, %v3511_v29  ;;  %v3520_v56 = vrot.slane %v3512_v36, %v7613_v28  ;;  %v3527_v35 = vrot.slane %v3513_v30, %v7613_v28  ;;  %v3536_v53 = vrot.slane %v3528_v43, %v7613_v28 }
 0xaba   : > { %v3915_v47 = vrot.slane %v3908_v10, %v7610_v21  ;;  %v3923_v48 = vrot.slane %v6242_v27, %v7610_v21  ;;  %v3931_v20 = vrot.slane %v3924_v11, %v7610_v21  ;;  %v3939_v57 = vrot.slane %v6243_v62, %v7610_v21 }
 0xabb   : > { %v3543_v37 = vrot.slane %v3529_v44, %v7613_v28  ;;  %v4268_v34 = vpack.c.bf16 %v3612_v26, %v3612_v26  ;;  %v4334_v17 = vsel %vm1812_vm1, %v4277_v39, 0  ;;  %v3616_v54 = vcombine.low %v3520_v56, %v3527_v35 }
 0xabc   : > { %v3940_v33 = vcombine.low %v3915_v47, %v3923_v48  ;;  %v3956_v5 = vcombine.low %v3931_v20, %v3939_v57  ;;  %v6238_v7 = vcombine.high %v3520_v56, %v3527_v35  ;;  %v3581_v4 = vcombine.high %v8169_v12, %v8172_v40 }
 0xabd   : > { %v3632_v23 = vcombine.low %v3536_v53, %v3543_v37  ;;  %v6239_v55 = vcombine.high %v3536_v53, %v3543_v37  ;;  %6599 = vmatmul.mubr.msk.bf16.vlgmr.msra.gmra.mrb[48].mxu1 %vm1812_vm1, %v4268_v34  ;;  %v3613_v8 = vcombine.high %v3588_v15, %v3604_v2  ;;  %v3623_v63 = vrot.slane %v3616_v54, %v7610_v21 }
 0xabe   : > { %v3948_v9 = vrot.slane %v3940_v33, %v7613_v28  ;;  %v3964_v1 = vrot.slane %v3956_v5, %v7613_v28  ;;  %v3631_v39 = vrot.slane %v6238_v7, %v7610_v21  ;;  %6603 = vmatpush3.bf16.xpose.msra.mxu1 %v4334_v17  ;;  %v3597_v14 = vcombine.high %v8175_v38, %v8178_v49 }
 0xabf   : > { %v3639_v42 = vrot.slane %v3632_v23, %v7610_v21  ;;  %v3647_v13 = vrot.slane %v6239_v55, %v7610_v21  ;;  %6604 = vmatprep.mubr.msk.bf16.mxu1 %vm7189_vm0, %v7187_v6  ;;  %6608 = vmatprep.subr.bf16.mxu1 %v7187_v6  ;;  %v3941_v40 = vcombine.high %v3915_v47, %v3923_v48 }
 0xac0   : > { %v3972_v12 = vcombine.low %v3948_v9, %v3964_v1  ;;  %v3648_v25 = vcombine.low %v3623_v63, %v3631_v39  ;;  %v4278_v15 = vpack.c.bf16 %v8126_v52, %v8126_v52  ;;  %v3957_v60 = vcombine.high %v3931_v20, %v3939_v57 }
 0xac1   : > { %v3664_v19 = vcombine.low %v3639_v42, %v3647_v13  ;;  %v3955_v31 = vrot.slane %v3941_v40, %v7613_v28  ;;  %v4269_v59 = vpack.c.bf16 %v3613_v8, %v3613_v8  ;;  %v3595_v29 = vrot.slane %v3581_v4, %v7613_v28 }
 0xac2   : > { %v4280_v2 = vpack.c.bf16 %v3972_v12, %v3972_v12  ;;  %v3656_v16 = vrot.slane %v3648_v25, %v7613_v28  ;;  %v3611_v58 = vrot.slane %v3597_v14, %v7613_v28  ;;  %v3971_v24 = vrot.slane %v3957_v60, %v7613_v28 }
 0xac3   : > { %v3672_v38 = vrot.slane %v3664_v19, %v7613_v28  ;;  %v3649_v26 = vcombine.high %v3623_v63, %v3631_v39  ;;  %v3665_v52 = vcombine.high %v3639_v42, %v3647_v13  ;;  %v4380_v10 = vsel %vm1812_vm1, %v4278_v15, 0 }
 0xac4   : > { %v4472_v49 = vsel %vm1812_vm1, %v4280_v2, 0  ;;  %v3974_v11 = vcombine.low %v3955_v31, %v3971_v24  ;;  %v3614_v62 = vcombine.low %v3595_v29, %v3611_v58  ;;  %v4279_v30 = vpack.c.bf16 %v8128_v0, %v8128_v0 }
 0xac5   : > { %6621 = vmatpush3.bf16.xpose.msra.mxu0 %v4472_v49  ;;  %6605 = vmatmul.mubr.msk.bf16.vlgmr.msra.gmra.mrb[52].mxu1 %vm1812_vm1, %v4269_v59  ;;  %v3680_v27 = vcombine.low %v3656_v16, %v3672_v38  ;;  %v3663_v44 = vrot.slane %v3649_v26, %v7613_v28  ;;  %v3679_v47 = vrot.slane %v3665_v52, %v7613_v28 }
 0xac6   : > { %6632 = vmatprep.subr.bf16.mxu0 %v7187_v6  ;;  %6609 = vmatpush3.bf16.xpose.msra.mxu1 %v4380_v10  ;;  %v4282_v36 = vpack.c.bf16 %v3974_v11, %v3974_v11  ;;  %v4270_v48 = vpack.c.bf16 %v3614_v62, %v3614_v62  ;;  %v4426_v57 = vsel %vm1812_vm1, %v4279_v30, 0  ;;  %v3973_v56 = vcombine.high %v3948_v9, %v3964_v1 }
 0xac7   : > { %6610 = vmatprep.mubr.msk.bf16.mxu1 %vm7189_vm0, %v7187_v6  ;;  %6614 = vmatprep.subr.bf16.mxu1 %v7187_v6  ;;  %v4272_v43 = vpack.c.bf16 %v3680_v27, %v3680_v27  ;;  %v3682_v0 = vcombine.low %v3663_v44, %v3679_v47  ;;  %v3615_v35 = vcombine.high %v3595_v29, %v3611_v58 }
 0xac8   : > { %v4564_v20 = vsel %vm1812_vm1, %v4282_v36, 0  ;;  %v4281_v53 = vpack.c.bf16 %v3973_v56, %v3973_v56  ;;  %v3975_v33 = vcombine.high %v3955_v31, %v3971_v24  ;;  %v3681_v5 = vcombine.high %v3656_v16, %v3672_v38 }
 0xac9   : > { %v4274_v37 = vpack.c.bf16 %v3682_v0, %v3682_v0  ;;  %v4271_v34 = vpack.c.bf16 %v3615_v35, %v3615_v35  ;;  %v3683_v55 = vcombine.high %v3663_v44, %v3679_v47 }
 0xaca   : > { %v4518_v17 = vsel %vm1812_vm1, %v4281_v53, 0  ;;  %v4283_v54 = vpack.c.bf16 %v3975_v33, %v3975_v33  ;;  %v4273_v7 = vpack.c.bf16 %v3681_v5, %v3681_v5 }
 0xacb   : > { %v4275_v4 = vpack.c.bf16 %v3683_v55, %v3683_v55 }
 0xacc   : > { %6623 = vmatmul.mubr.msk.bf16.vlgmr.msra.gmra.mrb[36].mxu0 %vm1812_vm1, %v4272_v43  ;;  %v4610_v23 = vsel %vm1812_vm1, %v4283_v54, 0 }
 0xacd   : > { %6633 = vmatpush3.bf16.xpose.msra.mxu0 %v4564_v20  ;;  %6634 = vmatprep.mubr.msk.bf16.mxu0 %vm7189_vm0, %v7187_v6 }
 0xace   : > { %6611 = vmatmul.mubr.msk.bf16.vlgmr.msra.gmra.mrb[56].mxu1 %vm1812_vm1, %v4270_v48  ;;  %6644 = vmatprep.subr.bf16.mxu0 %v7187_v6 }
 0xacf   : > { %6615 = vmatpush3.bf16.xpose.msra.mxu1 %v4426_v57  ;;  %6616 = vmatprep.mubr.msk.bf16.mxu1 %vm7189_vm0, %v7187_v6 }
 0xad0   : > { %6626 = vmatprep.subr.bf16.mxu1 %v7187_v6 }
 0xad4   : > { %6635 = vmatmul.mubr.msk.bf16.vlgmr.msra.gmra.mrb[40].mxu0 %vm1812_vm1, %v4274_v37 }
 0xad5   : > { %6646 = vmatprep.mubr.msk.bf16.mxu0 %vm7189_vm0, %v7187_v6 }
 0xad6   : > { %6617 = vmatmul.mubr.msk.bf16.vlgmr.msra.gmra.mrb[60].mxu1 %vm1812_vm1, %v4271_v34 }
 0xad7   : > { %6627 = vmatpush3.bf16.xpose.msra.mxu1 %v4518_v17  ;;  %6628 = vmatprep.mubr.msk.bf16.mxu1 %vm7189_vm0, %v7187_v6 }
 0xad8   : > { %6638 = vmatprep.subr.bf16.mxu1 %v7187_v6 }
 0xade   : > { %6629 = vmatmul.mubr.msk.bf16.vlgmr.msra.gmra.mrb[64].mxu1 %vm1812_vm1, %v4273_v7 }
 0xadf   : > { %6639 = vmatpush3.bf16.xpose.msra.mxu1 %v4610_v23  ;;  %6640 = vmatprep.mubr.msk.bf16.mxu1 %vm7189_vm0, %v7187_v6  ;;  %v3979_v23 = vpop.permute.xlu1 %3978 }
 0xae0   : > { %6650 = vmatprep.subr.bf16.mxu1 %v7187_v6 }
 0xae6   : > { %6641 = vmatmul.mubr.msk.bf16.vlgmr.msra.gmra.mrb[68].mxu1 %vm1812_vm1, %v4275_v4 }
 0xae7   : > { %6652 = vmatprep.mubr.msk.bf16.mxu1 %vm7189_vm0, %v7187_v6 }
 0xb90   : > { %v4324_v8 = vpop.f32.mrb[48].mxu1 }
 0xb91   : > { %v4652_v9 = vmul.f32 0.17677669, %v4324_v8  ;;  %v6600_v1 = vpop.f32.mrb[49].mxu1 }
 0xb92   : > { %v4327_v63 = vpop.f32.mrb[50].mxu1 }
 0xb93   : > { %v6601_v39 = vpop.f32.mrb[51].mxu1  ;;  %v4660_v42 = vsel %vm2204_vm3, %v4652_v9, -inf }
 0xb94   : > { %4661 = vmax.xlane.f32.xlu1 %v4660_v42 }
 0xb98   : > { %v4370_v13 = vpop.f32.mrb[52].mxu1 }
 0xb99   : > { %v4653_v14 = vmul.f32 0.17677669, %v4370_v13  ;;  %v6606_v12 = vpop.f32.mrb[53].mxu1 }
 0xb9a   : > { %v4373_v40 = vpop.f32.mrb[54].mxu1 }
 0xb9b   : > { %v6607_v25 = vpop.f32.mrb[55].mxu1  ;;  %v4663_v19 = vsel %vm2204_vm3, %v4653_v14, -inf }
 0xb9c   : > { %4664 = vmax.xlane.f32.xlu0 %v4663_v19 }
 0xb9f   : > { %v4508_v15 = vpop.f32.mrb[36].mxu0 }
 0xba0   : > { %v4656_v2 = vmul.f32 0.17677669, %v4508_v15  ;;  %v6624_v31 = vpop.f32.mrb[37].mxu0 }
 0xba1   : > { %v4416_v60 = vpop.f32.mrb[56].mxu1  ;;  %v4511_v59 = vpop.f32.mrb[38].mxu0 }
 0xba2   : > { %v4654_v16 = vmul.f32 0.17677669, %v4416_v60  ;;  %v6612_v38 = vpop.f32.mrb[57].mxu1  ;;  %v6625_v49 = vpop.f32.mrb[39].mxu0  ;;  %v4672_v29 = vsel %vm2204_vm3, %v4656_v2, -inf }
 0xba3   : > { %v4419_v58 = vpop.f32.mrb[58].mxu1  ;;  %4673 = vmax.xlane.f32.xlu1 %v4672_v29 }
 0xba4   : > { %v6613_v24 = vpop.f32.mrb[59].mxu1  ;;  %v4666_v26 = vsel %vm2204_vm3, %v4654_v16, -inf }
 0xba5   : > { %4667 = vmax.xlane.f32.xlu0 %v4666_v26 }
 0xba7   : > { %v4600_v52 = vpop.f32.mrb[40].mxu0 }
 0xba8   : > { %v8272_v10 = vmul.f32 0.17677669, %v4600_v52  ;;  %v6636_v27 = vpop.f32.mrb[41].mxu0 }
 0xba9   : > { %v4462_v11 = vpop.f32.mrb[60].mxu1  ;;  %v4603_v62 = vpop.f32.mrb[42].mxu0 }
 0xbaa   : > { %v4655_v36 = vmul.f32 0.17677669, %v4462_v11  ;;  %v6618_v30 = vpop.f32.mrb[61].mxu1  ;;  %v6637_v43 = vpop.f32.mrb[43].mxu0  ;;  %v4678_v44 = vsel %vm2204_vm3, %v8272_v10, -inf }
 0xbab   : > { %v4465_v47 = vpop.f32.mrb[62].mxu1  ;;  %4679 = vmax.xlane.f32.xlu1 %v4678_v44 }
 0xbac   : > { %v6619_v48 = vpop.f32.mrb[63].mxu1  ;;  %v4669_v20 = vsel %vm2204_vm3, %v4655_v36, -inf }
 0xbad   : > { %4670 = vmax.xlane.f32.xlu0 %v4669_v20 }
 0xbb1   : > { %v4554_v57 = vpop.f32.mrb[64].mxu1 }
 0xbb2   : > { %v8277_v56 = vmul.f32 0.17677669, %v4554_v57  ;;  %v6630_v0 = vpop.f32.mrb[65].mxu1 }
 0xbb3   : > { %v4557_v35 = vpop.f32.mrb[66].mxu1 }
 0xbb4   : > { %v6631_v53 = vpop.f32.mrb[67].mxu1  ;;  %v4675_v37 = vsel %vm2204_vm3, %v8277_v56, -inf }
 0xbb5   : > { %4676 = vmax.xlane.f32.xlu0 %v4675_v37 }
 0xbb9   : > { %v4646_v34 = vpop.f32.mrb[68].mxu1 }
 0xbba   : > { %v8281_v17 = vmul.f32 0.17677669, %v4646_v34  ;;  %v6642_v33 = vpop.f32.mrb[69].mxu1 }
 0xbbb   : > { %v4649_v5 = vpop.f32.mrb[70].mxu1 }
 0xbbc   : > { %v6643_v54 = vpop.f32.mrb[71].mxu1  ;;  %v4681_v7 = vsel %vm2204_vm3, %v8281_v17, -inf  ;;  %3990 = vrot.lane.b32.xlu1 %v8152_v50, %s7192_s20 }
 0xbbd   : > { %4682 = vmax.xlane.f32.xlu0 %v4681_v7 }
 0xbd3   : > { %3984 = vrot.lane.b32.xlu0 %v8152_v50, %s7190_s21 }
 0xc21   : > { %v4662_v55 = vpop.xlane.xlu1 %4661 }
 0xc22   : > { %v4684_v4 = vsub.f32 %v4652_v9, %v4662_v55 }
 0xc24   : > { %v4692_v8 = vmul.f32 1.442695, %v4684_v4 }
 0xc26   : > { %6967 = vpow2.f32 %v4692_v8 }
 0xc29   : > { %v4665_v1 = vpop.xlane.xlu0 %4664 }
 0xc2a   : > { %v4685_v63 = vsub.f32 %v4653_v14, %v4665_v1 }
 0xc2c   : > { %v4694_v12 = vmul.f32 1.442695, %v4685_v63 }
 0xc30   : > { %v4674_v39 = vpop.xlane.xlu1 %4673  ;;  %v8289_v42 = vpop.eup %6967 }
 0xc31   : > { %v4688_v13 = vsub.f32 %v4656_v2, %v4674_v39  ;;  %v4708_v25 = vsel %vm2204_vm3, %v8289_v42, 0.0 }
 0xc32   : > { %v4668_v40 = vpop.xlane.xlu0 %4667  ;;  %4709 = vadd.xlane.f32.xlu1 %v4708_v25 }
 0xc33   : > { %v4700_v19 = vmul.f32 1.442695, %v4688_v13  ;;  %v4686_v15 = vsub.f32 %v4654_v16, %v4668_v40 }
 0xc35   : > { %6969 = vpow2.f32 %v4700_v19  ;;  %v4696_v31 = vmul.f32 1.442695, %v4686_v15 }
 0xc36   : > { %6971 = vpow2.f32 %v4694_v12 }
 0xc37   : > { %6973 = vpow2.f32 %v4696_v31 }
 0xc38   : > { %v8303_v29 = vpop.xlane.xlu1 %4679 }
 0xc3a   : > { %v4671_v9 = vpop.xlane.xlu0 %4670 }
 0xc3b   : > { %v4687_v60 = vsub.f32 %v4655_v36, %v4671_v9 }
 0xc3c   : > { %v3991_v52 = vpop.permute.xlu1 %3990 }
 0xc3d   : > { %v4698_v59 = vmul.f32 1.442695, %v4687_v60  ;;  %v4012_v62 = vcombine.low %v3979_v23, %v3991_v52  ;;  %v4013_v36 = vcombine.high %v3979_v23, %v3991_v52 }
 0xc3f   : > { %v8293_v14 = vpop.eup %6969  ;;  %6975 = vpow2.f32 %v4698_v59  ;;  %v4020_v47 = vrot.slane %v4012_v62, %v7610_v21  ;;  %v4027_v48 = vrot.slane %v4013_v36, %v7610_v21 }
 0xc40   : > { %v8295_v38 = vpop.eup %6971  ;;  %v4720_v2 = vsel %vm2204_vm3, %v8293_v14, 0.0 }
 0xc41   : > { %v8299_v49 = vpop.eup %6973  ;;  %4721 = vadd.xlane.f32.xlu0 %v4720_v2  ;;  %v4711_v58 = vsel %vm2204_vm3, %v8295_v38, 0.0 }
 0xc42   : > { %v4714_v16 = vsel %vm2204_vm3, %v8299_v49, 0.0  ;;  %v4677_v24 = vpop.xlane.xlu0 %4676 }
 0xc43   : > { %4715 = vadd.xlane.f32.xlu1 %v4714_v16  ;;  %v4689_v52 = vsub.f32 %v8277_v56, %v4677_v24 }
 0xc45   : > { %4712 = vadd.xlane.f32.xlu0 %v4711_v58  ;;  %v4702_v36 = vmul.f32 1.442695, %v4689_v52 }
 0xc47   : > { %6977 = vpow2.f32 %v4702_v36 }
 0xc49   : > { %v8307_v26 = vpop.eup %6975 }
 0xc4a   : > { %v4683_v27 = vpop.xlane.xlu0 %4682  ;;  %v4717_v11 = vsel %vm2204_vm3, %v8307_v26, 0.0 }
 0xc4b   : > { %4718 = vadd.xlane.f32.xlu0 %v4717_v11 }
 0xc4e   : > { %v3985_v30 = vpop.permute.xlu0 %3984 }
 0xc4f   : > { %v3996_v43 = vcombine.low %v8152_v50, %v3985_v30  ;;  %v3997_v44 = vcombine.high %v8152_v50, %v3985_v30  ;;  %v4691_v30 = vsub.f32 %v8281_v17, %v4683_v27  ;;  %v4690_v17 = vsub.f32 %v8272_v10, %v8303_v29 }
 0xc51   : > { %v4004_v20 = vrot.slane %v3996_v43, %v7610_v21  ;;  %v4011_v57 = vrot.slane %v3997_v44, %v7610_v21  ;;  %v4706_v43 = vmul.f32 1.442695, %v4691_v30  ;;  %v8339_v44 = vpop.eup %6977  ;;  %v4704_v27 = vmul.f32 1.442695, %v4690_v17 }
 0xc52   : > { %v4723_v56 = vsel %vm2204_vm3, %v8339_v44, 0.0 }
 0xc53   : > { %v4028_v0 = vcombine.low %v4004_v20, %v4020_v47  ;;  %v4029_v35 = vcombine.high %v4004_v20, %v4020_v47  ;;  %v4044_v53 = vcombine.low %v4011_v57, %v4027_v48  ;;  %v4045_v37 = vcombine.high %v4011_v57, %v4027_v48 }
 0xc54   : > { %3986 = vrot.lane.b32.xlu1 %v8101_v3, %s7190_s21  ;;  %6979 = vpow2.f32 %v4706_v43 }
 0xc55   : > { %v4036_v34 = vrot.slane %v4028_v0, %v7613_v28  ;;  %v4043_v33 = vrot.slane %v4029_v35, %v7613_v28  ;;  %v4052_v50 = vrot.slane %v4044_v53, %v7613_v28  ;;  %v4059_v5 = vrot.slane %v4045_v37, %v7613_v28 }
 0xc56   : > { %6981 = vpow2.f32 %v4704_v27 }
 0xc57   : > { %v4132_v54 = vcombine.low %v4036_v34, %v4043_v33  ;;  %v6244_v7 = vcombine.high %v4036_v34, %v4043_v33  ;;  %v4148_v23 = vcombine.low %v4052_v50, %v4059_v5  ;;  %v6245_v55 = vcombine.high %v4052_v50, %v4059_v5 }
 0xc59   : > { %v4139_v4 = vrot.slane %v4132_v54, %v7610_v21  ;;  %v4147_v8 = vrot.slane %v6244_v7, %v7610_v21  ;;  %v4155_v1 = vrot.slane %v4148_v23, %v7610_v21  ;;  %v4163_v63 = vrot.slane %v6245_v55, %v7610_v21 }
 0xc5b   : > { %v4164_v39 = vcombine.low %v4139_v4, %v4147_v8  ;;  %v4180_v13 = vcombine.low %v4155_v1, %v4163_v63  ;;  %v4165_v12 = vcombine.high %v4139_v4, %v4147_v8  ;;  %v4181_v40 = vcombine.high %v4155_v1, %v4163_v63 }
 0xc5d   : > { %v4172_v25 = vrot.slane %v4164_v39, %v7613_v28  ;;  %v4188_v19 = vrot.slane %v4180_v13, %v7613_v28  ;;  %v4179_v15 = vrot.slane %v4165_v12, %v7613_v28  ;;  %v4195_v31 = vrot.slane %v4181_v40, %v7613_v28 }
 0xc5e   : > { %v8343_v24 = vpop.eup %6979 }
 0xc5f   : > { %v4196_v9 = vcombine.low %v4172_v25, %v4188_v19  ;;  %v4197_v60 = vcombine.high %v4172_v25, %v4188_v19  ;;  %v4198_v59 = vcombine.low %v4179_v15, %v4195_v31  ;;  %v4199_v2 = vcombine.high %v4179_v15, %v4195_v31 }
 0xc60   : > { %v4729_v47 = vsel %vm2204_vm3, %v8343_v24, 0.0  ;;  %v8351_v48 = vpop.eup %6981 }
 0xc61   : > { %3980 = vrot.lane.b32.xlu0 %v8101_v3, %s7191_s0  ;;  %v4756_v16 = vpack.c.bf16 %v4196_v9, %v4196_v9  ;;  %v4757_v58 = vpack.c.bf16 %v4197_v60, %v4197_v60  ;;  %v4726_v20 = vsel %vm2204_vm3, %v8351_v48, 0.0  ;;  %v4758_v53 = vpack.c.bf16 %v4198_v59, %v4198_v59 }
 0xc62   : > { %v4759_v55 = vpack.c.bf16 %v4199_v2, %v4199_v2 }
 0xc63   : > { %v4768_v11 = vsel %vm2312_vm4, %v4756_v16, 0  ;;  %v4814_v62 = vsel %vm2312_vm4, %v4757_v58, 0  ;;  %v4860_v10 = vsel %vm2312_vm4, %v4758_v53, 0 }
 0xc64   : > { %6645 = vmatpush3.bf16.msra.mxu0 %v4768_v11  ;;  %6651 = vmatpush3.bf16.msra.mxu1 %v4814_v62  ;;  %v4906_v8 = vsel %vm2312_vm4, %v4759_v55, 0 }
 0xc65   : > { %6656 = vmatprep.subr.bf16.mxu0 %v7187_v6  ;;  %6662 = vmatprep.subr.bf16.mxu1 %v7187_v6 }
 0xc78   : > { %4724 = vadd.xlane.f32.xlu1 %v4723_v56 }
 0xc80   : > { %4730 = vadd.xlane.f32.xlu0 %v4729_v47 }
 0xc89   : > { %3992 = vrot.lane.b32.xlu1 %v8101_v3, %s7192_s20 }
 0xcad   : > { %4727 = vadd.xlane.f32.xlu1 %v4726_v20 }
 0xcbf   : > { %v4710_v57 = vpop.xlane.xlu1 %4709 }
 0xcc0   : > { %6983 = vrcp.f32 %v4710_v57 }
 0xcca   : > { %v6984_v0 = vpop.eup %6983 }
 0xccb   : > { %v4740_v35 = vmul.f32 %v6984_v0, %v8289_v42 }
 0xccd   : > { %v4748_v37 = vpack.c.bf16 %v4740_v35, %v4740_v35 }
 0xcce   : > { %v4722_v34 = vpop.xlane.xlu0 %4721 }
 0xccf   : > { %6647 = vmatmul.mubr.msk.bf16.vlgmr.msra.gmra.mrb[44].mxu0 %vm2204_vm3, %v4748_v37 }
 0xcd0   : > { %v4716_v33 = vpop.xlane.xlu1 %4715  ;;  %6657 = vmatpush3.bf16.msra.mxu0 %v4860_v10  ;;  %6658 = vmatprep.mubr.msk.bf16.mxu0 %vm7189_vm0, %v7187_v6 }
 0xcd1   : > { %6985 = vrcp.f32 %v4716_v33  ;;  %6668 = vmatprep.subr.bf16.mxu0 %v7187_v6 }
 0xcd2   : > { %v4713_v29 = vpop.xlane.xlu0 %4712 }
 0xcd3   : > { %6987 = vrcp.f32 %v4713_v29 }
 0xcd4   : > { %v3987_v63 = vpop.permute.xlu1 %3986 }
 0xcd5   : > { %v4064_v13 = vcombine.low %v8101_v3, %v3987_v63  ;;  %v4065_v12 = vcombine.high %v8101_v3, %v3987_v63 }
 0xcd7   : > { %v4079_v31 = vrot.slane %v4065_v12, %v7610_v21 }
 0xcd8   : > { %v4719_v50 = vpop.xlane.xlu0 %4718 }
 0xcd9   : > { %6989 = vrcp.f32 %v4719_v50 }
 0xcda   : > { %6991 = vrcp.f32 %v4722_v34 }
 0xcdb   : > { %v6986_v42 = vpop.eup %6985 }
 0xcdc   : > { %v4742_v5 = vmul.f32 %v6986_v42, %v8299_v49  ;;  %v3981_v40 = vpop.permute.xlu0 %3980 }
 0xcdd   : > { %v6988_v54 = vpop.eup %6987 }
 0xcde   : > { %v4741_v7 = vmul.f32 %v6988_v54, %v8295_v38  ;;  %v4750_v23 = vpack.c.bf16 %v4742_v5, %v4742_v5 }
 0xce0   : > { %6659 = vmatmul.mubr.msk.bf16.vlgmr.msra.gmra.mrb[48].mxu0 %vm2204_vm3, %v4750_v23  ;;  %v4749_v4 = vpack.c.bf16 %v4741_v7, %v4741_v7 }
 0xce1   : > { %6670 = vmatprep.mubr.msk.bf16.mxu0 %vm7189_vm0, %v7187_v6 }
 0xce2   : > { %6653 = vmatmul.mubr.msk.bf16.vlgmr.msra.gmra.mrb[72].mxu1 %vm2204_vm3, %v4749_v4 }
 0xce3   : > { %v6990_v1 = vpop.eup %6989  ;;  %6663 = vmatpush3.bf16.msra.mxu1 %v4906_v8  ;;  %6664 = vmatprep.mubr.msk.bf16.mxu1 %vm7189_vm0, %v7187_v6 }
 0xce4   : > { %v4743_v49 = vmul.f32 %v6990_v1, %v8307_v26  ;;  %6674 = vmatprep.subr.bf16.mxu1 %v7187_v6  ;;  %v4072_v26 = vrot.slane %v4064_v13, %v7610_v21  ;;  %v6992_v34 = vpop.eup %6991 }
 0xce5   : > { %v4744_v55 = vmul.f32 %v6992_v34, %v8293_v14 }
 0xce6   : > { %v4751_v38 = vpack.c.bf16 %v4743_v49, %v4743_v49 }
 0xce7   : > { %v4752_v13 = vpack.c.bf16 %v4744_v55, %v4744_v55 }
 0xcea   : > { %6665 = vmatmul.mubr.msk.bf16.vlgmr.msra.gmra.mrb[76].mxu1 %vm2204_vm3, %v4751_v38 }
 0xceb   : > { %6676 = vmatprep.mubr.msk.bf16.mxu1 %vm7189_vm0, %v7187_v6 }
 0xd05   : > { %v4725_v39 = vpop.xlane.xlu1 %4724 }
 0xd06   : > { %6993 = vrcp.f32 %v4725_v39 }
 0xd09   : > { %v3993_v25 = vpop.permute.xlu1 %3992 }
 0xd0a   : > { %v4080_v19 = vcombine.low %v3981_v40, %v3993_v25  ;;  %v4081_v15 = vcombine.high %v3981_v40, %v3993_v25 }
 0xd0c   : > { %v4088_v9 = vrot.slane %v4080_v19, %v7610_v21  ;;  %v4095_v60 = vrot.slane %v4081_v15, %v7610_v21 }
 0xd0d   : > { %v4731_v57 = vpop.xlane.xlu0 %4730 }
 0xd0e   : > { %v4096_v59 = vcombine.low %v4072_v26, %v4088_v9  ;;  %v4097_v2 = vcombine.high %v4072_v26, %v4088_v9  ;;  %v4112_v16 = vcombine.low %v4079_v31, %v4095_v60  ;;  %v4113_v58 = vcombine.high %v4079_v31, %v4095_v60 }
 0xd0f   : > { %6995 = vrcp.f32 %v4731_v57 }
 0xd10   : > { %v4104_v3 = vrot.slane %v4096_v59, %v7613_v28  ;;  %v4111_v52 = vrot.slane %v4097_v2, %v7613_v28  ;;  %v4120_v11 = vrot.slane %v4112_v16, %v7613_v28  ;;  %v4127_v62 = vrot.slane %v4113_v58, %v7613_v28  ;;  %v6994_v42 = vpop.eup %6993 }
 0xd11   : > { %v4745_v4 = vmul.f32 %v6994_v42, %v8339_v44 }
 0xd12   : > { %v4200_v36 = vcombine.low %v4104_v3, %v4111_v52  ;;  %v6246_v30 = vcombine.high %v4104_v3, %v4111_v52  ;;  %v4216_v43 = vcombine.low %v4120_v11, %v4127_v62  ;;  %v6247_v56 = vcombine.high %v4120_v11, %v4127_v62 }
 0xd13   : > { %v4753_v12 = vpack.c.bf16 %v4745_v4, %v4745_v4  ;;  %v6883_v4 = vld [vmem:[%s7474_s29 + $0x20] sm:$0xff]  }
 0xd14   : > { %v4207_v47 = vrot.slane %v4200_v36, %v7610_v21  ;;  %v4215_v17 = vrot.slane %v6246_v30, %v7610_v21  ;;  %v4223_v27 = vrot.slane %v4216_v43, %v7610_v21  ;;  %v4231_v20 = vrot.slane %v6247_v56, %v7610_v21  ;;  %v6879_v36 = vld [vmem:[%s7474_s29] sm:$0xff]   ;;  %v6880_v56 = vld [vmem:[%s7474_s29 + $0x8] sm:$0xff]  }
 0xd16   : > { %v4232_v0 = vcombine.low %v4207_v47, %v4215_v17  ;;  %v4248_v35 = vcombine.low %v4223_v27, %v4231_v20  ;;  %v4233_v53 = vcombine.high %v4207_v47, %v4215_v17  ;;  %v4249_v37 = vcombine.high %v4223_v27, %v4231_v20  ;;  %v6881_v47 = vld [vmem:[%s7474_s29 + $0x10] sm:$0xff]  }
 0xd18   : > { %v4240_v33 = vrot.slane %v4232_v0, %v7613_v28  ;;  %v4256_v10 = vrot.slane %v4248_v35, %v7613_v28  ;;  %v4247_v29 = vrot.slane %v4233_v53, %v7613_v28  ;;  %v4263_v50 = vrot.slane %v4249_v37, %v7613_v28 }
 0xd19   : > { %v6996_v40 = vpop.eup %6995 }
 0xd1a   : > { %v4264_v5 = vcombine.low %v4240_v33, %v4256_v10  ;;  %v4265_v54 = vcombine.high %v4240_v33, %v4256_v10  ;;  %v4266_v7 = vcombine.low %v4247_v29, %v4263_v50  ;;  %v4267_v23 = vcombine.high %v4247_v29, %v4263_v50  ;;  %v6882_v10 = vld [vmem:[%s7474_s29 + $0x18] sm:$0xff]  }
 0xd1b   : > { %v4747_v25 = vmul.f32 %v6996_v40, %v8343_v24  ;;  %v6884_v40 = vld [vmem:[%s7474_s29 + $0x28] sm:$0xff]  }
 0xd1c   : > { %v4760_v8 = vpack.c.bf16 %v4264_v5, %v4264_v5  ;;  %v4761_v1 = vpack.c.bf16 %v4265_v54, %v4265_v54  ;;  %v4762_v63 = vpack.c.bf16 %v4266_v7, %v4266_v7  ;;  %v4763_v39 = vpack.c.bf16 %v4267_v23, %v4267_v23 }
 0xd1d   : > { %v4755_v19 = vpack.c.bf16 %v4747_v25, %v4747_v25 }
 0xd1e   : > { %v4952_v49 = vsel %vm2312_vm4, %v4760_v8, 0  ;;  %v4998_v38 = vsel %vm2312_vm4, %v4761_v1, 0  ;;  %v5044_v14 = vsel %vm2312_vm4, %v4762_v63, 0  ;;  %v5090_v44 = vsel %vm2312_vm4, %v4763_v39, 0 }
 0xd1f   : > { %6669 = vmatpush3.bf16.msra.mxu0 %v4952_v49  ;;  %6675 = vmatpush3.bf16.msra.mxu1 %v4998_v38 }
 0xd20   : > { %6680 = vmatprep.subr.bf16.mxu0 %v7187_v6  ;;  %6686 = vmatprep.subr.bf16.mxu1 %v7187_v6 }
 0xd22   : > { %6671 = vmatmul.mubr.msk.bf16.vlgmr.msra.gmra.mrb[52].mxu0 %vm2204_vm3, %v4752_v13  ;;  %6677 = vmatmul.mubr.msk.bf16.vlgmr.msra.gmra.mrb[80].mxu1 %vm2204_vm3, %v4753_v12 }
 0xd23   : > { %6681 = vmatpush3.bf16.msra.mxu0 %v5044_v14  ;;  %6687 = vmatpush3.bf16.msra.mxu1 %v5090_v44 }
 0xd24   : > { %6688 = vmatprep.mubr.msk.bf16.mxu1 %vm7189_vm0, %v7187_v6  ;;  %6682 = vmatprep.mubr.msk.bf16.mxu0 %vm7189_vm0, %v7187_v6 }
 0xd25   : > { %6692 = vmatprep.subr.bf16.mxu0 %v7187_v6 }
 0xd2a   : > { %6689 = vmatmul.mubr.msk.bf16.vlgmr.msra.gmra.mrb[84].mxu1 %vm2204_vm3, %v4755_v19 }
 0xd2b   : > { %5723 = vmatprep.mubr.bf16.mxu1 %v7188_v32 }
 0xd3a   : > { %v4728_v15 = vpop.xlane.xlu1 %4727 }
 0xd3b   : > { %6997 = vrcp.f32 %v4728_v15 }
 0xd45   : > { %v6998_v26 = vpop.eup %6997 }
 0xd46   : > { %v4746_v31 = vmul.f32 %v6998_v26, %v8351_v48 }
 0xd48   : > { %v4754_v24 = vpack.c.bf16 %v4746_v31, %v4746_v31 }
 0xd4a   : > { %6683 = vmatmul.mubr.msk.bf16.vlgmr.msra.gmra.mrb[56].mxu0 %vm2204_vm3, %v4754_v24 }
 0xd4b   : > { %6708 = vmatprep.mubr.msk.bf16.mxu0 %vm7189_vm0, %v7187_v6  ;;  %6693 = vmatpush3.bf16.msra.mxu0 %v6879_v36 }
 0xd4c   : > { %6694 = vmatprep.subr.bf16.mxu0 %v7187_v6 }
 0xd4f   : > { %6695 = vmatpush3.bf16.msra.mxu0 %v6880_v56 }
 0xd50   : > { %6696 = vmatprep.subr.bf16.mxu0 %v7187_v6 }
 0xd53   : > { %6697 = vmatpush3.bf16.msra.mxu0 %v6881_v47 }
 0xd54   : > { %6698 = vmatprep.subr.bf16.mxu0 %v7187_v6 }
 0xd57   : > { %6699 = vmatpush3.bf16.msra.mxu0 %v6882_v10 }
 0xd58   : > { %6700 = vmatprep.subr.bf16.mxu0 %v7187_v6 }
 0xd5b   : > { %6701 = vmatpush3.bf16.msra.mxu0 %v6883_v4 }
 0xd5c   : > { %6702 = vmatprep.subr.bf16.mxu0 %v7187_v6 }
 0xd5f   : > { %6703 = vmatpush3.bf16.msra.mxu0 %v6884_v40 }
 0xd60   : > { %6704 = vmatprep.subr.bf16.mxu0 %v7187_v6 }
 0xda2   : > { %v4804_v9 = vpop.f32.mrb[44].mxu0 }
 0xda3   : > { %v6648_v60 = vpop.f32.mrb[45].mxu0 }
 0xda4   : > { %v4807_v59 = vpop.f32.mrb[46].mxu0 }
 0xda5   : > { %v6649_v2 = vpop.f32.mrb[47].mxu0 }
 0xdb3   : > { %v4896_v16 = vpop.f32.mrb[48].mxu0 }
 0xdb4   : > { %v5132_v32 = vcombine.low %v4804_v9, %v4896_v16  ;;  %v5133_v58 = vcombine.high %v4804_v9, %v4896_v16  ;;  %v6660_v3 = vpop.f32.mrb[49].mxu0 }
 0xdb5   : > { %v4899_v52 = vpop.f32.mrb[50].mxu0  ;;  %v4850_v11 = vpop.f32.mrb[72].mxu1 }
 0xdb6   : > { %v6661_v48 = vpop.f32.mrb[51].mxu0  ;;  %v6654_v62 = vpop.f32.mrb[73].mxu1  ;;  %v5140_v35 = vrot.slane %v5132_v32, %v7610_v21  ;;  %v5147_v53 = vrot.slane %v5133_v58, %v7610_v21 }
 0xdb7   : > { %v4853_v30 = vpop.f32.mrb[74].mxu1 }
 0xdb8   : > { %v6655_v43 = vpop.f32.mrb[75].mxu1 }
 0xdbd   : > { %v4942_v17 = vpop.f32.mrb[76].mxu1 }
 0xdbe   : > { %v5148_v27 = vcombine.low %v4850_v11, %v4942_v17  ;;  %v5149_v20 = vcombine.high %v4850_v11, %v4942_v17  ;;  %v6666_v57 = vpop.f32.mrb[77].mxu1 }
 0xdbf   : > { %v4945_v0 = vpop.f32.mrb[78].mxu1 }
 0xdc0   : > { %v5156_v37 = vrot.slane %v5148_v27, %v7610_v21  ;;  %v5163_v34 = vrot.slane %v5149_v20, %v7610_v21  ;;  %v6667_v33 = vpop.f32.mrb[79].mxu1 }
 0xdc2   : > { %v5164_v29 = vcombine.low %v5140_v35, %v5156_v37  ;;  %v5165_v50 = vcombine.high %v5140_v35, %v5156_v37  ;;  %v5180_v42 = vcombine.low %v5147_v53, %v5163_v34  ;;  %v5181_v5 = vcombine.high %v5147_v53, %v5163_v34 }
 0xdc4   : > { %v5172_v54 = vrot.slane %v5164_v29, %v7613_v28  ;;  %v5179_v7 = vrot.slane %v5165_v50, %v7613_v28  ;;  %v5188_v23 = vrot.slane %v5180_v42, %v7613_v28  ;;  %v5195_v55 = vrot.slane %v5181_v5, %v7613_v28 }
 0xdc6   : > { %v5268_v8 = vcombine.low %v5172_v54, %v5179_v7  ;;  %v6264_v1 = vcombine.high %v5172_v54, %v5179_v7  ;;  %v5284_v49 = vcombine.low %v5188_v23, %v5195_v55  ;;  %v6265_v38 = vcombine.high %v5188_v23, %v5195_v55 }
 0xdc8   : > { %v5275_v63 = vrot.slane %v5268_v8, %v7610_v21  ;;  %v5283_v39 = vrot.slane %v6264_v1, %v7610_v21  ;;  %v5291_v13 = vrot.slane %v5284_v49, %v7610_v21  ;;  %v5299_v12 = vrot.slane %v6265_v38, %v7610_v21  ;;  %v6885_v38 = vld [vmem:[%s7474_s29 + $0x30] sm:$0xff]  }
 0xdc9   : > { %6705 = vmatpush3.bf16.msra.mxu0 %v6885_v38 }
 0xdca   : > { %v5301_v14 = vcombine.high %v5275_v63, %v5283_v39  ;;  %v5317_v44 = vcombine.high %v5291_v13, %v5299_v12  ;;  %v5300_v25 = vcombine.low %v5275_v63, %v5283_v39  ;;  %v5316_v19 = vcombine.low %v5291_v13, %v5299_v12  ;;  %6706 = vmatprep.subr.bf16.mxu0 %v7187_v6 }
 0xdcc   : > { %v8439_v15 = vrot.slane %v5301_v14, %v7613_v28  ;;  %v8442_v26 = vrot.slane %v5317_v44, %v7613_v28  ;;  %v8445_v31 = vrot.slane %v5300_v25, %v7613_v28  ;;  %v8448_v24 = vrot.slane %v5316_v19, %v7613_v28 }
 0xdce   : > { %v5334_v9 = vcombine.low %v8439_v15, %v8442_v26  ;;  %v5332_v60 = vcombine.low %v8445_v31, %v8448_v24  ;;  %v5333_v59 = vcombine.high %v8445_v31, %v8448_v24  ;;  %v5335_v2 = vcombine.high %v8439_v15, %v8442_v26  ;;  %v8492_v24 = vld [vmem:[%s7507_s23 + $0x8] sm:$0x7f] }
 0xdcf   : > { %v5544_v31 = vsub.s32 5, %v7562_v45 }
 0xdf5   : > { %v4988_v16 = vpop.f32.mrb[52].mxu0  ;;  %v5034_v32 = vpop.f32.mrb[80].mxu1 }
 0xdf6   : > { %v6672_v58 = vpop.f32.mrb[53].mxu0  ;;  %v6678_v3 = vpop.f32.mrb[81].mxu1 }
 0xdf7   : > { %v4991_v52 = vpop.f32.mrb[54].mxu0  ;;  %v5037_v11 = vpop.f32.mrb[82].mxu1 }
 0xdf8   : > { %v6673_v48 = vpop.f32.mrb[55].mxu0  ;;  %v6679_v62 = vpop.f32.mrb[83].mxu1 }
 0xdfd   : > { %v5126_v36 = vpop.f32.mrb[84].mxu1 }
 0xdfe   : > { %v5216_v30 = vcombine.low %v5034_v32, %v5126_v36  ;;  %v5217_v43 = vcombine.high %v5034_v32, %v5126_v36  ;;  %v6690_v56 = vpop.f32.mrb[85].mxu1  ;;  %v6886_v32 = vld [vmem:[%s7474_s29 + $0x38] sm:$0xff]  }
 0xdff   : > { %v5129_v47 = vpop.f32.mrb[86].mxu1  ;;  %6707 = vmatpush3.bf16.msra.mxu0 %v6886_v32 }
 0xe00   : > { %v6691_v17 = vpop.f32.mrb[87].mxu1  ;;  %v5224_v53 = vrot.slane %v5216_v30, %v7610_v21  ;;  %v5231_v37 = vrot.slane %v5217_v43, %v7610_v21 }
 0xe1d   : > { %v5080_v27 = vpop.f32.mrb[56].mxu0 }
 0xe1e   : > { %v5200_v20 = vcombine.low %v4988_v16, %v5080_v27  ;;  %v5201_v57 = vcombine.high %v4988_v16, %v5080_v27  ;;  %v6684_v0 = vpop.f32.mrb[57].mxu0 }
 0xe1f   : > { %v5083_v35 = vpop.f32.mrb[58].mxu0 }
 0xe20   : > { %v5208_v34 = vrot.slane %v5200_v20, %v7610_v21  ;;  %v5215_v33 = vrot.slane %v5201_v57, %v7610_v21  ;;  %v6685_v10 = vpop.f32.mrb[59].mxu0 }
 0xe22   : > { %v5232_v29 = vcombine.low %v5208_v34, %v5224_v53  ;;  %v5233_v50 = vcombine.high %v5208_v34, %v5224_v53  ;;  %v5248_v42 = vcombine.low %v5215_v33, %v5231_v37  ;;  %v5249_v5 = vcombine.high %v5215_v33, %v5231_v37 }
 0xe24   : > { %v5240_v54 = vrot.slane %v5232_v29, %v7613_v28  ;;  %v5247_v7 = vrot.slane %v5233_v50, %v7613_v28  ;;  %v5256_v23 = vrot.slane %v5248_v42, %v7613_v28  ;;  %v5263_v55 = vrot.slane %v5249_v5, %v7613_v28  ;;  %v6887_v5 = vld [vmem:[%s7492_s17] ss:$8 sps:$4 sm:$0xff]  }
 0xe26   : > { %v5336_v4 = vcombine.low %v5240_v54, %v5247_v7  ;;  %v6266_v8 = vcombine.high %v5240_v54, %v5247_v7  ;;  %v5352_v1 = vcombine.low %v5256_v23, %v5263_v55  ;;  %v6267_v49 = vcombine.high %v5256_v23, %v5263_v55  ;;  %v6889_v54 = vld [vmem:[%s7492_s17 + $0x4] ss:$8 sps:$4 sm:$0xff]   ;;  %v6892_v7 = vld [vmem:[%s7492_s17 + $0x14] ss:$8 sps:$4 sm:$0xff]  }
 0xe27   : > { %5691 = vmatprep.subr.bf16.mxu1 %v6889_v54  ;;  %v5599_v54 = vld [vmem:[%s7476_s15] sm:$0x3]  ;;  %s8622_s15 = sld [smem:[#allocation21_spill]] }
 0xe28   : > { %v5343_v63 = vrot.slane %v5336_v4, %v7610_v21  ;;  %v5351_v39 = vrot.slane %v6266_v8, %v7610_v21  ;;  %v5359_v13 = vrot.slane %v5352_v1, %v7610_v21  ;;  %v5367_v12 = vrot.slane %v6267_v49, %v7610_v21  ;;  %5692 = vmatpush1.bf16.msra.mxu1 %v6887_v5  ;;  %v6926_v5 = vld [vmem:[%s7502_s3 + $0x38] sm:$0xff]  }
 0xe29   : > { %5693 = vmatprep.subr.bf16.mxu1 %v6892_v7  ;;  %v5604_v7 = vrot.slane %v5599_v54, %v7565_v46 }
 0xe2a   : > { %v5369_v40 = vcombine.high %v5343_v63, %v5351_v39  ;;  %v5385_v14 = vcombine.high %v5359_v13, %v5367_v12  ;;  %v5368_v44 = vcombine.low %v5343_v63, %v5351_v39  ;;  %v5384_v25 = vcombine.low %v5359_v13, %v5367_v12  ;;  %v6895_v63 = vld [vmem:[%s7492_s17 + $0x24] ss:$8 sps:$4 sm:$0xff]   ;;  %v6893_v39 = vld [vmem:[%s7492_s17 + $0x20] ss:$8 sps:$4 sm:$0xff]   ;;  %v6898_v13 = vld [vmem:[%s7492_s17 + $0x34] ss:$8 sps:$4 sm:$0xff]  }
 0xe2b   : > { %v6896_v12 = vld [vmem:[%s7492_s17 + $0x30] ss:$8 sps:$4 sm:$0xff]  }
 0xe2c   : > { %v5383_v19 = vrot.slane %v5369_v40, %v7613_v28  ;;  %v5399_v15 = vrot.slane %v5385_v14, %v7613_v28  ;;  %v5376_v26 = vrot.slane %v5368_v44, %v7613_v28  ;;  %v5392_v16 = vrot.slane %v5384_v25, %v7613_v28  ;;  %v6901_v40 = vld [vmem:[%s7492_s17 + $0x44] ss:$8 sps:$4 sm:$0xff]   ;;  %v6899_v14 = vld [vmem:[%s7492_s17 + $0x40] ss:$8 sps:$4 sm:$0xff]   ;;  %v6904_v44 = vld [vmem:[%s7492_s17 + $0x54] ss:$8 sps:$4 sm:$0xff]  }
 0xe2d   : > { %v6902_v25 = vld [vmem:[%s7492_s17 + $0x50] ss:$8 sps:$4 sm:$0xff]  }
 0xe2e   : > { %v5402_v58 = vcombine.low %v5383_v19, %v5399_v15  ;;  %v5401_v3 = vcombine.high %v5376_v26, %v5392_v16  ;;  %v5400_v52 = vcombine.low %v5376_v26, %v5392_v16  ;;  %v5403_v21 = vcombine.high %v5383_v19, %v5399_v15  ;;  %v6907_v19 = vld [vmem:[%s7492_s17 + $0x64] ss:$8 sps:$4 sm:$0xff]   ;;  %v6905_v15 = vld [vmem:[%s7492_s17 + $0x60] ss:$8 sps:$4 sm:$0xff]   ;;  %v6910_v26 = vld [vmem:[%s7492_s17 + $0x74] ss:$8 sps:$4 sm:$0xff]  }
 0xe2f   : > { %v6908_v16 = vld [vmem:[%s7492_s17 + $0x70] ss:$8 sps:$4 sm:$0xff]  }
 0xe30   : > { %v6797_v11 = vpack.i.bf16 %v5402_v58, %v5334_v9  ;;  %v6792_v48 = vpack.i.bf16 %v5401_v3, %v5333_v59  ;;  %v6802_v62 = vpack.i.bf16 %v5403_v21, %v5335_v2 }
 0xe32   : > { %6798 = vrot.lane.b32.xlu1 %v6797_v11, %s7190_s21  ;;  %6793 = vrot.lane.b32.xlu0 %v6792_v48, %s7192_s20  ;;  %v7016_v48 = vld [vmem:[%s7507_s23] sm:$0xff] }
 0xe36   : > { %6803 = vrot.lane.b32.xlu1 %v6802_v62, %s7191_s0  ;;  %v5573_v62 = vrot.slane %v7016_v48, %v3388_v18  ;;  %v6911_v18 = vld [vmem:[%s7502_s3 + $0x40] sm:$0xff]  }
 0xe37   : > { %6418 = vmatprep.subr.bf16.mxu0 %v6911_v18 }
 0xea4   : > { %v6799_v6 = vpop.permute.xlu1 %6798  ;;  %v6794_v36 = vpop.permute.xlu0 %6793 }
 0xea5   : > { %v6796_v30 = vunpack.i.h.bf16 %v6794_v36  ;;  %v6795_v28 = vunpack.i.l.bf16 %v6794_v36  ;;  %v6801_v43 = vunpack.i.h.bf16 %v6799_v6  ;;  %v6800_v56 = vunpack.i.l.bf16 %v6799_v6 }
 0xea6   : > { %v5579_v36 = vrot.slane %v7016_v48, %v5544_v31 }
 0xea7   : > { %v5428_v9 = vsel %vm1812_vm1, %v5332_v60, %v6795_v28  ;;  %v5429_v59 = vsel %vm1812_vm1, %v5400_v52, %v6796_v30  ;;  %v5545_v60 = vrot.slane %v8492_v24, %v5544_v31  ;;  %v6918_v31 = vld [vmem:[%s7502_s3 + $0x18] sm:$0xff]  }
 0xea8   : > { %v6804_v2 = vpop.permute.xlu1 %6803  ;;  %v5430_v27 = vsel %vm2976_vm5, %v5428_v9, %v6800_v56  ;;  %v5431_v20 = vsel %vm2976_vm5, %v5429_v59, %v6801_v43 }
 0xea9   : > { %v6806_v47 = vunpack.i.h.bf16 %v6804_v2  ;;  %v6805_v17 = vunpack.i.l.bf16 %v6804_v2 }
 0xeab   : > { %v5432_v57 = vsel %vm2979_vm6, %v5430_v27, %v6805_v17  ;;  %v5433_v0 = vsel %vm2979_vm6, %v5431_v20, %v6806_v47  ;;  %v6912_v17 = vld [vmem:[%s7502_s3] sm:$0xff]   ;;  %v6913_v27 = vld [vmem:[%s7502_s3 + $0x48] sm:$0xff]  }
 0xeac   : > { %v5450_v35 = vpack.c.bf16 %v5433_v0, %v5432_v57  ;;  %v6914_v20 = vld [vmem:[%s7502_s3 + $0x8] sm:$0xff]   ;;  %v6915_v57 = vld [vmem:[%s7502_s3 + $0x50] sm:$0xff]  }
 0xead   : > { %v6916_v0 = vld [vmem:[%s7502_s3 + $0x10] sm:$0xff]  }
 0xeae   : > { %6709 = vmatmul.mubr.bf16.vlgmr.msra.gmra.mrb[60].mxu0 %v5450_v35  ;;  %v6917_v35 = vld [vmem:[%s7502_s3 + $0x58] sm:$0xff]  }
 0xeaf   : > { %6419 = vmatpush3.bf16.msra.mxu0 %v6912_v17 }
 0xeb0   : > { %6420 = vmatprep.subr.bf16.mxu0 %v6913_v27 }
 0xeb3   : > { %6421 = vmatpush3.bf16.msra.mxu0 %v6914_v20 }
 0xeb4   : > { %6422 = vmatprep.subr.bf16.mxu0 %v6915_v57 }
 0xeb7   : > { %6423 = vmatpush3.bf16.msra.mxu0 %v6916_v0 }
 0xeb8   : > { %6424 = vmatprep.subr.bf16.mxu0 %v6917_v35 }
 0xebb   : > { %6425 = vmatpush3.bf16.msra.mxu0 %v6918_v31 }
 0xf81   : > { %v5533_v53 = vpop.f32.mrb[60].mxu0 }
 0xf82   : > { %v5540_v37 = vadd.f32 %v5533_v53, %v8037_v41  ;;  %v6710_v34 = vpop.f32.mrb[61].mxu0  ;;  %v6890_v41 = vld [vmem:[%s7492_s17 + $0x10] ss:$8 sps:$4 sm:$0xff]   ;;  %v6920_v53 = vld [vmem:[%s7502_s3 + $0x20] sm:$0xff]  }
 0xf83   : > { %v5536_v33 = vpop.f32.mrb[62].mxu0  ;;  %5694 = vmatpush1.bf16.msra.mxu1 %v6890_v41  ;;  %v6922_v34 = vld [vmem:[%s7502_s3 + $0x28] sm:$0xff]   ;;  %v5608_v41 = vrot.slane %v5599_v54, %v7571_v51 }
 0xf84   : > { %v8498_v10 = vadd.f32 %v5545_v60, %v5540_v37  ;;  %v5541_v29 = vadd.f32 %v5536_v33, %v8039_v22  ;;  %v6711_v50 = vpop.f32.mrb[63].mxu0  ;;  %5695 = vmatprep.subr.bf16.mxu1 %v6895_v63  ;;  %v6921_v37 = vld [vmem:[%s7502_s3 + $0x68] sm:$0xff]   ;;  %v6923_v33 = vld [vmem:[%s7502_s3 + $0x70] sm:$0xff]  }
 0xf85   : > { %v6925_v50 = vld [vmem:[%s7502_s3 + $0x78] sm:$0xff]  }
 0xf86   : > { %v8501_v42 = vadd.f32 %v5545_v60, %v5541_v29  ;;  %5548 = vadd.xlane.f32.xlu0 %v8498_v10  ;;  %v6919_v60 = vld [vmem:[%s7502_s3 + $0x60] sm:$0xff]   ;;  %v6924_v29 = vld [vmem:[%s7502_s3 + $0x30] sm:$0xff]  }
 0xf87   : > { %5696 = vmatpush1.bf16.msra.mxu1 %v6893_v39  ;;  %6426 = vmatprep.subr.bf16.mxu0 %v6919_v60 }
 0xf88   : > { %5550 = vadd.xlane.f32.xlu1 %v8501_v42  ;;  %5697 = vmatprep.subr.bf16.mxu1 %v6898_v13 }
 0xf89   : > { %6427 = vmatpush3.bf16.msra.mxu0 %v6920_v53  ;;  %v5946_v53 = vrot.slane %v8492_v24, %v904_v61 }
 0xf8a   : > { %6428 = vmatprep.subr.bf16.mxu0 %v6921_v37 }
 0xf8b   : > { %5698 = vmatpush1.bf16.msra.mxu1 %v6896_v12 }
 0xf8c   : > { %5699 = vmatprep.subr.bf16.mxu1 %v6901_v40 }
 0xf8d   : > { %6429 = vmatpush3.bf16.msra.mxu0 %v6922_v34 }
 0xf8e   : > { %6430 = vmatprep.subr.bf16.mxu0 %v6923_v33 }
 0xf8f   : > { %5700 = vmatpush1.bf16.msra.mxu1 %v6899_v14 }
 0xf90   : > { %5701 = vmatprep.subr.bf16.mxu1 %v6904_v44 }
 0xf91   : > { %6431 = vmatpush3.bf16.msra.mxu0 %v6924_v29 }
 0xf92   : > { %6432 = vmatprep.subr.bf16.mxu0 %v6925_v50 }
 0xf93   : > { %5702 = vmatpush1.bf16.msra.mxu1 %v6902_v25 }
 0xf94   : > { %5703 = vmatprep.subr.bf16.mxu1 %v6907_v19 }
 0xf95   : > { %6433 = vmatpush3.bf16.msra.mxu0 %v6926_v5 }
 0xf97   : > { %5704 = vmatpush1.bf16.msra.mxu1 %v6905_v15 }
 0xf98   : > { %5705 = vmatprep.subr.bf16.mxu1 %v6910_v26 }
 0xf9b   : > { %5706 = vmatpush1.bf16.msra.mxu1 %v6908_v16 }
0x1013   : > { %v5549_v22 = vpop.xlane.xlu0 %5548 }
0x1014   : > { %v5552_v23 = vmul.f32 0.0078125, %v5549_v22 }
0x1015   : > { %v5551_v55 = vpop.xlane.xlu1 %5550 }
0x1016   : > { %v5554_v4 = vsub.f32 %v8498_v10, %v5552_v23  ;;  %v5553_v8 = vmul.f32 0.0078125, %v5551_v55 }
0x1018   : > { %v5555_v1 = vsub.f32 %v8501_v42, %v5553_v8  ;;  %v5556_v49 = vmul.f32 %v5554_v4, %v5554_v4 }
0x101a   : > { %5558 = vadd.xlane.f32.xlu0 %v5556_v49  ;;  %v5557_v38 = vmul.f32 %v5555_v1, %v5555_v1 }
0x101e   : > { %5560 = vadd.xlane.f32.xlu0 %v5557_v38 }
0x10a7   : > { %v5559_v32 = vpop.xlane.xlu0 %5558 }
0x10a8   : > { %v5562_v58 = vmul.f32 0.0078125, %v5559_v32 }
0x10aa   : > { %v5564_v3 = vadd.f32 1e-05, %v5562_v58 }
0x10ab   : > { %v5561_v52 = vpop.xlane.xlu0 %5560 }
0x10ac   : > { %6999 = vrsqrt.f32 %v5564_v3  ;;  %v5563_v21 = vmul.f32 0.0078125, %v5561_v52 }
0x10ae   : > { %v5565_v11 = vadd.f32 1e-05, %v5563_v21 }
0x10b0   : > { %7001 = vrsqrt.f32 %v5565_v11 }
0x10b6   : > { %v7000_v6 = vpop.eup %6999 }
0x10b7   : > { %v5568_v30 = vmul.f32 %v7000_v6, %v5554_v4 }
0x10b9   : > { %v5574_v28 = vmul.f32 %v5573_v62, %v5568_v30 }
0x10ba   : > { %v7002_v43 = vpop.eup %7001 }
0x10bb   : > { %v5569_v56 = vmul.f32 %v7002_v43, %v5555_v1  ;;  %v5580_v9 = vadd.f32 %v5579_v36, %v5574_v28 }
0x10bd   : > { %v5575_v59 = vmul.f32 %v5573_v62, %v5569_v56 }
0x10bf   : > { %v5581_v2 = vadd.f32 %v5579_v36, %v5575_v59 }
0x10c1   : > { %v5598_v47 = vpack.c.bf16 %v5581_v2, %v5580_v9 }
0x10c3   : > { %5724 = vmatmul.mubr.bf16.vlgmr.msra.gmra.mrb[88].mxu1 %v5598_v47 }
0x1196   : > { %v5725_v22 = vpop.f32.mrb[88].mxu1 }
0x1197   : > { %v5726_v23 = vadd.f32 %v5725_v22, %v5604_v7  ;;  %v5727_v55 = vpop.f32.mrb[89].mxu1 }
0x1198   : > { %v5728_v4 = vadd.f32 %v5727_v55, %v5608_v41  ;;  %v5729_v8 = vpop.f32.mrb[90].mxu1 }
0x1199   : > { %v5734_v1 = vmul.f32 %v5726_v23, %v5726_v23  ;;  %v5730_v49 = vadd.f32 %v5729_v8, %v5604_v7  ;;  %v5731_v38 = vpop.f32.mrb[91].mxu1 }
0x119a   : > { %v5735_v63 = vmul.f32 %v5728_v4, %v5728_v4  ;;  %v5732_v39 = vadd.f32 %v5731_v38, %v5608_v41 }
0x119b   : > { %v5738_v13 = vmul.f32 %v5734_v1, %v5726_v23  ;;  %v5736_v12 = vmul.f32 %v5730_v49, %v5730_v49 }
0x119c   : > { %v5739_v40 = vmul.f32 %v5735_v63, %v5728_v4  ;;  %v5737_v14 = vmul.f32 %v5732_v39, %v5732_v39 }
0x119d   : > { %v5742_v44 = vmul.f32 0.044715, %v5738_v13  ;;  %v5740_v25 = vmul.f32 %v5736_v12, %v5730_v49 }
0x119e   : > { %v5743_v19 = vmul.f32 0.044715, %v5739_v40  ;;  %v5741_v46 = vmul.f32 %v5737_v14, %v5732_v39 }
0x119f   : > { %v5746_v15 = vadd.f32 %v5742_v44, %v5726_v23  ;;  %v5744_v51 = vmul.f32 0.044715, %v5740_v25 }
0x11a0   : > { %v5747_v26 = vadd.f32 %v5743_v19, %v5728_v4  ;;  %v5745_v16 = vmul.f32 0.044715, %v5741_v46 }
0x11a1   : > { %v5750_v32 = vmul.f32 0.7978846, %v5746_v15  ;;  %v5748_v58 = vadd.f32 %v5744_v51, %v5730_v49 }
0x11a2   : > { %v5751_v3 = vmul.f32 0.7978846, %v5747_v26  ;;  %v5749_v52 = vadd.f32 %v5745_v16, %v5732_v39 }
0x11a3   : > { %7003 = vtanh.f32 %v5750_v32  ;;  %v5752_v21 = vmul.f32 0.7978846, %v5748_v58 }
0x11a4   : > { %7005 = vtanh.f32 %v5751_v3  ;;  %v5753_v11 = vmul.f32 0.7978846, %v5749_v52 }
0x11a5   : > { %7007 = vtanh.f32 %v5752_v21 }
0x11a6   : > { %7009 = vtanh.f32 %v5753_v11 }
0x11ad   : > { %v7004_v48 = vpop.eup %7003 }
0x11ae   : > { %v7006_v62 = vpop.eup %7005  ;;  %v5758_v6 = vadd.f32 1.0, %v7004_v48 }
0x11af   : > { %v7008_v36 = vpop.eup %7007  ;;  %v5759_v30 = vadd.f32 1.0, %v7006_v62 }
0x11b0   : > { %v7010_v28 = vpop.eup %7009  ;;  %v5762_v43 = vmul.f32 0.5, %v5758_v6  ;;  %v5760_v56 = vadd.f32 1.0, %v7008_v36 }
0x11b1   : > { %v5761_v9 = vadd.f32 1.0, %v7010_v28  ;;  %v5763_v59 = vmul.f32 0.5, %v5759_v30 }
0x11b2   : > { %v5764_v2 = vmul.f32 0.5, %v5760_v56  ;;  %v5766_v18 = vmul.f32 %v5762_v43, %v5726_v23 }
0x11b3   : > { %v5765_v47 = vmul.f32 0.5, %v5761_v9  ;;  %v5767_v27 = vmul.f32 %v5763_v59, %v5728_v4 }
0x11b4   : > { %v5768_v17 = vmul.f32 %v5764_v2, %v5730_v49 }
0x11b5   : > { %v5769_v20 = vmul.f32 %v5765_v47, %v5732_v39 }
0x11b6   : > { %v5802_v57 = vpack.c.bf16 %v5768_v17, %v5766_v18 }
0x11b7   : > { %v5803_v0 = vpack.c.bf16 %v5769_v20, %v5767_v27 }
0x11b9   : > { %5932 = vmatprep.mubr.bf16.mxu0 %v5803_v0 }
0x11ba   : > { %5933 = vmatmul.mubr.bf16.vlgmr.msra.gmra.mrb[64].mxu0 %v5802_v57 }
0x128d   : > { %v6434_v35 = vpop.f32.mrb[64].mxu0 }
0x128e   : > { %v6435_v31 = vpop.f32.mrb[65].mxu0 }
0x128f   : > { %v6436_v60 = vadd.f32 %v6435_v31, %v6434_v35  ;;  %v6437_v37 = vpop.f32.mrb[66].mxu0 }
0x1290   : > { %v6438_v34 = vpop.f32.mrb[67].mxu0 }
0x1291   : > { %v5941_v33 = vadd.f32 %v6436_v60, %v8498_v10  ;;  %v6439_v29 = vadd.f32 %v6438_v34, %v6437_v37 }
0x1293   : > { %v5947_v50 = vadd.f32 %v5946_v53, %v5941_v33  ;;  %v5942_v5 = vadd.f32 %v6439_v29, %v8501_v42 }
0x1295   : > { %5949 = vst [vmem:[#allocation2] sm:$0xff] %v5947_v50  ;;  %5951 = vst [vmem:[%s8622_s15] sm:$0xff] %v5947_v50  ;;  %v5948_v54 = vadd.f32 %v5946_v53, %v5942_v5 }
0x1297   : > { %5950 = vst [vmem:[#allocation2 + $0x8] sm:$0xff] %v5948_v54  ;;  %5952 = vst [vmem:[%s8622_s15 + $0x8] sm:$0xff] %v5948_v54 }
0x1298 PF: > { %s8623_s20 = sld [smem:[#allocation14_spill]]  ;;  %s8624_s3 = sld [smem:[#allocation13_spill]] }
0x1299   : > { %s8625_s19 = sld [smem:[#allocation15_spill]]  ;;  %s8626_s17 = smov %s7171_s18 }
0x129e   : > { %p27_p5 = scmp.ge.s32.totalorder %s8623_s20, 4   ;;  %s8627_s18 = smov %s8624_s3 }
0x12a0   :  { %29 = sbr.rel (!%p27_p5) target bundleno = 14 (0xe), region = 156 }
0x12a7   :  { %5964 = vsyncpa [#allocation4], 1 }
0x12a8   :  { %5966 = vsyncpa [#allocation4 + $0x1], 1 }
0x12a9   :  { %5967 = vsyncpa [#allocation6], 1 }
0x12aa   :  { %5969 = vsyncpa [#allocation6 + $0x1], 1 }
0x12ab   :  { %5970 = vsyncpa [#allocation9], 1 }
0x12ac   :  { %5972 = vsyncpa [#allocation9 + $0x1], 1 }

</bundles_post_ra>
